<compile_context>
chip_gen: v6e
topology: v6e:2x2x1
jax: 0.10.0
libtpu: 0.0.40
codegen_flags: <defaults>
</compile_context>

<pallas_src>
import jax
import jax.numpy as jnp
from jax import lax
from jax.experimental import pallas as pl
from jax.experimental.pallas import tpu as pltpu

NEG_INF = -1e30
_MIB = 1024 * 1024


def _round_up(x, m):
    return (x + m - 1) // m * m


def _vmem_capacity_bytes():
    try:
        info = pltpu.get_tpu_info()
        cap = int(getattr(info, "vmem_capacity_bytes", 0))
        if cap > 0:
            return cap
    except Exception:
        pass
    # Conservative fallback: v7x per-TensorCore VMEM.
    return 64 * _MIB


def _expert_vmem_estimate(tt, h, e, tf):
    """Rough VMEM bytes needed by the expert pallas_call (double-buffered tiles)."""
    lane = 128
    b = 0
    b += 2 * tt * h * 2                   # x tile (bf16)
    b += 2 * tt * max(e, lane) * 4        # dispatch-mask tile (f32, lane pad)
    b += 2 * h * tf * 2                   # W1 f-slice (bf16)
    b += 2 * tf * h * 2                   # W2 f-slice (bf16)
    b += 2 * 8 * max(tf, lane) * 4        # b1 f-slice (f32, sublane pad)
    b += 2 * 8 * max(h, lane) * 4         # b2 (f32)
    b += 2 * tt * h * 4                   # resident output tile (f32)
    b += tt * lane * 4                    # gate scratch (f32, lane pad)
    return b


# --------------------------------------------------------------------------- #
# Router kernel: logits, softmax routing weights, top-2 dispatch mask.
# Grid = (num_token_tiles,), fully parallel.
# --------------------------------------------------------------------------- #
def _router_kernel(x_ref, wr_ref, br_ref, logits_ref, rw_ref, dm_ref):
    x = x_ref[...]                                                       # [T, H]
    logits = jnp.dot(x, wr_ref[...],
                     preferred_element_type=jnp.float32) + br_ref[...]   # [T, E]
    n_tok, n_exp = logits.shape
    rw = jax.nn.softmax(logits, axis=-1)

    # top-2 selection (ties broken toward lower index, like lax.top_k)
    iota = lax.broadcasted_iota(jnp.int32, (n_tok, n_exp), 1)
    m1 = jnp.max(logits, axis=-1, keepdims=True)
    idx1 = jnp.min(jnp.where(logits == m1, iota, n_exp), axis=-1, keepdims=True)
    oh1 = (iota == idx1)
    logits_m = jnp.where(oh1, NEG_INF, logits)
    m2 = jnp.max(logits_m, axis=-1, keepdims=True)
    idx2 = jnp.min(jnp.where(logits_m == m2, iota, n_exp), axis=-1, keepdims=True)
    oh2 = (iota == idx2)

    # softmax over the two selected logits (m1 >= m2)
    z = jnp.exp(m2 - m1)
    g1 = 1.0 / (1.0 + z)
    g2 = z / (1.0 + z)
    dm = g1 * oh1.astype(jnp.float32) + g2 * oh2.astype(jnp.float32)

    logits_ref[...] = logits
    rw_ref[...] = rw
    dm_ref[...] = dm


# --------------------------------------------------------------------------- #
# Expert/combine kernel.
# Grid = (num_token_tiles [parallel], E [arbitrary], num_f_tiles [arbitrary]).
# Output tile stays resident across (e, f); gated partial products accumulate
# directly into it (no per-expert f32 accumulator scratch).
# --------------------------------------------------------------------------- #
def _expert_kernel(x_ref, dm_ref, w1_ref, b1_ref, w2_ref, b2_ref,
                   out_ref, gate_ref):
    e = pl.program_id(1)
    f = pl.program_id(2)

    # Zero the resident output tile on the first visit for this token tile.
    @pl.when(jnp.logical_and(e == 0, f == 0))
    def _():
        out_ref[...] = jnp.zeros_like(out_ref)

    # Gate column for this expert, computed once per (token tile, expert);
    # also fold in the gated b2 contribution here.
    @pl.when(f == 0)
    def _():
        dm = dm_ref[...]                                                  # [T, E]
        lane = lax.broadcasted_iota(jnp.int32, dm.shape, 1)
        gate = jnp.sum(jnp.where(lane == e, dm, 0.0),
                       axis=-1, keepdims=True)                            # [T, 1]
        gate_ref[...] = gate
        out_ref[...] += gate * b2_ref[0]

    # bf16 MXU operands, f32 accumulation straight into the output tile.
    h = jnp.dot(x_ref[...], w1_ref[0],
                preferred_element_type=jnp.float32) + b1_ref[0]           # [T, tF]
    h = jax.nn.gelu(h, approximate=True)
    out_ref[...] += gate_ref[...] * jnp.dot(
        h.astype(jnp.bfloat16), w2_ref[0], preferred_element_type=jnp.float32)


# --------------------------------------------------------------------------- #
# Wrapper
# --------------------------------------------------------------------------- #
def moe_layer_pallas(hidden_states, wr, br, w1, b1, w2, b2, *, token_tile=None):
    """Runs the MoE forward pass. Returns a dict matching the PyTorch module."""
    B, S, H = hidden_states.shape
    E, _, F = w1.shape
    N = B * S
    x = hidden_states.reshape(N, H).astype(jnp.float32)

    # ---------------- tile sizing from VMEM capacity ----------------
    cap = _vmem_capacity_bytes()
    budget = int(0.55 * cap)
    if cap >= 100 * _MIB:            # v5e / v6e class (128 MiB VMEM)
        tt_target, tf_cap = 1024, 1024
    else:                            # v7x class (64 MiB per TC)
        tt_target, tf_cap = 512, 512
    if token_tile is not None:
        tt_target = token_tile

    tt_max = _round_up(N, 8)
    tt_cands = sorted({min(t, tt_max)
                       for t in (tt_target, 768, 512, 384, 256, 128)
                       if t <= tt_target}, reverse=True)
    tf_cands = [c for c in (1024, 512, 256, 128) if c <= tf_cap and F % c == 0]
    if not tf_cands:
        tf_cands = [F]

    TT, TF = tt_cands[-1], tf_cands[-1]
    done = False
    for t in tt_cands:
        for f_ in tf_cands:
            if _expert_vmem_estimate(t, H, E, f_) <= budget:
                TT, TF = t, f_
                done = True
                break
        if done:
            break

    Np = _round_up(N, TT)
    if Np != N:
        x = jnp.pad(x, ((0, Np - N), (0, 0)))
    nt = Np // TT
    nf = F // TF

    est = _expert_vmem_estimate(TT, H, E, TF)
    vmem_limit = min(int(0.9 * cap), max(32 * _MIB, int(1.5 * est) + 4 * _MIB))

    # ---------------- router (f32) ----------------
    logits_p, rw_p, dm_p = pl.pallas_call(
        _router_kernel,
        out_shape=(
            jax.ShapeDtypeStruct((Np, E), jnp.float32),
            jax.ShapeDtypeStruct((Np, E), jnp.float32),
            jax.ShapeDtypeStruct((Np, E), jnp.float32),
        ),
        grid_spec=pltpu.PrefetchScalarGridSpec(
            num_scalar_prefetch=0,
            grid=(nt,),
            in_specs=[
                pl.BlockSpec((TT, H), lambda t: (t, 0)),   # tokens (tiled)
                pl.BlockSpec((H, E), lambda t: (0, 0)),    # router weight
                pl.BlockSpec((1, E), lambda t: (0, 0)),    # router bias
            ],
            out_specs=[
                pl.BlockSpec((TT, E), lambda t: (t, 0)),   # logits
                pl.BlockSpec((TT, E), lambda t: (t, 0)),   # routing weights
                pl.BlockSpec((TT, E), lambda t: (t, 0)),   # dispatch mask
            ],
        ),
        compiler_params=pltpu.CompilerParams(
            dimension_semantics=("parallel",),
            vmem_limit_bytes=vmem_limit),
    )(x, wr, br)

    # bf16 tokens / expert weights: halves DMA bytes, feeds MXU at bf16 rates.
    x_bf = x.astype(jnp.bfloat16)
    w1_b = w1.astype(jnp.bfloat16)
    w2_b = w2.astype(jnp.bfloat16)

    # ---------------- experts + combine ----------------
    # TODO(synk): a gather/grouped-matmul dispatch (sort tokens by expert and
    # scalar-prefetch per-expert row offsets into the token index_map) would cut
    # MXU FLOPs by E/top_k; dense compute over (token tile, expert, F tile) is
    # used here.
    # TODO(synk): on v7x megacore, stage the per-step W1/W2 f-slices in
    # pltpu.VMEM_SHARED (or sweep pipeline_mode=pl.Buffered(3) on v6e) to avoid
    # duplicated weight streaming when the token axis is split across cores.
    out_p = pl.pallas_call(
        _expert_kernel,
        out_shape=jax.ShapeDtypeStruct((Np, H), jnp.float32),
        grid_spec=pltpu.PrefetchScalarGridSpec(
            num_scalar_prefetch=0,
            grid=(nt, E, nf),
            in_specs=[
                pl.BlockSpec((TT, H), lambda t, e, f: (t, 0)),       # tokens bf16
                pl.BlockSpec((TT, E), lambda t, e, f: (t, 0)),       # dispatch mask
                pl.BlockSpec((1, H, TF), lambda t, e, f: (e, 0, f)), # W1 slice
                pl.BlockSpec((1, 1, TF), lambda t, e, f: (e, 0, f)), # b1 slice
                pl.BlockSpec((1, TF, H), lambda t, e, f: (e, f, 0)), # W2 slice
                pl.BlockSpec((1, 1, H), lambda t, e, f: (e, 0, 0)),  # b2
            ],
            out_specs=pl.BlockSpec((TT, H), lambda t, e, f: (t, 0)),
            scratch_shapes=[pltpu.VMEM((TT, 1), jnp.float32)],       # gate column
        ),
        compiler_params=pltpu.CompilerParams(
            dimension_semantics=("parallel", "arbitrary", "arbitrary"),
            vmem_limit_bytes=vmem_limit),
    )(x_bf, dm_p, w1_b, b1, w2_b, b2)

    out = out_p[:N]
    logits = logits_p[:N]
    rw = rw_p[:N]
    dm = dm_p[:N]

    # Auxiliary load-balancing loss from GLOBAL (un-padded) token statistics:
    #   E * sum( mean(routing_weights, tokens) * (sum(dispatch_mask, tokens)/N) )
    aux = jnp.sum(jnp.mean(rw, axis=0) * (jnp.sum(dm, axis=0) / N)) * E

    return {
        "expert_outputs": out.reshape(B, S, H),
        "routing_weights": rw.reshape(B, S, E),
        "dispatch_mask": dm.reshape(B, S, E),
        "aux_loss": aux,
        "router_logits": logits.reshape(B, S, E),
    }


# --------------------------------------------------------------------------- #
# Plain-JAX reference (same precision recipe: f32 router, bf16 expert matmuls
# with f32 accumulation) for verification.
# --------------------------------------------------------------------------- #
def moe_layer_reference(hidden_states, wr, br, w1, b1, w2, b2):
    B, S, H = hidden_states.shape
    E = w1.shape[0]
    N = B * S
    x = hidden_states.reshape(N, H).astype(jnp.float32)
    logits = jnp.matmul(x, wr, precision=lax.Precision.HIGHEST) + br
    rw = jax.nn.softmax(logits, axis=-1)
    topk_vals, topk_idx = lax.top_k(logits, 2)
    gates = jax.nn.softmax(topk_vals, axis=-1)
    dm = jnp.zeros_like(rw).at[jnp.arange(N)[:, None], topk_idx].set(gates)
    out = jnp.zeros_like(x)
    x_b = x.astype(jnp.bfloat16)
    for e in range(E):
        h = jnp.dot(x_b, w1[e].astype(jnp.bfloat16),
                    preferred_element_type=jnp.float32) + b1[e]
        h = jax.nn.gelu(h, approximate=True)
        y = jnp.dot(h.astype(jnp.bfloat16), w2[e].astype(jnp.bfloat16),
                    preferred_element_type=jnp.float32) + b2[e]
        out = out + dm[:, e:e + 1] * y
    aux = jnp.sum(jnp.mean(rw, axis=0) * (jnp.sum(dm, axis=0) / N)) * E
    return out.reshape(B, S, H), rw, dm, logits, aux


if __name__ == "__main__":
    # Small, deterministic configuration (N = B*S = 512 tokens).
    B, S, H, F, E = 2, 256, 128, 256, 8

    key = jax.random.PRNGKey(0)
    k_x, k_wr, k_br, k_w1, k_b1, k_w2, k_b2 = jax.random.split(key, 7)

    hidden_states = jax.random.normal(k_x, (B, S, H), dtype=jnp.float32)
    wr = jax.random.normal(k_wr, (H, E), dtype=jnp.float32) * (1.0 / H ** 0.5)
    br = jax.random.normal(k_br, (1, E), dtype=jnp.float32) * 0.02
    w1 = jax.random.normal(k_w1, (E, H, F), dtype=jnp.float32) * (1.0 / H ** 0.5)
    b1 = jax.random.normal(k_b1, (E, 1, F), dtype=jnp.float32) * 0.02
    w2 = jax.random.normal(k_w2, (E, F, H), dtype=jnp.float32) * (1.0 / F ** 0.5)
    b2 = jax.random.normal(k_b2, (E, 1, H), dtype=jnp.float32) * 0.02

    result = jax.block_until_ready(
        moe_layer_pallas(hidden_states, wr, br, w1, b1, w2, b2))

    # Sanity check against plain JAX (same bf16/f32 precision recipe).
    ref_out, ref_rw, ref_dm, ref_logits, ref_aux = moe_layer_reference(
        hidden_states, wr, br, w1, b1, w2, b2)
    assert jnp.max(jnp.abs(result["expert_outputs"] - ref_out)) < 1e-2
    assert jnp.max(jnp.abs(result["router_logits"].reshape(-1, E) - ref_logits)) < 1e-3
    assert jnp.max(jnp.abs(result["routing_weights"].reshape(-1, E) - ref_rw)) < 1e-3
    assert jnp.max(jnp.abs(result["dispatch_mask"].reshape(-1, E) - ref_dm)) < 1e-3
    assert jnp.abs(result["aux_loss"] - ref_aux) < 1e-3

    # TODO(synk): CUDA-stream parallel expert dispatch and the training-time
    # expert-usage buffer update have no Pallas equivalent (stateful/host-side);
    # noisy gating / capacity dropping / BPR are config-off in the default
    # forward path and are not implemented.
    print("KERNEL_OK")
</pallas_src>

<mosaic_0001>
module attributes {stable_mosaic.version = 11 : i64} {
  func.func @_router_kernel(%arg0: i32, %arg1: memref<512x128xf32, #tpu.memory_space<vmem>>, %arg2: memref<128x8xf32, #tpu.memory_space<vmem>>, %arg3: memref<1x8xf32, #tpu.memory_space<vmem>>, %arg4: memref<512x8xf32, #tpu.memory_space<vmem>>, %arg5: memref<512x8xf32, #tpu.memory_space<vmem>>, %arg6: memref<512x8xf32, #tpu.memory_space<vmem>>) attributes {dimension_semantics = [#tpu.dimension_semantics<parallel>], iteration_bounds = array<i64: 1>, scalar_prefetch = 0 : i64, scratch_operands = 0 : i64, tpu.core_type = #tpu.core_type<tc>, window_params = [{transform_indices = @transform_0, window_bounds = array<i64: 512, 128>}, {pipeline_mode = #tpu.pipeline_mode<synchronous>, transform_indices = @transform_1, window_bounds = array<i64: 128, 8>}, {pipeline_mode = #tpu.pipeline_mode<synchronous>, transform_indices = @transform_2, window_bounds = array<i64: 1, 8>}, {transform_indices = @transform_3, window_bounds = array<i64: 512, 8>}, {transform_indices = @transform_4, window_bounds = array<i64: 512, 8>}, {transform_indices = @transform_5, window_bounds = array<i64: 512, 8>}]} {
    %c0 = arith.constant 0 : index
    %c0_0 = arith.constant 0 : index
    %0 = vector.load %arg1[%c0, %c0_0] : memref<512x128xf32, #tpu.memory_space<vmem>>, vector<512x128xf32>
    %c0_1 = arith.constant 0 : index
    %c0_2 = arith.constant 0 : index
    %1 = vector.load %arg2[%c0_1, %c0_2] : memref<128x8xf32, #tpu.memory_space<vmem>>, vector<128x8xf32>
    %cst = arith.constant dense<0.000000e+00> : vector<512x8xf32>
    %2 = tpu.matmul %0, %1, %cst {dimension_numbers = #tpu.dot_dimension_numbers<[1], [0], [0], [1], [0, 0, 1, 1], [], []>} : vector<512x128xf32>, vector<128x8xf32>, vector<512x8xf32> -> vector<512x8xf32>
    %c0_3 = arith.constant 0 : index
    %c0_4 = arith.constant 0 : index
    %3 = vector.load %arg3[%c0_3, %c0_4] : memref<1x8xf32, #tpu.memory_space<vmem>>, vector<1x8xf32>
    %4 = vector.broadcast %3 : vector<1x8xf32> to vector<512x8xf32>
    %5 = arith.addf %2, %4 : vector<512x8xf32>
    %cst_5 = arith.constant dense<0xFF800000> : vector<512xf32>
    %6 = vector.multi_reduction <maximumf>, %5, %cst_5 [1] : vector<512x8xf32> to vector<512xf32>
    %cst_6 = arith.constant 0xFF800000 : f32
    %7 = vector.broadcast %cst_6 : f32 to vector<512xf32>
    %8 = arith.maximumf %7, %6 : vector<512xf32>
    %9 = vector.shape_cast %8 : vector<512xf32> to vector<512x1xf32>
    %10 = vector.broadcast %9 : vector<512x1xf32> to vector<512x8xf32>
    %11 = arith.subf %5, %10 : vector<512x8xf32>
    %12 = math.exp %11 : vector<512x8xf32>
    %cst_7 = arith.constant dense<0.000000e+00> : vector<512xf32>
    %13 = vector.multi_reduction <add>, %12, %cst_7 [1] : vector<512x8xf32> to vector<512xf32>
    %14 = vector.shape_cast %13 : vector<512xf32> to vector<512x1xf32>
    %15 = vector.broadcast %14 : vector<512x1xf32> to vector<512x8xf32>
    %16 = arith.divf %12, %15 : vector<512x8xf32>
    %17 = tpu.iota {dimensions = array<i32: 1>} : vector<512x8xi32>
    %cst_8 = arith.constant dense<0xFF800000> : vector<512xf32>
    %18 = vector.multi_reduction <maximumf>, %5, %cst_8 [1] : vector<512x8xf32> to vector<512xf32>
    %19 = vector.shape_cast %18 : vector<512xf32> to vector<512x1xf32>
    %20 = vector.broadcast %19 : vector<512x1xf32> to vector<512x8xf32>
    %21 = arith.cmpf oeq, %5, %20 : vector<512x8xf32>
    %c8_i32 = arith.constant 8 : i32
    %22 = vector.broadcast %c8_i32 : i32 to vector<512x8xi32>
    %23 = arith.select %21, %17, %22 : vector<512x8xi1>, vector<512x8xi32>
    %cst_9 = arith.constant dense<2147483647> : vector<512xi32>
    %24 = vector.multi_reduction <minsi>, %23, %cst_9 [1] : vector<512x8xi32> to vector<512xi32>
    %25 = vector.shape_cast %24 : vector<512xi32> to vector<512x1xi32>
    %26 = vector.broadcast %25 : vector<512x1xi32> to vector<512x8xi32>
    %27 = arith.cmpi eq, %17, %26 : vector<512x8xi32>
    %cst_10 = arith.constant -1.000000e+30 : f32
    %28 = vector.broadcast %cst_10 : f32 to vector<512x8xf32>
    %29 = arith.select %27, %28, %5 : vector<512x8xi1>, vector<512x8xf32>
    %cst_11 = arith.constant dense<0xFF800000> : vector<512xf32>
    %30 = vector.multi_reduction <maximumf>, %29, %cst_11 [1] : vector<512x8xf32> to vector<512xf32>
    %31 = vector.shape_cast %30 : vector<512xf32> to vector<512x1xf32>
    %32 = vector.broadcast %31 : vector<512x1xf32> to vector<512x8xf32>
    %33 = arith.cmpf oeq, %29, %32 : vector<512x8xf32>
    %c8_i32_12 = arith.constant 8 : i32
    %34 = vector.broadcast %c8_i32_12 : i32 to vector<512x8xi32>
    %35 = arith.select %33, %17, %34 : vector<512x8xi1>, vector<512x8xi32>
    %cst_13 = arith.constant dense<2147483647> : vector<512xi32>
    %36 = vector.multi_reduction <minsi>, %35, %cst_13 [1] : vector<512x8xi32> to vector<512xi32>
    %37 = vector.shape_cast %36 : vector<512xi32> to vector<512x1xi32>
    %38 = vector.broadcast %37 : vector<512x1xi32> to vector<512x8xi32>
    %39 = arith.cmpi eq, %17, %38 : vector<512x8xi32>
    %40 = arith.subf %31, %19 : vector<512x1xf32>
    %41 = math.exp %40 : vector<512x1xf32>
    %cst_14 = arith.constant 1.000000e+00 : f32
    %42 = vector.broadcast %cst_14 : f32 to vector<512x1xf32>
    %43 = arith.addf %42, %41 : vector<512x1xf32>
    %cst_15 = arith.constant 1.000000e+00 : f32
    %44 = vector.broadcast %cst_15 : f32 to vector<512x1xf32>
    %45 = arith.divf %44, %43 : vector<512x1xf32>
    %cst_16 = arith.constant 1.000000e+00 : f32
    %46 = vector.broadcast %cst_16 : f32 to vector<512x1xf32>
    %47 = arith.addf %46, %41 : vector<512x1xf32>
    %48 = arith.divf %41, %47 : vector<512x1xf32>
    %49 = arith.extui %27 : vector<512x8xi1> to vector<512x8xi32>
    %50 = arith.sitofp %49 : vector<512x8xi32> to vector<512x8xf32>
    %51 = vector.broadcast %45 : vector<512x1xf32> to vector<512x8xf32>
    %52 = arith.mulf %51, %50 : vector<512x8xf32>
    %53 = arith.extui %39 : vector<512x8xi1> to vector<512x8xi32>
    %54 = arith.sitofp %53 : vector<512x8xi32> to vector<512x8xf32>
    %55 = vector.broadcast %48 : vector<512x1xf32> to vector<512x8xf32>
    %56 = arith.mulf %55, %54 : vector<512x8xf32>
    %57 = arith.addf %52, %56 : vector<512x8xf32>
    %c0_17 = arith.constant 0 : index
    %c0_18 = arith.constant 0 : index
    %58 = vector.load %arg4[%c0_17, %c0_18] : memref<512x8xf32, #tpu.memory_space<vmem>>, vector<512x8xf32>
    tpu.vector_store %arg4[%c0_17, %c0_18], %5 {strides = array<i32>} : memref<512x8xf32, #tpu.memory_space<vmem>>, vector<512x8xf32>,
    %c0_19 = arith.constant 0 : index
    %c0_20 = arith.constant 0 : index
    %59 = vector.load %arg5[%c0_19, %c0_20] : memref<512x8xf32, #tpu.memory_space<vmem>>, vector<512x8xf32>
    tpu.vector_store %arg5[%c0_19, %c0_20], %16 {strides = array<i32>} : memref<512x8xf32, #tpu.memory_space<vmem>>, vector<512x8xf32>,
    %c0_21 = arith.constant 0 : index
    %c0_22 = arith.constant 0 : index
    %60 = vector.load %arg6[%c0_21, %c0_22] : memref<512x8xf32, #tpu.memory_space<vmem>>, vector<512x8xf32>
    tpu.vector_store %arg6[%c0_21, %c0_22], %57 {strides = array<i32>} : memref<512x8xf32, #tpu.memory_space<vmem>>, vector<512x8xf32>,
    return
  }
  func.func @transform_0(%arg0: i32) -> (i32, i32) {
    %c0_i32 = arith.constant 0 : i32
    %c0_i32_0 = arith.constant 0 : i32
    return %arg0, %c0_i32 : i32, i32
  }
  func.func @transform_1(%arg0: i32) -> (i32, i32) {
    %c0_i32 = arith.constant 0 : i32
    %c0_i32_0 = arith.constant 0 : i32
    %c0_i32_1 = arith.constant 0 : i32
    return %c0_i32, %c0_i32_0 : i32, i32
  }
  func.func @transform_2(%arg0: i32) -> (i32, i32) {
    %c0_i32 = arith.constant 0 : i32
    %c0_i32_0 = arith.constant 0 : i32
    %c0_i32_1 = arith.constant 0 : i32
    return %c0_i32, %c0_i32_0 : i32, i32
  }
  func.func @transform_3(%arg0: i32) -> (i32, i32) {
    %c0_i32 = arith.constant 0 : i32
    %c0_i32_0 = arith.constant 0 : i32
    return %arg0, %c0_i32 : i32, i32
  }
  func.func @transform_4(%arg0: i32) -> (i32, i32) {
    %c0_i32 = arith.constant 0 : i32
    %c0_i32_0 = arith.constant 0 : i32
    return %arg0, %c0_i32 : i32, i32
  }
  func.func @transform_5(%arg0: i32) -> (i32, i32) {
    %c0_i32 = arith.constant 0 : i32
    %c0_i32_0 = arith.constant 0 : i32
    return %arg0, %c0_i32 : i32, i32
  }
}

</mosaic_0001>

<bundles_post_ra>
// kernel: tpu_custom_call.1
= control target key start
LH: loop header
LB: loop body
LE: loop exit
PB: predicated region body
PF: predicated region fallthrough
CT: control target
= control target key end

     0   :  { %11 = vsyncpa [#allocation3], 0  ;;  %s5778_s18 = smov [#allocation2]   ;;  %s12162_s0 = inlined_call_operand.hbm [shape: f32[512,128], index: 0, kind: input, shape index: {}]   ;;  %s12163_s1 = inlined_call_operand.vmem [shape: f32[128,8], index: 1, kind: input, shape index: {}]   ;;  %s12164_s2 = inlined_call_operand.vmem [shape: f32[1,8], index: 2, kind: input, shape index: {}]   ;;  %s12165_s3 = inlined_call_operand.vmem [shape: f32[512,8], index: 3, kind: output, shape index: {0}]   ;;  %s12166_s4 = inlined_call_operand.vmem [shape: f32[512,8], index: 4, kind: output, shape index: {1}]   ;;  %s12167_s5 = inlined_call_operand.vmem [shape: f32[512,8], index: 5, kind: output, shape index: {2}]  }
   0x1   :  { %s17_s19 = sshll.u32 %s5778_s18, 4  ;;  %s18_s19 = int_to_ptr.vmem [resolvable:$true] %s17_s19 }
   0x2   :  { %s5764_s20 = scalar_lea.vmem %s18_s19, 8192  ;;  %p5769_p1 = scmp.lt.s32.totalorder %s18_s19, %s18_s19 }
   0x3   :  { %p5765_p0 = scmp.ne.s32.totalorder %s18_s19, %s5764_s20  ;;  %p5770_p2 = scmp.lt.s32.totalorder %s5764_s20, %s5764_s20 }
   0x5   :  { %p5771_p3 = por %p5770_p2, %p5769_p1 }
   0x7   :  { %p5772_p4 = pnand %p5771_p3, %p5765_p0 }
   0x9   :  { %5775 = shalt.err (!%p5772_p4)
}
   0xa   :  { %s5779_s21 = smov 128   ;;  %s5780_s22 = smov 8  }
   0xb   :  { %23 = dma.hbm_to_vmem [thread:$0]  %s12162_s0, 8192, %s18_s19, [#allocation3], %s5779_s21, %s5779_s21, %s5780_s22  }
   0xc   :  { %5776 = dma.done.wait [#allocation3], 8192  }
   0xd   :  { %5777 = vsyncadd [#allocation3], 4294959104  ;;  %v110_v0 = vld [vmem:[%s12163_s1 + $0x78] sm:$0xff]  ;;  %v109_v1 = vld [vmem:[%s12163_s1 + $0x70] sm:$0xff]  ;;  %vm503_vm0 = vcmask 64512  }
   0xe   :  { %5080 = vmatprep.subr.mxu0 %v110_v0  ;;  %5208 = vmatprep.subr.mxu1 %v110_v0  ;;  %v108_v2 = vld [vmem:[%s12163_s1 + $0x68] sm:$0xff]  ;;  %v107_v3 = vld [vmem:[%s12163_s1 + $0x60] sm:$0xff]  ;;  %v106_v4 = vld [vmem:[%s12163_s1 + $0x58] sm:$0xff] }
   0xf   :  { %5081 = vmatpush3.msra.mxu0 %v110_v0  ;;  %5224 = vmatpush3.msra.mxu1 %v110_v0  ;;  %v105_v5 = vld [vmem:[%s12163_s1 + $0x50] sm:$0xff]  ;;  %v104_v6 = vld [vmem:[%s12163_s1 + $0x48] sm:$0xff]  ;;  %v103_v7 = vld [vmem:[%s12163_s1 + $0x40] sm:$0xff] }
  0x10   :  { %5082 = vmatprep.subr.mxu0 %v109_v1  ;;  %5209 = vmatprep.subr.mxu1 %v109_v1  ;;  %v102_v8 = vld [vmem:[%s12163_s1 + $0x38] sm:$0xff]  ;;  %v101_v9 = vld [vmem:[%s12163_s1 + $0x30] sm:$0xff]  ;;  %v100_v10 = vld [vmem:[%s12163_s1 + $0x28] sm:$0xff] }
  0x11   :  { %5083 = vmatpush3.msra.mxu0 %v109_v1  ;;  %5225 = vmatpush3.msra.mxu1 %v109_v1  ;;  %v99_v11 = vld [vmem:[%s12163_s1 + $0x20] sm:$0xff]  ;;  %v98_v12 = vld [vmem:[%s12163_s1 + $0x18] sm:$0xff]  ;;  %v97_v13 = vld [vmem:[%s12163_s1 + $0x10] sm:$0xff] }
  0x12   :  { %5084 = vmatprep.subr.mxu0 %v108_v2  ;;  %5210 = vmatprep.subr.mxu1 %v108_v2  ;;  %v96_v14 = vld [vmem:[%s12163_s1 + $0x8] sm:$0xff]  ;;  %v95_v15 = vld [vmem:[%s12163_s1] sm:$0xff]  ;;  %v33_v20 = vld [vmem:[#allocation2 + $0x10] sm:$0xff] }
  0x13   :  { %5085 = vmatpush3.msra.mxu0 %v108_v2  ;;  %5226 = vmatpush3.msra.mxu1 %v108_v2  ;;  %v31_v16 = vld [vmem:[#allocation2] sm:$0xff]  ;;  %v32_v18 = vld [vmem:[#allocation2 + $0x8] sm:$0xff]  ;;  %v65_v21 = vld [vmem:[#allocation2 + $0x110] sm:$0xff] }
  0x14   :  { %5086 = vmatprep.subr.mxu0 %v107_v3  ;;  %5211 = vmatprep.subr.mxu1 %v107_v3  ;;  %v63_v17 = vld [vmem:[#allocation2 + $0x100] sm:$0xff]  ;;  %v64_v19 = vld [vmem:[#allocation2 + $0x108] sm:$0xff]  ;;  %v34_v22 = vld [vmem:[#allocation2 + $0x18] sm:$0xff] }
  0x15   :  { %5087 = vmatpush3.msra.mxu0 %v107_v3  ;;  %5227 = vmatpush3.msra.mxu1 %v107_v3  ;;  %v66_v23 = vld [vmem:[#allocation2 + $0x118] sm:$0xff]  ;;  %v35_v24 = vld [vmem:[#allocation2 + $0x20] sm:$0xff]  ;;  %v36_v26 = vld [vmem:[#allocation2 + $0x28] sm:$0xff] }
  0x16   :  { %5088 = vmatprep.subr.mxu0 %v106_v4  ;;  %5212 = vmatprep.subr.mxu1 %v106_v4  ;;  %v67_v25 = vld [vmem:[#allocation2 + $0x120] sm:$0xff]  ;;  %v68_v27 = vld [vmem:[#allocation2 + $0x128] sm:$0xff]  ;;  %v37_v28 = vld [vmem:[#allocation2 + $0x30] sm:$0xff] }
  0x17   :  { %5089 = vmatpush3.msra.mxu0 %v106_v4  ;;  %5228 = vmatpush3.msra.mxu1 %v106_v4  ;;  %v69_v29 = vld [vmem:[#allocation2 + $0x130] sm:$0xff]  ;;  %v38_v30 = vld [vmem:[#allocation2 + $0x38] sm:$0xff]  ;;  %v39_v32 = vld [vmem:[#allocation2 + $0x40] sm:$0xff] }
  0x18   :  { %5090 = vmatprep.subr.mxu0 %v105_v5  ;;  %5213 = vmatprep.subr.mxu1 %v105_v5  ;;  %v70_v31 = vld [vmem:[#allocation2 + $0x138] sm:$0xff]  ;;  %v71_v33 = vld [vmem:[#allocation2 + $0x140] sm:$0xff]  ;;  %v40_v34 = vld [vmem:[#allocation2 + $0x48] sm:$0xff] }
  0x19   :  { %5091 = vmatpush3.msra.mxu0 %v105_v5  ;;  %5229 = vmatpush3.msra.mxu1 %v105_v5  ;;  %v72_v35 = vld [vmem:[#allocation2 + $0x148] sm:$0xff]  ;;  %v41_v36 = vld [vmem:[#allocation2 + $0x50] sm:$0xff]  ;;  %v42_v38 = vld [vmem:[#allocation2 + $0x58] sm:$0xff] }
  0x1a   :  { %5092 = vmatprep.subr.mxu0 %v104_v6  ;;  %5214 = vmatprep.subr.mxu1 %v104_v6  ;;  %v73_v37 = vld [vmem:[#allocation2 + $0x150] sm:$0xff]  ;;  %v74_v39 = vld [vmem:[#allocation2 + $0x158] sm:$0xff]  ;;  %v43_v40 = vld [vmem:[#allocation2 + $0x60] sm:$0xff] }
  0x1b   :  { %5093 = vmatpush3.msra.mxu0 %v104_v6  ;;  %5230 = vmatpush3.msra.mxu1 %v104_v6  ;;  %v75_v41 = vld [vmem:[#allocation2 + $0x160] sm:$0xff]  ;;  %v44_v42 = vld [vmem:[#allocation2 + $0x68] sm:$0xff]  ;;  %v45_v44 = vld [vmem:[#allocation2 + $0x70] sm:$0xff] }
  0x1c   :  { %5094 = vmatprep.subr.mxu0 %v103_v7  ;;  %5215 = vmatprep.subr.mxu1 %v103_v7  ;;  %v76_v43 = vld [vmem:[#allocation2 + $0x168] sm:$0xff]  ;;  %v77_v45 = vld [vmem:[#allocation2 + $0x170] sm:$0xff]  ;;  %v46_v46 = vld [vmem:[#allocation2 + $0x78] sm:$0xff] }
  0x1d   :  { %5095 = vmatpush3.msra.mxu0 %v103_v7  ;;  %5231 = vmatpush3.msra.mxu1 %v103_v7  ;;  %v78_v47 = vld [vmem:[#allocation2 + $0x178] sm:$0xff]  ;;  %v47_v48 = vld [vmem:[#allocation2 + $0x80] sm:$0xff]  ;;  %v48_v50 = vld [vmem:[#allocation2 + $0x88] sm:$0xff] }
  0x1e   :  { %5096 = vmatprep.subr.mxu0 %v102_v8  ;;  %5216 = vmatprep.subr.mxu1 %v102_v8  ;;  %v79_v49 = vld [vmem:[#allocation2 + $0x180] sm:$0xff]  ;;  %v80_v51 = vld [vmem:[#allocation2 + $0x188] sm:$0xff]  ;;  %v49_v52 = vld [vmem:[#allocation2 + $0x90] sm:$0xff] }
  0x1f   :  { %5097 = vmatpush3.msra.mxu0 %v102_v8  ;;  %5232 = vmatpush3.msra.mxu1 %v102_v8  ;;  %v81_v53 = vld [vmem:[#allocation2 + $0x190] sm:$0xff]  ;;  %v50_v54 = vld [vmem:[#allocation2 + $0x98] sm:$0xff]  ;;  %v51_v56 = vld [vmem:[#allocation2 + $0xa0] sm:$0xff] }
  0x20   :  { %5098 = vmatprep.subr.mxu0 %v101_v9  ;;  %5217 = vmatprep.subr.mxu1 %v101_v9  ;;  %v82_v55 = vld [vmem:[#allocation2 + $0x198] sm:$0xff]  ;;  %v83_v57 = vld [vmem:[#allocation2 + $0x1a0] sm:$0xff]  ;;  %v52_v58 = vld [vmem:[#allocation2 + $0xa8] sm:$0xff] }
  0x21   :  { %5099 = vmatpush3.msra.mxu0 %v101_v9  ;;  %5233 = vmatpush3.msra.mxu1 %v101_v9  ;;  %v84_v59 = vld [vmem:[#allocation2 + $0x1a8] sm:$0xff]  ;;  %v53_v60 = vld [vmem:[#allocation2 + $0xb0] sm:$0xff]  ;;  %v54_v62 = vld [vmem:[#allocation2 + $0xb8] sm:$0xff] }
  0x22   :  { %5100 = vmatprep.subr.mxu0 %v100_v10  ;;  %5218 = vmatprep.subr.mxu1 %v100_v10  ;;  %v85_v61 = vld [vmem:[#allocation2 + $0x1b0] sm:$0xff]  ;;  %v86_v63 = vld [vmem:[#allocation2 + $0x1b8] sm:$0xff]  ;;  %v55_v0 = vld [vmem:[#allocation2 + $0xc0] sm:$0xff] }
  0x23   :  { %5101 = vmatpush3.msra.mxu0 %v100_v10  ;;  %5234 = vmatpush3.msra.mxu1 %v100_v10  ;;  %v87_v1 = vld [vmem:[#allocation2 + $0x1c0] sm:$0xff]  ;;  %v56_v2 = vld [vmem:[#allocation2 + $0xc8] sm:$0xff]  ;;  %v57_v4 = vld [vmem:[#allocation2 + $0xd0] sm:$0xff] }
  0x24   :  { %5102 = vmatprep.subr.mxu0 %v99_v11  ;;  %5219 = vmatprep.subr.mxu1 %v99_v11  ;;  %v88_v3 = vld [vmem:[#allocation2 + $0x1c8] sm:$0xff]  ;;  %v89_v5 = vld [vmem:[#allocation2 + $0x1d0] sm:$0xff]  ;;  %v58_v6 = vld [vmem:[#allocation2 + $0xd8] sm:$0xff] }
  0x25   :  { %5103 = vmatpush3.msra.mxu0 %v99_v11  ;;  %5235 = vmatpush3.msra.mxu1 %v99_v11  ;;  %v90_v7 = vld [vmem:[#allocation2 + $0x1d8] sm:$0xff]  ;;  %v59_v8 = vld [vmem:[#allocation2 + $0xe0] sm:$0xff]  ;;  %v60_v10 = vld [vmem:[#allocation2 + $0xe8] sm:$0xff] }
  0x26   :  { %5104 = vmatprep.subr.mxu0 %v98_v12  ;;  %5220 = vmatprep.subr.mxu1 %v98_v12  ;;  %v91_v9 = vld [vmem:[#allocation2 + $0x1e0] sm:$0xff]  ;;  %v92_v11 = vld [vmem:[#allocation2 + $0x1e8] sm:$0xff] }
  0x27   :  { %5105 = vmatpush3.msra.mxu0 %v98_v12  ;;  %5236 = vmatpush3.msra.mxu1 %v98_v12  ;;  %v61_v12 = vld [vmem:[#allocation2 + $0xf0] sm:$0xff] }
  0x28   :  { %5106 = vmatprep.subr.mxu0 %v97_v13  ;;  %5221 = vmatprep.subr.mxu1 %v97_v13 }
  0x29   :  { %5107 = vmatpush3.msra.mxu0 %v97_v13  ;;  %5237 = vmatpush3.msra.mxu1 %v97_v13  ;;  %v93_v13 = vld [vmem:[#allocation2 + $0x1f0] sm:$0xff] }
  0x2a   :  { %5108 = vmatprep.subr.mxu0 %v96_v14  ;;  %5222 = vmatprep.subr.mxu1 %v96_v14 }
  0x2b   :  { %5109 = vmatpush3.msra.mxu0 %v96_v14  ;;  %5238 = vmatpush3.msra.mxu1 %v96_v14  ;;  %v62_v14 = vld [vmem:[#allocation2 + $0xf8] sm:$0xff] }
  0x2c   :  { %5110 = vmatprep.subr.mxu0 %v95_v15  ;;  %5223 = vmatprep.subr.mxu1 %v95_v15 }
  0x2d   :  { %5111 = vmatpush3.msra.mxu0 %v95_v15  ;;  %5239 = vmatpush3.msra.mxu1 %v95_v15  ;;  %v94_v15 = vld [vmem:[#allocation2 + $0x1f8] sm:$0xff] }
  0x2e   :  { %5112 = vmatprep.mubr.f32.mxu0 %v31_v16  ;;  %5160 = vmatprep.mubr.f32.mxu1 %v63_v17  ;;  %v5866_v16 = vld [vmem:[%s12164_s2] ss:$0 sm:$0xff] }
  0x2f   :  { %5113 = vmatmul.mubr.f32.vlgmr.msra.gmra.mxu0 %v32_v18  ;;  %5161 = vmatmul.mubr.f32.vlgmr.msra.gmra.mxu1 %v64_v19 }
  0x30   :  { %5115 = vmatprep.mubr.f32.mxu0 %v33_v20  ;;  %5163 = vmatprep.mubr.f32.mxu1 %v65_v21 }
  0x33   :  { %5116 = vmatmul.mubr.f32.gmra.mxu0 %v34_v22  ;;  %5164 = vmatmul.mubr.f32.gmra.mxu1 %v66_v23 }
  0x34   :  { %5118 = vmatprep.mubr.f32.mxu0 %v35_v24  ;;  %5166 = vmatprep.mubr.f32.mxu1 %v67_v25 }
  0x37   :  { %5119 = vmatmul.mubr.f32.gmra.mxu0 %v36_v26  ;;  %5167 = vmatmul.mubr.f32.gmra.mxu1 %v68_v27 }
  0x38   :  { %5121 = vmatprep.mubr.f32.mxu0 %v37_v28  ;;  %5169 = vmatprep.mubr.f32.mxu1 %v69_v29 }
  0x3b   :  { %5122 = vmatmul.mubr.f32.gmra.mxu0 %v38_v30  ;;  %5170 = vmatmul.mubr.f32.gmra.mxu1 %v70_v31 }
  0x3c   :  { %5124 = vmatprep.mubr.f32.mxu0 %v39_v32  ;;  %5172 = vmatprep.mubr.f32.mxu1 %v71_v33 }
  0x3f   :  { %5125 = vmatmul.mubr.f32.gmra.mxu0 %v40_v34  ;;  %5173 = vmatmul.mubr.f32.gmra.mxu1 %v72_v35 }
  0x40   :  { %5127 = vmatprep.mubr.f32.mxu0 %v41_v36  ;;  %5175 = vmatprep.mubr.f32.mxu1 %v73_v37 }
  0x43   :  { %5128 = vmatmul.mubr.f32.gmra.mxu0 %v42_v38  ;;  %5176 = vmatmul.mubr.f32.gmra.mxu1 %v74_v39 }
  0x44   :  { %5130 = vmatprep.mubr.f32.mxu0 %v43_v40  ;;  %5178 = vmatprep.mubr.f32.mxu1 %v75_v41 }
  0x47   :  { %5131 = vmatmul.mubr.f32.gmra.mxu0 %v44_v42  ;;  %5179 = vmatmul.mubr.f32.gmra.mxu1 %v76_v43 }
  0x48   :  { %5133 = vmatprep.mubr.f32.mxu0 %v45_v44  ;;  %5181 = vmatprep.mubr.f32.mxu1 %v77_v45 }
  0x4b   :  { %5134 = vmatmul.mubr.f32.gmra.mxu0 %v46_v46  ;;  %5182 = vmatmul.mubr.f32.gmra.mxu1 %v78_v47 }
  0x4c   :  { %5136 = vmatprep.mubr.f32.mxu0 %v47_v48  ;;  %5184 = vmatprep.mubr.f32.mxu1 %v79_v49 }
  0x4f   :  { %5137 = vmatmul.mubr.f32.gmra.mxu0 %v48_v50  ;;  %5185 = vmatmul.mubr.f32.gmra.mxu1 %v80_v51 }
  0x50   :  { %5139 = vmatprep.mubr.f32.mxu0 %v49_v52  ;;  %5187 = vmatprep.mubr.f32.mxu1 %v81_v53 }
  0x53   :  { %5140 = vmatmul.mubr.f32.gmra.mxu0 %v50_v54  ;;  %5188 = vmatmul.mubr.f32.gmra.mxu1 %v82_v55 }
  0x54   :  { %5142 = vmatprep.mubr.f32.mxu0 %v51_v56  ;;  %5190 = vmatprep.mubr.f32.mxu1 %v83_v57 }
  0x57   :  { %5143 = vmatmul.mubr.f32.gmra.mxu0 %v52_v58  ;;  %5191 = vmatmul.mubr.f32.gmra.mxu1 %v84_v59 }
  0x58   :  { %5145 = vmatprep.mubr.f32.mxu0 %v53_v60  ;;  %5193 = vmatprep.mubr.f32.mxu1 %v85_v61 }
  0x5b   :  { %5146 = vmatmul.mubr.f32.gmra.mxu0 %v54_v62  ;;  %5194 = vmatmul.mubr.f32.gmra.mxu1 %v86_v63 }
  0x5c   :  { %5148 = vmatprep.mubr.f32.mxu0 %v55_v0  ;;  %5196 = vmatprep.mubr.f32.mxu1 %v87_v1 }
  0x5f   :  { %5149 = vmatmul.mubr.f32.gmra.mxu0 %v56_v2  ;;  %5197 = vmatmul.mubr.f32.gmra.mxu1 %v88_v3 }
  0x60   :  { %5151 = vmatprep.mubr.f32.mxu0 %v57_v4  ;;  %5199 = vmatprep.mubr.f32.mxu1 %v89_v5 }
  0x63   :  { %5152 = vmatmul.mubr.f32.gmra.mxu0 %v58_v6  ;;  %5200 = vmatmul.mubr.f32.gmra.mxu1 %v90_v7 }
  0x64   :  { %5154 = vmatprep.mubr.f32.mxu0 %v59_v8  ;;  %5202 = vmatprep.mubr.f32.mxu1 %v91_v9 }
  0x67   :  { %5155 = vmatmul.mubr.f32.gmra.mxu0 %v60_v10  ;;  %5203 = vmatmul.mubr.f32.gmra.mxu1 %v92_v11 }
  0x68   :  { %5157 = vmatprep.mubr.f32.mxu0 %v61_v12  ;;  %5205 = vmatprep.mubr.f32.mxu1 %v93_v13 }
  0x6b   :  { %5158 = vmatmul.mubr.f32.gmra.mxu0 %v62_v14  ;;  %5206 = vmatmul.mubr.f32.gmra.mxu1 %v94_v15 }
  0xef   :  { %v5114_v17 = vpop.f32.mrf.mxu0  ;;  %v5162_v18 = vpop.f32.mrf.mxu1 }
  0xf0   :  { %v5869_v19 = vadd.f32 %v5114_v17, %v5866_v16  ;;  %v5872_v20 = vadd.f32 %v5162_v18, %v5866_v16 }
  0xf1   :  { %v184_v21 = vpop.f32.mrf.mxu0  ;;  %v344_v22 = vpop.f32.mrf.mxu1 }
  0xf2   :  { %12958 = vst [vmem:[#allocation5_spill] sm:$0xff] %v5869_v19  ;;  %12959 = vst [vmem:[#allocation6_spill] sm:$0xff] %v5872_v20  ;;  %v5885_v23 = vadd.f32 %v5866_v16, %v184_v21  ;;  %v603_v24 = vsel %vm503_vm0, %v5872_v20, -inf  ;;  %v5890_v25 = vadd.f32 %v5866_v16, %v344_v22  ;;  %v507_v26 = vsel %vm503_vm0, %v5869_v19, -inf }
  0xf3   :  { %4667 = vst.msk [vmem:[%s12165_s3 + $0x8] sm:$0xff] %vm503_vm0, %v5869_v19  ;;  %4699 = vst.msk [vmem:[%s12165_s3 + $0x108] sm:$0xff] %vm503_vm0, %v5872_v20  ;;  %604 = vmax.xlane.f32.xlu1 %v603_v24  ;;  %508 = vmax.xlane.f32.xlu0 %v507_v26  ;;  %v5117_v27 = vpop.f32.mrf.mxu0  ;;  %v5165_v28 = vpop.f32.mrf.mxu1 }
  0xf4   :  { %12960 = vst [vmem:[#allocation7_spill] sm:$0xff] %v5885_v23  ;;  %12961 = vst [vmem:[#allocation8_spill] sm:$0xff] %v5890_v25  ;;  %v5905_v29 = vadd.f32 %v5117_v27, %v5866_v16  ;;  %v5908_v30 = vadd.f32 %v5165_v28, %v5866_v16  ;;  %v504_v34 = vsel %vm503_vm0, %v5885_v23, -inf  ;;  %v600_v44 = vsel %vm503_vm0, %v5890_v25, -inf }
  0xf5   :  { %4666 = vst.msk [vmem:[%s12165_s3] sm:$0xff] %vm503_vm0, %v5885_v23  ;;  %4698 = vst.msk [vmem:[%s12165_s3 + $0x100] sm:$0xff] %vm503_vm0, %v5890_v25  ;;  %v354_v31 = vpop.f32.mrf.mxu1  ;;  %v194_v32 = vpop.f32.mrf.mxu0 }
  0xf6   :  { %12962 = vst [vmem:[#allocation9_spill] sm:$0xff] %v5905_v29  ;;  %12963 = vst [vmem:[#allocation10_spill] sm:$0xff] %v5908_v30  ;;  %v513_v33 = vsel %vm503_vm0, %v5905_v29, -inf  ;;  %v5925_v35 = vadd.f32 %v5866_v16, %v354_v31  ;;  %v5928_v36 = vadd.f32 %v5866_v16, %v194_v32  ;;  %v609_v39 = vsel %vm503_vm0, %v5908_v30, -inf }
  0xf7   :  { %4669 = vst.msk [vmem:[%s12165_s3 + $0x18] sm:$0xff] %vm503_vm0, %v5905_v29  ;;  %4701 = vst.msk [vmem:[%s12165_s3 + $0x118] sm:$0xff] %vm503_vm0, %v5908_v30  ;;  %514 = vmax.xlane.f32.xlu1 %v513_v33  ;;  %505 = vmax.xlane.f32.xlu0 %v504_v34  ;;  %v5120_v37 = vpop.f32.mrf.mxu0  ;;  %v5168_v38 = vpop.f32.mrf.mxu1 }
  0xf8   :  { %12964 = vst [vmem:[#allocation11_spill] sm:$0xff] %v5925_v35  ;;  %12965 = vst [vmem:[#allocation12_spill] sm:$0xff] %v5928_v36  ;;  %v5943_v40 = vadd.f32 %v5120_v37, %v5866_v16  ;;  %v5946_v41 = vadd.f32 %v5168_v38, %v5866_v16  ;;  %v510_v49 = vsel %vm503_vm0, %v5928_v36, -inf  ;;  %v606_v50 = vsel %vm503_vm0, %v5925_v35, -inf }
  0xf9   :  { %4700 = vst.msk [vmem:[%s12165_s3 + $0x110] sm:$0xff] %vm503_vm0, %v5925_v35  ;;  %4668 = vst.msk [vmem:[%s12165_s3 + $0x10] sm:$0xff] %vm503_vm0, %v5928_v36  ;;  %v204_v42 = vpop.f32.mrf.mxu0  ;;  %v364_v43 = vpop.f32.mrf.mxu1 }
  0xfa   :  { %12966 = vst [vmem:[#allocation13_spill] sm:$0xff] %v5943_v40  ;;  %12967 = vst [vmem:[#allocation14_spill] sm:$0xff] %v5946_v41  ;;  %v5956_v45 = vadd.f32 %v5866_v16, %v204_v42  ;;  %v5964_v46 = vadd.f32 %v5866_v16, %v364_v43  ;;  %v519_v59 = vsel %vm503_vm0, %v5943_v40, -inf  ;;  %v615_v5 = vsel %vm503_vm0, %v5946_v41, -inf }
  0xfb   :  { %4671 = vst.msk [vmem:[%s12165_s3 + $0x28] sm:$0xff] %vm503_vm0, %v5943_v40  ;;  %4703 = vst.msk [vmem:[%s12165_s3 + $0x128] sm:$0xff] %vm503_vm0, %v5946_v41  ;;  %610 = vmax.xlane.f32.xlu1 %v609_v39  ;;  %601 = vmax.xlane.f32.xlu0 %v600_v44  ;;  %v5123_v47 = vpop.f32.mrf.mxu0  ;;  %v5171_v48 = vpop.f32.mrf.mxu1 }
  0xfc   :  { %12968 = vst [vmem:[#allocation15_spill] sm:$0xff] %v5956_v45  ;;  %12969 = vst [vmem:[#allocation16_spill] sm:$0xff] %v5964_v46  ;;  %v5981_v51 = vadd.f32 %v5123_v47, %v5866_v16  ;;  %v5984_v52 = vadd.f32 %v5171_v48, %v5866_v16  ;;  %v516_v60 = vsel %vm503_vm0, %v5956_v45, -inf  ;;  %v612_v6 = vsel %vm503_vm0, %v5964_v46, -inf }
  0xfd   :  { %4670 = vst.msk [vmem:[%s12165_s3 + $0x20] sm:$0xff] %vm503_vm0, %v5956_v45  ;;  %4702 = vst.msk [vmem:[%s12165_s3 + $0x120] sm:$0xff] %vm503_vm0, %v5964_v46  ;;  %v214_v53 = vpop.f32.mrf.mxu0  ;;  %v374_v54 = vpop.f32.mrf.mxu1 }
  0xfe   :  { %12970 = vst [vmem:[#allocation17_spill] sm:$0xff] %v5981_v51  ;;  %12971 = vst [vmem:[#allocation18_spill] sm:$0xff] %v5984_v52  ;;  %v5992_v55 = vadd.f32 %v5866_v16, %v214_v53  ;;  %v6000_v56 = vadd.f32 %v5866_v16, %v374_v54  ;;  %v525_v15 = vsel %vm503_vm0, %v5981_v51, -inf  ;;  %v621_v32 = vsel %vm503_vm0, %v5984_v52, -inf }
  0xff   :  { %4673 = vst.msk [vmem:[%s12165_s3 + $0x38] sm:$0xff] %vm503_vm0, %v5981_v51  ;;  %4705 = vst.msk [vmem:[%s12165_s3 + $0x138] sm:$0xff] %vm503_vm0, %v5984_v52  ;;  %511 = vmax.xlane.f32.xlu1 %v510_v49  ;;  %607 = vmax.xlane.f32.xlu0 %v606_v50  ;;  %v5126_v57 = vpop.f32.mrf.mxu0  ;;  %v5174_v58 = vpop.f32.mrf.mxu1 }
 0x100   :  { %12972 = vst [vmem:[#allocation19_spill] sm:$0xff] %v5992_v55  ;;  %12973 = vst [vmem:[#allocation20_spill] sm:$0xff] %v6000_v56  ;;  %v6017_v61 = vadd.f32 %v5126_v57, %v5866_v16  ;;  %v6020_v62 = vadd.f32 %v5174_v58, %v5866_v16  ;;  %v522_v17 = vsel %vm503_vm0, %v5992_v55, -inf  ;;  %v618_v33 = vsel %vm503_vm0, %v6000_v56, -inf }
 0x101   :  { %4672 = vst.msk [vmem:[%s12165_s3 + $0x30] sm:$0xff] %vm503_vm0, %v5992_v55  ;;  %4704 = vst.msk [vmem:[%s12165_s3 + $0x130] sm:$0xff] %vm503_vm0, %v6000_v56  ;;  %v224_v63 = vpop.f32.mrf.mxu0  ;;  %v384_v0 = vpop.f32.mrf.mxu1 }
 0x102   :  { %12974 = vst [vmem:[#allocation21_spill] sm:$0xff] %v6017_v61  ;;  %12975 = vst [vmem:[#allocation22_spill] sm:$0xff] %v6020_v62  ;;  %v6028_v1 = vadd.f32 %v5866_v16, %v224_v63  ;;  %v6036_v2 = vadd.f32 %v5866_v16, %v384_v0  ;;  %v531_v48 = vsel %vm503_vm0, %v6017_v61, -inf  ;;  %v627_v0 = vsel %vm503_vm0, %v6020_v62, -inf }
 0x103   :  { %4675 = vst.msk [vmem:[%s12165_s3 + $0x48] sm:$0xff] %vm503_vm0, %v6017_v61  ;;  %4707 = vst.msk [vmem:[%s12165_s3 + $0x148] sm:$0xff] %vm503_vm0, %v6020_v62  ;;  %520 = vmax.xlane.f32.xlu1 %v519_v59  ;;  %517 = vmax.xlane.f32.xlu0 %v516_v60  ;;  %v5129_v3 = vpop.f32.mrf.mxu0  ;;  %v5177_v4 = vpop.f32.mrf.mxu1 }
 0x104   :  { %12976 = vst [vmem:[#allocation23_spill] sm:$0xff] %v6028_v1  ;;  %12977 = vst [vmem:[#allocation24_spill] sm:$0xff] %v6036_v2  ;;  %v6053_v7 = vadd.f32 %v5129_v3, %v5866_v16  ;;  %v6056_v8 = vadd.f32 %v5177_v4, %v5866_v16  ;;  %v528_v49 = vsel %vm503_vm0, %v6028_v1, -inf  ;;  %v624_v3 = vsel %vm503_vm0, %v6036_v2, -inf }
 0x105   :  { %4674 = vst.msk [vmem:[%s12165_s3 + $0x40] sm:$0xff] %vm503_vm0, %v6028_v1  ;;  %4706 = vst.msk [vmem:[%s12165_s3 + $0x140] sm:$0xff] %vm503_vm0, %v6036_v2  ;;  %v234_v9 = vpop.f32.mrf.mxu0  ;;  %v394_v10 = vpop.f32.mrf.mxu1 }
 0x106   :  { %12978 = vst [vmem:[#allocation25_spill] sm:$0xff] %v6053_v7  ;;  %12979 = vst [vmem:[#allocation26_spill] sm:$0xff] %v6056_v8  ;;  %v6064_v11 = vadd.f32 %v5866_v16, %v234_v9  ;;  %v6072_v12 = vadd.f32 %v5866_v16, %v394_v10 }
 0x107   :  { %4677 = vst.msk [vmem:[%s12165_s3 + $0x58] sm:$0xff] %vm503_vm0, %v6053_v7  ;;  %4709 = vst.msk [vmem:[%s12165_s3 + $0x158] sm:$0xff] %vm503_vm0, %v6056_v8  ;;  %616 = vmax.xlane.f32.xlu1 %v615_v5  ;;  %613 = vmax.xlane.f32.xlu0 %v612_v6  ;;  %v5132_v13 = vpop.f32.mrf.mxu0  ;;  %v5180_v14 = vpop.f32.mrf.mxu1 }
 0x108   :  { %12980 = vst [vmem:[#allocation27_spill] sm:$0xff] %v6064_v11  ;;  %12981 = vst [vmem:[#allocation28_spill] sm:$0xff] %v6072_v12  ;;  %v6089_v18 = vadd.f32 %v5132_v13, %v5866_v16  ;;  %v6092_v21 = vadd.f32 %v5180_v14, %v5866_v16 }
 0x109   :  { %4676 = vst.msk [vmem:[%s12165_s3 + $0x50] sm:$0xff] %vm503_vm0, %v6064_v11  ;;  %4708 = vst.msk [vmem:[%s12165_s3 + $0x150] sm:$0xff] %vm503_vm0, %v6072_v12  ;;  %v244_v22 = vpop.f32.mrf.mxu0  ;;  %v404_v24 = vpop.f32.mrf.mxu1 }
 0x10a   :  { %12982 = vst [vmem:[#allocation29_spill] sm:$0xff] %v6089_v18  ;;  %12983 = vst [vmem:[#allocation30_spill] sm:$0xff] %v6092_v21  ;;  %v6100_v26 = vadd.f32 %v5866_v16, %v244_v22  ;;  %v6108_v27 = vadd.f32 %v5866_v16, %v404_v24  ;;  %v534_v22 = vsel %vm503_vm0, %v6064_v11, -inf }
 0x10b   :  { %4679 = vst.msk [vmem:[%s12165_s3 + $0x68] sm:$0xff] %vm503_vm0, %v6089_v18  ;;  %4711 = vst.msk [vmem:[%s12165_s3 + $0x168] sm:$0xff] %vm503_vm0, %v6092_v21  ;;  %526 = vmax.xlane.f32.xlu1 %v525_v15  ;;  %523 = vmax.xlane.f32.xlu0 %v522_v17  ;;  %v5135_v28 = vpop.f32.mrf.mxu0  ;;  %v5183_v31 = vpop.f32.mrf.mxu1  ;;  %v537_v17 = vsel %vm503_vm0, %v6053_v7, -inf }
 0x10c   :  { %12984 = vst [vmem:[#allocation31_spill] sm:$0xff] %v6100_v26  ;;  %12985 = vst [vmem:[#allocation32_spill] sm:$0xff] %v6108_v27  ;;  %v6125_v34 = vadd.f32 %v5135_v28, %v5866_v16  ;;  %v6128_v37 = vadd.f32 %v5183_v31, %v5866_v16 }
 0x10d   :  { %4678 = vst.msk [vmem:[%s12165_s3 + $0x60] sm:$0xff] %vm503_vm0, %v6100_v26  ;;  %4710 = vst.msk [vmem:[%s12165_s3 + $0x160] sm:$0xff] %vm503_vm0, %v6108_v27  ;;  %v254_v38 = vpop.f32.mrf.mxu0  ;;  %v414_v39 = vpop.f32.mrf.mxu1 }
 0x10e   :  { %12986 = vst [vmem:[#allocation33_spill] sm:$0xff] %v6125_v34  ;;  %12987 = vst [vmem:[#allocation34_spill] sm:$0xff] %v6128_v37  ;;  %v6136_v42 = vadd.f32 %v5866_v16, %v254_v38  ;;  %v6144_v43 = vadd.f32 %v5866_v16, %v414_v39 }
 0x10f   :  { %4681 = vst.msk [vmem:[%s12165_s3 + $0x78] sm:$0xff] %vm503_vm0, %v6125_v34  ;;  %4713 = vst.msk [vmem:[%s12165_s3 + $0x178] sm:$0xff] %vm503_vm0, %v6128_v37  ;;  %622 = vmax.xlane.f32.xlu1 %v621_v32  ;;  %619 = vmax.xlane.f32.xlu0 %v618_v33  ;;  %v5138_v44 = vpop.f32.mrf.mxu0  ;;  %v5186_v47 = vpop.f32.mrf.mxu1 }
 0x110   :  { %12988 = vst [vmem:[#allocation35_spill] sm:$0xff] %v6136_v42  ;;  %12989 = vst [vmem:[#allocation36_spill] sm:$0xff] %v6144_v43  ;;  %v6161_v50 = vadd.f32 %v5138_v44, %v5866_v16  ;;  %v6164_v53 = vadd.f32 %v5186_v47, %v5866_v16  ;;  %v633_v47 = vsel %vm503_vm0, %v6056_v8, -inf }
 0x111   :  { %4680 = vst.msk [vmem:[%s12165_s3 + $0x70] sm:$0xff] %vm503_vm0, %v6136_v42  ;;  %4712 = vst.msk [vmem:[%s12165_s3 + $0x170] sm:$0xff] %vm503_vm0, %v6144_v43  ;;  %v264_v54 = vpop.f32.mrf.mxu0  ;;  %v424_v57 = vpop.f32.mrf.mxu1 }
 0x112   :  { %12990 = vst [vmem:[#allocation37_spill] sm:$0xff] %v6161_v50  ;;  %12991 = vst [vmem:[#allocation38_spill] sm:$0xff] %v6164_v53  ;;  %v6172_v58 = vadd.f32 %v5866_v16, %v264_v54  ;;  %v6180_v59 = vadd.f32 %v5866_v16, %v424_v57 }
 0x113   :  { %4683 = vst.msk [vmem:[%s12165_s3 + $0x88] sm:$0xff] %vm503_vm0, %v6161_v50  ;;  %4715 = vst.msk [vmem:[%s12165_s3 + $0x188] sm:$0xff] %vm503_vm0, %v6164_v53  ;;  %532 = vmax.xlane.f32.xlu1 %v531_v48  ;;  %529 = vmax.xlane.f32.xlu0 %v528_v49  ;;  %v5141_v60 = vpop.f32.mrf.mxu0  ;;  %v5189_v63 = vpop.f32.mrf.mxu1  ;;  %v630_v48 = vsel %vm503_vm0, %v6072_v12, -inf  ;;  %v645_v12 = vsel %vm503_vm0, %v6128_v37, -inf }
 0x114   :  { %12992 = vst [vmem:[#allocation39_spill] sm:$0xff] %v6172_v58  ;;  %12993 = vst [vmem:[#allocation40_spill] sm:$0xff] %v6180_v59  ;;  %v6197_v4 = vadd.f32 %v5141_v60, %v5866_v16  ;;  %v6200_v5 = vadd.f32 %v5189_v63, %v5866_v16  ;;  %v552_v2 = vsel %vm503_vm0, %v6172_v58, -inf }
 0x115   :  { %4682 = vst.msk [vmem:[%s12165_s3 + $0x80] sm:$0xff] %vm503_vm0, %v6172_v58  ;;  %4714 = vst.msk [vmem:[%s12165_s3 + $0x180] sm:$0xff] %vm503_vm0, %v6180_v59  ;;  %v274_v6 = vpop.f32.mrf.mxu0  ;;  %v434_v9 = vpop.f32.mrf.mxu1 }
 0x116   :  { %12994 = vst [vmem:[#allocation41_spill] sm:$0xff] %v6197_v4  ;;  %12995 = vst [vmem:[#allocation42_spill] sm:$0xff] %v6200_v5  ;;  %v6208_v10 = vadd.f32 %v5866_v16, %v274_v6  ;;  %v6216_v13 = vadd.f32 %v5866_v16, %v434_v9  ;;  %v543_v9 = vsel %vm503_vm0, %v6089_v18, -inf }
 0x117   :  { %4685 = vst.msk [vmem:[%s12165_s3 + $0x98] sm:$0xff] %vm503_vm0, %v6197_v4  ;;  %4717 = vst.msk [vmem:[%s12165_s3 + $0x198] sm:$0xff] %vm503_vm0, %v6200_v5  ;;  %628 = vmax.xlane.f32.xlu1 %v627_v0  ;;  %625 = vmax.xlane.f32.xlu0 %v624_v3  ;;  %v5144_v14 = vpop.f32.mrf.mxu0  ;;  %v5192_v15 = vpop.f32.mrf.mxu1 }
 0x118   :  { %12996 = vst [vmem:[#allocation43_spill] sm:$0xff] %v6208_v10  ;;  %12997 = vst [vmem:[#allocation44_spill] sm:$0xff] %v6216_v13  ;;  %v6233_v24 = vadd.f32 %v5144_v14, %v5866_v16  ;;  %v6236_v28 = vadd.f32 %v5192_v15, %v5866_v16  ;;  %v540_v14 = vsel %vm503_vm0, %v6100_v26, -inf }
 0x119   :  { %4684 = vst.msk [vmem:[%s12165_s3 + $0x90] sm:$0xff] %vm503_vm0, %v6208_v10  ;;  %4716 = vst.msk [vmem:[%s12165_s3 + $0x190] sm:$0xff] %vm503_vm0, %v6216_v13  ;;  %v284_v31 = vpop.f32.mrf.mxu0  ;;  %v444_v32 = vpop.f32.mrf.mxu1 }
 0x11a   :  { %12998 = vst [vmem:[#allocation45_spill] sm:$0xff] %v6233_v24  ;;  %12999 = vst [vmem:[#allocation46_spill] sm:$0xff] %v6236_v28  ;;  %v6244_v33 = vadd.f32 %v5866_v16, %v284_v31  ;;  %v6252_v38 = vadd.f32 %v5866_v16, %v444_v32 }
 0x11b   :  { %4687 = vst.msk [vmem:[%s12165_s3 + $0xa8] sm:$0xff] %vm503_vm0, %v6233_v24  ;;  %4719 = vst.msk [vmem:[%s12165_s3 + $0x1a8] sm:$0xff] %vm503_vm0, %v6236_v28  ;;  %538 = vmax.xlane.f32.xlu1 %v537_v17  ;;  %535 = vmax.xlane.f32.xlu0 %v534_v22  ;;  %v5147_v39 = vpop.f32.mrf.mxu0  ;;  %v5195_v44 = vpop.f32.mrf.mxu1 }
 0x11c   :  { %13000 = vst [vmem:[#allocation47_spill] sm:$0xff] %v6244_v33  ;;  %13001 = vst [vmem:[#allocation48_spill] sm:$0xff] %v6252_v38  ;;  %v6269_v49 = vadd.f32 %v5147_v39, %v5866_v16  ;;  %v6272_v54 = vadd.f32 %v5195_v44, %v5866_v16 }
 0x11d   :  { %4686 = vst.msk [vmem:[%s12165_s3 + $0xa0] sm:$0xff] %vm503_vm0, %v6244_v33  ;;  %4718 = vst.msk [vmem:[%s12165_s3 + $0x1a0] sm:$0xff] %vm503_vm0, %v6252_v38  ;;  %v294_v57 = vpop.f32.mrf.mxu0  ;;  %v454_v60 = vpop.f32.mrf.mxu1 }
 0x11e   :  { %13002 = vst [vmem:[#allocation49_spill] sm:$0xff] %v6269_v49  ;;  %13003 = vst [vmem:[#allocation50_spill] sm:$0xff] %v6272_v54  ;;  %v6280_v63 = vadd.f32 %v5866_v16, %v294_v57  ;;  %v6288_v0 = vadd.f32 %v5866_v16, %v454_v60  ;;  %v636_v57 = vsel %vm503_vm0, %v6108_v27, -inf }
 0x11f   :  { %4689 = vst.msk [vmem:[%s12165_s3 + $0xb8] sm:$0xff] %vm503_vm0, %v6269_v49  ;;  %4721 = vst.msk [vmem:[%s12165_s3 + $0x1b8] sm:$0xff] %vm503_vm0, %v6272_v54  ;;  %634 = vmax.xlane.f32.xlu1 %v633_v47  ;;  %631 = vmax.xlane.f32.xlu0 %v630_v48  ;;  %v5150_v3 = vpop.f32.mrf.mxu0  ;;  %v5198_v6 = vpop.f32.mrf.mxu1  ;;  %v639_v48 = vsel %vm503_vm0, %v6092_v21, -inf }
 0x120   :  { %13004 = vst [vmem:[#allocation51_spill] sm:$0xff] %v6280_v63  ;;  %13005 = vst [vmem:[#allocation52_spill] sm:$0xff] %v6288_v0  ;;  %v6305_v15 = vadd.f32 %v5150_v3, %v5866_v16  ;;  %v6308_v17 = vadd.f32 %v5198_v6, %v5866_v16 }
 0x121   :  { %4688 = vst.msk [vmem:[%s12165_s3 + $0xb0] sm:$0xff] %vm503_vm0, %v6280_v63  ;;  %4720 = vst.msk [vmem:[%s12165_s3 + $0x1b0] sm:$0xff] %vm503_vm0, %v6288_v0  ;;  %v304_v22 = vpop.f32.mrf.mxu0  ;;  %v464_v31 = vpop.f32.mrf.mxu1 }
 0x122   :  { %13006 = vst [vmem:[#allocation53_spill] sm:$0xff] %v6305_v15  ;;  %13007 = vst [vmem:[#allocation54_spill] sm:$0xff] %v6308_v17  ;;  %v6316_v32 = vadd.f32 %v5866_v16, %v304_v22  ;;  %v6324_v39 = vadd.f32 %v5866_v16, %v464_v31 }
 0x123   :  { %4691 = vst.msk [vmem:[%s12165_s3 + $0xc8] sm:$0xff] %vm503_vm0, %v6305_v15  ;;  %4723 = vst.msk [vmem:[%s12165_s3 + $0x1c8] sm:$0xff] %vm503_vm0, %v6308_v17  ;;  %544 = vmax.xlane.f32.xlu1 %v543_v9  ;;  %541 = vmax.xlane.f32.xlu0 %v540_v14  ;;  %v5153_v44 = vpop.f32.mrf.mxu0  ;;  %v5201_v47 = vpop.f32.mrf.mxu1 }
 0x124   :  { %13008 = vst [vmem:[#allocation55_spill] sm:$0xff] %v6316_v32  ;;  %13009 = vst [vmem:[#allocation56_spill] sm:$0xff] %v6324_v39  ;;  %v6341_v60 = vadd.f32 %v5153_v44, %v5866_v16  ;;  %v6344_v3 = vadd.f32 %v5201_v47, %v5866_v16  ;;  %v549_v47 = vsel %vm503_vm0, %v6125_v34, -inf }
 0x125   :  { %4690 = vst.msk [vmem:[%s12165_s3 + $0xc0] sm:$0xff] %vm503_vm0, %v6316_v32  ;;  %4722 = vst.msk [vmem:[%s12165_s3 + $0x1c0] sm:$0xff] %vm503_vm0, %v6324_v39  ;;  %v314_v6 = vpop.f32.mrf.mxu0  ;;  %v474_v9 = vpop.f32.mrf.mxu1 }
 0x126   :  { %13010 = vst [vmem:[#allocation57_spill] sm:$0xff] %v6341_v60  ;;  %13011 = vst [vmem:[#allocation58_spill] sm:$0xff] %v6344_v3  ;;  %v6352_v14 = vadd.f32 %v5866_v16, %v314_v6  ;;  %v6360_v22 = vadd.f32 %v5866_v16, %v474_v9  ;;  %v546_v6 = vsel %vm503_vm0, %v6136_v42, -inf }
 0x127   :  { %4693 = vst.msk [vmem:[%s12165_s3 + $0xd8] sm:$0xff] %vm503_vm0, %v6341_v60  ;;  %4725 = vst.msk [vmem:[%s12165_s3 + $0x1d8] sm:$0xff] %vm503_vm0, %v6344_v3  ;;  %640 = vmax.xlane.f32.xlu1 %v639_v48  ;;  %637 = vmax.xlane.f32.xlu0 %v636_v57  ;;  %v5156_v31 = vpop.f32.mrf.mxu0  ;;  %v5204_v44 = vpop.f32.mrf.mxu1 }
 0x128   :  { %13012 = vst [vmem:[#allocation59_spill] sm:$0xff] %v6352_v14  ;;  %13013 = vst [vmem:[#allocation60_spill] sm:$0xff] %v6360_v22  ;;  %v6377_v48 = vadd.f32 %v5156_v31, %v5866_v16  ;;  %v6380_v57 = vadd.f32 %v5204_v44, %v5866_v16 }
 0x129   :  { %4692 = vst.msk [vmem:[%s12165_s3 + $0xd0] sm:$0xff] %vm503_vm0, %v6352_v14  ;;  %4724 = vst.msk [vmem:[%s12165_s3 + $0x1d0] sm:$0xff] %vm503_vm0, %v6360_v22  ;;  %v324_v9 = vpop.f32.mrf.mxu0  ;;  %v484_v42 = vpop.f32.mrf.mxu1 }
 0x12a   :  { %13014 = vst [vmem:[#allocation61_spill] sm:$0xff] %v6377_v48  ;;  %13015 = vst [vmem:[#allocation62_spill] sm:$0xff] %v6380_v57  ;;  %v6388_v27 = vadd.f32 %v5866_v16, %v324_v9  ;;  %v6396_v31 = vadd.f32 %v5866_v16, %v484_v42  ;;  %v642_v9 = vsel %vm503_vm0, %v6144_v43, -inf }
 0x12b   :  { %4695 = vst.msk [vmem:[%s12165_s3 + $0xe8] sm:$0xff] %vm503_vm0, %v6377_v48  ;;  %4727 = vst.msk [vmem:[%s12165_s3 + $0x1e8] sm:$0xff] %vm503_vm0, %v6380_v57  ;;  %550 = vmax.xlane.f32.xlu1 %v549_v47  ;;  %547 = vmax.xlane.f32.xlu0 %v546_v6  ;;  %v5159_v44 = vpop.f32.mrf.mxu0  ;;  %v5207_v26 = vpop.f32.mrf.mxu1 }
 0x12c   :  { %13016 = vst [vmem:[#allocation63_spill] sm:$0xff] %v6388_v27  ;;  %13017 = vst [vmem:[#allocation64_spill] sm:$0xff] %v6396_v31  ;;  %v6413_v42 = vadd.f32 %v5159_v44, %v5866_v16  ;;  %v6416_v47 = vadd.f32 %v5207_v26, %v5866_v16  ;;  %v555_v44 = vsel %vm503_vm0, %v6161_v50, -inf }
 0x12d   :  { %4694 = vst.msk [vmem:[%s12165_s3 + $0xe0] sm:$0xff] %vm503_vm0, %v6388_v27  ;;  %4726 = vst.msk [vmem:[%s12165_s3 + $0x1e0] sm:$0xff] %vm503_vm0, %v6396_v31  ;;  %v334_v6 = vpop.f32.mrf.mxu0  ;;  %v494_v43 = vpop.f32.mrf.mxu1 }
 0x12e   :  { %13018 = vst [vmem:[#allocation65_spill] sm:$0xff] %v6413_v42  ;;  %13019 = vst [vmem:[#allocation66_spill] sm:$0xff] %v6416_v47  ;;  %v6424_v11 = vadd.f32 %v5866_v16, %v334_v6  ;;  %v6432_v26 = vadd.f32 %v5866_v16, %v494_v43  ;;  %v651_v16 = vsel %vm503_vm0, %v6164_v53, -inf  ;;  %v561_v43 = vsel %vm503_vm0, %v6197_v4, -inf }
 0x12f   :  { %4697 = vst.msk [vmem:[%s12165_s3 + $0xf8] sm:$0xff] %vm503_vm0, %v6413_v42  ;;  %4729 = vst.msk [vmem:[%s12165_s3 + $0x1f8] sm:$0xff] %vm503_vm0, %v6416_v47  ;;  %646 = vmax.xlane.f32.xlu1 %v645_v12  ;;  %643 = vmax.xlane.f32.xlu0 %v642_v9  ;;  %v648_v12 = vsel %vm503_vm0, %v6180_v59, -inf  ;;  %v558_v9 = vsel %vm503_vm0, %v6208_v10, -inf  ;;  %v657_v6 = vsel %vm503_vm0, %v6200_v5, -inf }
 0x130   :  { %13020 = vst [vmem:[#allocation67_spill] sm:$0xff] %v6424_v11  ;;  %13021 = vst [vmem:[#allocation68_spill] sm:$0xff] %v6432_v26 }
 0x131   :  { %4696 = vst.msk [vmem:[%s12165_s3 + $0xf0] sm:$0xff] %vm503_vm0, %v6424_v11  ;;  %4728 = vst.msk [vmem:[%s12165_s3 + $0x1f0] sm:$0xff] %vm503_vm0, %v6432_v26 }
 0x133   :  { %556 = vmax.xlane.f32.xlu1 %v555_v44  ;;  %553 = vmax.xlane.f32.xlu0 %v552_v2  ;;  %v654_v2 = vsel %vm503_vm0, %v6216_v13, -inf  ;;  %v567_v44 = vsel %vm503_vm0, %v6233_v24, -inf }
 0x137   :  { %652 = vmax.xlane.f32.xlu1 %v651_v16  ;;  %649 = vmax.xlane.f32.xlu0 %v648_v12  ;;  %v564_v16 = vsel %vm503_vm0, %v6244_v33, -inf  ;;  %v663_v12 = vsel %vm503_vm0, %v6236_v28, -inf }
 0x13b   :  { %562 = vmax.xlane.f32.xlu1 %v561_v43  ;;  %559 = vmax.xlane.f32.xlu0 %v558_v9  ;;  %v660_v43 = vsel %vm503_vm0, %v6252_v38, -inf  ;;  %v573_v9 = vsel %vm503_vm0, %v6269_v49, -inf }
 0x13f   :  { %658 = vmax.xlane.f32.xlu1 %v657_v6  ;;  %655 = vmax.xlane.f32.xlu0 %v654_v2  ;;  %v570_v6 = vsel %vm503_vm0, %v6280_v63, -inf  ;;  %v669_v2 = vsel %vm503_vm0, %v6272_v54, -inf }
 0x143   :  { %568 = vmax.xlane.f32.xlu1 %v567_v44  ;;  %565 = vmax.xlane.f32.xlu0 %v564_v16  ;;  %v666_v44 = vsel %vm503_vm0, %v6288_v0, -inf  ;;  %v579_v16 = vsel %vm503_vm0, %v6305_v15, -inf }
 0x147   :  { %664 = vmax.xlane.f32.xlu1 %v663_v12  ;;  %661 = vmax.xlane.f32.xlu0 %v660_v43  ;;  %v576_v12 = vsel %vm503_vm0, %v6316_v32, -inf  ;;  %v675_v43 = vsel %vm503_vm0, %v6308_v17, -inf }
 0x14b   :  { %574 = vmax.xlane.f32.xlu1 %v573_v9  ;;  %571 = vmax.xlane.f32.xlu0 %v570_v6  ;;  %v672_v9 = vsel %vm503_vm0, %v6324_v39, -inf  ;;  %v585_v6 = vsel %vm503_vm0, %v6341_v60, -inf }
 0x14f   :  { %670 = vmax.xlane.f32.xlu1 %v669_v2  ;;  %667 = vmax.xlane.f32.xlu0 %v666_v44  ;;  %v582_v2 = vsel %vm503_vm0, %v6352_v14, -inf  ;;  %v681_v44 = vsel %vm503_vm0, %v6344_v3, -inf }
 0x153   :  { %580 = vmax.xlane.f32.xlu1 %v579_v16  ;;  %577 = vmax.xlane.f32.xlu0 %v576_v12  ;;  %v678_v16 = vsel %vm503_vm0, %v6360_v22, -inf  ;;  %v591_v12 = vsel %vm503_vm0, %v6377_v48, -inf }
 0x157   :  { %676 = vmax.xlane.f32.xlu1 %v675_v43  ;;  %673 = vmax.xlane.f32.xlu0 %v672_v9  ;;  %v588_v43 = vsel %vm503_vm0, %v6388_v27, -inf  ;;  %v687_v9 = vsel %vm503_vm0, %v6380_v57, -inf }
 0x15b   :  { %586 = vmax.xlane.f32.xlu1 %v585_v6  ;;  %583 = vmax.xlane.f32.xlu0 %v582_v2  ;;  %v684_v6 = vsel %vm503_vm0, %v6396_v31, -inf  ;;  %v597_v2 = vsel %vm503_vm0, %v6413_v42, -inf }
 0x15f   :  { %682 = vmax.xlane.f32.xlu1 %v681_v44  ;;  %679 = vmax.xlane.f32.xlu0 %v678_v16  ;;  %v594_v44 = vsel %vm503_vm0, %v6424_v11, -inf  ;;  %v693_v16 = vsel %vm503_vm0, %v6416_v47, -inf }
 0x163   :  { %592 = vmax.xlane.f32.xlu1 %v591_v12  ;;  %589 = vmax.xlane.f32.xlu0 %v588_v43  ;;  %v690_v12 = vsel %vm503_vm0, %v6432_v26, -inf  ;;  %v1208_v43 = vlaneseq }
 0x165   :  { %v6508_v31 = vand.u32 127, %v1208_v43 }
 0x167   :  { %688 = vmax.xlane.f32.xlu1 %v687_v9  ;;  %685 = vmax.xlane.f32.xlu0 %v684_v6 }
 0x16b   :  { %598 = vmax.xlane.f32.xlu1 %v597_v2  ;;  %595 = vmax.xlane.f32.xlu0 %v594_v44 }
 0x16f   :  { %694 = vmax.xlane.f32.xlu1 %v693_v16  ;;  %691 = vmax.xlane.f32.xlu0 %v690_v12 }
 0x17c   :  { %v6510_v9 = vpop.xlane.xlu1 %604  ;;  %v6512_v6 = vpop.xlane.xlu0 %508 }
 0x17d   :  { %13022 = vst [vmem:[#allocation69_spill] sm:$0xff] %v6510_v9  ;;  %13023 = vst [vmem:[#allocation70_spill] sm:$0xff] %v6512_v6  ;;  %v729_v11 = vsub.f32 %v5872_v20, %v6510_v9  ;;  %v697_v2 = vsub.f32 %v5869_v19, %v6512_v6  ;;  %vm1211_vm1 = vcmp.eq.f32.partialorder %v5869_v19, %v6512_v6 }
 0x17e   :  { %vm1243_vm2 = vcmp.eq.f32.partialorder %v5872_v20, %v6510_v9  ;;  %v1275_v44 = vsel %vm1211_vm1, %v6508_v31, 8 }
 0x17f   :  { %v1307_v16 = vsel %vm1243_vm2, %v6508_v31, 8  ;;  %v762_v12 = vmul.f32 1.442695, %v697_v2  ;;  %v6525_v43 = vsel %vm503_vm0, %v1275_v44, 2147483647 }
 0x180   :  { %13024 = vst [vmem:[#allocation71_spill] sm:$0xff] %v6525_v43  ;;  %v826_v26 = vmul.f32 1.442695, %v729_v11  ;;  %v6527_v22 = vpop.xlane.xlu1 %514  ;;  %v6529_v39 = vpop.xlane.xlu0 %505  ;;  %v1355_v27 = vshra.s32 %v6525_v43, 16  ;;  %v6533_v6 = vsel %vm503_vm0, %v1307_v16, 2147483647 }
 0x181   :  { %13025 = vst [vmem:[#allocation72_spill] sm:$0xff] %v6527_v22  ;;  %13026 = vst [vmem:[#allocation73_spill] sm:$0xff] %v6529_v39  ;;  %v699_v9 = vsub.f32 %v5905_v29, %v6527_v22  ;;  %5244 = vpow2.f32 %v762_v12  ;;  %v1835_v2 = vshra.s32 %v6533_v6, 16  ;;  %vm1210_vm3 = vcmp.eq.f32.partialorder %v5885_v23, %v6529_v39 }
 0x182   :  { %13027 = vst [vmem:[#allocation74_spill] sm:$0xff] %v6533_v6  ;;  %v6537_v20 = vcvt.s32.f32 %v1355_v27  ;;  %v1274_v11 = vsel %vm1210_vm3, %v6508_v31, 8  ;;  %5246 = vpow2.f32 %v826_v26  ;;  %vm1213_vm4 = vcmp.eq.f32.partialorder %v5905_v29, %v6527_v22 }
 0x183   :  { %v766_v44 = vmul.f32 1.442695, %v699_v9  ;;  %v6549_v0 = vsel %vm503_vm0, %v1274_v11, 2147483647  ;;  %v6555_v12 = vcvt.s32.f32 %v1835_v2  ;;  %v1277_v2 = vsel %vm1213_vm4, %v6508_v31, 8 }
 0x184   :  { %13028 = vst [vmem:[#allocation75_spill] sm:$0xff] %v6537_v20  ;;  %v6543_v19 = vpop.xlane.xlu1 %610  ;;  %1358 = vmin.xlane.f32.xlu0 %v6537_v20  ;;  %v6546_v16 = vpop.xlane.xlu0 %601  ;;  %13031 = vst [vmem:[#allocation78_spill] sm:$0xff] %v6549_v0  ;;  %v1340_v26 = vshra.s32 %v6549_v0, 16 }
 0x185   :  { %13029 = vst [vmem:[#allocation76_spill] sm:$0xff] %v6543_v19  ;;  %13030 = vst [vmem:[#allocation77_spill] sm:$0xff] %v6546_v16  ;;  %v731_v27 = vsub.f32 %v5908_v30, %v6543_v19  ;;  %vm1242_vm5 = vcmp.eq.f32.partialorder %v5890_v25, %v6546_v16  ;;  %5248 = vpow2.f32 %v766_v44  ;;  %vm1245_vm6 = vcmp.eq.f32.partialorder %v5908_v30, %v6543_v19 }
 0x186   :  { %13032 = vst [vmem:[#allocation79_spill] sm:$0xff] %v6555_v12  ;;  %v1306_v9 = vsel %vm1242_vm5, %v6508_v31, 8  ;;  %v6572_v22 = vcvt.s32.f32 %v1340_v26  ;;  %v6576_v44 = vsel %vm503_vm0, %v1277_v2, 2147483647 }
 0x187   :  { %v830_v14 = vmul.f32 1.442695, %v731_v27  ;;  %v6567_v38 = vsel %vm503_vm0, %v1306_v9, 2147483647  ;;  %13037 = vst [vmem:[#allocation84_spill] sm:$0xff] %v6576_v44  ;;  %v1309_v9 = vsel %vm1245_vm6, %v6508_v31, 8 }
 0x188   :  { %v6561_v32 = vpop.xlane.xlu1 %511  ;;  %1838 = vmin.xlane.f32.xlu0 %v6555_v12  ;;  %v6564_v11 = vpop.xlane.xlu0 %607  ;;  %13035 = vst [vmem:[#allocation82_spill] sm:$0xff] %v6567_v38  ;;  %13036 = vst [vmem:[#allocation83_spill] sm:$0xff] %v6572_v22  ;;  %v1820_v29 = vshra.s32 %v6567_v38, 16  ;;  %v1385_v2 = vshra.s32 %v6576_v44, 16  ;;  %v6594_v30 = vsel %vm503_vm0, %v1309_v9, 2147483647 }
 0x189   :  { %13033 = vst [vmem:[#allocation80_spill] sm:$0xff] %v6561_v32  ;;  %13034 = vst [vmem:[#allocation81_spill] sm:$0xff] %v6564_v11  ;;  %5250 = vpow2.f32 %v830_v14  ;;  %vm1212_vm7 = vcmp.eq.f32.partialorder %v5928_v36, %v6561_v32  ;;  %vm1244_vm8 = vcmp.eq.f32.partialorder %v5925_v35, %v6564_v11 }
 0x18a   :  { %v6588_v26 = vcvt.s32.f32 %v1820_v29  ;;  %13042 = vst [vmem:[#allocation89_spill] sm:$0xff] %v6594_v30  ;;  %v1276_v29 = vsel %vm1212_vm7, %v6508_v31, 8  ;;  %v6610_v9 = vcvt.s32.f32 %v1385_v2 }
 0x18c   :  { %v6578_v27 = vpop.xlane.xlu1 %520  ;;  %1343 = vmin.xlane.f32.xlu0 %v6572_v22  ;;  %v6581_v13 = vpop.xlane.xlu0 %517  ;;  %13040 = vst [vmem:[#allocation87_spill] sm:$0xff] %v6588_v26  ;;  %13046 = vst [vmem:[#allocation93_spill] sm:$0xff] %v6610_v9 }
 0x18d   :  { %13038 = vst [vmem:[#allocation85_spill] sm:$0xff] %v6578_v27  ;;  %13039 = vst [vmem:[#allocation86_spill] sm:$0xff] %v6581_v13  ;;  %v701_v63 = vsub.f32 %v5943_v40, %v6578_v27  ;;  %vm1215_vm9 = vcmp.eq.f32.partialorder %v5943_v40, %v6578_v27  ;;  %vm1214_vm11 = vcmp.eq.f32.partialorder %v5956_v45, %v6581_v13 }
 0x18e   :  { %v6591_v19 = vpop.eup %5244 }
 0x18f   :  { %13041 = vst [vmem:[#allocation88_spill] sm:$0xff] %v6591_v19  ;;  %v770_v14 = vmul.f32 1.442695, %v701_v63  ;;  %v891_v33 = vsel %vm503_vm0, %v6591_v19, 0.0  ;;  %v6604_v58 = vpop.eup %5246  ;;  %v1865_v19 = vshra.s32 %v6594_v30, 16 }
 0x190   :  { %v6598_v10 = vpop.xlane.xlu1 %616  ;;  %1823 = vmin.xlane.f32.xlu0 %v6588_v26  ;;  %v6601_v59 = vpop.xlane.xlu0 %613  ;;  %13045 = vst [vmem:[#allocation92_spill] sm:$0xff] %v6604_v58  ;;  %892 = vadd.xlane.f32.xlu1 %v891_v33  ;;  %v6614_v26 = vsel %vm503_vm0, %v1276_v29, 2147483647  ;;  %v987_v22 = vsel %vm503_vm0, %v6604_v58, 0.0 }
 0x191   :  { %13043 = vst [vmem:[#allocation90_spill] sm:$0xff] %v6598_v10  ;;  %13044 = vst [vmem:[#allocation91_spill] sm:$0xff] %v6601_v59  ;;  %5252 = vpow2.f32 %v770_v14  ;;  %v733_v63 = vsub.f32 %v5946_v41, %v6598_v10  ;;  %v1308_v14 = vsel %vm1244_vm8, %v6508_v31, 8  ;;  %v6630_v29 = vcvt.s32.f32 %v1865_v19 }
 0x192   :  { %13047 = vst [vmem:[#allocation94_spill] sm:$0xff] %v6614_v26  ;;  %v6624_v12 = vpop.eup %5248  ;;  %vm1247_vm10 = vcmp.eq.f32.partialorder %v5946_v41, %v6598_v10  ;;  %vm1246_vm12 = vcmp.eq.f32.partialorder %v5964_v46, %v6601_v59 }
 0x193   :  { %v834_v44 = vmul.f32 1.442695, %v733_v63  ;;  %13050 = vst [vmem:[#allocation97_spill] sm:$0xff] %v6624_v12  ;;  %13051 = vst [vmem:[#allocation98_spill] sm:$0xff] %v6630_v29  ;;  %v1370_v63 = vshra.s32 %v6614_v26, 16  ;;  %v897_v30 = vsel %vm503_vm0, %v6624_v12, 0.0 }
 0x194   :  { %v6618_v38 = vpop.xlane.xlu1 %526  ;;  %1388 = vmin.xlane.f32.xlu0 %v6610_v9  ;;  %v6621_v33 = vpop.xlane.xlu0 %523  ;;  %988 = vadd.xlane.f32.xlu1 %v987_v22  ;;  %v6634_v9 = vsel %vm503_vm0, %v1308_v14, 2147483647  ;;  %v1310_v43 = vsel %vm1246_vm12, %v6508_v31, 8 }
 0x195   :  { %13048 = vst [vmem:[#allocation95_spill] sm:$0xff] %v6618_v38  ;;  %13049 = vst [vmem:[#allocation96_spill] sm:$0xff] %v6621_v33  ;;  %5254 = vpow2.f32 %v834_v44  ;;  %v703_v2 = vsub.f32 %v5981_v51, %v6618_v38  ;;  %v1279_v44 = vsel %vm1215_vm9, %v6508_v31, 8  ;;  %v6650_v14 = vcvt.s32.f32 %v1370_v63 }
 0x196   :  { %13052 = vst [vmem:[#allocation99_spill] sm:$0xff] %v6634_v9  ;;  %v6644_v27 = vpop.eup %5250  ;;  %v6654_v12 = vsel %vm503_vm0, %v1279_v44, 2147483647  ;;  %vm1217_vm13 = vcmp.eq.f32.partialorder %v5981_v51, %v6618_v38  ;;  %vm1216_vm15 = vcmp.eq.f32.partialorder %v5992_v55, %v6621_v33 }
 0x197   :  { %v774_v58 = vmul.f32 1.442695, %v703_v2  ;;  %13055 = vst [vmem:[#allocation102_spill] sm:$0xff] %v6644_v27  ;;  %13056 = vst [vmem:[#allocation103_spill] sm:$0xff] %v6650_v14  ;;  %v1850_v2 = vshra.s32 %v6634_v9, 16  ;;  %v1415_v10 = vshra.s32 %v6654_v12, 16 }
 0x198   :  { %v6638_v0 = vpop.xlane.xlu1 %622  ;;  %1868 = vmin.xlane.f32.xlu0 %v6630_v29  ;;  %v6641_v22 = vpop.xlane.xlu0 %619  ;;  %898 = vadd.xlane.f32.xlu1 %v897_v30  ;;  %13057 = vst [vmem:[#allocation104_spill] sm:$0xff] %v6654_v12  ;;  %v993_v29 = vsel %vm503_vm0, %v6644_v27, 0.0  ;;  %v1278_v9 = vsel %vm1214_vm11, %v6508_v31, 8 }
 0x199   :  { %13053 = vst [vmem:[#allocation100_spill] sm:$0xff] %v6638_v0  ;;  %13054 = vst [vmem:[#allocation101_spill] sm:$0xff] %v6641_v22  ;;  %5256 = vpow2.f32 %v774_v58  ;;  %v735_v19 = vsub.f32 %v5984_v52, %v6638_v0  ;;  %v1311_v58 = vsel %vm1247_vm10, %v6508_v31, 8  ;;  %vm1249_vm14 = vcmp.eq.f32.partialorder %v5984_v52, %v6638_v0 }
 0x19a   :  { %vm1248_vm1 = vcmp.eq.f32.partialorder %v6000_v56, %v6641_v22 }
 0x19b   :  { %v838_v40 = vmul.f32 1.442695, %v735_v19  ;;  %v6670_v19 = vcvt.s32.f32 %v1850_v2 }
 0x19c   :  { %v6658_v26 = vpop.xlane.xlu1 %532  ;;  %1373 = vmin.xlane.f32.xlu0 %v6650_v14  ;;  %v6661_v30 = vpop.xlane.xlu0 %529  ;;  %994 = vadd.xlane.f32.xlu1 %v993_v29  ;;  %v6676_v14 = vsel %vm503_vm0, %v1311_v58, 2147483647  ;;  %v696_v58 = vsub.f32 %v5885_v23, %v6529_v39  ;;  %v728_v39 = vsub.f32 %v5890_v25, %v6546_v16 }
 0x19d   :  { %13058 = vst [vmem:[#allocation105_spill] sm:$0xff] %v6658_v26  ;;  %13059 = vst [vmem:[#allocation106_spill] sm:$0xff] %v6661_v30  ;;  %5258 = vpow2.f32 %v838_v40  ;;  %v705_v63 = vsub.f32 %v6017_v61, %v6658_v26  ;;  %vm1219_vm2 = vcmp.eq.f32.partialorder %v6017_v61, %v6658_v26  ;;  %vm1218_vm4 = vcmp.eq.f32.partialorder %v6028_v1, %v6661_v30 }
 0x19e   :  { %v6668_v44 = vpop.eup %5252  ;;  %13061 = vst [vmem:[#allocation108_spill] sm:$0xff] %v6670_v19  ;;  %13062 = vst [vmem:[#allocation109_spill] sm:$0xff] %v6676_v14 }
 0x19f   :  { %13060 = vst [vmem:[#allocation107_spill] sm:$0xff] %v6668_v44  ;;  %v778_v41 = vmul.f32 1.442695, %v705_v63  ;;  %v903_v27 = vsel %vm503_vm0, %v6668_v44, 0.0  ;;  %v6692_v44 = vcvt.s32.f32 %v1415_v10 }
 0x1a0   :  { %v6678_v40 = vpop.xlane.xlu1 %628  ;;  %1853 = vmin.xlane.f32.xlu0 %v6670_v19  ;;  %v6681_v29 = vpop.xlane.xlu0 %625  ;;  %904 = vadd.xlane.f32.xlu1 %v903_v27  ;;  %v1895_v19 = vshra.s32 %v6676_v14, 16  ;;  %v6698_v27 = vsel %vm503_vm0, %v1278_v9, 2147483647  ;;  %v760_v9 = vmul.f32 1.442695, %v696_v58  ;;  %v1281_v58 = vsel %vm1217_vm13, %v6508_v31, 8 }
 0x1a1   :  { %13063 = vst [vmem:[#allocation110_spill] sm:$0xff] %v6678_v40  ;;  %13064 = vst [vmem:[#allocation111_spill] sm:$0xff] %v6681_v29  ;;  %5260 = vpow2.f32 %v778_v41  ;;  %v737_v2 = vsub.f32 %v6020_v62, %v6678_v40  ;;  %vm1251_vm3 = vcmp.eq.f32.partialorder %v6020_v62, %v6678_v40 }
 0x1a2   :  { %v6688_v63 = vpop.eup %5254  ;;  %13066 = vst [vmem:[#allocation113_spill] sm:$0xff] %v6692_v44  ;;  %13067 = vst [vmem:[#allocation114_spill] sm:$0xff] %v6698_v27  ;;  %v6714_v23 = vcvt.s32.f32 %v1895_v19 }
 0x1a3   :  { %13065 = vst [vmem:[#allocation112_spill] sm:$0xff] %v6688_v63  ;;  %v842_v12 = vmul.f32 1.442695, %v737_v2  ;;  %v999_v41 = vsel %vm503_vm0, %v6688_v63, 0.0  ;;  %v1400_v63 = vshra.s32 %v6698_v27, 16 }
 0x1a4   :  { %v6700_v20 = vpop.xlane.xlu1 %538  ;;  %1418 = vmin.xlane.f32.xlu0 %v6692_v44  ;;  %v6703_v6 = vpop.xlane.xlu0 %535  ;;  %1000 = vadd.xlane.f32.xlu1 %v999_v41  ;;  %13071 = vst [vmem:[#allocation118_spill] sm:$0xff] %v6714_v23  ;;  %v6720_v41 = vsel %vm503_vm0, %v1310_v43, 2147483647  ;;  %v824_v43 = vmul.f32 1.442695, %v728_v39  ;;  %v1313_v39 = vsel %vm1249_vm14, %v6508_v31, 8 }
 0x1a5   :  { %13068 = vst [vmem:[#allocation115_spill] sm:$0xff] %v6700_v20  ;;  %13069 = vst [vmem:[#allocation116_spill] sm:$0xff] %v6703_v6  ;;  %5262 = vpow2.f32 %v842_v12  ;;  %v707_v10 = vsub.f32 %v6053_v7, %v6700_v20  ;;  %v6734_v16 = vcvt.s32.f32 %v1400_v63  ;;  %v1880_v51 = vshra.s32 %v6720_v41, 16 }
 0x1a6   :  { %v6710_v2 = vpop.eup %5256  ;;  %13072 = vst [vmem:[#allocation119_spill] sm:$0xff] %v6720_v41  ;;  %vm1221_vm6 = vcmp.eq.f32.partialorder %v6053_v7, %v6700_v20 }
 0x1a7   :  { %13070 = vst [vmem:[#allocation117_spill] sm:$0xff] %v6710_v2  ;;  %v782_v44 = vmul.f32 1.442695, %v707_v10  ;;  %v909_v12 = vsel %vm503_vm0, %v6710_v2, 0.0  ;;  %13076 = vst [vmem:[#allocation123_spill] sm:$0xff] %v6734_v16 }
 0x1a8   :  { %v6722_v14 = vpop.xlane.xlu1 %634  ;;  %1898 = vmin.xlane.f32.xlu0 %v6714_v23  ;;  %v6725_v38 = vpop.xlane.xlu0 %631  ;;  %910 = vadd.xlane.f32.xlu1 %v909_v12 }
 0x1a9   :  { %13073 = vst [vmem:[#allocation120_spill] sm:$0xff] %v6722_v14  ;;  %13074 = vst [vmem:[#allocation121_spill] sm:$0xff] %v6725_v38  ;;  %5264 = vpow2.f32 %v782_v44  ;;  %v739_v19 = vsub.f32 %v6056_v8, %v6722_v14  ;;  %v6740_v44 = vsel %vm503_vm0, %v1281_v58, 2147483647  ;;  %vm1253_vm7 = vcmp.eq.f32.partialorder %v6056_v8, %v6722_v14 }
 0x1aa   :  { %v6732_v10 = vpop.eup %5258  ;;  %5266 = vpow2.f32 %v760_v9  ;;  %13077 = vst [vmem:[#allocation124_spill] sm:$0xff] %v6740_v44  ;;  %v1445_v58 = vshra.s32 %v6740_v44, 16  ;;  %v1317_v14 = vsel %vm1253_vm7, %v6508_v31, 8 }
 0x1ab   :  { %13075 = vst [vmem:[#allocation122_spill] sm:$0xff] %v6732_v10  ;;  %v846_v25 = vmul.f32 1.442695, %v739_v19  ;;  %v1005_v2 = vsel %vm503_vm0, %v6732_v10, 0.0  ;;  %v6752_v19 = vcvt.s32.f32 %v1880_v51 }
 0x1ac   :  { %v6742_v12 = vpop.xlane.xlu1 %544  ;;  %1403 = vmin.xlane.f32.xlu0 %v6734_v16  ;;  %v6745_v0 = vpop.xlane.xlu0 %541  ;;  %1006 = vadd.xlane.f32.xlu1 %v1005_v2  ;;  %v6758_v16 = vsel %vm503_vm0, %v1313_v39, 2147483647 }
 0x1ad   :  { %13078 = vst [vmem:[#allocation125_spill] sm:$0xff] %v6742_v12  ;;  %13079 = vst [vmem:[#allocation126_spill] sm:$0xff] %v6745_v0  ;;  %5268 = vpow2.f32 %v846_v25  ;;  %v709_v63 = vsub.f32 %v6089_v18, %v6742_v12  ;;  %vm1223_vm10 = vcmp.eq.f32.partialorder %v6089_v18, %v6742_v12 }
 0x1ae   :  { %v6750_v9 = vpop.eup %5260  ;;  %13081 = vst [vmem:[#allocation128_spill] sm:$0xff] %v6752_v19  ;;  %5270 = vpow2.f32 %v824_v43  ;;  %13082 = vst [vmem:[#allocation129_spill] sm:$0xff] %v6758_v16  ;;  %v6769_v43 = vcvt.s32.f32 %v1445_v58 }
 0x1af   :  { %13080 = vst [vmem:[#allocation127_spill] sm:$0xff] %v6750_v9  ;;  %v786_v52 = vmul.f32 1.442695, %v709_v63  ;;  %v915_v10 = vsel %vm503_vm0, %v6750_v9, 0.0  ;;  %v1925_v63 = vshra.s32 %v6758_v16, 16 }
 0x1b0   :  { %v6760_v41 = vpop.xlane.xlu1 %640  ;;  %1883 = vmin.xlane.f32.xlu0 %v6752_v19  ;;  %v6763_v25 = vpop.xlane.xlu0 %637  ;;  %916 = vadd.xlane.f32.xlu1 %v915_v10  ;;  %13086 = vst [vmem:[#allocation133_spill] sm:$0xff] %v6769_v43 }
 0x1b1   :  { %13083 = vst [vmem:[#allocation130_spill] sm:$0xff] %v6760_v41  ;;  %13084 = vst [vmem:[#allocation131_spill] sm:$0xff] %v6763_v25  ;;  %5272 = vpow2.f32 %v786_v52  ;;  %v741_v51 = vsub.f32 %v6092_v21, %v6760_v41  ;;  %v6785_v58 = vcvt.s32.f32 %v1925_v63  ;;  %vm1255_vm11 = vcmp.eq.f32.partialorder %v6092_v21, %v6760_v41 }
 0x1b2   :  { %v6767_v2 = vpop.eup %5262 }
 0x1b3   :  { %13085 = vst [vmem:[#allocation132_spill] sm:$0xff] %v6767_v2  ;;  %v850_v9 = vmul.f32 1.442695, %v741_v51  ;;  %v1011_v39 = vsel %vm503_vm0, %v6767_v2, 0.0  ;;  %13090 = vst [vmem:[#allocation137_spill] sm:$0xff] %v6785_v58 }
 0x1b4   :  { %v6774_v44 = vpop.xlane.xlu1 %550  ;;  %1448 = vmin.xlane.f32.xlu0 %v6769_v43  ;;  %v6777_v19 = vpop.xlane.xlu0 %547  ;;  %1012 = vadd.xlane.f32.xlu1 %v1011_v39  ;;  %v1280_v39 = vsel %vm1216_vm15, %v6508_v31, 8 }
 0x1b5   :  { %13087 = vst [vmem:[#allocation134_spill] sm:$0xff] %v6774_v44  ;;  %13088 = vst [vmem:[#allocation135_spill] sm:$0xff] %v6777_v19  ;;  %5274 = vpow2.f32 %v850_v9  ;;  %v711_v52 = vsub.f32 %v6125_v34, %v6774_v44  ;;  %vm1225_vm14 = vcmp.eq.f32.partialorder %v6125_v34, %v6774_v44  ;;  %v13166_v44 = vld [vmem:[#allocation71_spill] sm:$0xff] }
 0x1b6   :  { %v6783_v10 = vpop.eup %5264  ;;  %v1354_v34 = vand.u32 65535, %v13166_v44 }
 0x1b7   :  { %13089 = vst [vmem:[#allocation136_spill] sm:$0xff] %v6783_v10  ;;  %v790_v51 = vmul.f32 1.442695, %v711_v52  ;;  %v921_v2 = vsel %vm503_vm0, %v6783_v10, 0.0  ;;  %v6789_v16 = vpop.eup %5266  ;;  %v698_v10 = vsub.f32 %v5928_v36, %v6561_v32  ;;  %v730_v36 = vsub.f32 %v5925_v35, %v6564_v11 }
 0x1b8   :  { %13091 = vst [vmem:[#allocation138_spill] sm:$0xff] %v6789_v16  ;;  %v6791_v43 = vpop.xlane.xlu1 %646  ;;  %1928 = vmin.xlane.f32.xlu0 %v6785_v58  ;;  %v6794_v9 = vpop.xlane.xlu0 %643  ;;  %922 = vadd.xlane.f32.xlu1 %v921_v2  ;;  %v888_v27 = vsel %vm503_vm0, %v6789_v16, 0.0 }
 0x1b9   :  { %13092 = vst [vmem:[#allocation139_spill] sm:$0xff] %v6791_v43  ;;  %13093 = vst [vmem:[#allocation140_spill] sm:$0xff] %v6794_v9  ;;  %5276 = vpow2.f32 %v790_v51  ;;  %v743_v63 = vsub.f32 %v6128_v37, %v6791_v43  ;;  %v6810_v9 = vsel %vm503_vm0, %v1280_v39, 2147483647  ;;  %v1312_v37 = vsel %vm1248_vm1, %v6508_v31, 8 }
 0x1ba   :  { %v6801_v52 = vpop.eup %5268  ;;  %13095 = vst [vmem:[#allocation142_spill] sm:$0xff] %v6810_v9  ;;  %v764_v39 = vmul.f32 1.442695, %v698_v10  ;;  %v1283_v10 = vsel %vm1219_vm2, %v6508_v31, 8  ;;  %v828_v35 = vmul.f32 1.442695, %v730_v36 }
 0x1bb   :  { %13094 = vst [vmem:[#allocation141_spill] sm:$0xff] %v6801_v52  ;;  %v854_v23 = vmul.f32 1.442695, %v743_v63  ;;  %v1017_v58 = vsel %vm503_vm0, %v6801_v52, 0.0  ;;  %v6812_v51 = vpop.eup %5270  ;;  %v1315_v36 = vsel %vm1251_vm3, %v6508_v31, 8 }
 0x1bc   :  { %13096 = vst [vmem:[#allocation143_spill] sm:$0xff] %v6812_v51  ;;  %v6814_v2 = vpop.xlane.xlu1 %556  ;;  %889 = vadd.xlane.f32.xlu0 %v888_v27  ;;  %v6816_v19 = vpop.xlane.xlu0 %553  ;;  %1018 = vadd.xlane.f32.xlu1 %v1017_v58  ;;  %v1430_v27 = vshra.s32 %v6810_v9, 16  ;;  %v984_v26 = vsel %vm503_vm0, %v6812_v51, 0.0  ;;  %v6852_v9 = vsel %vm503_vm0, %v1283_v10, 2147483647 }
 0x1bd   :  { %13097 = vst [vmem:[#allocation144_spill] sm:$0xff] %v6814_v2  ;;  %13098 = vst [vmem:[#allocation145_spill] sm:$0xff] %v6816_v19  ;;  %5278 = vpow2.f32 %v854_v23  ;;  %v713_v63 = vsub.f32 %v6161_v50, %v6814_v2  ;;  %v6833_v23 = vsel %vm503_vm0, %v1312_v37, 2147483647  ;;  %v1475_v10 = vshra.s32 %v6852_v9, 16 }
 0x1be   :  { %v6823_v32 = vpop.eup %5272  ;;  %v6846_v37 = vcvt.s32.f32 %v1430_v27  ;;  %13104 = vst [vmem:[#allocation151_spill] sm:$0xff] %v6852_v9  ;;  %vm1227_vm7 = vcmp.eq.f32.partialorder %v6161_v50, %v6814_v2 }
 0x1bf   :  { %13099 = vst [vmem:[#allocation146_spill] sm:$0xff] %v6823_v32  ;;  %v794_v52 = vmul.f32 1.442695, %v713_v63  ;;  %v927_v16 = vsel %vm503_vm0, %v6823_v32, 0.0  ;;  %v1910_v32 = vshra.s32 %v6833_v23, 16 }
 0x1c0   :  { %v6835_v58 = vpop.xlane.xlu1 %652  ;;  %985 = vadd.xlane.f32.xlu0 %v984_v26  ;;  %v6837_v61 = vpop.xlane.xlu0 %649  ;;  %928 = vadd.xlane.f32.xlu1 %v927_v16  ;;  %13103 = vst [vmem:[#allocation150_spill] sm:$0xff] %v6846_v37 }
 0x1c1   :  { %13100 = vst [vmem:[#allocation147_spill] sm:$0xff] %v6835_v58  ;;  %13101 = vst [vmem:[#allocation148_spill] sm:$0xff] %v6837_v61  ;;  %5280 = vpow2.f32 %v794_v52  ;;  %v745_v63 = vsub.f32 %v6164_v53, %v6835_v58 }
 0x1c2   :  { %v6844_v11 = vpop.eup %5274  ;;  %5282 = vpow2.f32 %v764_v39 }
 0x1c3   :  { %13102 = vst [vmem:[#allocation149_spill] sm:$0xff] %v6844_v11  ;;  %v858_v26 = vmul.f32 1.442695, %v745_v63  ;;  %v1023_v51 = vsel %vm503_vm0, %v6844_v11, 0.0  ;;  %v6864_v63 = vcvt.s32.f32 %v1910_v32  ;;  %v6870_v11 = vsel %vm503_vm0, %v1315_v36, 2147483647 }
 0x1c4   :  { %v6854_v52 = vpop.xlane.xlu1 %562  ;;  %1433 = vmin.xlane.f32.xlu0 %v6846_v37  ;;  %v6857_v16 = vpop.xlane.xlu0 %559  ;;  %1024 = vadd.xlane.f32.xlu1 %v1023_v51  ;;  %13109 = vst [vmem:[#allocation156_spill] sm:$0xff] %v6870_v11 }
 0x1c5   :  { %13105 = vst [vmem:[#allocation152_spill] sm:$0xff] %v6854_v52  ;;  %13106 = vst [vmem:[#allocation153_spill] sm:$0xff] %v6857_v16  ;;  %5284 = vpow2.f32 %v858_v26  ;;  %v715_v39 = vsub.f32 %v6197_v4, %v6854_v52 }
 0x1c6   :  { %v6862_v27 = vpop.eup %5276  ;;  %13108 = vst [vmem:[#allocation155_spill] sm:$0xff] %v6864_v63  ;;  %5286 = vpow2.f32 %v828_v35  ;;  %v6881_v35 = vcvt.s32.f32 %v1475_v10 }
 0x1c7   :  { %13107 = vst [vmem:[#allocation154_spill] sm:$0xff] %v6862_v27  ;;  %v798_v40 = vmul.f32 1.442695, %v715_v39  ;;  %v933_v62 = vsel %vm503_vm0, %v6862_v27, 0.0  ;;  %v1955_v39 = vshra.s32 %v6870_v11, 16 }
 0x1c8   :  { %v6872_v37 = vpop.xlane.xlu1 %658  ;;  %1913 = vmin.xlane.f32.xlu0 %v6864_v63  ;;  %v6875_v51 = vpop.xlane.xlu0 %655  ;;  %934 = vadd.xlane.f32.xlu1 %v933_v62  ;;  %13113 = vst [vmem:[#allocation160_spill] sm:$0xff] %v6881_v35 }
 0x1c9   :  { %13110 = vst [vmem:[#allocation157_spill] sm:$0xff] %v6872_v37  ;;  %13111 = vst [vmem:[#allocation158_spill] sm:$0xff] %v6875_v51  ;;  %5288 = vpow2.f32 %v798_v40  ;;  %v747_v32 = vsub.f32 %v6200_v5, %v6872_v37  ;;  %v6897_v10 = vcvt.s32.f32 %v1955_v39 }
 0x1ca   :  { %v6879_v26 = vpop.eup %5278 }
 0x1cb   :  { %13112 = vst [vmem:[#allocation159_spill] sm:$0xff] %v6879_v26  ;;  %v862_v27 = vmul.f32 1.442695, %v747_v32  ;;  %v1029_v36 = vsel %vm503_vm0, %v6879_v26, 0.0  ;;  %13117 = vst [vmem:[#allocation164_spill] sm:$0xff] %v6897_v10 }
 0x1cc   :  { %v6886_v9 = vpop.xlane.xlu1 %568  ;;  %1478 = vmin.xlane.f32.xlu0 %v6881_v35  ;;  %v6889_v51 = vpop.xlane.xlu0 %565  ;;  %1030 = vadd.xlane.f32.xlu1 %v1029_v36  ;;  %v13121_v36 = vld [vmem:[#allocation24_spill] sm:$0xff] }
 0x1cd   :  { %13114 = vst [vmem:[#allocation161_spill] sm:$0xff] %v6886_v9  ;;  %13115 = vst [vmem:[#allocation162_spill] sm:$0xff] %v6889_v51  ;;  %5290 = vpow2.f32 %v862_v27  ;;  %v717_v62 = vsub.f32 %v6233_v24, %v6886_v9  ;;  %v1282_v27 = vsel %vm1218_vm4, %v6508_v31, 8  ;;  %vm1250_vm5 = vcmp.eq.f32.partialorder %v13121_v36, %v6681_v29 }
 0x1ce   :  { %v6895_v40 = vpop.eup %5280  ;;  %v6922_v63 = vsel %vm503_vm0, %v1282_v27, 2147483647 }
 0x1cf   :  { %13116 = vst [vmem:[#allocation163_spill] sm:$0xff] %v6895_v40  ;;  %v802_v32 = vmul.f32 1.442695, %v717_v62  ;;  %v939_v5 = vsel %vm503_vm0, %v6895_v40, 0.0  ;;  %v6901_v37 = vpop.eup %5282  ;;  %v700_v40 = vsub.f32 %v5956_v45, %v6581_v13  ;;  %v732_v45 = vsub.f32 %v5964_v46, %v6601_v59 }
 0x1d0   :  { %13118 = vst [vmem:[#allocation165_spill] sm:$0xff] %v6901_v37  ;;  %v6903_v26 = vpop.xlane.xlu1 %664  ;;  %1958 = vmin.xlane.f32.xlu0 %v6897_v10  ;;  %v6906_v35 = vpop.xlane.xlu0 %661  ;;  %940 = vadd.xlane.f32.xlu1 %v939_v5 }
 0x1d1   :  { %13119 = vst [vmem:[#allocation166_spill] sm:$0xff] %v6903_v26  ;;  %13120 = vst [vmem:[#allocation167_spill] sm:$0xff] %v6906_v35  ;;  %5292 = vpow2.f32 %v802_v32  ;;  %v749_v39 = vsub.f32 %v6236_v28, %v6903_v26  ;;  %v894_v35 = vsel %vm503_vm0, %v6901_v37, 0.0  ;;  %v1314_v26 = vsel %vm1250_vm5, %v6508_v31, 8 }
 0x1d2   :  { %v6913_v62 = vpop.eup %5284  ;;  %v768_v27 = vmul.f32 1.442695, %v700_v40  ;;  %v1285_v40 = vsel %vm1221_vm6, %v6508_v31, 8  ;;  %v832_v46 = vmul.f32 1.442695, %v732_v45 }
 0x1d3   :  { %13122 = vst [vmem:[#allocation168_spill] sm:$0xff] %v6913_v62  ;;  %v866_v11 = vmul.f32 1.442695, %v749_v39  ;;  %v1035_v10 = vsel %vm503_vm0, %v6913_v62, 0.0  ;;  %v6924_v32 = vpop.eup %5286 }
 0x1d4   :  { %13123 = vst [vmem:[#allocation169_spill] sm:$0xff] %v6924_v32  ;;  %v6926_v5 = vpop.xlane.xlu1 %574  ;;  %895 = vadd.xlane.f32.xlu0 %v894_v35  ;;  %v6928_v28 = vpop.xlane.xlu0 %571  ;;  %1036 = vadd.xlane.f32.xlu1 %v1035_v10  ;;  %v1460_v35 = vshra.s32 %v6922_v63, 16  ;;  %v990_v20 = vsel %vm503_vm0, %v6924_v32, 0.0 }
 0x1d5   :  { %13124 = vst [vmem:[#allocation170_spill] sm:$0xff] %v6926_v5  ;;  %13125 = vst [vmem:[#allocation171_spill] sm:$0xff] %v6928_v28  ;;  %5294 = vpow2.f32 %v866_v11  ;;  %v719_v39 = vsub.f32 %v6269_v49, %v6926_v5  ;;  %v6945_v11 = vsel %vm503_vm0, %v1314_v26, 2147483647 }
 0x1d6   :  { %v6935_v13 = vpop.eup %5288  ;;  %v6958_v26 = vcvt.s32.f32 %v1460_v35 }
 0x1d7   :  { %13126 = vst [vmem:[#allocation172_spill] sm:$0xff] %v6935_v13  ;;  %v806_v62 = vmul.f32 1.442695, %v719_v39  ;;  %v945_v37 = vsel %vm503_vm0, %v6935_v13, 0.0  ;;  %v1940_v13 = vshra.s32 %v6945_v11, 16 }
 0x1d8   :  { %v6947_v10 = vpop.xlane.xlu1 %670  ;;  %991 = vadd.xlane.f32.xlu0 %v990_v20  ;;  %946 = vadd.xlane.f32.xlu1 %v945_v37  ;;  %v6954_v59 = vpop.xlane.xlu0 %667 }
 0x1d9   :  { %13127 = vst [vmem:[#allocation173_spill] sm:$0xff] %v6947_v10  ;;  %5296 = vpow2.f32 %v806_v62  ;;  %v751_v39 = vsub.f32 %v6272_v54, %v6947_v10  ;;  %13128 = vst [vmem:[#allocation174_spill] sm:$0xff] %v6954_v59  ;;  %v6964_v62 = vsel %vm503_vm0, %v1285_v40, 2147483647  ;;  %v6982_v10 = vsel %vm503_vm0, %v1317_v14, 2147483647 }
 0x1da   :  { %v6956_v7 = vpop.eup %5290  ;;  %5298 = vpow2.f32 %v768_v27  ;;  %v6974_v27 = vcvt.s32.f32 %v1940_v13 }
 0x1db   :  { %13129 = vst [vmem:[#allocation175_spill] sm:$0xff] %v6956_v7  ;;  %v870_v20 = vmul.f32 1.442695, %v751_v39  ;;  %v1041_v32 = vsel %vm503_vm0, %v6956_v7, 0.0  ;;  %v1505_v39 = vshra.s32 %v6964_v62, 16 }
 0x1dc   :  { %v6966_v37 = vpop.xlane.xlu1 %580  ;;  %1463 = vmin.xlane.f32.xlu0 %v6958_v26  ;;  %1042 = vadd.xlane.f32.xlu1 %v1041_v32  ;;  %v6977_v8 = vpop.xlane.xlu0 %577 }
 0x1dd   :  { %13130 = vst [vmem:[#allocation176_spill] sm:$0xff] %v6966_v37  ;;  %5300 = vpow2.f32 %v870_v20  ;;  %v721_v45 = vsub.f32 %v6305_v15, %v6966_v37  ;;  %13132 = vst [vmem:[#allocation178_spill] sm:$0xff] %v6977_v8 }
 0x1de   :  { %v6972_v35 = vpop.eup %5292  ;;  %5302 = vpow2.f32 %v832_v46  ;;  %v6991_v46 = vcvt.s32.f32 %v1505_v39 }
 0x1df   :  { %13131 = vst [vmem:[#allocation177_spill] sm:$0xff] %v6972_v35  ;;  %v810_v40 = vmul.f32 1.442695, %v721_v45  ;;  %v951_v54 = vsel %vm503_vm0, %v6972_v35, 0.0  ;;  %v1985_v45 = vshra.s32 %v6982_v10, 16 }
 0x1e0   :  { %v6984_v32 = vpop.xlane.xlu1 %676  ;;  %1943 = vmin.xlane.f32.xlu0 %v6974_v27  ;;  %952 = vadd.xlane.f32.xlu1 %v951_v54  ;;  %v7001_v54 = vpop.xlane.xlu0 %673 }
 0x1e1   :  { %13133 = vst [vmem:[#allocation179_spill] sm:$0xff] %v6984_v32  ;;  %5304 = vpow2.f32 %v810_v40  ;;  %v753_v13 = vsub.f32 %v6308_v17, %v6984_v32  ;;  %v13136_v40 = vld [vmem:[#allocation27_spill] sm:$0xff]  ;;  %13137 = vst [vmem:[#allocation182_spill] sm:$0xff] %v7001_v54  ;;  %v702_v54 = vsub.f32 %v5992_v55, %v6621_v33 }
 0x1e2   :  { %v6989_v20 = vpop.eup %5294  ;;  %vm1220_vm8 = vcmp.eq.f32.partialorder %v13136_v40, %v6703_v6 }
 0x1e3   :  { %13134 = vst [vmem:[#allocation180_spill] sm:$0xff] %v6989_v20  ;;  %v874_v59 = vmul.f32 1.442695, %v753_v13  ;;  %v1047_v14 = vsel %vm503_vm0, %v6989_v20, 0.0  ;;  %v7007_v13 = vcvt.s32.f32 %v1985_v45  ;;  %v772_v55 = vmul.f32 1.442695, %v702_v54 }
 0x1e4   :  { %v6996_v35 = vpop.xlane.xlu1 %586  ;;  %1508 = vmin.xlane.f32.xlu0 %v6991_v46  ;;  %1048 = vadd.xlane.f32.xlu1 %v1047_v14  ;;  %v13142_v14 = vld [vmem:[#allocation28_spill] sm:$0xff]  ;;  %v1287_v54 = vsel %vm1223_vm10, %v6508_v31, 8 }
 0x1e5   :  { %13135 = vst [vmem:[#allocation181_spill] sm:$0xff] %v6996_v35  ;;  %5306 = vpow2.f32 %v874_v59  ;;  %v723_v39 = vsub.f32 %v6341_v60, %v6996_v35  ;;  %13139 = vst [vmem:[#allocation184_spill] sm:$0xff] %v7007_v13  ;;  %v1284_v59 = vsel %vm1220_vm8, %v6508_v31, 8  ;;  %vm1252_vm9 = vcmp.eq.f32.partialorder %v13142_v14, %v6725_v38 }
 0x1e6   :  { %v7005_v17 = vpop.eup %5296  ;;  %v7072_v41 = vsel %vm503_vm0, %v1287_v54, 2147483647 }
 0x1e7   :  { %13138 = vst [vmem:[#allocation183_spill] sm:$0xff] %v7005_v17  ;;  %v814_v32 = vmul.f32 1.442695, %v723_v39  ;;  %v957_v20 = vsel %vm503_vm0, %v7005_v17, 0.0  ;;  %v7011_v7 = vpop.eup %5298  ;;  %v7025_v17 = vpop.xlane.xlu0 %583 }
 0x1e8   :  { %13140 = vst [vmem:[#allocation185_spill] sm:$0xff] %v7011_v7  ;;  %v7013_v8 = vpop.xlane.xlu1 %682  ;;  %1988 = vmin.xlane.f32.xlu0 %v7007_v13  ;;  %958 = vadd.xlane.f32.xlu1 %v957_v20  ;;  %13144 = vst [vmem:[#allocation188_spill] sm:$0xff] %v7025_v17  ;;  %v900_v13 = vsel %vm503_vm0, %v7011_v7, 0.0 }
 0x1e9   :  { %13141 = vst [vmem:[#allocation186_spill] sm:$0xff] %v7013_v8  ;;  %5308 = vpow2.f32 %v814_v32  ;;  %v755_v45 = vsub.f32 %v6344_v3, %v7013_v8  ;;  %v7032_v32 = vsel %vm503_vm0, %v1284_v59, 2147483647  ;;  %v1316_v8 = vsel %vm1252_vm9, %v6508_v31, 8 }
 0x1ea   :  { %v7021_v39 = vpop.eup %5300  ;;  %v734_v59 = vsub.f32 %v6000_v56, %v6641_v22  ;;  %vm1259_vm9 = vcmp.eq.f32.partialorder %v6164_v53, %v6835_v58 }
 0x1eb   :  { %13143 = vst [vmem:[#allocation187_spill] sm:$0xff] %v7021_v39  ;;  %v878_v60 = vmul.f32 1.442695, %v755_v45  ;;  %v1053_v35 = vsel %vm503_vm0, %v7021_v39, 0.0  ;;  %v7034_v20 = vpop.eup %5302  ;;  %v1490_v39 = vshra.s32 %v7032_v32, 16  ;;  %v7060_v22 = vpop.xlane.xlu0 %679 }
 0x1ec   :  { %13145 = vst [vmem:[#allocation189_spill] sm:$0xff] %v7034_v20  ;;  %v7036_v3 = vpop.xlane.xlu1 %592  ;;  %901 = vadd.xlane.f32.xlu0 %v900_v13  ;;  %1054 = vadd.xlane.f32.xlu1 %v1053_v35  ;;  %v996_v12 = vsel %vm503_vm0, %v7034_v20, 0.0  ;;  %13149 = vst [vmem:[#allocation193_spill] sm:$0xff] %v7060_v22  ;;  %v836_v56 = vmul.f32 1.442695, %v734_v59 }
 0x1ed   :  { %13146 = vst [vmem:[#allocation190_spill] sm:$0xff] %v7036_v3  ;;  %5310 = vpow2.f32 %v878_v60  ;;  %v725_v45 = vsub.f32 %v6377_v48, %v7036_v3  ;;  %v7053_v60 = vsel %vm503_vm0, %v1316_v8, 2147483647  ;;  %v7066_v8 = vcvt.s32.f32 %v1490_v39 }
 0x1ee   :  { %v7043_v33 = vpop.eup %5304 }
 0x1ef   :  { %13147 = vst [vmem:[#allocation191_spill] sm:$0xff] %v7043_v33  ;;  %v818_v7 = vmul.f32 1.442695, %v725_v45  ;;  %v963_v13 = vsel %vm503_vm0, %v7043_v33, 0.0  ;;  %v1970_v33 = vshra.s32 %v7053_v60, 16  ;;  %v7085_v54 = vpop.xlane.xlu0 %589 }
 0x1f0   :  { %v7055_v35 = vpop.xlane.xlu1 %688  ;;  %997 = vadd.xlane.f32.xlu0 %v996_v12  ;;  %964 = vadd.xlane.f32.xlu1 %v963_v13  ;;  %v1319_v13 = vsel %vm1255_vm11, %v6508_v31, 8  ;;  %13152 = vst [vmem:[#allocation196_spill] sm:$0xff] %v7085_v54 }
 0x1f1   :  { %13148 = vst [vmem:[#allocation192_spill] sm:$0xff] %v7055_v35  ;;  %5312 = vpow2.f32 %v818_v7  ;;  %v757_v45 = vsub.f32 %v6380_v57, %v7055_v35  ;;  %v7090_v35 = vsel %vm503_vm0, %v1319_v13, 2147483647 }
 0x1f2   :  { %v7064_v18 = vpop.eup %5306  ;;  %5314 = vpow2.f32 %v772_v55  ;;  %v7082_v55 = vcvt.s32.f32 %v1970_v33 }
 0x1f3   :  { %v882_v12 = vmul.f32 1.442695, %v757_v45  ;;  %v1059_v20 = vsel %vm503_vm0, %v7064_v18, 0.0  ;;  %v1535_v45 = vshra.s32 %v7072_v41, 16 }
 0x1f4   :  { %v7074_v7 = vpop.xlane.xlu1 %598  ;;  %1493 = vmin.xlane.f32.xlu0 %v7066_v8  ;;  %1060 = vadd.xlane.f32.xlu1 %v1059_v20 }
 0x1f5   :  { %13150 = vst [vmem:[#allocation194_spill] sm:$0xff] %v7074_v7  ;;  %5316 = vpow2.f32 %v882_v12  ;;  %v727_v39 = vsub.f32 %v6413_v42, %v7074_v7  ;;  %v13155_v42 = vld [vmem:[#allocation31_spill] sm:$0xff] }
 0x1f6   :  { %v7080_v59 = vpop.eup %5308  ;;  %5318 = vpow2.f32 %v836_v56  ;;  %v7099_v56 = vcvt.s32.f32 %v1535_v45  ;;  %vm1222_vm12 = vcmp.eq.f32.partialorder %v13155_v42, %v6745_v0 }
 0x1f7   :  { %13151 = vst [vmem:[#allocation195_spill] sm:$0xff] %v7080_v59  ;;  %v822_v21 = vmul.f32 1.442695, %v727_v39  ;;  %v969_v57 = vsel %vm503_vm0, %v7080_v59, 0.0  ;;  %v2015_v39 = vshra.s32 %v7090_v35, 16 }
 0x1f8   :  { %v7092_v20 = vpop.xlane.xlu1 %694  ;;  %1973 = vmin.xlane.f32.xlu0 %v7082_v55  ;;  %970 = vadd.xlane.f32.xlu1 %v969_v57 }
 0x1f9   :  { %13153 = vst [vmem:[#allocation197_spill] sm:$0xff] %v7092_v20  ;;  %5320 = vpow2.f32 %v822_v21  ;;  %v759_v33 = vsub.f32 %v6416_v47, %v7092_v20  ;;  %v7107_v21 = vpop.xlane.xlu0 %685  ;;  %v7111_v47 = vcvt.s32.f32 %v2015_v39  ;;  %v1286_v20 = vsel %vm1222_vm12, %v6508_v31, 8 }
 0x1fa   :  { %v7097_v12 = vpop.eup %5310  ;;  %13156 = vst [vmem:[#allocation199_spill] sm:$0xff] %v7107_v21  ;;  %v7132_v7 = vsel %vm503_vm0, %v1286_v20, 2147483647 }
 0x1fb   :  { %13154 = vst [vmem:[#allocation198_spill] sm:$0xff] %v7097_v12  ;;  %v886_v22 = vmul.f32 1.442695, %v759_v33  ;;  %v1065_v13 = vsel %vm503_vm0, %v7097_v12, 0.0  ;;  %v13159_v12 = vld [vmem:[#allocation32_spill] sm:$0xff]  ;;  %13162 = vst [vmem:[#allocation204_spill] sm:$0xff] %v7132_v7 }
 0x1fc   :  { %1538 = vmin.xlane.f32.xlu0 %v7099_v56  ;;  %1066 = vadd.xlane.f32.xlu1 %v1065_v13  ;;  %vm1254_vm13 = vcmp.eq.f32.partialorder %v13159_v12, %v6763_v25 }
 0x1fd   :  { %5322 = vpow2.f32 %v886_v22  ;;  %v704_v22 = vsub.f32 %v6028_v1, %v6661_v30  ;;  %v7125_v39 = vpop.xlane.xlu0 %595 }
 0x1fe   :  { %v7109_v57 = vpop.eup %5312  ;;  %13161 = vst [vmem:[#allocation203_spill] sm:$0xff] %v7125_v39  ;;  %v1520_v39 = vshra.s32 %v7132_v7, 16 }
 0x1ff   :  { %13157 = vst [vmem:[#allocation200_spill] sm:$0xff] %v7109_v57  ;;  %v975_v45 = vsel %vm503_vm0, %v7109_v57, 0.0  ;;  %v7115_v33 = vpop.eup %5314  ;;  %v776_v1 = vmul.f32 1.442695, %v704_v22  ;;  %v13167_v22 = vld [vmem:[#allocation34_spill] sm:$0xff] }
 0x200   :  { %13158 = vst [vmem:[#allocation201_spill] sm:$0xff] %v7115_v33  ;;  %2018 = vmin.xlane.f32.xlu0 %v7111_v47  ;;  %976 = vadd.xlane.f32.xlu1 %v975_v45  ;;  %v906_v57 = vsel %vm503_vm0, %v7115_v33, 0.0  ;;  %v1318_v45 = vsel %vm1254_vm13, %v6508_v31, 8  ;;  %vm1257_vm15 = vcmp.eq.f32.partialorder %v13167_v22, %v6791_v43  ;;  %v13172_v43 = vld [vmem:[#allocation74_spill] sm:$0xff] }
 0x201   :  { %v7149_v33 = vsel %vm503_vm0, %v1318_v45, 2147483647  ;;  %v7155_v7 = vpop.xlane.xlu0 %691  ;;  %5324 = vpow2.f32 %v776_v1  ;;  %v1321_v44 = vsel %vm1257_vm15, %v6508_v31, 8  ;;  %v13175_v1 = vld [vmem:[#allocation75_spill] sm:$0xff] }
 0x202   :  { %v7121_v21 = vpop.eup %5316  ;;  %13165 = vst [vmem:[#allocation207_spill] sm:$0xff] %v7149_v33  ;;  %13168 = vst [vmem:[#allocation71_spill] sm:$0xff] %v7155_v7 }
 0x203   :  { %13160 = vst [vmem:[#allocation202_spill] sm:$0xff] %v7121_v21  ;;  %v1071_v13 = vsel %vm503_vm0, %v7121_v21, 0.0  ;;  %v7134_v59 = vpop.eup %5318  ;;  %v736_v21 = vsub.f32 %v13121_v36, %v6681_v29  ;;  %v7159_v36 = vcvt.s32.f32 %v1520_v39  ;;  %v1356_v39 = vcvt.s32.f32 %v1354_v34 }
 0x204   :  { %13163 = vst [vmem:[#allocation205_spill] sm:$0xff] %v7134_v59  ;;  %907 = vadd.xlane.f32.xlu0 %v906_v57  ;;  %1072 = vadd.xlane.f32.xlu1 %v1071_v13  ;;  %v1002_v57 = vsel %vm503_vm0, %v7134_v59, 0.0  ;;  %v1289_v13 = vsel %vm1225_vm14, %v6508_v31, 8 }
 0x205   :  { %13170 = vst [vmem:[#allocation209_spill] sm:$0xff] %v7159_v36  ;;  %v840_v45 = vmul.f32 1.442695, %v736_v21  ;;  %v7165_v59 = vsel %vm503_vm0, %v1289_v13, 2147483647 }
 0x206   :  { %v7139_v30 = vpop.eup %5320  ;;  %13171 = vst [vmem:[#allocation210_spill] sm:$0xff] %v7165_v59  ;;  %v1565_v21 = vshra.s32 %v7165_v59, 16  ;;  %v13190_v59 = vld [vmem:[#allocation36_spill] sm:$0xff] }
 0x207   :  { %13164 = vst [vmem:[#allocation206_spill] sm:$0xff] %v7139_v30  ;;  %v981_v20 = vsel %vm503_vm0, %v7139_v30, 0.0  ;;  %v2000_v30 = vshra.s32 %v7149_v33, 16  ;;  %5326 = vpow2.f32 %v840_v45  ;;  %v13180_v33 = vld [vmem:[#allocation79_spill] sm:$0xff] }
 0x208   :  { %1003 = vadd.xlane.f32.xlu0 %v1002_v57  ;;  %982 = vadd.xlane.f32.xlu1 %v981_v20  ;;  %v1834_v20 = vand.u32 65535, %v13172_v43 }
 0x209   :  { %v7172_v7 = vcvt.s32.f32 %v2000_v30  ;;  %v7184_v30 = vcvt.s32.f32 %v1565_v21  ;;  %v13186_v21 = vld [vmem:[#allocation83_spill] sm:$0xff] }
 0x20a   :  { %v7157_v29 = vpop.eup %5322  ;;  %v1836_v34 = vcvt.s32.f32 %v1834_v20 }
 0x20b   :  { %13169 = vst [vmem:[#allocation208_spill] sm:$0xff] %v7157_v29  ;;  %v1077_v57 = vsel %vm503_vm0, %v7157_v29, 0.0  ;;  %13174 = vst [vmem:[#allocation211_spill] sm:$0xff] %v7172_v7  ;;  %v7178_v29 = vsel %vm503_vm0, %v1321_v44, 2147483647  ;;  %v13181_v44 = vld [vmem:[#allocation82_spill] sm:$0xff] }
 0x20c   :  { %1523 = vmin.xlane.f32.xlu0 %v7159_v36  ;;  %1078 = vadd.xlane.f32.xlu1 %v1077_v57  ;;  %13176 = vst [vmem:[#allocation75_spill] sm:$0xff] %v7178_v29  ;;  %v13177_v36 = vld [vmem:[#allocation78_spill] sm:$0xff]  ;;  %13179 = vst [vmem:[#allocation212_spill] sm:$0xff] %v7184_v30 }
 0x20d   :  { %v7170_v22 = vpop.xlane.xlu0 %1358  ;;  %v1339_v43 = vand.u32 65535, %v13177_v36 }
 0x20e   :  { %13173 = vst [vmem:[#allocation74_spill] sm:$0xff] %v7170_v22  ;;  %vm1360_vm1 = vcmp.eq.f32.partialorder %v13175_v1, %v7170_v22  ;;  %v2045_v1 = vshra.s32 %v7178_v29, 16  ;;  %v13182_v22 = vld [vmem:[#allocation135_spill] sm:$0xff]  ;;  %v13189_v29 = vld [vmem:[#allocation140_spill] sm:$0xff] }
 0x20f   :  { %v1361_v13 = vsel %vm1360_vm1, %v1356_v39, inf  ;;  %v1819_v39 = vand.u32 65535, %v13181_v44  ;;  %v13188_v44 = vld [vmem:[#allocation84_spill] sm:$0xff]  ;;  %vm1256_vm5 = vcmp.eq.f32.partialorder %v13190_v59, %v13189_v29 }
 0x210   :  { %2003 = vmin.xlane.f32.xlu0 %v7172_v7  ;;  %1362 = vmin.xlane.f32.xlu1 %v1361_v13  ;;  %v13183_v7 = vld [vmem:[#allocation35_spill] sm:$0xff]  ;;  %v1341_v13 = vcvt.s32.f32 %v1339_v43  ;;  %v7195_v20 = vcvt.s32.f32 %v2045_v1 }
 0x211   :  { %v7182_v57 = vpop.xlane.xlu0 %1838  ;;  %vm1224_vm3 = vcmp.eq.f32.partialorder %v13183_v7, %v13182_v22  ;;  %v1821_v1 = vcvt.s32.f32 %v1819_v39 }
 0x212   :  { %13178 = vst [vmem:[#allocation78_spill] sm:$0xff] %v7182_v57  ;;  %vm1840_vm2 = vcmp.eq.f32.partialorder %v13180_v33, %v7182_v57  ;;  %13185 = vst [vmem:[#allocation82_spill] sm:$0xff] %v7195_v20  ;;  %v7199_v57 = vpop.eup %5324 }
 0x213   :  { %v1841_v45 = vsel %vm1840_vm2, %v1836_v34, inf  ;;  %13187 = vst [vmem:[#allocation83_spill] sm:$0xff] %v7199_v57  ;;  %v1288_v34 = vsel %vm1224_vm3, %v6508_v31, 8  ;;  %vm1229_vm2 = vcmp.eq.f32.partialorder %v6197_v4, %v6854_v52 }
 0x214   :  { %1568 = vmin.xlane.f32.xlu0 %v7184_v30  ;;  %1842 = vmin.xlane.f32.xlu1 %v1841_v45  ;;  %v1384_v30 = vand.u32 65535, %v13188_v44  ;;  %v706_v45 = vsub.f32 %v13136_v40, %v6703_v6  ;;  %v7215_v44 = vsel %vm503_vm0, %v1288_v34, 2147483647  ;;  %v7217_v6 = vpop.eup %5326  ;;  %v13194_v40 = vld [vmem:[#allocation89_spill] sm:$0xff] }
 0x215   :  { %v7193_v36 = vpop.xlane.xlu0 %1343  ;;  %v1864_v54 = vand.u32 65535, %v13194_v40  ;;  %v1008_v40 = vsel %vm503_vm0, %v7217_v6, 0.0 }
 0x216   :  { %13184 = vst [vmem:[#allocation79_spill] sm:$0xff] %v7193_v36  ;;  %vm1345_vm4 = vcmp.eq.f32.partialorder %v13186_v21, %v7193_v36  ;;  %v912_v36 = vsel %vm503_vm0, %v7199_v57, 0.0  ;;  %v780_v39 = vmul.f32 1.442695, %v706_v45 }
 0x217   :  { %v1346_v33 = vsel %vm1345_vm4, %v1341_v13, inf  ;;  %v13192_v13 = vld [vmem:[#allocation87_spill] sm:$0xff] }
 0x218   :  { %2048 = vmin.xlane.f32.xlu0 %v7195_v20  ;;  %1347 = vmin.xlane.f32.xlu1 %v1346_v33  ;;  %13193 = vst [vmem:[#allocation87_spill] sm:$0xff] %v7217_v6  ;;  %v1320_v33 = vsel %vm1256_vm5, %v6508_v31, 8 }
 0x219   :  { %v7208_v43 = vpop.xlane.xlu0 %1823  ;;  %v893_v21 = vpop.xlane.xlu1 %892  ;;  %v7233_v2 = vsel %vm503_vm0, %v1320_v33, 2147483647  ;;  %v13199_v33 = vld [vmem:[#allocation98_spill] sm:$0xff] }
 0x21a   :  { %13191 = vst [vmem:[#allocation84_spill] sm:$0xff] %v7208_v43  ;;  %vm1825_vm6 = vcmp.eq.f32.partialorder %v13192_v13, %v7208_v43  ;;  %5328 = vrcp.f32 %v893_v21  ;;  %v1386_v13 = vcvt.s32.f32 %v1384_v30  ;;  %v13196_v43 = vld [vmem:[#allocation93_spill] sm:$0xff]  ;;  %v1291_v30 = vsel %vm1227_vm7, %v6508_v31, 8 }
 0x21b   :  { %v1826_v20 = vsel %vm1825_vm6, %v1821_v1, inf  ;;  %v738_v1 = vsub.f32 %v13142_v14, %v6725_v38 }
 0x21c   :  { %913 = vadd.xlane.f32.xlu0 %v912_v36  ;;  %1827 = vmin.xlane.f32.xlu1 %v1826_v20  ;;  %v1550_v36 = vshra.s32 %v7215_v44, 16  ;;  %v13197_v20 = vld [vmem:[#allocation94_spill] sm:$0xff] }
 0x21d   :  { %v7223_v21 = vpop.xlane.xlu0 %1388  ;;  %v989_v34 = vpop.xlane.xlu1 %988  ;;  %v1369_v50 = vand.u32 65535, %v13197_v20  ;;  %v844_v38 = vmul.f32 1.442695, %v738_v1  ;;  %v13200_v20 = vld [vmem:[#allocation99_spill] sm:$0xff] }
 0x21e   :  { %13195 = vst [vmem:[#allocation89_spill] sm:$0xff] %v7223_v21  ;;  %vm1390_vm8 = vcmp.eq.f32.partialorder %v13196_v43, %v7223_v21  ;;  %5330 = vrcp.f32 %v989_v34  ;;  %v1866_v34 = vcvt.s32.f32 %v1864_v54  ;;  %v7241_v14 = vcvt.s32.f32 %v1550_v36 }
 0x21f   :  { %v1391_v45 = vsel %vm1390_vm8, %v1386_v13, inf  ;;  %5332 = vpow2.f32 %v780_v39  ;;  %v2030_v13 = vshra.s32 %v7233_v2, 16  ;;  %v7247_v39 = vsel %vm503_vm0, %v1291_v30, 2147483647 }
 0x220   :  { %1009 = vadd.xlane.f32.xlu0 %v1008_v40  ;;  %1392 = vmin.xlane.f32.xlu1 %v1391_v45  ;;  %v1323_v45 = vsel %vm1259_vm9, %v6508_v31, 8  ;;  %v1849_v54 = vand.u32 65535, %v13200_v20  ;;  %v1371_v36 = vcvt.s32.f32 %v1369_v50  ;;  %v1595_v30 = vshra.s32 %v7247_v39, 16  ;;  %v13205_v50 = vld [vmem:[#allocation88_spill] sm:$0xff] }
 0x221   :  { %v7239_v43 = vpop.xlane.xlu0 %1868  ;;  %v899_v21 = vpop.xlane.xlu1 %898  ;;  %v7260_v53 = vsel %vm503_vm0, %v1323_v45, 2147483647  ;;  %vm1231_vm8 = vcmp.eq.f32.partialorder %v6233_v24, %v6886_v9 }
 0x222   :  { %13198 = vst [vmem:[#allocation93_spill] sm:$0xff] %v7239_v43  ;;  %vm1870_vm10 = vcmp.eq.f32.partialorder %v13199_v33, %v7239_v43  ;;  %5334 = vrcp.f32 %v899_v21  ;;  %v7254_v33 = vcvt.s32.f32 %v2030_v13  ;;  %v13202_v21 = vld [vmem:[#allocation103_spill] sm:$0xff]  ;;  %13203 = vst [vmem:[#allocation98_spill] sm:$0xff] %v7260_v53  ;;  %v1851_v6 = vcvt.s32.f32 %v1849_v54 }
 0x223   :  { %v1871_v40 = vsel %vm1870_vm10, %v1866_v34, inf  ;;  %5336 = vpow2.f32 %v844_v38  ;;  %v2075_v45 = vshra.s32 %v7260_v53, 16 }
 0x224   :  { %1553 = vmin.xlane.f32.xlu0 %v7241_v14  ;;  %1872 = vmin.xlane.f32.xlu1 %v1871_v40  ;;  %v13204_v40 = vld [vmem:[#allocation104_spill] sm:$0xff] }
 0x225   :  { %v7252_v1 = vpop.xlane.xlu0 %1373  ;;  %v995_v58 = vpop.xlane.xlu1 %994  ;;  %v1414_v20 = vand.u32 65535, %v13204_v40  ;;  %v13211_v40 = vld [vmem:[#allocation92_spill] sm:$0xff] }
 0x226   :  { %13201 = vst [vmem:[#allocation94_spill] sm:$0xff] %v7252_v1  ;;  %vm1375_vm11 = vcmp.eq.f32.partialorder %v13202_v21, %v7252_v1  ;;  %5338 = vrcp.f32 %v995_v58  ;;  %v7267_v21 = vcvt.s32.f32 %v1595_v30  ;;  %v13208_v58 = vld [vmem:[#allocation108_spill] sm:$0xff]  ;;  %v13210_v30 = vld [vmem:[#allocation39_spill] sm:$0xff] }
 0x227   :  { %v1376_v34 = vsel %vm1375_vm11, %v1371_v36, inf  ;;  %v5329_v43 = vpop.eup %5328  ;;  %vm1226_vm13 = vcmp.eq.f32.partialorder %v13210_v30, %v6816_v19  ;;  %v712_v24 = vsub.f32 %v13210_v30, %v6816_v19  ;;  %v13247_v19 = vld [vmem:[#allocation151_spill] sm:$0xff] }
 0x228   :  { %2033 = vmin.xlane.f32.xlu0 %v7254_v33  ;;  %v1083_v38 = vmul.f32 %v5329_v43, %v13205_v50  ;;  %1377 = vmin.xlane.f32.xlu1 %v1376_v34  ;;  %13207 = vst [vmem:[#allocation103_spill] sm:$0xff] %v7267_v21  ;;  %v13209_v34 = vld [vmem:[#allocation109_spill] sm:$0xff]  ;;  %v1474_v30 = vand.u32 65535, %v13247_v19 }
 0x229   :  { %v7265_v13 = vpop.xlane.xlu0 %1853  ;;  %v905_v57 = vpop.xlane.xlu1 %904  ;;  %v1894_v54 = vand.u32 65535, %v13209_v34  ;;  %v13215_v34 = vld [vmem:[#allocation114_spill] sm:$0xff] }
 0x22a   :  { %13206 = vst [vmem:[#allocation99_spill] sm:$0xff] %v7265_v13  ;;  %vm1855_vm12 = vcmp.eq.f32.partialorder %v13208_v58, %v7265_v13  ;;  %4731 = vst.msk [vmem:[%s12166_s4 + $0x8] sm:$0xff] %vm503_vm0, %v1083_v38  ;;  %5340 = vrcp.f32 %v905_v57  ;;  %v1416_v13 = vcvt.s32.f32 %v1414_v20  ;;  %v708_v57 = vsub.f32 %v13155_v42, %v6745_v0  ;;  %v13217_v0 = vld [vmem:[#allocation97_spill] sm:$0xff] }
 0x22b   :  { %v1856_v36 = vsel %vm1855_vm12, %v1851_v6, inf  ;;  %v5331_v43 = vpop.eup %5330  ;;  %v7287_v38 = vcvt.s32.f32 %v2075_v45  ;;  %v1290_v20 = vsel %vm1226_vm13, %v6508_v31, 8  ;;  %v13216_v45 = vld [vmem:[#allocation40_spill] sm:$0xff]  ;;  %vm1233_vm12 = vcmp.eq.f32.partialorder %v6269_v49, %v6926_v5 }
 0x22c   :  { %1598 = vmin.xlane.f32.xlu0 %v7267_v21  ;;  %v1147_v50 = vmul.f32 %v5331_v43, %v13211_v40  ;;  %1857 = vmin.xlane.f32.xlu1 %v1856_v36  ;;  %v7283_v1 = vpop.eup %5332  ;;  %v13214_v21 = vld [vmem:[#allocation113_spill] sm:$0xff]  ;;  %v1399_v40 = vand.u32 65535, %v13215_v34  ;;  %vm1258_vm15 = vcmp.eq.f32.partialorder %v13216_v45, %v6837_v61  ;;  %v784_v53 = vmul.f32 1.442695, %v708_v57  ;;  %v13221_v34 = vld [vmem:[#allocation119_spill] sm:$0xff]  ;;  %v13263_v5 = vld [vmem:[#allocation44_spill] sm:$0xff] }
 0x22d   :  { %v7281_v58 = vpop.xlane.xlu0 %1418  ;;  %v1001_v6 = vpop.xlane.xlu1 %1000  ;;  %13213 = vst [vmem:[#allocation88_spill] sm:$0xff] %v7287_v38  ;;  %v7316_v57 = vsel %vm503_vm0, %v1290_v20, 2147483647 }
 0x22e   :  { %13212 = vst [vmem:[#allocation104_spill] sm:$0xff] %v7281_v58  ;;  %vm1420_vm14 = vcmp.eq.f32.partialorder %v13214_v21, %v7281_v58  ;;  %4763 = vst.msk [vmem:[%s12166_s4 + $0x108] sm:$0xff] %vm503_vm0, %v1147_v50  ;;  %5342 = vrcp.f32 %v1001_v6  ;;  %v1896_v58 = vcvt.s32.f32 %v1894_v54  ;;  %v13219_v6 = vld [vmem:[#allocation118_spill] sm:$0xff] }
 0x22f   :  { %v1421_v36 = vsel %vm1420_vm14, %v1416_v13, inf  ;;  %v5335_v43 = vpop.eup %5334  ;;  %v740_v13 = vsub.f32 %v13159_v12, %v6763_v25  ;;  %v1580_v12 = vshra.s32 %v7316_v57, 16 }
 0x230   :  { %2078 = vmin.xlane.f32.xlu0 %v7287_v38  ;;  %v1087_v42 = vmul.f32 %v5335_v43, %v13217_v0  ;;  %1422 = vmin.xlane.f32.xlu1 %v1421_v36  ;;  %v7307_v38 = vpop.eup %5336  ;;  %v918_v0 = vsel %vm503_vm0, %v7283_v1, 0.0  ;;  %v1322_v43 = vsel %vm1258_vm15, %v6508_v31, 8 }
 0x231   :  { %v7301_v21 = vpop.xlane.xlu0 %1898  ;;  %v911_v50 = vpop.xlane.xlu1 %910  ;;  %13220 = vst [vmem:[#allocation109_spill] sm:$0xff] %v7307_v38  ;;  %v848_v20 = vmul.f32 1.442695, %v740_v13  ;;  %v1293_v13 = vsel %vm1229_vm2, %v6508_v31, 8 }
 0x232   :  { %13218 = vst [vmem:[#allocation108_spill] sm:$0xff] %v7301_v21  ;;  %vm1900_vm1 = vcmp.eq.f32.partialorder %v13219_v6, %v7301_v21  ;;  %4733 = vst.msk [vmem:[%s12166_s4 + $0x18] sm:$0xff] %vm503_vm0, %v1087_v42  ;;  %5344 = vrcp.f32 %v911_v50  ;;  %v1879_v6 = vand.u32 65535, %v13221_v34  ;;  %v13222_v42 = vld [vmem:[#allocation102_spill] sm:$0xff]  ;;  %v13225_v34 = vld [vmem:[#allocation124_spill] sm:$0xff] }
 0x233   :  { %v1901_v54 = vsel %vm1900_vm1, %v1896_v58, inf  ;;  %v5339_v36 = vpop.eup %5338  ;;  %v1401_v58 = vcvt.s32.f32 %v1399_v40  ;;  %5346 = vpow2.f32 %v784_v53  ;;  %v7338_v40 = vsel %vm503_vm0, %v1322_v43, 2147483647  ;;  %v13228_v43 = vld [vmem:[#allocation128_spill] sm:$0xff] }
 0x234   :  { %919 = vadd.xlane.f32.xlu0 %v918_v0  ;;  %v1151_v50 = vmul.f32 %v5339_v36, %v13222_v42  ;;  %1902 = vmin.xlane.f32.xlu1 %v1901_v54  ;;  %v13224_v0 = vld [vmem:[#allocation123_spill] sm:$0xff]  ;;  %v1014_v54 = vsel %vm503_vm0, %v7307_v38, 0.0  ;;  %v1444_v42 = vand.u32 65535, %v13225_v34  ;;  %v7348_v38 = vcvt.s32.f32 %v1580_v12 }
 0x235   :  { %v7326_v25 = vpop.xlane.xlu0 %1403  ;;  %v1007_v21 = vpop.xlane.xlu1 %1006  ;;  %v710_v12 = vsub.f32 %v13183_v7, %v13182_v22  ;;  %vm1235_vm1 = vcmp.eq.f32.partialorder %v6305_v15, %v6966_v37  ;;  %v13271_v37 = vld [vmem:[#allocation168_spill] sm:$0xff] }
 0x236   :  { %13223 = vst [vmem:[#allocation92_spill] sm:$0xff] %v7326_v25  ;;  %vm1405_vm3 = vcmp.eq.f32.partialorder %v13224_v0, %v7326_v25  ;;  %4765 = vst.msk [vmem:[%s12166_s4 + $0x118] sm:$0xff] %vm503_vm0, %v1151_v50  ;;  %5348 = vrcp.f32 %v1007_v21  ;;  %v13226_v0 = vld [vmem:[#allocation107_spill] sm:$0xff]  ;;  %v1881_v50 = vcvt.s32.f32 %v1879_v6  ;;  %v1446_v4 = vcvt.s32.f32 %v1444_v42 }
 0x237   :  { %v1406_v36 = vsel %vm1405_vm3, %v1401_v58, inf  ;;  %v5341_v53 = vpop.eup %5340  ;;  %5350 = vpow2.f32 %v848_v20  ;;  %v13229_v20 = vld [vmem:[#allocation129_spill] sm:$0xff]  ;;  %v742_v42 = vsub.f32 %v13190_v59, %v13189_v29  ;;  %v13243_v59 = vld [vmem:[#allocation150_spill] sm:$0xff] }
 0x238   :  { %1015 = vadd.xlane.f32.xlu0 %v1014_v54  ;;  %v1091_v25 = vmul.f32 %v5341_v53, %v13226_v0  ;;  %1407 = vmin.xlane.f32.xlu1 %v1406_v36  ;;  %v2060_v54 = vshra.s32 %v7338_v40, 16  ;;  %v7358_v36 = vsel %vm503_vm0, %v1293_v13, 2147483647  ;;  %v1924_v34 = vand.u32 65535, %v13229_v20  ;;  %v13230_v0 = vld [vmem:[#allocation112_spill] sm:$0xff]  ;;  %v13232_v13 = vld [vmem:[#allocation133_spill] sm:$0xff] }
 0x239   :  { %v7346_v21 = vpop.xlane.xlu0 %1883  ;;  %v917_v58 = vpop.xlane.xlu1 %916 }
 0x23a   :  { %13227 = vst [vmem:[#allocation113_spill] sm:$0xff] %v7346_v21  ;;  %vm1885_vm4 = vcmp.eq.f32.partialorder %v13228_v43, %v7346_v21  ;;  %4735 = vst.msk [vmem:[%s12166_s4 + $0x28] sm:$0xff] %vm503_vm0, %v1091_v25  ;;  %5352 = vrcp.f32 %v917_v58  ;;  %v7367_v58 = vcvt.s32.f32 %v2060_v54  ;;  %v13233_v54 = vld [vmem:[#allocation43_spill] sm:$0xff]  ;;  %v792_v21 = vmul.f32 1.442695, %v712_v24 }
 0x23b   :  { %v1886_v53 = vsel %vm1885_vm4, %v1881_v50, inf  ;;  %v5343_v6 = vpop.eup %5342  ;;  %v1625_v50 = vshra.s32 %v7358_v36, 16  ;;  %vm1228_vm6 = vcmp.eq.f32.partialorder %v13233_v54, %v6857_v16 }
 0x23c   :  { %1583 = vmin.xlane.f32.xlu0 %v7348_v38  ;;  %v1155_v43 = vmul.f32 %v5343_v6, %v13230_v0  ;;  %1887 = vmin.xlane.f32.xlu1 %v1886_v53  ;;  %v788_v53 = vmul.f32 1.442695, %v710_v12  ;;  %v13234_v0 = vld [vmem:[#allocation117_spill] sm:$0xff] }
 0x23d   :  { %v7365_v52 = vpop.xlane.xlu0 %1448  ;;  %v1013_v25 = vpop.xlane.xlu1 %1012 }
 0x23e   :  { %13231 = vst [vmem:[#allocation114_spill] sm:$0xff] %v7365_v52  ;;  %vm1450_vm5 = vcmp.eq.f32.partialorder %v13232_v13, %v7365_v52  ;;  %4767 = vst.msk [vmem:[%s12166_s4 + $0x128] sm:$0xff] %vm503_vm0, %v1155_v43  ;;  %5354 = vrcp.f32 %v1013_v25  ;;  %v1926_v52 = vcvt.s32.f32 %v1924_v34  ;;  %v7384_v43 = vcvt.s32.f32 %v1625_v50 }
 0x23f   :  { %v1451_v20 = vsel %vm1450_vm5, %v1446_v4, inf  ;;  %v5345_v6 = vpop.eup %5344  ;;  %v13236_v4 = vld [vmem:[#allocation137_spill] sm:$0xff]  ;;  %v1292_v34 = vsel %vm1228_vm6, %v6508_v31, 8  ;;  %v852_v50 = vmul.f32 1.442695, %v742_v42  ;;  %v1295_v42 = vsel %vm1231_vm8, %v6508_v31, 8 }
 0x240   :  { %2063 = vmin.xlane.f32.xlu0 %v7367_v58  ;;  %v1095_v13 = vmul.f32 %v5345_v6, %v13234_v0  ;;  %1452 = vmin.xlane.f32.xlu1 %v1451_v20  ;;  %v7388_v12 = vpop.eup %5346  ;;  %v13237_v20 = vld [vmem:[#allocation122_spill] sm:$0xff] }
 0x241   :  { %v7382_v22 = vpop.xlane.xlu0 %1928  ;;  %v923_v7 = vpop.xlane.xlu1 %922 }
 0x242   :  { %13235 = vst [vmem:[#allocation97_spill] sm:$0xff] %v7382_v22  ;;  %vm1930_vm7 = vcmp.eq.f32.partialorder %v13236_v4, %v7382_v22  ;;  %4737 = vst.msk [vmem:[%s12166_s4 + $0x38] sm:$0xff] %vm503_vm0, %v1095_v13  ;;  %5356 = vrcp.f32 %v923_v7  ;;  %v7408_v7 = vsel %vm503_vm0, %v1292_v34, 2147483647  ;;  %v13239_v13 = vld [vmem:[#allocation142_spill] sm:$0xff] }
 0x243   :  { %v1931_v25 = vsel %vm1930_vm7, %v1926_v52, inf  ;;  %v5349_v6 = vpop.eup %5348  ;;  %5358 = vpow2.f32 %v788_v53  ;;  %v924_v52 = vsel %vm503_vm0, %v7388_v12, 0.0 }
 0x244   :  { %1628 = vmin.xlane.f32.xlu0 %v7384_v43  ;;  %v1159_v0 = vmul.f32 %v5349_v6, %v13237_v20  ;;  %1932 = vmin.xlane.f32.xlu1 %v1931_v25  ;;  %v7399_v22 = vpop.eup %5350  ;;  %v1429_v25 = vand.u32 65535, %v13239_v13  ;;  %v13240_v6 = vld [vmem:[#allocation127_spill] sm:$0xff] }
 0x245   :  { %v890_v4 = vpop.xlane.xlu0 %889  ;;  %v1019_v29 = vpop.xlane.xlu1 %1018  ;;  %13238 = vst [vmem:[#allocation118_spill] sm:$0xff] %v7399_v22  ;;  %v1020_v34 = vsel %vm503_vm0, %v7399_v22, 0.0 }
 0x246   :  { %5360 = vrcp.f32 %v890_v4  ;;  %4769 = vst.msk [vmem:[%s12166_s4 + $0x138] sm:$0xff] %vm503_vm0, %v1159_v0 }
 0x247   :  { %5362 = vrcp.f32 %v1019_v29  ;;  %v5353_v53 = vpop.eup %5352  ;;  %v1610_v29 = vshra.s32 %v7408_v7, 16 }
 0x248   :  { %925 = vadd.xlane.f32.xlu0 %v924_v52  ;;  %5364 = vpow2.f32 %v852_v50  ;;  %v1099_v20 = vmul.f32 %v5353_v53, %v13240_v6  ;;  %v7421_v50 = vsel %vm503_vm0, %v1295_v42, 2147483647  ;;  %v13241_v52 = vld [vmem:[#allocation132_spill] sm:$0xff]  ;;  %v1431_v6 = vcvt.s32.f32 %v1429_v25 }
 0x249   :  { %v986_v4 = vpop.xlane.xlu0 %985  ;;  %v929_v9 = vpop.xlane.xlu1 %928  ;;  %v1655_v42 = vshra.s32 %v7421_v50, 16 }
 0x24a   :  { %5366 = vrcp.f32 %v986_v4  ;;  %4739 = vst.msk [vmem:[%s12166_s4 + $0x48] sm:$0xff] %vm503_vm0, %v1099_v20  ;;  %v1909_v4 = vand.u32 65535, %v6833_v23  ;;  %v13244_v23 = vld [vmem:[#allocation47_spill] sm:$0xff] }
 0x24b   :  { %5368 = vrcp.f32 %v929_v9  ;;  %v5355_v0 = vpop.eup %5354  ;;  %v7429_v9 = vcvt.s32.f32 %v1610_v29  ;;  %vm1230_vm10 = vcmp.eq.f32.partialorder %v13244_v23, %v6889_v51  ;;  %v13245_v29 = vld [vmem:[#allocation136_spill] sm:$0xff] }
 0x24c   :  { %1021 = vadd.xlane.f32.xlu0 %v1020_v34  ;;  %v1163_v53 = vmul.f32 %v5355_v0, %v13241_v52 }
 0x24d   :  { %v7424_v13 = vpop.xlane.xlu0 %1433  ;;  %v1025_v20 = vpop.xlane.xlu1 %1024 }
 0x24e   :  { %13242 = vst [vmem:[#allocation119_spill] sm:$0xff] %v7424_v13  ;;  %vm1435_vm9 = vcmp.eq.f32.partialorder %v13243_v59, %v7424_v13  ;;  %4771 = vst.msk [vmem:[%s12166_s4 + $0x148] sm:$0xff] %vm503_vm0, %v1163_v53  ;;  %5370 = vrcp.f32 %v1025_v20  ;;  %v1911_v59 = vcvt.s32.f32 %v1909_v4  ;;  %v744_v53 = vsub.f32 %v13216_v45, %v6837_v61 }
 0x24f   :  { %v1436_v25 = vsel %vm1435_vm9, %v1431_v6, inf  ;;  %v5357_v34 = vpop.eup %5356  ;;  %v7449_v20 = vcvt.s32.f32 %v1655_v42  ;;  %v1294_v42 = vsel %vm1230_vm10, %v6508_v31, 8 }
 0x250   :  { %1613 = vmin.xlane.f32.xlu0 %v7429_v9  ;;  %1437 = vmin.xlane.f32.xlu1 %v1436_v25  ;;  %v1103_v0 = vmul.f32 %v5357_v34, %v13245_v29  ;;  %v7445_v13 = vpop.eup %5358  ;;  %v13248_v25 = vld [vmem:[#allocation155_spill] sm:$0xff]  ;;  %v13249_v34 = vld [vmem:[#allocation138_spill] sm:$0xff]  ;;  %v13250_v29 = vld [vmem:[#allocation141_spill] sm:$0xff] }
 0x251   :  { %v7442_v52 = vpop.xlane.xlu0 %1913  ;;  %v935_v6 = vpop.xlane.xlu1 %934 }
 0x252   :  { %13246 = vst [vmem:[#allocation102_spill] sm:$0xff] %v7442_v52  ;;  %vm1915_vm11 = vcmp.eq.f32.partialorder %v13248_v25, %v7442_v52  ;;  %4741 = vst.msk [vmem:[%s12166_s4 + $0x58] sm:$0xff] %vm503_vm0, %v1103_v0  ;;  %5372 = vrcp.f32 %v935_v6  ;;  %v1476_v0 = vcvt.s32.f32 %v1474_v30  ;;  %v930_v30 = vsel %vm503_vm0, %v7445_v13, 0.0 }
 0x253   :  { %v5361_v22 = vpop.eup %5360  ;;  %v1916_v19 = vsel %vm1915_vm11, %v1911_v59, inf  ;;  %v13252_v59 = vld [vmem:[#allocation156_spill] sm:$0xff]  ;;  %5374 = vpow2.f32 %v792_v21  ;;  %vm1239_vm11 = vcmp.eq.f32.partialorder %v6377_v48, %v7036_v3 }
 0x254   :  { %v5363_v4 = vpop.eup %5362  ;;  %v1081_v24 = vmul.f32 %v5361_v22, %v13249_v34  ;;  %1658 = vmin.xlane.f32.xlu0 %v7449_v20  ;;  %1917 = vmin.xlane.f32.xlu1 %v1916_v19  ;;  %v1954_v6 = vand.u32 65535, %v13252_v59  ;;  %v856_v22 = vmul.f32 1.442695, %v744_v53  ;;  %v13254_v34 = vld [vmem:[#allocation160_spill] sm:$0xff]  ;;  %v7484_v53 = vsel %vm503_vm0, %v1294_v42, 2147483647 }
 0x255   :  { %v1167_v25 = vmul.f32 %v5363_v4, %v13250_v29  ;;  %v7466_v61 = vpop.xlane.xlu0 %1478  ;;  %v7469_v45 = vpop.eup %5364  ;;  %v1297_v59 = vsel %vm1233_vm12, %v6508_v31, 8  ;;  %v13309_v3 = vld [vmem:[#allocation56_spill] sm:$0xff] }
 0x256   :  { %13251 = vst [vmem:[#allocation123_spill] sm:$0xff] %v7466_v61  ;;  %13253 = vst [vmem:[#allocation124_spill] sm:$0xff] %v7469_v45  ;;  %v1031_v19 = vpop.xlane.xlu1 %1030  ;;  %vm1480_vm13 = vcmp.eq.f32.partialorder %v13254_v34, %v7466_v61  ;;  %v13256_v34 = vld [vmem:[#allocation146_spill] sm:$0xff]  ;;  %v1956_v61 = vcvt.s32.f32 %v1954_v6  ;;  %v1026_v6 = vsel %vm503_vm0, %v7469_v45, 0.0 }
 0x257   :  { %4730 = vst.msk [vmem:[%s12166_s4] sm:$0xff] %vm503_vm0, %v1081_v24  ;;  %v5367_v52 = vpop.eup %5366  ;;  %4773 = vst.msk [vmem:[%s12166_s4 + $0x158] sm:$0xff] %vm503_vm0, %v1167_v25  ;;  %5376 = vrcp.f32 %v1031_v19  ;;  %v1481_v21 = vsel %vm1480_vm13, %v1476_v0, inf  ;;  %v13255_v24 = vld [vmem:[#allocation143_spill] sm:$0xff]  ;;  %v1640_v0 = vshra.s32 %v7484_v53, 16 }
 0x258   :  { %v5369_v4 = vpop.eup %5368  ;;  %v1145_v29 = vmul.f32 %v5367_v52, %v13255_v24  ;;  %931 = vadd.xlane.f32.xlu0 %v930_v30  ;;  %1482 = vmin.xlane.f32.xlu1 %v1481_v21  ;;  %5378 = vpow2.f32 %v856_v22  ;;  %v13258_v52 = vld [vmem:[#allocation164_spill] sm:$0xff]  ;;  %v7508_v30 = vsel %vm503_vm0, %v1297_v59, 2147483647  ;;  %v13260_v59 = vld [vmem:[#allocation51_spill] sm:$0xff] }
 0x259   :  { %v1107_v25 = vmul.f32 %v5369_v4, %v13256_v34  ;;  %v7492_v19 = vpop.xlane.xlu0 %1958  ;;  %v13259_v4 = vld [vmem:[#allocation149_spill] sm:$0xff]  ;;  %v714_v34 = vsub.f32 %v13233_v54, %v6857_v16  ;;  %vm1232_vm15 = vcmp.eq.f32.partialorder %v13260_v59, %v6928_v28 }
 0x25a   :  { %13257 = vst [vmem:[#allocation107_spill] sm:$0xff] %v7492_v19  ;;  %4762 = vst.msk [vmem:[%s12166_s4 + $0x100] sm:$0xff] %vm503_vm0, %v1145_v29  ;;  %v941_v42 = vpop.xlane.xlu1 %940  ;;  %vm1960_vm14 = vcmp.eq.f32.partialorder %v13258_v52, %v7492_v19 }
 0x25b   :  { %4743 = vst.msk [vmem:[%s12166_s4 + $0x68] sm:$0xff] %vm503_vm0, %v1107_v25  ;;  %5380 = vrcp.f32 %v941_v42  ;;  %v1961_v22 = vsel %vm1960_vm14, %v1956_v61, inf  ;;  %v5371_v21 = vpop.eup %5370  ;;  %v7513_v25 = vcvt.s32.f32 %v1640_v0  ;;  %v1685_v42 = vshra.s32 %v7508_v30, 16 }
 0x25c   :  { %1027 = vadd.xlane.f32.xlu0 %v1026_v6  ;;  %1962 = vmin.xlane.f32.xlu1 %v1961_v22  ;;  %v1171_v24 = vmul.f32 %v5371_v21, %v13259_v4  ;;  %v13261_v6 = vld [vmem:[#allocation154_spill] sm:$0xff]  ;;  %v1459_v0 = vand.u32 65535, %v6922_v63  ;;  %v796_v4 = vmul.f32 1.442695, %v714_v34  ;;  %v1296_v63 = vsel %vm1232_vm15, %v6508_v31, 8  ;;  %v13265_v34 = vld [vmem:[#allocation159_spill] sm:$0xff] }
 0x25d   :  { %v896_v29 = vpop.xlane.xlu0 %895  ;;  %v7527_v54 = vcvt.s32.f32 %v1685_v42 }
 0x25e   :  { %v1037_v52 = vpop.xlane.xlu1 %1036  ;;  %5382 = vrcp.f32 %v896_v29  ;;  %4775 = vst.msk [vmem:[%s12166_s4 + $0x168] sm:$0xff] %vm503_vm0, %v1171_v24  ;;  %v13262_v29 = vld [vmem:[#allocation158_spill] sm:$0xff] }
 0x25f   :  { %5384 = vrcp.f32 %v1037_v52  ;;  %v5373_v61 = vpop.eup %5372  ;;  %v746_v16 = vsub.f32 %v13263_v5, %v13262_v29 }
 0x260   :  { %1643 = vmin.xlane.f32.xlu0 %v7513_v25  ;;  %v1111_v22 = vmul.f32 %v5373_v61, %v13261_v6  ;;  %v7529_v24 = vpop.eup %5374  ;;  %v1461_v6 = vcvt.s32.f32 %v1459_v0 }
 0x261   :  { %v992_v21 = vpop.xlane.xlu0 %991  ;;  %13264 = vst [vmem:[#allocation128_spill] sm:$0xff] %v7529_v24  ;;  %v860_v19 = vmul.f32 1.442695, %v746_v16 }
 0x262   :  { %v947_v49 = vpop.xlane.xlu1 %946  ;;  %5386 = vrcp.f32 %v992_v21  ;;  %4745 = vst.msk [vmem:[%s12166_s4 + $0x78] sm:$0xff] %vm503_vm0, %v1111_v22  ;;  %v1939_v21 = vand.u32 65535, %v6945_v11  ;;  %v936_v22 = vsel %vm503_vm0, %v7529_v24, 0.0  ;;  %v7554_v11 = vsel %vm503_vm0, %v1296_v63, 2147483647 }
 0x263   :  { %5388 = vrcp.f32 %v947_v49  ;;  %v1670_v63 = vshra.s32 %v7554_v11, 16 }
 0x264   :  { %v5377_v52 = vpop.eup %5376  ;;  %1688 = vmin.xlane.f32.xlu0 %v7527_v54  ;;  %5390 = vpow2.f32 %v796_v4  ;;  %v13268_v4 = vld [vmem:[#allocation163_spill] sm:$0xff] }
 0x265   :  { %v1175_v61 = vmul.f32 %v5377_v52, %v13265_v34  ;;  %v7540_v42 = vpop.xlane.xlu0 %1463  ;;  %v7545_v49 = vpop.eup %5378 }
 0x266   :  { %13266 = vst [vmem:[#allocation129_spill] sm:$0xff] %v7540_v42  ;;  %v1043_v45 = vpop.xlane.xlu1 %1042  ;;  %vm1465_vm2 = vcmp.eq.f32.partialorder %v6958_v26, %v7540_v42  ;;  %13267 = vst [vmem:[#allocation112_spill] sm:$0xff] %v7545_v49  ;;  %v1299_v26 = vsel %vm1235_vm1, %v6508_v31, 8 }
 0x267   :  { %4777 = vst.msk [vmem:[%s12166_s4 + $0x178] sm:$0xff] %vm503_vm0, %v1175_v61  ;;  %5392 = vrcp.f32 %v1043_v45  ;;  %v1466_v0 = vsel %vm1465_vm2, %v1461_v6, inf  ;;  %v1941_v45 = vcvt.s32.f32 %v1939_v21  ;;  %v1504_v61 = vand.u32 65535, %v6964_v62 }
 0x268   :  { %v5381_v16 = vpop.eup %5380  ;;  %937 = vadd.xlane.f32.xlu0 %v936_v22  ;;  %1467 = vmin.xlane.f32.xlu1 %v1466_v0  ;;  %5394 = vpow2.f32 %v860_v19  ;;  %v1032_v0 = vsel %vm503_vm0, %v7545_v49, 0.0  ;;  %v7574_v62 = vsel %vm503_vm0, %v1299_v26, 2147483647 }
 0x269   :  { %v1115_v52 = vmul.f32 %v5381_v16, %v13268_v4  ;;  %v7561_v34 = vpop.xlane.xlu0 %1943  ;;  %v13270_v16 = vld [vmem:[#allocation165_spill] sm:$0xff] }
 0x26a   :  { %13269 = vst [vmem:[#allocation133_spill] sm:$0xff] %v7561_v34  ;;  %v953_v6 = vpop.xlane.xlu1 %952  ;;  %vm1945_vm3 = vcmp.eq.f32.partialorder %v6974_v27, %v7561_v34  ;;  %v716_v27 = vsub.f32 %v13244_v23, %v6889_v51  ;;  %v13277_v51 = vld [vmem:[#allocation55_spill] sm:$0xff]  ;;  %v13278_v23 = vld [vmem:[#allocation172_spill] sm:$0xff] }
 0x26b   :  { %v5383_v22 = vpop.eup %5382  ;;  %4747 = vst.msk [vmem:[%s12166_s4 + $0x88] sm:$0xff] %vm503_vm0, %v1115_v52  ;;  %5396 = vrcp.f32 %v953_v6  ;;  %v1946_v21 = vsel %vm1945_vm3, %v1941_v45, inf  ;;  %v1506_v52 = vcvt.s32.f32 %v1504_v61  ;;  %v1984_v6 = vand.u32 65535, %v6982_v10 }
 0x26c   :  { %v5385_v19 = vpop.eup %5384  ;;  %v1085_v4 = vmul.f32 %v5383_v22, %v13270_v16  ;;  %1033 = vadd.xlane.f32.xlu0 %v1032_v0  ;;  %1947 = vmin.xlane.f32.xlu1 %v1946_v21  ;;  %v7587_v45 = vcvt.s32.f32 %v1670_v63  ;;  %v1715_v22 = vshra.s32 %v7574_v62, 16  ;;  %v800_v61 = vmul.f32 1.442695, %v716_v27  ;;  %v13273_v21 = vld [vmem:[#allocation169_spill] sm:$0xff]  ;;  %v13274_v63 = vld [vmem:[#allocation167_spill] sm:$0xff]  ;;  %v13275_v16 = vld [vmem:[#allocation48_spill] sm:$0xff] }
 0x26d   :  { %v1179_v15 = vmul.f32 %v5385_v19, %v13271_v37  ;;  %v7580_v34 = vpop.xlane.xlu0 %1508 }
 0x26e   :  { %13272 = vst [vmem:[#allocation117_spill] sm:$0xff] %v7580_v34  ;;  %4732 = vst.msk [vmem:[%s12166_s4 + $0x10] sm:$0xff] %vm503_vm0, %v1085_v4  ;;  %v1049_v26 = vpop.xlane.xlu1 %1048  ;;  %vm1510_vm4 = vcmp.eq.f32.partialorder %v6991_v46, %v7580_v34  ;;  %v748_v46 = vsub.f32 %v13275_v16, %v13274_v63  ;;  %v13276_v4 = vld [vmem:[#allocation178_spill] sm:$0xff] }
 0x26f   :  { %v5387_v0 = vpop.eup %5386  ;;  %4779 = vst.msk [vmem:[%s12166_s4 + $0x188] sm:$0xff] %vm503_vm0, %v1179_v15  ;;  %5398 = vrcp.f32 %v1049_v26  ;;  %v1511_v10 = vsel %vm1510_vm4, %v1506_v52, inf  ;;  %vm1234_vm5 = vcmp.eq.f32.partialorder %v13277_v51, %v13276_v4  ;;  %v1986_v15 = vcvt.s32.f32 %v1984_v6  ;;  %v13280_v26 = vld [vmem:[#allocation184_spill] sm:$0xff] }
 0x270   :  { %v5389_v37 = vpop.eup %5388  ;;  %v1149_v19 = vmul.f32 %v5387_v0, %v13273_v21  ;;  %1673 = vmin.xlane.f32.xlu0 %v7587_v45  ;;  %1512 = vmin.xlane.f32.xlu1 %v1511_v10  ;;  %v7609_v52 = vcvt.s32.f32 %v1715_v22  ;;  %v1298_v10 = vsel %vm1234_vm5, %v6508_v31, 8  ;;  %v864_v22 = vmul.f32 1.442695, %v748_v46  ;;  %v13282_v21 = vld [vmem:[#allocation57_spill] sm:$0xff] }
 0x271   :  { %v1119_v34 = vmul.f32 %v5389_v37, %v13278_v23  ;;  %v7603_v42 = vpop.xlane.xlu0 %1988  ;;  %v7613_v0 = vpop.eup %5390  ;;  %v13281_v37 = vld [vmem:[#allocation181_spill] sm:$0xff] }
 0x272   :  { %13279 = vst [vmem:[#allocation137_spill] sm:$0xff] %v7603_v42  ;;  %4764 = vst.msk [vmem:[%s12166_s4 + $0x110] sm:$0xff] %vm503_vm0, %v1149_v19  ;;  %v959_v27 = vpop.xlane.xlu1 %958  ;;  %vm1990_vm6 = vcmp.eq.f32.partialorder %v13280_v26, %v7603_v42  ;;  %vm1237_vm7 = vcmp.eq.f32.partialorder %v13282_v21, %v13281_v37  ;;  %v13283_v19 = vld [vmem:[#allocation175_spill] sm:$0xff]  ;;  %v718_v37 = vsub.f32 %v13260_v59, %v6928_v28  ;;  %v1534_v28 = vand.u32 65535, %v7072_v41 }
 0x273   :  { %4749 = vst.msk [vmem:[%s12166_s4 + $0x98] sm:$0xff] %vm503_vm0, %v1119_v34  ;;  %5400 = vrcp.f32 %v959_v27  ;;  %v1991_v23 = vsel %vm1990_vm6, %v1986_v15, inf  ;;  %v942_v34 = vsel %vm503_vm0, %v7613_v0, 0.0  ;;  %v1301_v15 = vsel %vm1237_vm7, %v6508_v31, 8 }
 0x274   :  { %v5393_v6 = vpop.eup %5392  ;;  %1718 = vmin.xlane.f32.xlu0 %v7609_v52  ;;  %1992 = vmin.xlane.f32.xlu1 %v1991_v23  ;;  %5402 = vpow2.f32 %v800_v61  ;;  %v7633_v61 = vsel %vm503_vm0, %v1298_v10, 2147483647  ;;  %v804_v59 = vmul.f32 1.442695, %v718_v37 }
 0x275   :  { %v1183_v26 = vmul.f32 %v5393_v6, %v13283_v19  ;;  %v902_v42 = vpop.xlane.xlu0 %901  ;;  %v7624_v24 = vpop.eup %5394  ;;  %13284 = vst [vmem:[#allocation122_spill] sm:$0xff] %v7633_v61  ;;  %v1489_v6 = vand.u32 65535, %v7032_v32 }
 0x276   :  { %v1055_v49 = vpop.xlane.xlu1 %1054  ;;  %5404 = vrcp.f32 %v902_v42  ;;  %v13285_v42 = vld [vmem:[#allocation177_spill] sm:$0xff]  ;;  %v1038_v10 = vsel %vm503_vm0, %v7624_v24, 0.0 }
 0x277   :  { %4781 = vst.msk [vmem:[%s12166_s4 + $0x198] sm:$0xff] %vm503_vm0, %v1183_v26  ;;  %5406 = vrcp.f32 %v1055_v49  ;;  %v1700_v49 = vshra.s32 %v7633_v61, 16 }
 0x278   :  { %v5397_v46 = vpop.eup %5396  ;;  %943 = vadd.xlane.f32.xlu0 %v942_v34  ;;  %5408 = vpow2.f32 %v864_v22  ;;  %v7646_v22 = vsel %vm503_vm0, %v1301_v15, 2147483647  ;;  %v13287_v34 = vld [vmem:[#allocation180_spill] sm:$0xff] }
 0x279   :  { %v1123_v27 = vmul.f32 %v5397_v46, %v13285_v42  ;;  %v998_v23 = vpop.xlane.xlu0 %997  ;;  %13286 = vst [vmem:[#allocation142_spill] sm:$0xff] %v7646_v22  ;;  %v1491_v42 = vcvt.s32.f32 %v1489_v6  ;;  %v1745_v15 = vshra.s32 %v7646_v22, 16 }
 0x27a   :  { %v965_v19 = vpop.xlane.xlu1 %964  ;;  %5410 = vrcp.f32 %v998_v23  ;;  %v1969_v23 = vand.u32 65535, %v7053_v60  ;;  %v13289_v60 = vld [vmem:[#allocation59_spill] sm:$0xff] }
 0x27b   :  { %4751 = vst.msk [vmem:[%s12166_s4 + $0xa8] sm:$0xff] %vm503_vm0, %v1123_v27  ;;  %5412 = vrcp.f32 %v965_v19  ;;  %v7654_v19 = vcvt.s32.f32 %v1700_v49  ;;  %vm1236_vm9 = vcmp.eq.f32.partialorder %v13289_v60, %v7025_v17  ;;  %v13290_v49 = vld [vmem:[#allocation183_spill] sm:$0xff]  ;;  %v7674_v61 = vcvt.s32.f32 %v1745_v15 }
 0x27c   :  { %v5399_v26 = vpop.eup %5398  ;;  %1039 = vadd.xlane.f32.xlu0 %v1038_v10  ;;  %v1300_v15 = vsel %vm1236_vm9, %v6508_v31, 8 }
 0x27d   :  { %v1187_v32 = vmul.f32 %v5399_v26, %v13287_v34  ;;  %v7649_v46 = vpop.xlane.xlu0 %1493  ;;  %13288 = vst [vmem:[#allocation127_spill] sm:$0xff] %v7654_v19  ;;  %13293 = vst [vmem:[#allocation132_spill] sm:$0xff] %v7674_v61 }
 0x27e   :  { %v1061_v27 = vpop.xlane.xlu1 %1060  ;;  %vm1495_vm8 = vcmp.eq.f32.partialorder %v7066_v8, %v7649_v46  ;;  %v1971_v8 = vcvt.s32.f32 %v1969_v23 }
 0x27f   :  { %4783 = vst.msk [vmem:[%s12166_s4 + $0x1a8] sm:$0xff] %vm503_vm0, %v1187_v32  ;;  %5414 = vrcp.f32 %v1061_v27  ;;  %v1496_v6 = vsel %vm1495_vm8, %v1491_v42, inf  ;;  %v13291_v32 = vld [vmem:[#allocation174_spill] sm:$0xff]  ;;  %v13292_v27 = vld [vmem:[#allocation52_spill] sm:$0xff] }
 0x280   :  { %v5401_v10 = vpop.eup %5400  ;;  %1703 = vmin.xlane.f32.xlu0 %v7654_v19  ;;  %1497 = vmin.xlane.f32.xlu1 %v1496_v6  ;;  %v750_v42 = vsub.f32 %v13292_v27, %v13291_v32 }
 0x281   :  { %v1127_v26 = vmul.f32 %v5401_v10, %v13290_v49  ;;  %v7667_v34 = vpop.xlane.xlu0 %1973  ;;  %v7670_v21 = vpop.eup %5402  ;;  %v13294_v10 = vld [vmem:[#allocation185_spill] sm:$0xff] }
 0x282   :  { %v971_v22 = vpop.xlane.xlu1 %970  ;;  %vm1975_vm10 = vcmp.eq.f32.partialorder %v7082_v55, %v7667_v34  ;;  %v13295_v55 = vld [vmem:[#allocation187_spill] sm:$0xff] }
 0x283   :  { %v5405_v6 = vpop.eup %5404  ;;  %4753 = vst.msk [vmem:[%s12166_s4 + $0xb8] sm:$0xff] %vm503_vm0, %v1127_v26  ;;  %5416 = vrcp.f32 %v971_v22  ;;  %v1976_v41 = vsel %vm1975_vm10, %v1971_v8, inf  ;;  %v1536_v22 = vcvt.s32.f32 %v1534_v28  ;;  %v2014_v26 = vand.u32 65535, %v7090_v35 }
 0x284   :  { %v5407_v23 = vpop.eup %5406  ;;  %v1089_v37 = vmul.f32 %v5405_v6, %v13294_v10  ;;  %1748 = vmin.xlane.f32.xlu0 %v7674_v61  ;;  %1977 = vmin.xlane.f32.xlu1 %v1976_v41  ;;  %5418 = vpow2.f32 %v804_v59  ;;  %v868_v6 = vmul.f32 1.442695, %v750_v42  ;;  %v948_v28 = vsel %vm503_vm0, %v7670_v21, 0.0 }
 0x285   :  { %v1191_v49 = vmul.f32 %v5407_v23, %v13295_v55  ;;  %v7691_v19 = vpop.xlane.xlu0 %1538  ;;  %v7694_v8 = vpop.eup %5408  ;;  %v7709_v59 = vsel %vm503_vm0, %v1300_v15, 2147483647  ;;  %v13299_v23 = vld [vmem:[#allocation189_spill] sm:$0xff]  ;;  %v13300_v55 = vld [vmem:[#allocation191_spill] sm:$0xff]  ;;  %vm1260_vm10 = vcmp.eq.f32.partialorder %v13263_v5, %v13262_v29 }
 0x286   :  { %13296 = vst [vmem:[#allocation150_spill] sm:$0xff] %v7691_v19  ;;  %13297 = vst [vmem:[#allocation136_spill] sm:$0xff] %v7694_v8  ;;  %v1067_v41 = vpop.xlane.xlu1 %1066  ;;  %vm1540_vm12 = vcmp.eq.f32.partialorder %v7099_v56, %v7691_v19  ;;  %v1303_v56 = vsel %vm1239_vm11, %v6508_v31, 8  ;;  %v2016_v19 = vcvt.s32.f32 %v2014_v26  ;;  %v1044_v26 = vsel %vm503_vm0, %v7694_v8, 0.0 }
 0x287   :  { %4734 = vst.msk [vmem:[%s12166_s4 + $0x20] sm:$0xff] %vm503_vm0, %v1089_v37  ;;  %v5411_v10 = vpop.eup %5410  ;;  %4785 = vst.msk [vmem:[%s12166_s4 + $0x1b8] sm:$0xff] %vm503_vm0, %v1191_v49  ;;  %5420 = vrcp.f32 %v1067_v41  ;;  %v1541_v35 = vsel %vm1540_vm12, %v1536_v22, inf  ;;  %v1730_v22 = vshra.s32 %v7709_v59, 16  ;;  %vm1262_vm12 = vcmp.eq.f32.partialorder %v13275_v16, %v13274_v63  ;;  %v13363_v16 = vld [vmem:[#allocation166_spill] sm:$0xff] }
 0x288   :  { %13298 = vst [vmem:[#allocation151_spill] sm:$0xff] %v7709_v59  ;;  %v5413_v42 = vpop.eup %5412  ;;  %v1153_v37 = vmul.f32 %v5411_v10, %v13299_v23  ;;  %949 = vadd.xlane.f32.xlu0 %v948_v28  ;;  %1542 = vmin.xlane.f32.xlu1 %v1541_v35  ;;  %5422 = vpow2.f32 %v868_v6  ;;  %v7733_v10 = vsel %vm503_vm0, %v1303_v56, 2147483647  ;;  %v13305_v56 = vld [vmem:[#allocation63_spill] sm:$0xff]  ;;  %v1326_v63 = vsel %vm1262_vm12, %v6508_v31, 8 }
 0x289   :  { %v1131_v49 = vmul.f32 %v5413_v42, %v13300_v55  ;;  %v7717_v41 = vpop.xlane.xlu0 %2018  ;;  %13302 = vst [vmem:[#allocation138_spill] sm:$0xff] %v7733_v10  ;;  %v720_v42 = vsub.f32 %v13277_v51, %v13276_v4  ;;  %v1775_v55 = vshra.s32 %v7733_v10, 16  ;;  %v13316_v10 = vld [vmem:[#allocation207_spill] sm:$0xff] }
 0x28a   :  { %13301 = vst [vmem:[#allocation155_spill] sm:$0xff] %v7717_v41  ;;  %4766 = vst.msk [vmem:[%s12166_s4 + $0x120] sm:$0xff] %vm503_vm0, %v1153_v37  ;;  %v977_v15 = vpop.xlane.xlu1 %976  ;;  %vm2020_vm13 = vcmp.eq.f32.partialorder %v7111_v47, %v7717_v41  ;;  %v7738_v37 = vcvt.s32.f32 %v1730_v22 }
 0x28b   :  { %4755 = vst.msk [vmem:[%s12166_s4 + $0xc8] sm:$0xff] %vm503_vm0, %v1131_v49  ;;  %5424 = vrcp.f32 %v977_v15  ;;  %v2021_v6 = vsel %vm2020_vm13, %v2016_v19, inf  ;;  %v13306_v49 = vld [vmem:[#allocation195_spill] sm:$0xff]  ;;  %v7752_v51 = vcvt.s32.f32 %v1775_v55 }
 0x28c   :  { %v5415_v28 = vpop.eup %5414  ;;  %1045 = vadd.xlane.f32.xlu0 %v1044_v26  ;;  %2022 = vmin.xlane.f32.xlu1 %v2021_v6  ;;  %13303 = vst [vmem:[#allocation141_spill] sm:$0xff] %v7738_v37  ;;  %v13307_v6 = vld [vmem:[#allocation204_spill] sm:$0xff] }
 0x28d   :  { %v1195_v47 = vmul.f32 %v5415_v28, %v7064_v18  ;;  %v908_v35 = vpop.xlane.xlu0 %907  ;;  %v13304_v18 = vld [vmem:[#allocation196_spill] sm:$0xff]  ;;  %v1519_v22 = vand.u32 65535, %v13307_v6  ;;  %v808_v28 = vmul.f32 1.442695, %v720_v42  ;;  %13310 = vst [vmem:[#allocation156_spill] sm:$0xff] %v7752_v51  ;;  %v13314_v6 = vld [vmem:[#allocation198_spill] sm:$0xff] }
 0x28e   :  { %v1073_v23 = vpop.xlane.xlu1 %1072  ;;  %5426 = vrcp.f32 %v908_v35  ;;  %vm1238_vm14 = vcmp.eq.f32.partialorder %v13305_v56, %v13304_v18  ;;  %v13308_v35 = vld [vmem:[#allocation182_spill] sm:$0xff] }
 0x28f   :  { %4787 = vst.msk [vmem:[%s12166_s4 + $0x1c8] sm:$0xff] %vm503_vm0, %v1195_v47  ;;  %5428 = vrcp.f32 %v1073_v23  ;;  %v752_v4 = vsub.f32 %v13309_v3, %v13308_v35  ;;  %v1302_v42 = vsel %vm1238_vm14, %v6508_v31, 8  ;;  %v1521_v41 = vcvt.s32.f32 %v1519_v22 }
 0x290   :  { %v5417_v19 = vpop.eup %5416  ;;  %1733 = vmin.xlane.f32.xlu0 %v7738_v37  ;;  %v1999_v37 = vand.u32 65535, %v13316_v10  ;;  %v7779_v10 = vsel %vm503_vm0, %v1302_v42, 2147483647 }
 0x291   :  { %v1135_v15 = vmul.f32 %v5417_v19, %v13306_v49  ;;  %v1004_v26 = vpop.xlane.xlu0 %1003  ;;  %v7754_v47 = vpop.eup %5418  ;;  %v13312_v19 = vld [vmem:[#allocation194_spill] sm:$0xff]  ;;  %v13313_v49 = vld [vmem:[#allocation65_spill] sm:$0xff]  ;;  %v872_v59 = vmul.f32 1.442695, %v752_v4  ;;  %13318 = vst [vmem:[#allocation146_spill] sm:$0xff] %v7779_v10 }
 0x292   :  { %v983_v48 = vpop.xlane.xlu1 %982  ;;  %5430 = vrcp.f32 %v1004_v26  ;;  %13311 = vst [vmem:[#allocation160_spill] sm:$0xff] %v7754_v47  ;;  %vm1241_vm15 = vcmp.eq.f32.partialorder %v13313_v49, %v13312_v19  ;;  %v13325_v19 = vld [vmem:[#allocation201_spill] sm:$0xff]  ;;  %v13327_v49 = vld [vmem:[#allocation60_spill] sm:$0xff] }
 0x293   :  { %4757 = vst.msk [vmem:[%s12166_s4 + $0xd8] sm:$0xff] %vm503_vm0, %v1135_v15  ;;  %5432 = vrcp.f32 %v983_v48  ;;  %v13317_v48 = vld [vmem:[#allocation209_spill] sm:$0xff] }
 0x294   :  { %v5421_v23 = vpop.eup %5420  ;;  %1778 = vmin.xlane.f32.xlu0 %v7752_v51  ;;  %5434 = vpow2.f32 %v808_v28  ;;  %v1305_v28 = vsel %vm1241_vm15, %v6508_v31, 8 }
 0x295   :  { %v1199_v26 = vmul.f32 %v5421_v23, %v13314_v6  ;;  %v7765_v55 = vpop.xlane.xlu0 %1523  ;;  %v7770_v15 = vpop.eup %5422  ;;  %v954_v23 = vsel %vm503_vm0, %v7754_v47, 0.0  ;;  %v13319_v6 = vld [vmem:[#allocation200_spill] sm:$0xff] }
 0x296   :  { %13315 = vst [vmem:[#allocation143_spill] sm:$0xff] %v7765_v55  ;;  %v1079_v61 = vpop.xlane.xlu1 %1078  ;;  %vm1525_vm1 = vcmp.eq.f32.partialorder %v13317_v48, %v7765_v55 }
 0x297   :  { %4789 = vst.msk [vmem:[%s12166_s4 + $0x1d8] sm:$0xff] %vm503_vm0, %v1199_v26  ;;  %5436 = vrcp.f32 %v1079_v61  ;;  %v1526_v22 = vsel %vm1525_vm1, %v1521_v41, inf  ;;  %v2001_v61 = vcvt.s32.f32 %v1999_v37  ;;  %v13321_v26 = vld [vmem:[#allocation210_spill] sm:$0xff]  ;;  %v722_v41 = vsub.f32 %v13289_v60, %v7025_v17 }
 0x298   :  { %v5425_v4 = vpop.eup %5424  ;;  %955 = vadd.xlane.f32.xlu0 %v954_v23  ;;  %1527 = vmin.xlane.f32.xlu1 %v1526_v22  ;;  %v1564_v8 = vand.u32 65535, %v13321_v26  ;;  %v13323_v23 = vld [vmem:[#allocation211_spill] sm:$0xff]  ;;  %v1760_v22 = vshra.s32 %v7779_v10, 16  ;;  %5438 = vpow2.f32 %v872_v59  ;;  %v1050_v37 = vsel %vm503_vm0, %v7770_v15, 0.0  ;;  %v13328_v60 = vld [vmem:[#allocation202_spill] sm:$0xff] }
 0x299   :  { %v1139_v48 = vmul.f32 %v5425_v4, %v13319_v6  ;;  %v7786_v51 = vpop.xlane.xlu0 %2003  ;;  %v7803_v6 = vsel %vm503_vm0, %v1305_v28, 2147483647  ;;  %vm1264_vm1 = vcmp.eq.f32.partialorder %v13292_v27, %v13291_v32  ;;  %v13371_v27 = vld [vmem:[#allocation179_spill] sm:$0xff] }
 0x29a   :  { %13320 = vst [vmem:[#allocation164_spill] sm:$0xff] %v7786_v51  ;;  %v7791_v42 = vpop.xlane.xlu1 %1362  ;;  %vm2005_vm2 = vcmp.eq.f32.partialorder %v13323_v23, %v7786_v51  ;;  %13324 = vst [vmem:[#allocation154_spill] sm:$0xff] %v7803_v6  ;;  %v13326_v23 = vld [vmem:[#allocation193_spill] sm:$0xff]  ;;  %v13330_v51 = vld [vmem:[#allocation75_spill] sm:$0xff] }
 0x29b   :  { %13322 = vst [vmem:[#allocation149_spill] sm:$0xff] %v7791_v42  ;;  %v5427_v47 = vpop.eup %5426  ;;  %4759 = vst.msk [vmem:[%s12166_s4 + $0xe8] sm:$0xff] %vm503_vm0, %v1139_v48  ;;  %v2006_v4 = vsel %vm2005_vm2, %v2001_v61, inf  ;;  %v754_v59 = vsub.f32 %v13327_v49, %v13326_v23  ;;  %v1566_v48 = vcvt.s32.f32 %v1564_v8  ;;  %v2044_v55 = vand.u32 65535, %v13330_v51 }
 0x29c   :  { %v5429_v26 = vpop.eup %5428  ;;  %v1093_v17 = vmul.f32 %v5427_v47, %v13325_v19  ;;  %1051 = vadd.xlane.f32.xlu0 %v1050_v37  ;;  %2007 = vmin.xlane.f32.xlu1 %v2006_v4  ;;  %v7818_v47 = vcvt.s32.f32 %v1760_v22  ;;  %v13333_v19 = vld [vmem:[#allocation212_spill] sm:$0xff]  ;;  %v1805_v61 = vshra.s32 %v7803_v6, 16  ;;  %v812_v37 = vmul.f32 1.442695, %v722_v41  ;;  %v13334_v4 = vld [vmem:[#allocation205_spill] sm:$0xff] }
 0x29d   :  { %v1203_v42 = vmul.f32 %v5429_v26, %v13328_v60  ;;  %v7809_v10 = vpop.xlane.xlu0 %1568  ;;  %v876_v22 = vmul.f32 1.442695, %v754_v59  ;;  %v13335_v26 = vld [vmem:[#allocation203_spill] sm:$0xff]  ;;  %v2046_v41 = vcvt.s32.f32 %v2044_v55 }
 0x29e   :  { %13329 = vst [vmem:[#allocation159_spill] sm:$0xff] %v7809_v10  ;;  %4736 = vst.msk [vmem:[%s12166_s4 + $0x30] sm:$0xff] %vm503_vm0, %v1093_v17  ;;  %v7816_v28 = vpop.xlane.xlu1 %1842  ;;  %vm1570_vm3 = vcmp.eq.f32.partialorder %v13333_v19, %v7809_v10  ;;  %v13337_v19 = vld [vmem:[#allocation206_spill] sm:$0xff]  ;;  %5440 = vpow2.f32 %v812_v37  ;;  %v13342_v37 = vld [vmem:[#allocation208_spill] sm:$0xff] }
 0x29f   :  { %13331 = vst [vmem:[#allocation163_spill] sm:$0xff] %v7816_v28  ;;  %13332 = vst [vmem:[#allocation165_spill] sm:$0xff] %v7818_v47  ;;  %v5431_v60 = vpop.eup %5430  ;;  %v1571_v51 = vsel %vm1570_vm3, %v1566_v48, inf  ;;  %v13336_v28 = vld [vmem:[#allocation67_spill] sm:$0xff]  ;;  %v7840_v48 = vcvt.s32.f32 %v1805_v61  ;;  %5442 = vpow2.f32 %v876_v22 }
 0x2a0   :  { %4791 = vst.msk [vmem:[%s12166_s4 + $0x1e8] sm:$0xff] %vm503_vm0, %v1203_v42  ;;  %v5433_v8 = vpop.eup %5432  ;;  %v1157_v17 = vmul.f32 %v5431_v60, %v13334_v4  ;;  %1763 = vmin.xlane.f32.xlu0 %v7818_v47  ;;  %1572 = vmin.xlane.f32.xlu1 %v1571_v51  ;;  %vm1240_vm4 = vcmp.eq.f32.partialorder %v13336_v28, %v13335_v26  ;;  %v13340_v60 = vld [vmem:[#allocation82_spill] sm:$0xff]  ;;  %v2029_v47 = vand.u32 65535, %v7233_v2 }
 0x2a1   :  { %v1143_v10 = vmul.f32 %v5433_v8, %v13337_v19  ;;  %v7832_v6 = vpop.xlane.xlu0 %2048  ;;  %13339 = vst [vmem:[#allocation169_spill] sm:$0xff] %v7840_v48  ;;  %v7844_v59 = vpop.eup %5434  ;;  %v724_v51 = vsub.f32 %v13305_v56, %v13304_v18  ;;  %v1304_v61 = vsel %vm1240_vm4, %v6508_v31, 8  ;;  %v13343_v18 = vld [vmem:[#allocation199_spill] sm:$0xff]  ;;  %vm1266_vm4 = vcmp.eq.f32.partialorder %v13309_v3, %v13308_v35 }
 0x2a2   :  { %13338 = vst [vmem:[#allocation168_spill] sm:$0xff] %v7832_v6  ;;  %4768 = vst.msk [vmem:[%s12166_s4 + $0x130] sm:$0xff] %vm503_vm0, %v1157_v17  ;;  %v7838_v42 = vpop.xlane.xlu1 %1347  ;;  %vm2050_vm5 = vcmp.eq.f32.partialorder %v13340_v60, %v7832_v6  ;;  %v7869_v22 = vsel %vm503_vm0, %v1304_v61, 2147483647  ;;  %v2031_v2 = vcvt.s32.f32 %v2029_v47 }
 0x2a3   :  { %13341 = vst [vmem:[#allocation172_spill] sm:$0xff] %v7844_v59  ;;  %4761 = vst.msk [vmem:[%s12166_s4 + $0xf8] sm:$0xff] %vm503_vm0, %v1143_v10  ;;  %v2051_v55 = vsel %vm2050_vm5, %v2046_v41, inf  ;;  %v816_v60 = vmul.f32 1.442695, %v724_v51  ;;  %v13344_v10 = vld [vmem:[#allocation64_spill] sm:$0xff] }
 0x2a4   :  { %v5437_v8 = vpop.eup %5436  ;;  %1808 = vmin.xlane.f32.xlu0 %v7840_v48  ;;  %2052 = vmin.xlane.f32.xlu1 %v2051_v55  ;;  %v756_v41 = vsub.f32 %v13344_v10, %v13343_v18  ;;  %v960_v55 = vsel %vm503_vm0, %v7844_v59, 0.0  ;;  %13345 = vst [vmem:[#allocation184_spill] sm:$0xff] %v7869_v22  ;;  %v1549_v51 = vand.u32 65535, %v7215_v44  ;;  %v1790_v56 = vshra.s32 %v7869_v22, 16 }
 0x2a5   :  { %v1207_v4 = vmul.f32 %v5437_v8, %v13342_v37  ;;  %v914_v17 = vpop.xlane.xlu0 %913  ;;  %v7871_v8 = vpop.eup %5438 }
 0x2a6   :  { %v7858_v19 = vpop.xlane.xlu1 %1827  ;;  %5444 = vrcp.f32 %v914_v17  ;;  %13346 = vst [vmem:[#allocation175_spill] sm:$0xff] %v7871_v8  ;;  %v880_v6 = vmul.f32 1.442695, %v756_v41  ;;  %v1056_v61 = vsel %vm503_vm0, %v7871_v8, 0.0  ;;  %v13350_v41 = vld [vmem:[#allocation71_spill] sm:$0xff]  ;;  %v13354_v8 = vld [vmem:[#allocation98_spill] sm:$0xff] }
 0x2a7   :  { %4793 = vst.msk [vmem:[%s12166_s4 + $0x1f8] sm:$0xff] %vm503_vm0, %v1207_v4  ;;  %v726_v4 = vsub.f32 %v13336_v28, %v13335_v26  ;;  %v2074_v59 = vand.u32 65535, %v13354_v8 }
 0x2a8   :  { %961 = vadd.xlane.f32.xlu0 %v960_v55  ;;  %v1551_v55 = vcvt.s32.f32 %v1549_v51 }
 0x2a9   :  { %v1010_v37 = vpop.xlane.xlu0 %1009 }
 0x2aa   :  { %v7874_v17 = vpop.xlane.xlu1 %1392  ;;  %5446 = vrcp.f32 %v1010_v37  ;;  %v13351_v37 = vld [vmem:[#allocation68_spill] sm:$0xff] }
 0x2ab   :  { %13347 = vst [vmem:[#allocation177_spill] sm:$0xff] %v7874_v17  ;;  %5448 = vpow2.f32 %v816_v60  ;;  %v7886_v17 = vcvt.s32.f32 %v1790_v56  ;;  %v820_v60 = vmul.f32 1.442695, %v726_v4  ;;  %v758_v26 = vsub.f32 %v13351_v37, %v13350_v41  ;;  %v7892_v22 = vpop.eup %5440 }
 0x2ac   :  { %1057 = vadd.xlane.f32.xlu0 %v1056_v61  ;;  %5450 = vpow2.f32 %v880_v6  ;;  %v1594_v56 = vand.u32 65535, %v7247_v39  ;;  %v7898_v61 = vpop.eup %5442  ;;  %v966_v4 = vsel %vm503_vm0, %v7892_v22, 0.0 }
 0x2ad   :  { %v7881_v48 = vpop.xlane.xlu0 %1553  ;;  %13349 = vst [vmem:[#allocation183_spill] sm:$0xff] %v7886_v17  ;;  %5452 = vpow2.f32 %v820_v60  ;;  %v884_v6 = vmul.f32 1.442695, %v758_v26 }
 0x2ae   :  { %v7884_v44 = vpop.xlane.xlu1 %1872  ;;  %vm1555_vm6 = vcmp.eq.f32.partialorder %v7241_v14, %v7881_v48  ;;  %v1596_v39 = vcvt.s32.f32 %v1594_v56  ;;  %v13356_v56 = vld [vmem:[#allocation87_spill] sm:$0xff] }
 0x2af   :  { %13348 = vst [vmem:[#allocation180_spill] sm:$0xff] %v7884_v44  ;;  %v1556_v28 = vsel %vm1555_vm6, %v1551_v55, inf  ;;  %5454 = vpow2.f32 %v884_v6  ;;  %v13358_v6 = vld [vmem:[#allocation88_spill] sm:$0xff] }
 0x2b0   :  { %1793 = vmin.xlane.f32.xlu0 %v7886_v17  ;;  %1557 = vmin.xlane.f32.xlu1 %v1556_v28  ;;  %v13352_v28 = vld [vmem:[#allocation83_spill] sm:$0xff] }
 0x2b1   :  { %v7895_v51 = vpop.xlane.xlu0 %2033 }
 0x2b2   :  { %v7900_v44 = vpop.xlane.xlu1 %1377  ;;  %vm2035_vm7 = vcmp.eq.f32.partialorder %v7254_v33, %v7895_v51  ;;  %v13355_v33 = vld [vmem:[#allocation103_spill] sm:$0xff] }
 0x2b3   :  { %v5445_v14 = vpop.eup %5444  ;;  %v2036_v55 = vsel %vm2035_vm7, %v2031_v2, inf  ;;  %v1062_v2 = vsel %vm503_vm0, %v7898_v61, 0.0  ;;  %vm1268_vm7 = vcmp.eq.f32.partialorder %v13327_v49, %v13326_v23  ;;  %v13378_v49 = vld [vmem:[#allocation58_spill] sm:$0xff] }
 0x2b4   :  { %v1097_v17 = vmul.f32 %v5445_v14, %v13352_v28  ;;  %967 = vadd.xlane.f32.xlu0 %v966_v4  ;;  %2037 = vmin.xlane.f32.xlu1 %v2036_v55 }
 0x2b5   :  { %v7907_v47 = vpop.xlane.xlu0 %1598 }
 0x2b6   :  { %13353 = vst [vmem:[#allocation185_spill] sm:$0xff] %v7907_v47  ;;  %4738 = vst.msk [vmem:[%s12166_s4 + $0x40] sm:$0xff] %vm503_vm0, %v1097_v17  ;;  %vm1600_vm8 = vcmp.eq.f32.partialorder %v13355_v33, %v7907_v47  ;;  %v7916_v60 = vpop.xlane.xlu1 %1857  ;;  %v2076_v17 = vcvt.s32.f32 %v2074_v59 }
 0x2b7   :  { %v5447_v26 = vpop.eup %5446  ;;  %v1601_v14 = vsel %vm1600_vm8, %v1596_v39, inf }
 0x2b8   :  { %v7920_v4 = vpop.eup %5448  ;;  %v1161_v8 = vmul.f32 %v5447_v26, %v13356_v56  ;;  %1063 = vadd.xlane.f32.xlu0 %v1062_v2  ;;  %1602 = vmin.xlane.f32.xlu1 %v1601_v14  ;;  %v1324_v56 = vsel %vm1260_vm10, %v6508_v31, 8  ;;  %vm1270_vm10 = vcmp.eq.f32.partialorder %v13344_v10, %v13343_v18  ;;  %v13382_v18 = vld [vmem:[#allocation192_spill] sm:$0xff]  ;;  %v13383_v10 = vld [vmem:[#allocation62_spill] sm:$0xff] }
 0x2b9   :  { %v7923_v55 = vpop.xlane.xlu0 %2078  ;;  %v972_v28 = vsel %vm503_vm0, %v7920_v4, 0.0  ;;  %v7933_v33 = vpop.eup %5450  ;;  %v7952_v29 = vsel %vm503_vm0, %v1324_v56, 2147483647 }
 0x2ba   :  { %13357 = vst [vmem:[#allocation187_spill] sm:$0xff] %v7923_v55  ;;  %4770 = vst.msk [vmem:[%s12166_s4 + $0x140] sm:$0xff] %vm503_vm0, %v1161_v8  ;;  %vm2080_vm9 = vcmp.eq.f32.partialorder %v13358_v6, %v7923_v55  ;;  %v7937_v59 = vpop.xlane.xlu1 %1422  ;;  %v1068_v2 = vsel %vm503_vm0, %v7933_v33, 0.0  ;;  %v7941_v14 = vpop.eup %5452  ;;  %v13360_v8 = vld [vmem:[#allocation157_spill] sm:$0xff] }
 0x2bb   :  { %v2081_v39 = vsel %vm2080_vm9, %v2076_v17, inf  ;;  %13359 = vst [vmem:[#allocation189_spill] sm:$0xff] %v7937_v59  ;;  %v13361_v17 = vld [vmem:[#allocation42_spill] sm:$0xff] }
 0x2bc   :  { %973 = vadd.xlane.f32.xlu0 %v972_v28  ;;  %2082 = vmin.xlane.f32.xlu1 %v2081_v39  ;;  %vm1261_vm11 = vcmp.eq.f32.partialorder %v13361_v17, %v13360_v8  ;;  %v1579_v28 = vand.u32 65535, %v7316_v57  ;;  %v7954_v55 = vpop.eup %5454  ;;  %v2090_v17 = vshra.s32 %v7952_v29, 16 }
 0x2bd   :  { %v920_v26 = vpop.xlane.xlu0 %919  ;;  %v1074_v56 = vsel %vm503_vm0, %v7954_v55, 0.0 }
 0x2be   :  { %5456 = vrcp.f32 %v920_v26  ;;  %v7947_v39 = vpop.xlane.xlu1 %1902  ;;  %v978_v26 = vsel %vm503_vm0, %v7941_v14, 0.0  ;;  %v1581_v57 = vcvt.s32.f32 %v1579_v28  ;;  %v13364_v28 = vld [vmem:[#allocation46_spill] sm:$0xff]  ;;  %v7978_v59 = vcvt.s32.f32 %v2090_v17 }
 0x2bf   :  { %13362 = vst [vmem:[#allocation191_spill] sm:$0xff] %v7947_v39  ;;  %vm1263_vm14 = vcmp.eq.f32.partialorder %v13364_v28, %v13363_v16  ;;  %v1624_v39 = vand.u32 65535, %v7358_v36  ;;  %v13368_v28 = vld [vmem:[#allocation50_spill] sm:$0xff] }
 0x2c0   :  { %1069 = vadd.xlane.f32.xlu0 %v1068_v2  ;;  %v1325_v2 = vsel %vm1261_vm11, %v6508_v31, 8  ;;  %vm1271_vm11 = vcmp.eq.f32.partialorder %v13383_v10, %v13382_v18 }
 0x2c1   :  { %v1016_v6 = vpop.xlane.xlu0 %1015 }
 0x2c2   :  { %5458 = vrcp.f32 %v1016_v6  ;;  %v2059_v6 = vand.u32 65535, %v7338_v40  ;;  %v7973_v40 = vpop.xlane.xlu1 %1407 }
 0x2c4   :  { %979 = vadd.xlane.f32.xlu0 %v978_v26  ;;  %v7968_v26 = vsel %vm503_vm0, %v1325_v2, 2147483647 }
 0x2c5   :  { %v7959_v8 = vpop.xlane.xlu0 %1583  ;;  %v2105_v2 = vshra.s32 %v7968_v26, 16 }
 0x2c6   :  { %vm1585_vm13 = vcmp.eq.f32.partialorder %v7348_v38, %v7959_v8  ;;  %v2061_v38 = vcvt.s32.f32 %v2059_v6  ;;  %v1327_v6 = vsel %vm1263_vm14, %v6508_v31, 8 }
 0x2c7   :  { %v1586_v47 = vsel %vm1585_vm13, %v1581_v57, inf  ;;  %vm1272_vm13 = vcmp.eq.f32.partialorder %v13351_v37, %v13350_v41 }
 0x2c8   :  { %1075 = vadd.xlane.f32.xlu0 %v1074_v56  ;;  %1587 = vmin.xlane.f32.xlu1 %v1586_v47  ;;  %v7984_v56 = vsel %vm503_vm0, %v1326_v63, 2147483647  ;;  %v7997_v63 = vcvt.s32.f32 %v2105_v2  ;;  %v13367_v2 = vld [vmem:[#allocation173_spill] sm:$0xff]  ;;  %v1336_v41 = vsel %vm1272_vm13, %v6508_v31, 8 }
 0x2c9   :  { %v7975_v5 = vpop.xlane.xlu0 %2063  ;;  %vm1265_vm3 = vcmp.eq.f32.partialorder %v13368_v28, %v13367_v2  ;;  %v1330_v28 = vsel %vm1266_vm4, %v6508_v31, 8 }
 0x2ca   :  { %vm2065_vm15 = vcmp.eq.f32.partialorder %v7367_v58, %v7975_v5  ;;  %v1626_v58 = vcvt.s32.f32 %v1624_v39  ;;  %v13366_v39 = vld [vmem:[#allocation109_spill] sm:$0xff] }
 0x2cb   :  { %v5457_v47 = vpop.eup %5456  ;;  %v2066_v57 = vsel %vm2065_vm15, %v2061_v38, inf  ;;  %v8002_v38 = vpop.xlane.xlu1 %1887 }
 0x2cc   :  { %v1101_v16 = vmul.f32 %v5457_v47, %v7283_v1  ;;  %2093 = vmin.xlane.f32.xlu0 %v7978_v59  ;;  %2067 = vmin.xlane.f32.xlu1 %v2066_v57  ;;  %v2120_v1 = vshra.s32 %v7984_v56, 16  ;;  %v8005_v57 = vsel %vm503_vm0, %v1327_v6, 2147483647 }
 0x2cd   :  { %v7991_v36 = vpop.xlane.xlu0 %1628  ;;  %v2135_v6 = vshra.s32 %v8005_v57, 16 }
 0x2ce   :  { %13365 = vst [vmem:[#allocation195_spill] sm:$0xff] %v7991_v36  ;;  %4740 = vst.msk [vmem:[%s12166_s4 + $0x50] sm:$0xff] %vm503_vm0, %v1101_v16  ;;  %vm1630_vm2 = vcmp.eq.f32.partialorder %v7384_v43, %v7991_v36  ;;  %v1328_v16 = vsel %vm1264_vm1, %v6508_v31, 8  ;;  %v13372_v36 = vld [vmem:[#allocation54_spill] sm:$0xff] }
 0x2cf   :  { %v5459_v17 = vpop.eup %5458  ;;  %v1631_v47 = vsel %vm1630_vm2, %v1626_v58, inf  ;;  %v8016_v58 = vcvt.s32.f32 %v2120_v1  ;;  %v8029_v1 = vcvt.s32.f32 %v2135_v6  ;;  %vm1267_vm5 = vcmp.eq.f32.partialorder %v13372_v36, %v13371_v27 }
 0x2d0   :  { %v1165_v32 = vmul.f32 %v5459_v17, %v13366_v39  ;;  %2108 = vmin.xlane.f32.xlu0 %v7997_v63  ;;  %1632 = vmin.xlane.f32.xlu1 %v1631_v47  ;;  %v8020_v17 = vsel %vm503_vm0, %v1328_v16, 2147483647  ;;  %v1329_v47 = vsel %vm1265_vm3, %v6508_v31, 8  ;;  %v8026_v39 = vpop.xlane.xlu1 %1452 }
 0x2d1   :  { %v926_v43 = vpop.xlane.xlu0 %925  ;;  %13369 = vst [vmem:[#allocation204_spill] sm:$0xff] %v8020_v17  ;;  %13370 = vst [vmem:[#allocation198_spill] sm:$0xff] %v8026_v39  ;;  %v8033_v16 = vsel %vm503_vm0, %v1329_v47, 2147483647  ;;  %v8050_v39 = vsel %vm503_vm0, %v1330_v28, 2147483647 }
 0x2d2   :  { %4772 = vst.msk [vmem:[%s12166_s4 + $0x150] sm:$0xff] %vm503_vm0, %v1165_v32  ;;  %5460 = vrcp.f32 %v926_v43  ;;  %v1609_v32 = vand.u32 65535, %v7408_v7  ;;  %v2150_v43 = vshra.s32 %v8020_v17, 16  ;;  %v1654_v7 = vand.u32 65535, %v7421_v50  ;;  %13375 = vst [vmem:[#allocation200_spill] sm:$0xff] %v8050_v39 }
 0x2d3   :  { %v2165_v6 = vshra.s32 %v8033_v16, 16 }
 0x2d4   :  { %2123 = vmin.xlane.f32.xlu0 %v8016_v58  ;;  %v1611_v3 = vcvt.s32.f32 %v1609_v32  ;;  %v8047_v47 = vpop.xlane.xlu1 %1932  ;;  %v1331_v32 = vsel %vm1267_vm5, %v6508_v31, 8 }
 0x2d5   :  { %v1022_v2 = vpop.xlane.xlu0 %1021  ;;  %13374 = vst [vmem:[#allocation209_spill] sm:$0xff] %v8047_v47  ;;  %v8060_v27 = vcvt.s32.f32 %v2165_v6  ;;  %v8068_v36 = vsel %vm503_vm0, %v1331_v32, 2147483647  ;;  %v13377_v6 = vld [vmem:[#allocation186_spill] sm:$0xff] }
 0x2d6   :  { %5462 = vrcp.f32 %v1022_v2  ;;  %v8042_v2 = vcvt.s32.f32 %v2150_v43  ;;  %v1656_v43 = vcvt.s32.f32 %v1654_v7  ;;  %v1332_v7 = vsel %vm1268_vm7, %v6508_v31, 8 }
 0x2d7   :  { %vm1269_vm9 = vcmp.eq.f32.partialorder %v13378_v49, %v13377_v6  ;;  %v2195_v32 = vshra.s32 %v8068_v36, 16 }
 0x2d8   :  { %2138 = vmin.xlane.f32.xlu0 %v8029_v1  ;;  %v1333_v6 = vsel %vm1269_vm9, %v6508_v31, 8 }
 0x2d9   :  { %v8039_v35 = vpop.xlane.xlu0 %1613 }
 0x2da   :  { %13373 = vst [vmem:[#allocation207_spill] sm:$0xff] %v8039_v35  ;;  %vm1615_vm6 = vcmp.eq.f32.partialorder %v7429_v9, %v8039_v35  ;;  %v2180_v9 = vshra.s32 %v8050_v39, 16 }
 0x2db   :  { %v8052_v17 = vsel %vm1615_vm6, %v1611_v3, inf  ;;  %v8065_v3 = vpop.xlane.xlu1 %1437 }
 0x2dc   :  { %2153 = vmin.xlane.f32.xlu0 %v8042_v2 }
 0x2dd   :  { %v8058_v50 = vpop.xlane.xlu0 %1658 }
 0x2de   :  { %13376 = vst [vmem:[#allocation210_spill] sm:$0xff] %v8058_v50  ;;  %vm1660_vm8 = vcmp.eq.f32.partialorder %v7449_v20, %v8058_v50  ;;  %v8081_v20 = vcvt.s32.f32 %v2180_v9  ;;  %v8099_v9 = vcvt.s32.f32 %v2195_v32 }
 0x2df   :  { %v5461_v28 = vpop.eup %5460  ;;  %v8070_v35 = vsel %vm1660_vm8, %v1656_v43, inf  ;;  %v8092_v49 = vpop.xlane.xlu1 %1917 }
 0x2e0   :  { %v1105_v23 = vmul.f32 %v5461_v28, %v7388_v12  ;;  %2168 = vmin.xlane.f32.xlu0 %v8060_v27  ;;  %13379 = vst [vmem:[#allocation211_spill] sm:$0xff] %v8081_v20  ;;  %v8085_v12 = vsel %vm503_vm0, %v1332_v7, 2147483647  ;;  %v13381_v28 = vld [vmem:[#allocation118_spill] sm:$0xff] }
 0x2e1   :  { %v932_v47 = vpop.xlane.xlu0 %931  ;;  %13380 = vst [vmem:[#allocation201_spill] sm:$0xff] %v8085_v12  ;;  %v2210_v7 = vshra.s32 %v8085_v12, 16 }
 0x2e2   :  { %4742 = vst.msk [vmem:[%s12166_s4 + $0x60] sm:$0xff] %vm503_vm0, %v1105_v23  ;;  %5464 = vrcp.f32 %v932_v47  ;;  %v1639_v47 = vand.u32 65535, %v7484_v53 }
 0x2e3   :  { %v5463_v43 = vpop.eup %5462 }
 0x2e4   :  { %v1169_v50 = vmul.f32 %v5463_v43, %v13381_v28  ;;  %2183 = vmin.xlane.f32.xlu0 %v8081_v20  ;;  %v8103_v43 = vsel %vm503_vm0, %v1333_v6, 2147483647  ;;  %v1334_v28 = vsel %vm1270_vm10, %v6508_v31, 8  ;;  %v1641_v20 = vcvt.s32.f32 %v1639_v47  ;;  %v8117_v6 = vpop.xlane.xlu1 %1482 }
 0x2e5   :  { %v1028_v23 = vpop.xlane.xlu0 %1027  ;;  %v2225_v32 = vshra.s32 %v8103_v43, 16  ;;  %13386 = vst [vmem:[#allocation212_spill] sm:$0xff] %v8117_v6  ;;  %v8120_v12 = vsel %vm503_vm0, %v1334_v28, 2147483647  ;;  %v1335_v47 = vsel %vm1271_vm11, %v6508_v31, 8 }
 0x2e6   :  { %4774 = vst.msk [vmem:[%s12166_s4 + $0x160] sm:$0xff] %vm503_vm0, %v1169_v50  ;;  %5466 = vrcp.f32 %v1028_v23  ;;  %v1684_v50 = vand.u32 65535, %v7508_v30  ;;  %v8112_v23 = vcvt.s32.f32 %v2210_v7  ;;  %13387 = vst [vmem:[#allocation205_spill] sm:$0xff] %v8120_v12 }
 0x2e7   :  { %v8130_v18 = vcvt.s32.f32 %v2225_v32  ;;  %v13391_v32 = vld [vmem:[#allocation66_spill] sm:$0xff] }
 0x2e8   :  { %2198 = vmin.xlane.f32.xlu0 %v8099_v9  ;;  %13385 = vst [vmem:[#allocation75_spill] sm:$0xff] %v8112_v23  ;;  %v1686_v7 = vcvt.s32.f32 %v1684_v50  ;;  %v13390_v50 = vld [vmem:[#allocation197_spill] sm:$0xff]  ;;  %v8145_v37 = vpop.xlane.xlu1 %1962 }
 0x2e9   :  { %v8109_v53 = vpop.xlane.xlu0 %1643  ;;  %vm1273_vm15 = vcmp.eq.f32.partialorder %v13391_v32, %v13390_v50  ;;  %13392 = vst [vmem:[#allocation208_spill] sm:$0xff] %v8145_v37  ;;  %v13396_v50 = vld [vmem:[#allocation124_spill] sm:$0xff] }
 0x2ea   :  { %13384 = vst [vmem:[#allocation202_spill] sm:$0xff] %v8109_v53  ;;  %vm1645_vm12 = vcmp.eq.f32.partialorder %v7513_v25, %v8109_v53  ;;  %v2240_v25 = vshra.s32 %v8120_v12, 16  ;;  %v1337_v37 = vsel %vm1273_vm15, %v6508_v31, 8  ;;  %v1349_v12 = vcvt.f32.s32 %v7838_v42 }
 0x2eb   :  { %v8122_v39 = vsel %vm1645_vm12, %v1641_v20, inf  ;;  %v8136_v20 = vsel %vm503_vm0, %v1335_v47, 2147483647  ;;  %v8174_v42 = vsel %vm503_vm0, %v1337_v37, 2147483647 }
 0x2ec   :  { %2213 = vmin.xlane.f32.xlu0 %v8112_v23  ;;  %13389 = vst [vmem:[#allocation82_spill] sm:$0xff] %v8136_v20 }
 0x2ed   :  { %v8128_v30 = vpop.xlane.xlu0 %1688 }
 0x2ee   :  { %13388 = vst [vmem:[#allocation206_spill] sm:$0xff] %v8128_v30  ;;  %vm1690_vm14 = vcmp.eq.f32.partialorder %v7527_v54, %v8128_v30  ;;  %v8151_v54 = vcvt.s32.f32 %v2240_v25  ;;  %v8156_v30 = vsel %vm503_vm0, %v1336_v41, 2147483647  ;;  %v1669_v25 = vand.u32 65535, %v7554_v11 }
 0x2ef   :  { %v5465_v28 = vpop.eup %5464  ;;  %v8138_v10 = vsel %vm1690_vm14, %v1686_v7, inf  ;;  %v13394_v7 = vld [vmem:[#allocation79_spill] sm:$0xff]  ;;  %13395 = vst [vmem:[#allocation98_spill] sm:$0xff] %v8156_v30  ;;  %v1829_v11 = vcvt.f32.s32 %v7858_v19 }
 0x2f0   :  { %v1109_v53 = vmul.f32 %v5465_v28, %v7445_v13  ;;  %2228 = vmin.xlane.f32.xlu0 %v8130_v18  ;;  %13393 = vst [vmem:[#allocation83_spill] sm:$0xff] %v8151_v54  ;;  %v2255_v13 = vshra.s32 %v8136_v20, 16  ;;  %v1350_v28 = vcvt.f32.s32 %v13394_v7  ;;  %v13398_v7 = vld [vmem:[#allocation84_spill] sm:$0xff] }
 0x2f1   :  { %v938_v6 = vpop.xlane.xlu0 %937 }
 0x2f2   :  { %4744 = vst.msk [vmem:[%s12166_s4 + $0x70] sm:$0xff] %vm503_vm0, %v1109_v53  ;;  %5468 = vrcp.f32 %v938_v6  ;;  %v8162_v53 = vpop.xlane.xlu1 %1467  ;;  %v8169_v41 = vcvt.s32.f32 %v2255_v13  ;;  %v1714_v13 = vand.u32 65535, %v7574_v62  ;;  %v1379_v62 = vcvt.f32.s32 %v7900_v44  ;;  %v13406_v44 = vld [vmem:[#allocation7_spill] sm:$0xff] }
 0x2f3   :  { %v5467_v47 = vpop.eup %5466 }
 0x2f4   :  { %v1173_v32 = vmul.f32 %v5467_v47, %v13396_v50  ;;  %2243 = vmin.xlane.f32.xlu0 %v8151_v54  ;;  %13397 = vst [vmem:[#allocation103_spill] sm:$0xff] %v8169_v41  ;;  %v2270_v50 = vshra.s32 %v8156_v30, 16  ;;  %v1351_v47 = vshll.u32 %v1350_v28, 16  ;;  %v1830_v54 = vcvt.f32.s32 %v13398_v7  ;;  %v13401_v7 = vld [vmem:[#allocation94_spill] sm:$0xff] }
 0x2f5   :  { %v1034_v6 = vpop.xlane.xlu0 %1033  ;;  %v2285_v28 = vshra.s32 %v8174_v42, 16  ;;  %v1380_v30 = vcvt.f32.s32 %v13401_v7 }
 0x2f6   :  { %4776 = vst.msk [vmem:[%s12166_s4 + $0x170] sm:$0xff] %vm503_vm0, %v1173_v32  ;;  %5470 = vrcp.f32 %v1034_v6  ;;  %v8177_v20 = vadd.s32 %v1351_v47, %v1349_v12  ;;  %v1671_v32 = vcvt.s32.f32 %v1669_v25  ;;  %v8183_v6 = vcvt.s32.f32 %v2270_v50 }
 0x2f7   :  { %v1831_v37 = vshll.u32 %v1830_v54, 16  ;;  %v1716_v50 = vcvt.s32.f32 %v1714_v13  ;;  %v1381_v47 = vshll.u32 %v1380_v30, 16 }
 0x2f8   :  { %2258 = vmin.xlane.f32.xlu0 %v8169_v41  ;;  %13399 = vst [vmem:[#allocation87_spill] sm:$0xff] %v8177_v20  ;;  %v8189_v41 = vpop.xlane.xlu1 %1947  ;;  %vm2298_vm2 = vcmp.eq.s32.totalorder %v6508_v31, %v8177_v20 }
 0x2f9   :  { %v8180_v23 = vpop.xlane.xlu0 %1673  ;;  %v8194_v19 = vadd.s32 %v1831_v37, %v1829_v11  ;;  %v13405_v11 = vld [vmem:[#allocation128_spill] sm:$0xff]  ;;  %v8214_v13 = vsel %vm2298_vm2, -1e+30, %v13406_v44 }
 0x2fa   :  { %13400 = vst [vmem:[#allocation88_spill] sm:$0xff] %v8180_v23  ;;  %vm1675_vm1 = vcmp.eq.f32.partialorder %v7587_v45, %v8180_v23  ;;  %v8201_v45 = vcvt.s32.f32 %v2285_v28  ;;  %13407 = vst [vmem:[#allocation79_spill] sm:$0xff] %v8214_v13  ;;  %v8216_v28 = vadd.s32 %v1381_v47, %v1379_v62  ;;  %v2426_v62 = vsel %vm503_vm0, %v8214_v13, -inf  ;;  %v13412_v44 = vld [vmem:[#allocation8_spill] sm:$0xff] }
 0x2fb   :  { %v8191_v12 = vsel %vm1675_vm1, %v1671_v32, inf  ;;  %13402 = vst [vmem:[#allocation109_spill] sm:$0xff] %v8194_v19  ;;  %v13404_v32 = vld [vmem:[#allocation99_spill] sm:$0xff]  ;;  %vm2330_vm4 = vcmp.eq.s32.totalorder %v6508_v31, %v8194_v19 }
 0x2fc   :  { %2273 = vmin.xlane.f32.xlu0 %v8183_v6  ;;  %v1860_v7 = vcvt.f32.s32 %v13404_v32  ;;  %13408 = vst [vmem:[#allocation124_spill] sm:$0xff] %v8216_v28  ;;  %v13410_v32 = vld [vmem:[#allocation92_spill] sm:$0xff]  ;;  %v8235_v20 = vsel %vm2330_vm4, -1e+30, %v13412_v44  ;;  %vm2300_vm5 = vcmp.eq.s32.totalorder %v6508_v31, %v8216_v28 }
 0x2fd   :  { %v8197_v25 = vpop.xlane.xlu0 %1718  ;;  %13413 = vst [vmem:[#allocation94_spill] sm:$0xff] %v8235_v20 }
 0x2fe   :  { %13403 = vst [vmem:[#allocation118_spill] sm:$0xff] %v8197_v25  ;;  %vm1720_vm3 = vcmp.eq.f32.partialorder %v7609_v52, %v8197_v25  ;;  %v1859_v52 = vcvt.f32.s32 %v7916_v60  ;;  %v8219_v25 = vpop.xlane.xlu1 %1512  ;;  %v13411_v60 = vld [vmem:[#allocation112_spill] sm:$0xff] }
 0x2ff   :  { %v5469_v54 = vpop.eup %5468  ;;  %v8206_v23 = vsel %vm1720_vm3, %v1716_v50, inf  ;;  %13409 = vst [vmem:[#allocation84_spill] sm:$0xff] %v8219_v25 }
 0x300   :  { %v1113_v37 = vmul.f32 %v5469_v54, %v13405_v11  ;;  %2288 = vmin.xlane.f32.xlu0 %v8201_v45  ;;  %v1861_v54 = vshll.u32 %v1860_v7, 16  ;;  %v1410_v11 = vcvt.f32.s32 %v13410_v32 }
 0x301   :  { %v944_v30 = vpop.xlane.xlu0 %943 }
 0x302   :  { %4746 = vst.msk [vmem:[%s12166_s4 + $0x80] sm:$0xff] %vm503_vm0, %v1113_v37  ;;  %5472 = vrcp.f32 %v944_v30  ;;  %v8237_v25 = vadd.s32 %v1861_v54, %v1859_v52  ;;  %v1409_v37 = vcvt.f32.s32 %v7973_v40  ;;  %v1411_v7 = vshll.u32 %v1410_v11, 16  ;;  %v13416_v40 = vld [vmem:[#allocation12_spill] sm:$0xff] }
 0x303   :  { %v5471_v50 = vpop.eup %5470  ;;  %v2522_v52 = vsel %vm503_vm0, %v8235_v20, -inf  ;;  %v8255_v54 = vsel %vm2300_vm5, -1e+30, %v13416_v40  ;;  %v13420_v40 = vld [vmem:[#allocation11_spill] sm:$0xff]  ;;  %v13422_v20 = vld [vmem:[#allocation102_spill] sm:$0xff] }
 0x304   :  { %v1177_v47 = vmul.f32 %v5471_v50, %v13411_v60  ;;  %2427 = vmax.xlane.f32.xlu0 %v2426_v62  ;;  %13414 = vst [vmem:[#allocation99_spill] sm:$0xff] %v8237_v25  ;;  %v13415_v50 = vld [vmem:[#allocation113_spill] sm:$0xff]  ;;  %v8247_v62 = vpop.xlane.xlu1 %1992  ;;  %13417 = vst [vmem:[#allocation128_spill] sm:$0xff] %v8255_v54  ;;  %v8257_v60 = vadd.s32 %v1411_v7, %v1409_v37  ;;  %vm2332_vm6 = vcmp.eq.s32.totalorder %v6508_v31, %v8237_v25 }
 0x305   :  { %v1040_v30 = vpop.xlane.xlu0 %1039  ;;  %v1890_v32 = vcvt.f32.s32 %v13415_v50  ;;  %v8273_v37 = vsel %vm2332_vm6, -1e+30, %v13420_v40  ;;  %v1439_v7 = vcvt.f32.s32 %v8065_v3  ;;  %v13423_v40 = vld [vmem:[#allocation15_spill] sm:$0xff] }
 0x306   :  { %4778 = vst.msk [vmem:[%s12166_s4 + $0x180] sm:$0xff] %vm503_vm0, %v1177_v47  ;;  %5474 = vrcp.f32 %v1040_v30  ;;  %13418 = vst [vmem:[#allocation7_spill] sm:$0xff] %v8257_v60  ;;  %v1889_v47 = vcvt.f32.s32 %v8002_v38  ;;  %v13419_v30 = vld [vmem:[#allocation119_spill] sm:$0xff]  ;;  %vm2302_vm7 = vcmp.eq.s32.totalorder %v6508_v31, %v8257_v60 }
 0x307   :  { %v1891_v11 = vshll.u32 %v1890_v32, 16  ;;  %v1440_v50 = vcvt.f32.s32 %v13419_v30  ;;  %v8290_v3 = vsel %vm2302_vm7, -1e+30, %v13423_v40 }
 0x308   :  { %2523 = vmax.xlane.f32.xlu0 %v2522_v52  ;;  %v2432_v52 = vsel %vm503_vm0, %v8255_v54, -inf  ;;  %v1920_v54 = vcvt.f32.s32 %v13422_v20 }
 0x309   :  { %v8260_v44 = vpop.xlane.xlu0 %1703  ;;  %v8265_v19 = vpop.xlane.xlu1 %1497  ;;  %v8275_v38 = vadd.s32 %v1891_v11, %v1889_v47  ;;  %v1441_v30 = vshll.u32 %v1440_v50, 16  ;;  %v1919_v11 = vcvt.f32.s32 %v8092_v49 }
 0x30a   :  { %v1921_v20 = vshll.u32 %v1920_v54, 16  ;;  %v13429_v54 = vld [vmem:[#allocation133_spill] sm:$0xff] }
 0x30b   :  { %13421 = vst [vmem:[#allocation92_spill] sm:$0xff] %v8275_v38  ;;  %v8292_v47 = vadd.s32 %v1441_v30, %v1439_v7  ;;  %vm12659_vm8 = vcmp.eq.s32.totalorder %v6508_v31, %v8275_v38  ;;  %v2438_v7 = vsel %vm503_vm0, %v8290_v3, -inf  ;;  %v13426_v30 = vld [vmem:[#allocation16_spill] sm:$0xff] }
 0x30c   :  { %2433 = vmax.xlane.f32.xlu0 %v2432_v52  ;;  %v2528_v52 = vsel %vm503_vm0, %v8273_v37, -inf  ;;  %v8309_v40 = vsel %vm12659_vm8, -1e+30, %v13426_v30  ;;  %v8311_v60 = vadd.s32 %v1921_v20, %v1919_v11 }
 0x30d   :  { %v8278_v28 = vpop.xlane.xlu0 %1748  ;;  %13424 = vst [vmem:[#allocation112_spill] sm:$0xff] %v8292_v47  ;;  %v1978_v13 = vpop.xlane.xlu1 %1977  ;;  %13427 = vst [vmem:[#allocation8_spill] sm:$0xff] %v8309_v40  ;;  %vm12573_vm9 = vcmp.eq.s32.totalorder %v6508_v31, %v8292_v47  ;;  %v2534_v11 = vsel %vm503_vm0, %v8309_v40, -inf }
 0x30e   :  { %13428 = vst [vmem:[#allocation113_spill] sm:$0xff] %v8311_v60  ;;  %vm12569_vm10 = vcmp.eq.s32.totalorder %v6508_v31, %v8311_v60  ;;  %v1979_v38 = vcvt.f32.s32 %v1978_v13 }
 0x30f   :  { %v5473_v32 = vpop.eup %5472 }
 0x310   :  { %v1117_v25 = vmul.f32 %v5473_v32, %v7613_v0  ;;  %2529 = vmax.xlane.f32.xlu0 %v2528_v52  ;;  %v13425_v32 = vld [vmem:[#allocation129_spill] sm:$0xff] }
 0x311   :  { %v950_v50 = vpop.xlane.xlu0 %949  ;;  %v1470_v52 = vcvt.f32.s32 %v13425_v32  ;;  %v8321_v32 = vpop.xlane.xlu1 %1542 }
 0x312   :  { %4748 = vst.msk [vmem:[%s12166_s4 + $0x90] sm:$0xff] %vm503_vm0, %v1117_v25  ;;  %5476 = vrcp.f32 %v950_v50  ;;  %v1469_v25 = vcvt.f32.s32 %v8162_v53  ;;  %v13430_v53 = vld [vmem:[#allocation19_spill] sm:$0xff] }
 0x313   :  { %v5475_v0 = vpop.eup %5474  ;;  %v8329_v20 = vsel %vm12573_vm9, -1e+30, %v13430_v53 }
 0x314   :  { %v1181_v49 = vmul.f32 %v5475_v0, %v7624_v24  ;;  %2439 = vmax.xlane.f32.xlu0 %v2438_v7  ;;  %v1471_v24 = vshll.u32 %v1470_v52, 16  ;;  %v1950_v0 = vcvt.f32.s32 %v13429_v54  ;;  %13431 = vst [vmem:[#allocation12_spill] sm:$0xff] %v8329_v20  ;;  %v2444_v54 = vsel %vm503_vm0, %v8329_v20, -inf }
 0x315   :  { %v1046_v50 = vpop.xlane.xlu0 %1045  ;;  %v8350_v53 = vpop.xlane.xlu1 %2022 }
 0x316   :  { %4780 = vst.msk [vmem:[%s12166_s4 + $0x190] sm:$0xff] %vm503_vm0, %v1181_v49  ;;  %5478 = vrcp.f32 %v1046_v50  ;;  %v8331_v7 = vadd.s32 %v1471_v24, %v1469_v25  ;;  %v1949_v49 = vcvt.f32.s32 %v8189_v41  ;;  %v1951_v52 = vshll.u32 %v1950_v0, 16 }
 0x317   :  { %v1500_v50 = vcvt.f32.s32 %v7649_v46  ;;  %v1499_v41 = vcvt.f32.s32 %v8265_v19 }
 0x318   :  { %2535 = vmax.xlane.f32.xlu0 %v2534_v11  ;;  %13432 = vst [vmem:[#allocation119_spill] sm:$0xff] %v8331_v7  ;;  %v13433_v11 = vld [vmem:[#allocation20_spill] sm:$0xff]  ;;  %v8347_v24 = vadd.s32 %v1951_v52, %v1949_v49  ;;  %vm12568_vm11 = vcmp.eq.s32.totalorder %v6508_v31, %v8331_v7  ;;  %v13435_v49 = vld [vmem:[#allocation23_spill] sm:$0xff] }
 0x319   :  { %v8334_v30 = vpop.xlane.xlu0 %1733  ;;  %v8345_v25 = vsel %vm12569_vm10, -1e+30, %v13433_v11  ;;  %v1501_v0 = vshll.u32 %v1500_v50, 16  ;;  %v8364_v19 = vsel %vm12568_vm11, -1e+30, %v13435_v49 }
 0x31a   :  { %13434 = vst [vmem:[#allocation11_spill] sm:$0xff] %v8347_v24  ;;  %v2540_v60 = vsel %vm503_vm0, %v8345_v25, -inf  ;;  %vm12567_vm12 = vcmp.eq.s32.totalorder %v6508_v31, %v8347_v24 }
 0x31b   :  { %v8366_v52 = vadd.s32 %v1501_v0, %v1499_v41  ;;  %v2450_v41 = vsel %vm503_vm0, %v8364_v19, -inf  ;;  %v13439_v0 = vld [vmem:[#allocation24_spill] sm:$0xff] }
 0x31c   :  { %2445 = vmax.xlane.f32.xlu0 %v2444_v54  ;;  %v1980_v54 = vcvt.f32.s32 %v7667_v34  ;;  %v8382_v49 = vsel %vm12567_vm12, -1e+30, %v13439_v0 }
 0x31d   :  { %v8352_v47 = vpop.xlane.xlu0 %1778  ;;  %13436 = vst [vmem:[#allocation102_spill] sm:$0xff] %v8366_v52  ;;  %13440 = vst [vmem:[#allocation15_spill] sm:$0xff] %v8382_v49  ;;  %vm12566_vm13 = vcmp.eq.s32.totalorder %v6508_v31, %v8366_v52  ;;  %v13450_v52 = vld [vmem:[#allocation31_spill] sm:$0xff] }
 0x31e   :  { %v1981_v34 = vshll.u32 %v1980_v54, 16 }
 0x31f   :  { %v5477_v46 = vpop.eup %5476 }
 0x320   :  { %v1121_v11 = vmul.f32 %v5477_v46, %v7670_v21  ;;  %2541 = vmax.xlane.f32.xlu0 %v2540_v60  ;;  %v13437_v60 = vld [vmem:[#allocation143_spill] sm:$0xff]  ;;  %v13438_v46 = vld [vmem:[#allocation136_spill] sm:$0xff]  ;;  %v8384_v7 = vadd.s32 %v1981_v34, %v1979_v38 }
 0x321   :  { %v1528_v20 = vpop.xlane.xlu1 %1527  ;;  %v956_v40 = vpop.xlane.xlu0 %955  ;;  %v1530_v50 = vcvt.f32.s32 %v13437_v60  ;;  %v13442_v60 = vld [vmem:[#allocation164_spill] sm:$0xff]  ;;  %v13443_v38 = vld [vmem:[#allocation27_spill] sm:$0xff] }
 0x322   :  { %4750 = vst.msk [vmem:[%s12166_s4 + $0xa0] sm:$0xff] %vm503_vm0, %v1121_v11  ;;  %5480 = vrcp.f32 %v956_v40  ;;  %13441 = vst [vmem:[#allocation129_spill] sm:$0xff] %v8384_v7  ;;  %v1529_v11 = vcvt.f32.s32 %v1528_v20  ;;  %v8399_v20 = vsel %vm12566_vm13, -1e+30, %v13443_v38  ;;  %vm12565_vm14 = vcmp.eq.s32.totalorder %v6508_v31, %v8384_v7  ;;  %v13449_v38 = vld [vmem:[#allocation160_spill] sm:$0xff] }
 0x323   :  { %v5479_v21 = vpop.eup %5478  ;;  %13444 = vst [vmem:[#allocation16_spill] sm:$0xff] %v8399_v20 }
 0x324   :  { %v1185_v13 = vmul.f32 %v5479_v21, %v13438_v46  ;;  %2451 = vmax.xlane.f32.xlu0 %v2450_v41  ;;  %v1531_v21 = vshll.u32 %v1530_v50, 16  ;;  %v2010_v41 = vcvt.f32.s32 %v13442_v60  ;;  %v2546_v46 = vsel %vm503_vm0, %v8382_v49, -inf }
 0x325   :  { %v1052_v40 = vpop.xlane.xlu0 %1051  ;;  %v2008_v54 = vpop.xlane.xlu1 %2007 }
 0x326   :  { %4782 = vst.msk [vmem:[%s12166_s4 + $0x1a0] sm:$0xff] %vm503_vm0, %v1185_v13  ;;  %5482 = vrcp.f32 %v1052_v40  ;;  %v8401_v34 = vadd.s32 %v1531_v21, %v1529_v11  ;;  %v2009_v0 = vcvt.f32.s32 %v2008_v54  ;;  %v2011_v50 = vshll.u32 %v2010_v41, 16  ;;  %v13446_v40 = vld [vmem:[#allocation28_spill] sm:$0xff] }
 0x327   :  { %v2456_v13 = vsel %vm503_vm0, %v8399_v20, -inf  ;;  %v8413_v60 = vsel %vm12565_vm14, -1e+30, %v13446_v40 }
 0x328   :  { %2547 = vmax.xlane.f32.xlu0 %v2546_v46  ;;  %13445 = vst [vmem:[#allocation133_spill] sm:$0xff] %v8401_v34  ;;  %13447 = vst [vmem:[#allocation19_spill] sm:$0xff] %v8413_v60  ;;  %v8415_v46 = vadd.s32 %v2011_v50, %v2009_v0  ;;  %vm12564_vm15 = vcmp.eq.s32.totalorder %v6508_v31, %v8401_v34  ;;  %v2552_v41 = vsel %vm503_vm0, %v8413_v60, -inf  ;;  %v1560_v60 = vcvt.f32.s32 %v7881_v48 }
 0x329   :  { %v8403_v24 = vpop.xlane.xlu0 %1763  ;;  %v8421_v21 = vpop.xlane.xlu1 %1572  ;;  %v8430_v0 = vsel %vm12564_vm15, -1e+30, %v13450_v52 }
 0x32a   :  { %13448 = vst [vmem:[#allocation20_spill] sm:$0xff] %v8415_v46  ;;  %13451 = vst [vmem:[#allocation23_spill] sm:$0xff] %v8430_v0  ;;  %vm12556_vm1 = vcmp.eq.s32.totalorder %v6508_v31, %v8415_v46 }
 0x32c   :  { %2457 = vmax.xlane.f32.xlu0 %v2456_v13 }
 0x32d   :  { %v8417_v11 = vpop.xlane.xlu0 %1808  ;;  %v8447_v34 = vpop.xlane.xlu1 %2052 }
 0x32f   :  { %v5481_v54 = vpop.eup %5480 }
 0x330   :  { %v1125_v13 = vmul.f32 %v5481_v54, %v13449_v38  ;;  %2553 = vmax.xlane.f32.xlu0 %v2552_v41  ;;  %v2462_v54 = vsel %vm503_vm0, %v8430_v0, -inf  ;;  %v13452_v38 = vld [vmem:[#allocation32_spill] sm:$0xff] }
 0x331   :  { %v962_v50 = vpop.xlane.xlu0 %961  ;;  %v8445_v52 = vsel %vm12556_vm1, -1e+30, %v13452_v38 }
 0x332   :  { %4752 = vst.msk [vmem:[%s12166_s4 + $0xb0] sm:$0xff] %vm503_vm0, %v1125_v13  ;;  %5484 = vrcp.f32 %v962_v50 }
 0x333   :  { %v5483_v40 = vpop.eup %5482 }
 0x334   :  { %v1189_v41 = vmul.f32 %v5483_v40, %v7770_v15  ;;  %2463 = vmax.xlane.f32.xlu0 %v2462_v54  ;;  %v2558_v15 = vsel %vm503_vm0, %v8445_v52, -inf  ;;  %v1561_v40 = vshll.u32 %v1560_v60, 16  ;;  %v2040_v54 = vcvt.f32.s32 %v7895_v51  ;;  %v13455_v60 = vld [vmem:[#allocation172_spill] sm:$0xff] }
 0x335   :  { %v1058_v7 = vpop.xlane.xlu0 %1057 }
 0x336   :  { %4784 = vst.msk [vmem:[%s12166_s4 + $0x1b0] sm:$0xff] %vm503_vm0, %v1189_v41  ;;  %5486 = vrcp.f32 %v1058_v7  ;;  %v2041_v20 = vshll.u32 %v2040_v54, 16  ;;  %v13454_v41 = vld [vmem:[#allocation35_spill] sm:$0xff] }
 0x338   :  { %2559 = vmax.xlane.f32.xlu0 %v2558_v15 }
 0x339   :  { %v1558_v13 = vpop.xlane.xlu1 %1557  ;;  %v8456_v50 = vpop.xlane.xlu0 %1793 }
 0x33a   :  { %v1559_v38 = vcvt.f32.s32 %v1558_v13 }
 0x33c   :  { %v8459_v46 = vadd.s32 %v1561_v40, %v1559_v38  ;;  %v13457_v38 = vld [vmem:[#allocation36_spill] sm:$0xff] }
 0x33d   :  { %v2038_v48 = vpop.xlane.xlu1 %2037  ;;  %v968_v0 = vpop.xlane.xlu0 %967 }
 0x33e   :  { %13453 = vst [vmem:[#allocation143_spill] sm:$0xff] %v8459_v46  ;;  %v2039_v49 = vcvt.f32.s32 %v2038_v48  ;;  %5488 = vrcp.f32 %v968_v0  ;;  %vm12562_vm3 = vcmp.eq.s32.totalorder %v6508_v31, %v8459_v46  ;;  %v2070_v46 = vcvt.f32.s32 %v7975_v5 }
 0x33f   :  { %v5485_v7 = vpop.eup %5484  ;;  %v8467_v15 = vsel %vm12562_vm3, -1e+30, %v13454_v41 }
 0x340   :  { %v1129_v51 = vmul.f32 %v5485_v7, %v13455_v60  ;;  %v8470_v13 = vadd.s32 %v2041_v20, %v2039_v49  ;;  %v2468_v40 = vsel %vm503_vm0, %v8467_v15, -inf  ;;  %v13459_v20 = vld [vmem:[#allocation175_spill] sm:$0xff] }
 0x341   :  { %2469 = vmax.xlane.f32.xlu0 %v2468_v40  ;;  %v1064_v54 = vpop.xlane.xlu0 %1063  ;;  %v8493_v60 = vpop.xlane.xlu1 %1602 }
 0x342   :  { %13456 = vst [vmem:[#allocation136_spill] sm:$0xff] %v8470_v13  ;;  %4754 = vst.msk [vmem:[%s12166_s4 + $0xc0] sm:$0xff] %vm503_vm0, %v1129_v51  ;;  %5490 = vrcp.f32 %v1064_v54  ;;  %vm12560_vm1 = vcmp.eq.s32.totalorder %v6508_v31, %v8470_v13 }
 0x343   :  { %v5487_v0 = vpop.eup %5486  ;;  %v8484_v49 = vsel %vm12560_vm1, -1e+30, %v13457_v38 }
 0x344   :  { %13458 = vst [vmem:[#allocation24_spill] sm:$0xff] %v8484_v49  ;;  %v1193_v48 = vmul.f32 %v5487_v0, %v13459_v20  ;;  %v2564_v7 = vsel %vm503_vm0, %v8484_v49, -inf  ;;  %v1590_v20 = vcvt.f32.s32 %v7959_v8 }
 0x345   :  { %2565 = vmax.xlane.f32.xlu0 %v2564_v7  ;;  %v974_v41 = vpop.xlane.xlu0 %973  ;;  %v8496_v38 = vpop.xlane.xlu1 %2082 }
 0x346   :  { %4786 = vst.msk [vmem:[%s12166_s4 + $0x1c0] sm:$0xff] %vm503_vm0, %v1193_v48  ;;  %5492 = vrcp.f32 %v974_v41 }
 0x349   :  { %v1070_v51 = vpop.xlane.xlu0 %1069 }
 0x34a   :  { %5494 = vrcp.f32 %v1070_v51  ;;  %v1591_v51 = vshll.u32 %v1590_v20, 16  ;;  %v2071_v20 = vshll.u32 %v2070_v46, 16 }
 0x34b   :  { %v5489_v40 = vpop.eup %5488 }
 0x34c   :  { %v1133_v54 = vmul.f32 %v5489_v40, %v7892_v22 }
 0x34d   :  { %v980_v0 = vpop.xlane.xlu0 %979 }
 0x34e   :  { %4756 = vst.msk [vmem:[%s12166_s4 + $0xd0] sm:$0xff] %vm503_vm0, %v1133_v54  ;;  %5496 = vrcp.f32 %v980_v0 }
 0x34f   :  { %v5491_v48 = vpop.eup %5490 }
 0x350   :  { %v1197_v7 = vmul.f32 %v5491_v48, %v7898_v61  ;;  %v2104_v61 = vand.u32 65535, %v7968_v26  ;;  %v13461_v48 = vld [vmem:[#allocation39_spill] sm:$0xff] }
 0x351   :  { %v1588_v41 = vpop.xlane.xlu1 %1587  ;;  %v1076_v13 = vpop.xlane.xlu0 %1075 }
 0x352   :  { %4788 = vst.msk [vmem:[%s12166_s4 + $0x1d0] sm:$0xff] %vm503_vm0, %v1197_v7  ;;  %v1589_v22 = vcvt.f32.s32 %v1588_v41  ;;  %5498 = vrcp.f32 %v1076_v13 }
 0x353   :  { %v5493_v8 = vpop.eup %5492 }
 0x354   :  { %v1137_v40 = vmul.f32 %v5493_v8, %v7920_v4  ;;  %v8510_v54 = vadd.s32 %v1591_v51, %v1589_v22  ;;  %v2106_v51 = vcvt.s32.f32 %v2104_v61  ;;  %v13463_v8 = vld [vmem:[#allocation40_spill] sm:$0xff] }
 0x355   :  { %v2068_v0 = vpop.xlane.xlu1 %2067  ;;  %v8512_v49 = vpop.xlane.xlu0 %2093 }
 0x356   :  { %13460 = vst [vmem:[#allocation164_spill] sm:$0xff] %v8510_v54  ;;  %4758 = vst.msk [vmem:[%s12166_s4 + $0xe0] sm:$0xff] %vm503_vm0, %v1137_v40  ;;  %v2069_v5 = vcvt.f32.s32 %v2068_v0  ;;  %vm12561_vm1 = vcmp.eq.s32.totalorder %v6508_v31, %v8510_v54 }
 0x357   :  { %v5495_v13 = vpop.eup %5494  ;;  %v8525_v4 = vsel %vm12561_vm1, -1e+30, %v13461_v48 }
 0x358   :  { %v1201_v7 = vmul.f32 %v5495_v13, %v7933_v33  ;;  %v8528_v26 = vadd.s32 %v2071_v20, %v2069_v5  ;;  %v2474_v46 = vsel %vm503_vm0, %v8525_v4, -inf }
 0x359   :  { %2475 = vmax.xlane.f32.xlu0 %v2474_v46  ;;  %v8532_v41 = vpop.xlane.xlu0 %2108 }
 0x35a   :  { %13462 = vst [vmem:[#allocation27_spill] sm:$0xff] %v8528_v26  ;;  %4790 = vst.msk [vmem:[%s12166_s4 + $0x1e0] sm:$0xff] %vm503_vm0, %v1201_v7  ;;  %vm2110_vm1 = vcmp.eq.f32.partialorder %v7997_v63, %v8532_v41  ;;  %vm12563_vm3 = vcmp.eq.s32.totalorder %v6508_v31, %v8528_v26  ;;  %v2089_v63 = vand.u32 65535, %v7952_v29  ;;  %v2134_v7 = vand.u32 65535, %v8005_v57  ;;  %v13525_v26 = vld [vmem:[#allocation117_spill] sm:$0xff] }
 0x35b   :  { %v5497_v33 = vpop.eup %5496  ;;  %v2111_v22 = vsel %vm2110_vm1, %v2106_v51, inf  ;;  %v8546_v40 = vsel %vm12563_vm3, -1e+30, %v13463_v8  ;;  %vm2095_vm1 = vcmp.eq.f32.partialorder %v7978_v59, %v8512_v49  ;;  %v2119_v59 = vand.u32 65535, %v7984_v56 }
 0x35c   :  { %13464 = vst [vmem:[#allocation28_spill] sm:$0xff] %v8546_v40  ;;  %v1141_v0 = vmul.f32 %v5497_v33, %v7941_v14  ;;  %2112 = vmin.xlane.f32.xlu1 %v2111_v22  ;;  %v2570_v61 = vsel %vm503_vm0, %v8546_v40, -inf  ;;  %v2091_v14 = vcvt.s32.f32 %v2089_v63  ;;  %v13465_v22 = vld [vmem:[#allocation204_spill] sm:$0xff] }
 0x35d   :  { %2571 = vmax.xlane.f32.xlu0 %v2570_v61  ;;  %v8556_v5 = vpop.xlane.xlu0 %2123  ;;  %v2121_v51 = vcvt.s32.f32 %v2119_v59  ;;  %v13466_v61 = vld [vmem:[#allocation122_spill] sm:$0xff]  ;;  %v13471_v59 = vld [vmem:[#allocation132_spill] sm:$0xff] }
 0x35e   :  { %4760 = vst.msk [vmem:[%s12166_s4 + $0xf0] sm:$0xff] %vm503_vm0, %v1141_v0  ;;  %v2096_v29 = vsel %vm2095_vm1, %v2091_v14, inf  ;;  %vm2125_vm1 = vcmp.eq.f32.partialorder %v8016_v58, %v8556_v5  ;;  %v1699_v63 = vand.u32 65535, %v13466_v61 }
 0x35f   :  { %v5499_v20 = vpop.eup %5498  ;;  %v2126_v33 = vsel %vm2125_vm1, %v2121_v51, inf }
 0x360   :  { %v1205_v13 = vmul.f32 %v5499_v20, %v7954_v55  ;;  %1617 = vmin.xlane.f32.xlu1 %v8052_v17  ;;  %v2136_v55 = vcvt.s32.f32 %v2134_v7 }
 0x361   :  { %v8566_v48 = vpop.xlane.xlu0 %2138 }
 0x362   :  { %4792 = vst.msk [vmem:[%s12166_s4 + $0x1f0] sm:$0xff] %vm503_vm0, %v1205_v13  ;;  %vm2140_vm3 = vcmp.eq.f32.partialorder %v8029_v1, %v8566_v48  ;;  %v13468_v13 = vld [vmem:[#allocation200_spill] sm:$0xff] }
 0x363   :  { %v2141_v17 = vsel %vm2140_vm3, %v2136_v55, inf  ;;  %v2179_v14 = vand.u32 65535, %v13468_v13 }
 0x364   :  { %2097 = vmin.xlane.f32.xlu1 %v2096_v29 }
 0x365   :  { %v8573_v46 = vpop.xlane.xlu0 %2153 }
 0x366   :  { %vm2155_vm1 = vcmp.eq.f32.partialorder %v8042_v2, %v8573_v46  ;;  %v1701_v2 = vcvt.s32.f32 %v1699_v63 }
 0x368   :  { %1662 = vmin.xlane.f32.xlu1 %v8070_v35  ;;  %v2164_v35 = vand.u32 65535, %v8033_v16 }
 0x369   :  { %v8578_v57 = vpop.xlane.xlu0 %2168 }
 0x36a   :  { %vm2170_vm3 = vcmp.eq.f32.partialorder %v8060_v27, %v8578_v57  ;;  %v2166_v56 = vcvt.s32.f32 %v2164_v35  ;;  %v2224_v35 = vand.u32 65535, %v8103_v43  ;;  %v13475_v43 = vld [vmem:[#allocation75_spill] sm:$0xff] }
 0x36c   :  { %2142 = vmin.xlane.f32.xlu1 %v2141_v17  ;;  %v2171_v1 = vsel %vm2170_vm3, %v2166_v56, inf }
 0x36d   :  { %v8585_v8 = vpop.xlane.xlu0 %2183 }
 0x370   :  { %1647 = vmin.xlane.f32.xlu1 %v8122_v39  ;;  %v2149_v39 = vand.u32 65535, %v13465_v22  ;;  %v13472_v22 = vld [vmem:[#allocation151_spill] sm:$0xff] }
 0x371   :  { %v8590_v16 = vpop.xlane.xlu0 %2198 }
 0x372   :  { %v2151_v58 = vcvt.s32.f32 %v2149_v39  ;;  %vm2200_vm3 = vcmp.eq.f32.partialorder %v8099_v9, %v8590_v16  ;;  %v13470_v9 = vld [vmem:[#allocation142_spill] sm:$0xff]  ;;  %v1729_v39 = vand.u32 65535, %v13472_v22 }
 0x373   :  { %v1744_v55 = vand.u32 65535, %v13470_v9 }
 0x374   :  { %2127 = vmin.xlane.f32.xlu1 %v2126_v33  ;;  %v2156_v0 = vsel %vm2155_vm1, %v2151_v58, inf }
 0x375   :  { %v8600_v29 = vpop.xlane.xlu0 %2213  ;;  %v1746_v33 = vcvt.s32.f32 %v1744_v55 }
 0x378   :  { %1692 = vmin.xlane.f32.xlu1 %v8138_v10  ;;  %v2194_v10 = vand.u32 65535, %v8068_v36  ;;  %v13469_v36 = vld [vmem:[#allocation211_spill] sm:$0xff] }
 0x379   :  { %vm2185_vm1 = vcmp.eq.f32.partialorder %v13469_v36, %v8585_v8  ;;  %v8607_v51 = vpop.xlane.xlu0 %2228 }
 0x37a   :  { %v2196_v27 = vcvt.s32.f32 %v2194_v10  ;;  %v1731_v10 = vcvt.s32.f32 %v1729_v39  ;;  %v13482_v39 = vld [vmem:[#allocation205_spill] sm:$0xff] }
 0x37c   :  { %2172 = vmin.xlane.f32.xlu1 %v2171_v1  ;;  %v2201_v20 = vsel %vm2200_vm3, %v2196_v27, inf  ;;  %vm1750_vm3 = vcmp.eq.f32.partialorder %v13471_v59, %v8278_v28  ;;  %v2226_v1 = vcvt.s32.f32 %v2224_v35  ;;  %v13474_v27 = vld [vmem:[#allocation201_spill] sm:$0xff] }
 0x37d   :  { %v1751_v56 = vsel %vm1750_vm3, %v1746_v33, inf  ;;  %v2209_v61 = vand.u32 65535, %v13474_v27  ;;  %v8616_v63 = vpop.xlane.xlu0 %2243  ;;  %vm2215_vm3 = vcmp.eq.f32.partialorder %v13475_v43, %v8600_v29  ;;  %v13480_v33 = vld [vmem:[#allocation146_spill] sm:$0xff]  ;;  %v13483_v27 = vld [vmem:[#allocation83_spill] sm:$0xff] }
 0x37e   :  { %v1759_v35 = vand.u32 65535, %v13480_v33  ;;  %v13488_v33 = vld [vmem:[#allocation184_spill] sm:$0xff] }
 0x380   :  { %1677 = vmin.xlane.f32.xlu1 %v8191_v12  ;;  %v13467_v12 = vld [vmem:[#allocation127_spill] sm:$0xff]  ;;  %v1761_v22 = vcvt.s32.f32 %v1759_v35  ;;  %v1789_v35 = vand.u32 65535, %v13488_v33 }
 0x381   :  { %vm1705_vm15 = vcmp.eq.f32.partialorder %v13467_v12, %v8260_v44  ;;  %v2211_v12 = vcvt.s32.f32 %v2209_v61 }
 0x382   :  { %v1706_v7 = vsel %vm1705_vm15, %v1701_v2, inf  ;;  %vm2230_vm15 = vcmp.eq.f32.partialorder %v8130_v18, %v8607_v51  ;;  %v13476_v18 = vld [vmem:[#allocation138_spill] sm:$0xff] }
 0x383   :  { %v2231_v58 = vsel %vm2230_vm15, %v2226_v1, inf  ;;  %v1774_v2 = vand.u32 65535, %v13476_v18  ;;  %v2216_v13 = vsel %vm2215_vm3, %v2211_v12, inf  ;;  %v13481_v1 = vld [vmem:[#allocation165_spill] sm:$0xff] }
 0x384   :  { %2157 = vmin.xlane.f32.xlu1 %v2156_v0  ;;  %v13473_v0 = vld [vmem:[#allocation141_spill] sm:$0xff]  ;;  %vm1765_vm3 = vcmp.eq.f32.partialorder %v13481_v1, %v8403_v24  ;;  %v13489_v1 = vld [vmem:[#allocation78_spill] sm:$0xff] }
 0x385   :  { %v1776_v36 = vcvt.s32.f32 %v1774_v2  ;;  %v13485_v18 = vld [vmem:[#allocation169_spill] sm:$0xff] }
 0x388   :  { %1722 = vmin.xlane.f32.xlu1 %v8206_v23  ;;  %v2181_v23 = vcvt.s32.f32 %v2179_v14  ;;  %v13477_v14 = vld [vmem:[#allocation156_spill] sm:$0xff] }
 0x389   :  { %vm1780_vm15 = vcmp.eq.f32.partialorder %v13477_v14, %v8352_v47  ;;  %v2284_v14 = vand.u32 65535, %v8174_v42 }
 0x38a   :  { %v2186_v17 = vsel %vm2185_vm1, %v2181_v23, inf  ;;  %vm1735_vm1 = vcmp.eq.f32.partialorder %v13473_v0, %v8334_v30  ;;  %v13478_v23 = vld [vmem:[#allocation82_spill] sm:$0xff]  ;;  %v1781_v55 = vsel %vm1780_vm15, %v1776_v36, inf  ;;  %vm2245_vm15 = vcmp.eq.f32.partialorder %v13483_v27, %v8616_v63 }
 0x38b   :  { %v2254_v9 = vand.u32 65535, %v13478_v23  ;;  %v13486_v36 = vld [vmem:[#allocation74_spill] sm:$0xff] }
 0x38c   :  { %2202 = vmin.xlane.f32.xlu1 %v2201_v20  ;;  %v1736_v20 = vsel %vm1735_vm1, %v1731_v10, inf  ;;  %v1766_v10 = vsel %vm1765_vm3, %v1761_v22, inf  ;;  %v1365_v23 = vcvt.f32.s32 %v13486_v36  ;;  %v1845_v22 = vcvt.f32.s32 %v13489_v1  ;;  %v13496_v36 = vld [vmem:[#allocation177_spill] sm:$0xff]  ;;  %v13500_v1 = vld [vmem:[#allocation180_spill] sm:$0xff] }
 0x38d   :  { %v2256_v59 = vcvt.s32.f32 %v2254_v9 }
 0x390   :  { %1707 = vmin.xlane.f32.xlu1 %v1706_v7  ;;  %v8623_v7 = vpop.xlane.xlu0 %2258 }
 0x394   :  { %2187 = vmin.xlane.f32.xlu1 %v2186_v17  ;;  %v13479_v17 = vld [vmem:[#allocation103_spill] sm:$0xff]  ;;  %v8632_v0 = vpop.xlane.xlu0 %2273 }
 0x395   :  { %vm2260_vm1 = vcmp.eq.f32.partialorder %v13479_v17, %v8623_v7 }
 0x398   :  { %1752 = vmin.xlane.f32.xlu1 %v1751_v56  ;;  %v2261_v56 = vsel %vm2260_vm1, %v2256_v59, inf  ;;  %vm1810_vm1 = vcmp.eq.f32.partialorder %v13485_v18, %v8417_v11  ;;  %v8639_v2 = vpop.xlane.xlu0 %2288  ;;  %v2286_v59 = vcvt.s32.f32 %v2284_v14 }
 0x399   :  { %vm2290_vm3 = vcmp.eq.f32.partialorder %v8201_v45, %v8639_v2 }
 0x39c   :  { %2232 = vmin.xlane.f32.xlu1 %v2231_v58  ;;  %v2239_v58 = vand.u32 65535, %v13482_v39  ;;  %v2291_v39 = vsel %vm2290_vm3, %v2286_v59, inf }
 0x39e   :  { %v2241_v61 = vcvt.s32.f32 %v2239_v58  ;;  %v13490_v58 = vld [vmem:[#allocation183_spill] sm:$0xff] }
 0x3a0   :  { %1737 = vmin.xlane.f32.xlu1 %v1736_v20  ;;  %v13484_v20 = vld [vmem:[#allocation154_spill] sm:$0xff]  ;;  %v2246_v12 = vsel %vm2245_vm15, %v2241_v61, inf  ;;  %vm1795_vm15 = vcmp.eq.f32.partialorder %v13490_v58, %v8456_v50  ;;  %v1791_v61 = vcvt.s32.f32 %v1789_v35  ;;  %v13498_v35 = vld [vmem:[#allocation5_spill] sm:$0xff]  ;;  %v13501_v58 = vld [vmem:[#allocation104_spill] sm:$0xff] }
 0x3a1   :  { %v1804_v43 = vand.u32 65535, %v13484_v20  ;;  %v13493_v20 = vld [vmem:[#allocation98_spill] sm:$0xff] }
 0x3a2   :  { %v2269_v45 = vand.u32 65535, %v13493_v20 }
 0x3a4   :  { %2217 = vmin.xlane.f32.xlu1 %v2216_v13  ;;  %v1806_v13 = vcvt.s32.f32 %v1804_v43  ;;  %v1846_v43 = vshll.u32 %v1845_v22, 16  ;;  %v1874_v22 = vcvt.f32.s32 %v13500_v1  ;;  %v13509_v1 = vld [vmem:[#allocation114_spill] sm:$0xff] }
 0x3a6   :  { %v1811_v9 = vsel %vm1810_vm1, %v1806_v13, inf  ;;  %v1796_v13 = vsel %vm1795_vm15, %v1791_v61, inf  ;;  %vm2275_vm1 = vcmp.eq.f32.partialorder %v8183_v6, %v8632_v0  ;;  %v13502_v61 = vld [vmem:[#allocation6_spill] sm:$0xff] }
 0x3a8   :  { %1782 = vmin.xlane.f32.xlu1 %v1781_v55  ;;  %v13487_v55 = vld [vmem:[#allocation149_spill] sm:$0xff] }
 0x3a9   :  { %v1364_v17 = vcvt.f32.s32 %v13487_v55 }
 0x3ac   :  { %2262 = vmin.xlane.f32.xlu1 %v2261_v56  ;;  %v1366_v56 = vshll.u32 %v1365_v23, 16  ;;  %v1394_v23 = vcvt.f32.s32 %v13496_v36 }
 0x3ae   :  { %v8650_v42 = vadd.s32 %v1366_v56, %v1364_v17  ;;  %v13497_v17 = vld [vmem:[#allocation93_spill] sm:$0xff] }
 0x3af   :  { %v1875_v59 = vcvt.f32.s32 %v13497_v17 }
 0x3b0   :  { %1767 = vmin.xlane.f32.xlu1 %v1766_v10  ;;  %13491 = vst [vmem:[#allocation160_spill] sm:$0xff] %v8650_v42  ;;  %v13492_v10 = vld [vmem:[#allocation163_spill] sm:$0xff]  ;;  %vm2299_vm3 = vcmp.eq.s32.totalorder %v6508_v31, %v8650_v42 }
 0x3b1   :  { %v1844_v27 = vcvt.f32.s32 %v13492_v10  ;;  %v8667_v56 = vsel %vm2299_vm3, -1e+30, %v13498_v35  ;;  %v1425_v10 = vcvt.f32.s32 %v13501_v58  ;;  %v13510_v58 = vld [vmem:[#allocation10_spill] sm:$0xff] }
 0x3b3   :  { %v8657_v14 = vadd.s32 %v1846_v43, %v1844_v27  ;;  %v2429_v27 = vsel %vm503_vm0, %v8667_v56, -inf  ;;  %v13504_v43 = vld [vmem:[#allocation189_spill] sm:$0xff] }
 0x3b4   :  { %2247 = vmin.xlane.f32.xlu1 %v2246_v12  ;;  %v13494_v12 = vld [vmem:[#allocation89_spill] sm:$0xff] }
 0x3b5   :  { %v1395_v18 = vcvt.f32.s32 %v13494_v12  ;;  %13495 = vst [vmem:[#allocation31_spill] sm:$0xff] %v8657_v14  ;;  %vm2331_vm15 = vcmp.eq.s32.totalorder %v6508_v31, %v8657_v14  ;;  %v1424_v12 = vcvt.f32.s32 %v13504_v43 }
 0x3b6   :  { %v8681_v20 = vsel %vm2331_vm15, -1e+30, %v13502_v61  ;;  %v13512_v61 = vld [vmem:[#allocation198_spill] sm:$0xff] }
 0x3b7   :  { %v1396_v55 = vshll.u32 %v1395_v18, 16  ;;  %v1426_v18 = vshll.u32 %v1425_v10, 16  ;;  %v1454_v43 = vcvt.f32.s32 %v13512_v61  ;;  %v13518_v61 = vld [vmem:[#allocation14_spill] sm:$0xff] }
 0x3b8   :  { %1812 = vmin.xlane.f32.xlu1 %v1811_v9  ;;  %v2271_v9 = vcvt.s32.f32 %v2269_v45 }
 0x3b9   :  { %v8669_v6 = vadd.s32 %v1396_v55, %v1394_v23  ;;  %v2525_v23 = vsel %vm503_vm0, %v8681_v20, -inf  ;;  %v8697_v17 = vadd.s32 %v1426_v18, %v1424_v12  ;;  %v13513_v18 = vld [vmem:[#allocation97_spill] sm:$0xff] }
 0x3ba   :  { %v2276_v33 = vsel %vm2275_vm1, %v2271_v9, inf  ;;  %v13506_v9 = vld [vmem:[#allocation9_spill] sm:$0xff] }
 0x3bb   :  { %13499 = vst [vmem:[#allocation32_spill] sm:$0xff] %v8669_v6  ;;  %vm2301_vm1 = vcmp.eq.s32.totalorder %v6508_v31, %v8669_v6  ;;  %13507 = vst [vmem:[#allocation172_spill] sm:$0xff] %v8697_v17  ;;  %vm2303_vm13 = vcmp.eq.s32.totalorder %v6508_v31, %v8697_v17  ;;  %v13530_v17 = vld [vmem:[#allocation21_spill] sm:$0xff] }
 0x3bc   :  { %2292 = vmin.xlane.f32.xlu1 %v2291_v39  ;;  %v1876_v39 = vshll.u32 %v1875_v59, 16  ;;  %v8695_v55 = vsel %vm2301_vm1, -1e+30, %v13506_v9  ;;  %v13508_v59 = vld [vmem:[#allocation191_spill] sm:$0xff] }
 0x3be   :  { %v8683_v45 = vadd.s32 %v1876_v39, %v1874_v22  ;;  %v1455_v22 = vcvt.f32.s32 %v13509_v1  ;;  %v2435_v39 = vsel %vm503_vm0, %v8695_v55, -inf }
 0x3c0   :  { %1797 = vmin.xlane.f32.xlu1 %v1796_v13  ;;  %13503 = vst [vmem:[#allocation35_spill] sm:$0xff] %v8683_v45  ;;  %v13505_v13 = vld [vmem:[#allocation108_spill] sm:$0xff]  ;;  %vm2333_vm14 = vcmp.eq.s32.totalorder %v6508_v31, %v8683_v45  ;;  %v1456_v12 = vshll.u32 %v1455_v22, 16  ;;  %v13517_v22 = vld [vmem:[#allocation123_spill] sm:$0xff]  ;;  %v13533_v45 = vld [vmem:[#allocation150_spill] sm:$0xff] }
 0x3c1   :  { %v1905_v36 = vcvt.f32.s32 %v13505_v13  ;;  %v8709_v10 = vsel %vm2333_vm14, -1e+30, %v13510_v58  ;;  %v1935_v13 = vcvt.f32.s32 %v13513_v18 }
 0x3c3   :  { %v1906_v35 = vshll.u32 %v1905_v36, 16  ;;  %v2531_v36 = vsel %vm503_vm0, %v8709_v10, -inf  ;;  %v1936_v1 = vshll.u32 %v1935_v13, 16 }
 0x3c4   :  { %2277 = vmin.xlane.f32.xlu1 %v2276_v33  ;;  %v1904_v33 = vcvt.f32.s32 %v13508_v59  ;;  %v8725_v59 = vadd.s32 %v1456_v12, %v1454_v43  ;;  %v13520_v12 = vld [vmem:[#allocation212_spill] sm:$0xff] }
 0x3c6   :  { %13515 = vst [vmem:[#allocation175_spill] sm:$0xff] %v8725_v59  ;;  %vm12586_vm11 = vcmp.eq.s32.totalorder %v6508_v31, %v8725_v59  ;;  %v8770_v59 = vpop.xlane.xlu1 %1632 }
 0x3c8   :  { %2430 = vmax.xlane.f32.xlu1 %v2429_v27  ;;  %v8711_v27 = vadd.s32 %v1906_v35, %v1904_v33  ;;  %v13516_v33 = vld [vmem:[#allocation209_spill] sm:$0xff] }
 0x3c9   :  { %v1934_v35 = vcvt.f32.s32 %v13516_v33 }
 0x3ca   :  { %13511 = vst [vmem:[#allocation36_spill] sm:$0xff] %v8711_v27  ;;  %vm2335_vm12 = vcmp.eq.s32.totalorder %v6508_v31, %v8711_v27 }
 0x3cb   :  { %v8737_v18 = vsel %vm2335_vm12, -1e+30, %v13518_v61  ;;  %v8739_v43 = vadd.s32 %v1936_v1, %v1934_v35  ;;  %v13524_v1 = vld [vmem:[#allocation208_spill] sm:$0xff] }
 0x3cc   :  { %2526 = vmax.xlane.f32.xlu1 %v2525_v23  ;;  %v13514_v23 = vld [vmem:[#allocation13_spill] sm:$0xff] }
 0x3cd   :  { %v8723_v9 = vsel %vm2303_vm13, -1e+30, %v13514_v23  ;;  %13519 = vst [vmem:[#allocation39_spill] sm:$0xff] %v8739_v43  ;;  %v13521_v23 = vld [vmem:[#allocation107_spill] sm:$0xff]  ;;  %vm12576_vm10 = vcmp.eq.s32.totalorder %v6508_v31, %v8739_v43 }
 0x3ce   :  { %v2441_v58 = vsel %vm503_vm0, %v8723_v9, -inf  ;;  %v1965_v33 = vcvt.f32.s32 %v13521_v23  ;;  %v1515_v23 = vcvt.f32.s32 %v13525_v26 }
 0x3d0   :  { %2436 = vmax.xlane.f32.xlu1 %v2435_v39  ;;  %v1485_v39 = vcvt.f32.s32 %v13517_v22  ;;  %v2537_v22 = vsel %vm503_vm0, %v8737_v18, -inf  ;;  %v1516_v26 = vshll.u32 %v1515_v23, 16  ;;  %v13532_v23 = vld [vmem:[#allocation207_spill] sm:$0xff] }
 0x3d2   :  { %v1486_v13 = vshll.u32 %v1485_v39, 16  ;;  %v1966_v39 = vshll.u32 %v1965_v33, 16  ;;  %v13529_v33 = vld [vmem:[#allocation137_spill] sm:$0xff] }
 0x3d3   :  { %v1995_v27 = vcvt.f32.s32 %v13529_v33  ;;  %v1620_v33 = vcvt.f32.s32 %v13532_v23 }
 0x3d4   :  { %2532 = vmax.xlane.f32.xlu1 %v2531_v36  ;;  %v1484_v36 = vcvt.f32.s32 %v13520_v12  ;;  %v1964_v12 = vcvt.f32.s32 %v13524_v1 }
 0x3d5   :  { %v1996_v43 = vshll.u32 %v1995_v27, 16  ;;  %v1621_v27 = vshll.u32 %v1620_v33, 16 }
 0x3d6   :  { %v8753_v35 = vadd.s32 %v1486_v13, %v1484_v36  ;;  %v8767_v36 = vadd.s32 %v1966_v39, %v1964_v12  ;;  %v13528_v13 = vld [vmem:[#allocation84_spill] sm:$0xff] }
 0x3d7   :  { %v1514_v1 = vcvt.f32.s32 %v13528_v13 }
 0x3d8   :  { %2442 = vmax.xlane.f32.xlu1 %v2441_v58  ;;  %v13522_v58 = vld [vmem:[#allocation17_spill] sm:$0xff]  ;;  %13523 = vst [vmem:[#allocation40_spill] sm:$0xff] %v8753_v35  ;;  %13527 = vst [vmem:[#allocation204_spill] sm:$0xff] %v8767_v36  ;;  %vm12581_vm9 = vcmp.eq.s32.totalorder %v6508_v31, %v8753_v35 }
 0x3d9   :  { %v8751_v61 = vsel %vm12586_vm11, -1e+30, %v13522_v58  ;;  %v8781_v12 = vsel %vm12581_vm9, -1e+30, %v13530_v17  ;;  %v8783_v39 = vadd.s32 %v1516_v26, %v1514_v1  ;;  %v13534_v17 = vld [vmem:[#allocation22_spill] sm:$0xff]  ;;  %v1544_v26 = vcvt.f32.s32 %v8321_v32 }
 0x3da   :  { %v2447_v54 = vsel %vm503_vm0, %v8751_v61, -inf  ;;  %v2453_v6 = vsel %vm503_vm0, %v8781_v12, -inf }
 0x3db   :  { %13531 = vst [vmem:[#allocation122_spill] sm:$0xff] %v8783_v39  ;;  %vm12589_vm9 = vcmp.eq.s32.totalorder %v6508_v31, %v8783_v39  ;;  %v13552_v39 = vld [vmem:[#allocation185_spill] sm:$0xff] }
 0x3dc   :  { %2538 = vmax.xlane.f32.xlu1 %v2537_v22  ;;  %v13526_v22 = vld [vmem:[#allocation18_spill] sm:$0xff] }
 0x3dd   :  { %v8765_v58 = vsel %vm12576_vm10, -1e+30, %v13526_v22  ;;  %v1994_v22 = vcvt.f32.s32 %v8247_v62  ;;  %vm12585_vm10 = vcmp.eq.s32.totalorder %v6508_v31, %v8767_v36 }
 0x3de   :  { %v8798_v1 = vsel %vm12585_vm10, -1e+30, %v13534_v17 }
 0x3df   :  { %v8800_v62 = vadd.s32 %v1996_v43, %v1994_v22  ;;  %v2549_v36 = vsel %vm503_vm0, %v8798_v1, -inf  ;;  %v13538_v43 = vld [vmem:[#allocation25_spill] sm:$0xff] }
 0x3e0   :  { %2448 = vmax.xlane.f32.xlu1 %v2447_v54  ;;  %v2543_v54 = vsel %vm503_vm0, %v8765_v58, -inf  ;;  %v8815_v32 = vsel %vm12589_vm9, -1e+30, %v13538_v43  ;;  %v13541_v43 = vld [vmem:[#allocation43_spill] sm:$0xff] }
 0x3e1   :  { %13535 = vst [vmem:[#allocation127_spill] sm:$0xff] %v8800_v62  ;;  %vm12601_vm10 = vcmp.eq.s32.totalorder %v6508_v31, %v8800_v62 }
 0x3e4   :  { %2544 = vmax.xlane.f32.xlu1 %v2543_v54  ;;  %v1545_v54 = vcvt.f32.s32 %v13533_v45  ;;  %v2100_v45 = vcvt.f32.s32 %v8512_v49  ;;  %v2024_v49 = vcvt.f32.s32 %v8350_v53 }
 0x3e5   :  { %v8786_v13 = vpop.xlane.xlu1 %2112 }
 0x3e6   :  { %v1546_v14 = vshll.u32 %v1545_v54, 16  ;;  %v2101_v33 = vshll.u32 %v2100_v45, 16  ;;  %v13544_v45 = vld [vmem:[#allocation26_spill] sm:$0xff] }
 0x3e8   :  { %2454 = vmax.xlane.f32.xlu1 %v2453_v6  ;;  %v13536_v6 = vld [vmem:[#allocation155_spill] sm:$0xff]  ;;  %v8817_v22 = vadd.s32 %v1546_v14, %v1544_v26 }
 0x3e9   :  { %v1618_v35 = vpop.xlane.xlu1 %1617  ;;  %v2025_v42 = vcvt.f32.s32 %v13536_v6  ;;  %v2459_v6 = vsel %vm503_vm0, %v8815_v32, -inf }
 0x3ea   :  { %v1619_v23 = vcvt.f32.s32 %v1618_v35  ;;  %13539 = vst [vmem:[#allocation211_spill] sm:$0xff] %v8817_v22 }
 0x3ec   :  { %v8809_v17 = vadd.s32 %v1621_v27, %v1619_v23  ;;  %2550 = vmax.xlane.f32.xlu1 %v2549_v36  ;;  %v2026_v36 = vshll.u32 %v2025_v42, 16  ;;  %v13540_v27 = vld [vmem:[#allocation159_spill] sm:$0xff]  ;;  %v8841_v42 = vsel %vm12601_vm10, -1e+30, %v13544_v45  ;;  %v13547_v45 = vld [vmem:[#allocation44_spill] sm:$0xff] }
 0x3ed   :  { %v2098_v35 = vpop.xlane.xlu1 %2097  ;;  %v1575_v23 = vcvt.f32.s32 %v13540_v27  ;;  %v1574_v27 = vcvt.f32.s32 %v8421_v21 }
 0x3ee   :  { %13537 = vst [vmem:[#allocation200_spill] sm:$0xff] %v8809_v17  ;;  %v2099_v54 = vcvt.f32.s32 %v2098_v35  ;;  %vm12588_vm11 = vcmp.eq.s32.totalorder %v6508_v31, %v8809_v17  ;;  %v8843_v35 = vadd.s32 %v2026_v36, %v2024_v49  ;;  %v13549_v36 = vld [vmem:[#allocation29_spill] sm:$0xff] }
 0x3ef   :  { %v8831_v53 = vsel %vm12588_vm11, -1e+30, %v13541_v43  ;;  %vm12596_vm11 = vcmp.eq.s32.totalorder %v6508_v31, %v8817_v22  ;;  %v2555_v43 = vsel %vm503_vm0, %v8841_v42, -inf }
 0x3f0   :  { %13542 = vst [vmem:[#allocation142_spill] sm:$0xff] %v8831_v53  ;;  %v8833_v14 = vadd.s32 %v2101_v33, %v2099_v54  ;;  %2460 = vmax.xlane.f32.xlu1 %v2459_v6  ;;  %v2480_v26 = vsel %vm503_vm0, %v8831_v53, -inf  ;;  %13545 = vst [vmem:[#allocation151_spill] sm:$0xff] %v8843_v35  ;;  %v1576_v33 = vshll.u32 %v1575_v23, 16  ;;  %v13546_v54 = vld [vmem:[#allocation168_spill] sm:$0xff] }
 0x3f1   :  { %2481 = vmax.xlane.f32.xlu0 %v2480_v26  ;;  %v8846_v17 = vpop.xlane.xlu1 %1662  ;;  %v2055_v6 = vcvt.f32.s32 %v13546_v54  ;;  %v8867_v23 = vsel %vm12596_vm11, -1e+30, %v13549_v36  ;;  %v2054_v54 = vcvt.f32.s32 %v8447_v34  ;;  %v13553_v36 = vld [vmem:[#allocation30_spill] sm:$0xff] }
 0x3f2   :  { %13543 = vst [vmem:[#allocation132_spill] sm:$0xff] %v8833_v14  ;;  %vm12591_vm9 = vcmp.eq.s32.totalorder %v6508_v31, %v8833_v14  ;;  %v8869_v26 = vadd.s32 %v1576_v33, %v1574_v27  ;;  %v2465_v22 = vsel %vm503_vm0, %v8867_v23, -inf  ;;  %v1604_v33 = vcvt.f32.s32 %v8493_v60 }
 0x3f3   :  { %v8859_v21 = vsel %vm12591_vm9, -1e+30, %v13547_v45  ;;  %vm12600_vm9 = vcmp.eq.s32.totalorder %v6508_v31, %v8843_v35  ;;  %v2056_v14 = vshll.u32 %v2055_v6, 16 }
 0x3f4   :  { %13548 = vst [vmem:[#allocation141_spill] sm:$0xff] %v8859_v21  ;;  %2556 = vmax.xlane.f32.xlu1 %v2555_v43  ;;  %v2576_v49 = vsel %vm503_vm0, %v8859_v21, -inf  ;;  %13550 = vst [vmem:[#allocation201_spill] sm:$0xff] %v8869_v26  ;;  %v13551_v43 = vld [vmem:[#allocation202_spill] sm:$0xff]  ;;  %v1605_v21 = vcvt.f32.s32 %v13552_v39  ;;  %v8884_v34 = vsel %vm12600_vm9, -1e+30, %v13553_v36  ;;  %vm12604_vm11 = vcmp.eq.s32.totalorder %v6508_v31, %v8869_v26 }
 0x3f5   :  { %2577 = vmax.xlane.f32.xlu0 %v2576_v49  ;;  %v8872_v62 = vpop.xlane.xlu1 %2142  ;;  %v1650_v45 = vcvt.f32.s32 %v13551_v43  ;;  %v8886_v27 = vadd.s32 %v2056_v14, %v2054_v54  ;;  %v2130_v39 = vcvt.f32.s32 %v8556_v5  ;;  %v2561_v35 = vsel %vm503_vm0, %v8884_v34, -inf  ;;  %v13557_v14 = vld [vmem:[#allocation33_spill] sm:$0xff] }
 0x3f6   :  { %v1606_v53 = vshll.u32 %v1605_v21, 16  ;;  %v8901_v60 = vsel %vm12604_vm11, -1e+30, %v13557_v14  ;;  %v2084_v5 = vcvt.f32.s32 %v8496_v38  ;;  %v13560_v14 = vld [vmem:[#allocation47_spill] sm:$0xff] }
 0x3f7   :  { %13554 = vst [vmem:[#allocation75_spill] sm:$0xff] %v8886_v27  ;;  %v1651_v6 = vshll.u32 %v1650_v45, 16  ;;  %vm12614_vm9 = vcmp.eq.s32.totalorder %v6508_v31, %v8886_v27  ;;  %v2131_v21 = vshll.u32 %v2130_v39, 16  ;;  %v13562_v39 = vld [vmem:[#allocation34_spill] sm:$0xff] }
 0x3f8   :  { %2466 = vmax.xlane.f32.xlu1 %v2465_v22  ;;  %v13555_v22 = vld [vmem:[#allocation187_spill] sm:$0xff]  ;;  %v8903_v54 = vadd.s32 %v1606_v53, %v1604_v33 }
 0x3f9   :  { %v1648_v49 = vpop.xlane.xlu1 %1647  ;;  %v2085_v40 = vcvt.f32.s32 %v13555_v22  ;;  %v2471_v22 = vsel %vm503_vm0, %v8901_v60, -inf }
 0x3fa   :  { %v1649_v43 = vcvt.f32.s32 %v1648_v49  ;;  %13558 = vst [vmem:[#allocation156_spill] sm:$0xff] %v8903_v54 }
 0x3fc   :  { %v8895_v36 = vadd.s32 %v1651_v6, %v1649_v43  ;;  %2562 = vmax.xlane.f32.xlu1 %v2561_v35  ;;  %v2086_v35 = vshll.u32 %v2085_v40, 16  ;;  %v13559_v6 = vld [vmem:[#allocation195_spill] sm:$0xff]  ;;  %v8927_v40 = vsel %vm12614_vm9, -1e+30, %v13562_v39 }
 0x3fd   :  { %v2128_v45 = vpop.xlane.xlu1 %2127  ;;  %v1635_v43 = vcvt.f32.s32 %v13559_v6  ;;  %v1634_v6 = vcvt.f32.s32 %v8770_v59 }
 0x3fe   :  { %13556 = vst [vmem:[#allocation138_spill] sm:$0xff] %v8895_v36  ;;  %v2129_v49 = vcvt.f32.s32 %v2128_v45  ;;  %vm12603_vm10 = vcmp.eq.s32.totalorder %v6508_v31, %v8895_v36  ;;  %v8929_v45 = vadd.s32 %v2086_v35, %v2084_v5  ;;  %v13566_v35 = vld [vmem:[#allocation37_spill] sm:$0xff] }
 0x3ff   :  { %v8917_v38 = vsel %vm12603_vm10, -1e+30, %v13560_v14  ;;  %vm12610_vm10 = vcmp.eq.s32.totalorder %v6508_v31, %v8903_v54  ;;  %v13564_v14 = vld [vmem:[#allocation48_spill] sm:$0xff] }
 0x400   :  { %v8919_v53 = vadd.s32 %v2131_v21, %v2129_v49  ;;  %2472 = vmax.xlane.f32.xlu1 %v2471_v22  ;;  %v2486_v33 = vsel %vm503_vm0, %v8917_v38, -inf  ;;  %13563 = vst [vmem:[#allocation103_spill] sm:$0xff] %v8929_v45  ;;  %v1636_v21 = vshll.u32 %v1635_v43, 16  ;;  %v2115_v49 = vcvt.f32.s32 %v8532_v41 }
 0x401   :  { %2487 = vmax.xlane.f32.xlu0 %v2486_v33  ;;  %v8932_v36 = vpop.xlane.xlu1 %1692  ;;  %v2567_v22 = vsel %vm503_vm0, %v8927_v40, -inf  ;;  %v8953_v43 = vsel %vm12610_vm10, -1e+30, %v13566_v35  ;;  %v2114_v33 = vcvt.f32.s32 %v8786_v13  ;;  %v13570_v35 = vld [vmem:[#allocation38_spill] sm:$0xff] }
 0x402   :  { %13561 = vst [vmem:[#allocation82_spill] sm:$0xff] %v8919_v53  ;;  %vm12605_vm11 = vcmp.eq.s32.totalorder %v6508_v31, %v8919_v53  ;;  %v8955_v41 = vadd.s32 %v1636_v21, %v1634_v6  ;;  %v13569_v53 = vld [vmem:[#allocation210_spill] sm:$0xff]  ;;  %v2116_v26 = vshll.u32 %v2115_v49, 16  ;;  %v1664_v21 = vcvt.f32.s32 %v8846_v17 }
 0x403   :  { %v8945_v59 = vsel %vm12605_vm11, -1e+30, %v13564_v14  ;;  %vm12613_vm11 = vcmp.eq.s32.totalorder %v6508_v31, %v8929_v45  ;;  %v13568_v14 = vld [vmem:[#allocation88_spill] sm:$0xff]  ;;  %v1665_v27 = vcvt.f32.s32 %v13569_v53  ;;  %v2160_v49 = vcvt.f32.s32 %v8573_v46 }
 0x404   :  { %13565 = vst [vmem:[#allocation146_spill] sm:$0xff] %v8945_v59  ;;  %2568 = vmax.xlane.f32.xlu1 %v2567_v22  ;;  %v2582_v5 = vsel %vm503_vm0, %v8945_v59, -inf  ;;  %13567 = vst [vmem:[#allocation165_spill] sm:$0xff] %v8955_v41  ;;  %v1680_v22 = vcvt.f32.s32 %v13568_v14  ;;  %v2477_v59 = vsel %vm503_vm0, %v8953_v43, -inf  ;;  %v8968_v6 = vsel %vm12613_vm11, -1e+30, %v13570_v35 }
 0x405   :  { %2583 = vmax.xlane.f32.xlu0 %v2582_v5  ;;  %v2173_v39 = vpop.xlane.xlu1 %2172  ;;  %v8970_v13 = vadd.s32 %v2116_v26, %v2114_v33  ;;  %vm12617_vm10 = vcmp.eq.s32.totalorder %v6508_v31, %v8955_v41  ;;  %v1666_v54 = vshll.u32 %v1665_v27, 16  ;;  %v2573_v45 = vsel %vm503_vm0, %v8968_v6, -inf  ;;  %v13573_v26 = vld [vmem:[#allocation41_spill] sm:$0xff] }
 0x406   :  { %v1681_v53 = vshll.u32 %v1680_v22, 16  ;;  %v8985_v17 = vsel %vm12617_vm10, -1e+30, %v13573_v26  ;;  %v2144_v46 = vcvt.f32.s32 %v8872_v62  ;;  %v13576_v26 = vld [vmem:[#allocation51_spill] sm:$0xff] }
 0x407   :  { %13571 = vst [vmem:[#allocation205_spill] sm:$0xff] %v8970_v13  ;;  %v8987_v33 = vadd.s32 %v1666_v54, %v1664_v21  ;;  %vm12618_vm11 = vcmp.eq.s32.totalorder %v6508_v31, %v8970_v13 }
 0x408   :  { %2478 = vmax.xlane.f32.xlu1 %v2477_v59  ;;  %v2145_v59 = vcvt.f32.s32 %v8566_v48  ;;  %v2161_v48 = vshll.u32 %v2160_v49, 16  ;;  %v13578_v49 = vld [vmem:[#allocation42_spill] sm:$0xff] }
 0x409   :  { %v1678_v5 = vpop.xlane.xlu1 %1677  ;;  %13574 = vst [vmem:[#allocation154_spill] sm:$0xff] %v8987_v33 }
 0x40a   :  { %v1679_v14 = vcvt.f32.s32 %v1678_v5 }
 0x40c   :  { %v8979_v35 = vadd.s32 %v1681_v53, %v1679_v14  ;;  %2574 = vmax.xlane.f32.xlu1 %v2573_v45  ;;  %v13575_v45 = vld [vmem:[#allocation206_spill] sm:$0xff]  ;;  %v2146_v53 = vshll.u32 %v2145_v59, 16  ;;  %v2483_v14 = vsel %vm503_vm0, %v8985_v17, -inf  ;;  %v9011_v59 = vsel %vm12618_vm11, -1e+30, %v13578_v49 }
 0x40d   :  { %v2158_v22 = vpop.xlane.xlu1 %2157  ;;  %v1695_v5 = vcvt.f32.s32 %v13575_v45  ;;  %v1694_v45 = vcvt.f32.s32 %v8932_v36 }
 0x40e   :  { %13572 = vst [vmem:[#allocation83_spill] sm:$0xff] %v8979_v35  ;;  %v2159_v27 = vcvt.f32.s32 %v2158_v22  ;;  %vm12616_vm9 = vcmp.eq.s32.totalorder %v6508_v31, %v8979_v35  ;;  %v9013_v22 = vadd.s32 %v2146_v53, %v2144_v46  ;;  %v13582_v53 = vld [vmem:[#allocation45_spill] sm:$0xff] }
 0x40f   :  { %v9001_v62 = vsel %vm12616_vm9, -1e+30, %v13576_v26  ;;  %vm12627_vm9 = vcmp.eq.s32.totalorder %v6508_v31, %v8987_v33  ;;  %v13580_v26 = vld [vmem:[#allocation52_spill] sm:$0xff]  ;;  %v13585_v33 = vld [vmem:[#allocation46_spill] sm:$0xff] }
 0x410   :  { %v9003_v54 = vadd.s32 %v2161_v48, %v2159_v27  ;;  %2484 = vmax.xlane.f32.xlu1 %v2483_v14  ;;  %v2492_v21 = vsel %vm503_vm0, %v9001_v62, -inf  ;;  %13579 = vst [vmem:[#allocation74_spill] sm:$0xff] %v9013_v22  ;;  %v1696_v48 = vshll.u32 %v1695_v5, 16  ;;  %v2175_v27 = vcvt.f32.s32 %v8578_v57 }
 0x411   :  { %2493 = vmax.xlane.f32.xlu0 %v2492_v21  ;;  %v1723_v35 = vpop.xlane.xlu1 %1722  ;;  %v2579_v14 = vsel %vm503_vm0, %v9011_v59, -inf  ;;  %v9035_v5 = vsel %vm12627_vm9, -1e+30, %v13582_v53  ;;  %v2174_v21 = vcvt.f32.s32 %v2173_v39  ;;  %vm12626_vm11 = vcmp.eq.s32.totalorder %v6508_v31, %v9013_v22 }
 0x412   :  { %13577 = vst [vmem:[#allocation169_spill] sm:$0xff] %v9003_v54  ;;  %vm12623_vm10 = vcmp.eq.s32.totalorder %v6508_v31, %v9003_v54  ;;  %v9037_v57 = vadd.s32 %v1696_v48, %v1694_v45  ;;  %v2176_v13 = vshll.u32 %v2175_v27, 16  ;;  %v2489_v41 = vsel %vm503_vm0, %v9035_v5, -inf }
 0x413   :  { %v9027_v46 = vsel %vm12623_vm10, -1e+30, %v13580_v26  ;;  %v1710_v26 = vcvt.f32.s32 %v8260_v44  ;;  %v9049_v45 = vsel %vm12626_vm11, -1e+30, %v13585_v33  ;;  %v1724_v48 = vcvt.f32.s32 %v1723_v35 }
 0x414   :  { %13581 = vst [vmem:[#allocation149_spill] sm:$0xff] %v9027_v46  ;;  %2580 = vmax.xlane.f32.xlu1 %v2579_v14  ;;  %v2588_v36 = vsel %vm503_vm0, %v9027_v46, -inf  ;;  %13583 = vst [vmem:[#allocation184_spill] sm:$0xff] %v9037_v57  ;;  %v13584_v14 = vld [vmem:[#allocation118_spill] sm:$0xff]  ;;  %v9051_v39 = vadd.s32 %v2176_v13, %v2174_v21  ;;  %vm12629_vm10 = vcmp.eq.s32.totalorder %v6508_v31, %v9037_v57  ;;  %v2190_v27 = vcvt.f32.s32 %v8585_v8  ;;  %v13588_v13 = vld [vmem:[#allocation49_spill] sm:$0xff] }
 0x415   :  { %2589 = vmax.xlane.f32.xlu0 %v2588_v36  ;;  %v2203_v49 = vpop.xlane.xlu1 %2202  ;;  %v1725_v54 = vcvt.f32.s32 %v13584_v14  ;;  %v1711_v44 = vshll.u32 %v1710_v26, 16  ;;  %v2585_v46 = vsel %vm503_vm0, %v9049_v45, -inf  ;;  %v9065_v35 = vsel %vm12629_vm10, -1e+30, %v13588_v13  ;;  %v13619_v57 = vld [vmem:[#allocation66_spill] sm:$0xff] }
 0x416   :  { %13586 = vst [vmem:[#allocation78_spill] sm:$0xff] %v9051_v39  ;;  %v2204_v21 = vcvt.f32.s32 %v2203_v49  ;;  %vm12630_vm11 = vcmp.eq.s32.totalorder %v6508_v31, %v9051_v39  ;;  %v13617_v39 = vld [vmem:[#allocation65_spill] sm:$0xff] }
 0x417   :  { %v1726_v14 = vshll.u32 %v1725_v54, 16 }
 0x418   :  { %2490 = vmax.xlane.f32.xlu1 %v2489_v41  ;;  %v2205_v41 = vcvt.f32.s32 %v8590_v16  ;;  %v2191_v16 = vshll.u32 %v2190_v27, 16 }
 0x419   :  { %v1708_v36 = vpop.xlane.xlu1 %1707  ;;  %v9067_v33 = vadd.s32 %v1726_v14, %v1724_v48 }
 0x41a   :  { %v1709_v53 = vcvt.f32.s32 %v1708_v36  ;;  %v2206_v26 = vshll.u32 %v2205_v41, 16  ;;  %v2495_v36 = vsel %vm503_vm0, %v9065_v35, -inf }
 0x41b   :  { %13589 = vst [vmem:[#allocation163_spill] sm:$0xff] %v9067_v33 }
 0x41c   :  { %v9059_v22 = vadd.s32 %v1711_v44, %v1709_v53  ;;  %2586 = vmax.xlane.f32.xlu1 %v2585_v46  ;;  %v1755_v46 = vcvt.f32.s32 %v8278_v28  ;;  %v13590_v44 = vld [vmem:[#allocation55_spill] sm:$0xff]  ;;  %v13592_v53 = vld [vmem:[#allocation50_spill] sm:$0xff]  ;;  %v9092_v14 = vadd.s32 %v2206_v26, %v2204_v21 }
 0x41d   :  { %v2188_v8 = vpop.xlane.xlu1 %2187  ;;  %v9090_v28 = vsel %vm12630_vm11, -1e+30, %v13592_v53  ;;  %v1740_v53 = vcvt.f32.s32 %v8334_v30  ;;  %v2220_v30 = vcvt.f32.s32 %v8600_v29 }
 0x41e   :  { %13587 = vst [vmem:[#allocation183_spill] sm:$0xff] %v9059_v22  ;;  %v2189_v54 = vcvt.f32.s32 %v2188_v8  ;;  %vm12628_vm9 = vcmp.eq.s32.totalorder %v6508_v31, %v9059_v22  ;;  %13593 = vst [vmem:[#allocation89_spill] sm:$0xff] %v9092_v14  ;;  %v1756_v8 = vshll.u32 %v1755_v46, 16  ;;  %vm12634_vm11 = vcmp.eq.s32.totalorder %v6508_v31, %v9092_v14  ;;  %v13600_v22 = vld [vmem:[#allocation57_spill] sm:$0xff] }
 0x41f   :  { %v9080_v49 = vsel %vm12628_vm9, -1e+30, %v13590_v44  ;;  %vm12635_vm9 = vcmp.eq.s32.totalorder %v6508_v31, %v9067_v33  ;;  %v13595_v44 = vld [vmem:[#allocation53_spill] sm:$0xff]  ;;  %v2221_v29 = vshll.u32 %v2220_v30, 16  ;;  %v13603_v30 = vld [vmem:[#allocation58_spill] sm:$0xff]  ;;  %v2265_v14 = vcvt.f32.s32 %v8623_v7  ;;  %v13611_v33 = vld [vmem:[#allocation63_spill] sm:$0xff] }
 0x420   :  { %v9082_v48 = vadd.s32 %v2191_v16, %v2189_v54  ;;  %2496 = vmax.xlane.f32.xlu1 %v2495_v36  ;;  %v2498_v27 = vsel %vm503_vm0, %v9080_v49, -inf  ;;  %v2235_v16 = vcvt.f32.s32 %v8607_v51  ;;  %v2591_v54 = vsel %vm503_vm0, %v9090_v28, -inf  ;;  %v13594_v36 = vld [vmem:[#allocation56_spill] sm:$0xff] }
 0x421   :  { %2499 = vmax.xlane.f32.xlu0 %v2498_v27  ;;  %v1753_v41 = vpop.xlane.xlu1 %1752  ;;  %v9113_v46 = vsel %vm12635_vm9, -1e+30, %v13595_v44 }
 0x422   :  { %13591 = vst [vmem:[#allocation98_spill] sm:$0xff] %v9082_v48  ;;  %v1754_v13 = vcvt.f32.s32 %v1753_v41  ;;  %vm12632_vm10 = vcmp.eq.s32.totalorder %v6508_v31, %v9082_v48  ;;  %v13597_v48 = vld [vmem:[#allocation54_spill] sm:$0xff] }
 0x423   :  { %v9105_v21 = vsel %vm12632_vm10, -1e+30, %v13594_v36  ;;  %v2501_v36 = vsel %vm503_vm0, %v9113_v46, -inf  ;;  %v9126_v44 = vsel %vm12634_vm11, -1e+30, %v13597_v48 }
 0x424   :  { %2592 = vmax.xlane.f32.xlu1 %v2591_v54  ;;  %v2594_v26 = vsel %vm503_vm0, %v9105_v21, -inf  ;;  %v9115_v51 = vadd.s32 %v1756_v8, %v1754_v13  ;;  %v2236_v54 = vshll.u32 %v2235_v16, 16 }
 0x425   :  { %2595 = vmax.xlane.f32.xlu0 %v2594_v26  ;;  %v2233_v27 = vpop.xlane.xlu1 %2232  ;;  %v1741_v26 = vshll.u32 %v1740_v53, 16  ;;  %v1785_v53 = vcvt.f32.s32 %v8352_v47 }
 0x426   :  { %13596 = vst [vmem:[#allocation177_spill] sm:$0xff] %v9115_v51  ;;  %v2234_v41 = vcvt.f32.s32 %v2233_v27  ;;  %vm12656_vm10 = vcmp.eq.s32.totalorder %v6508_v31, %v9115_v51  ;;  %v2597_v27 = vsel %vm503_vm0, %v9126_v44, -inf }
 0x427   :  { %v9141_v48 = vsel %vm12656_vm10, -1e+30, %v13600_v22  ;;  %v1786_v51 = vshll.u32 %v1785_v53, 16 }
 0x428   :  { %2502 = vmax.xlane.f32.xlu1 %v2501_v36  ;;  %v9128_v13 = vadd.s32 %v2236_v54, %v2234_v41 }
 0x429   :  { %v1738_v8 = vpop.xlane.xlu1 %1737 }
 0x42a   :  { %13598 = vst [vmem:[#allocation93_spill] sm:$0xff] %v9128_v13  ;;  %v1739_v16 = vcvt.f32.s32 %v1738_v8  ;;  %vm12640_vm11 = vcmp.eq.s32.totalorder %v6508_v31, %v9128_v13  ;;  %v2507_v8 = vsel %vm503_vm0, %v9141_v48, -inf  ;;  %v13607_v13 = vld [vmem:[#allocation61_spill] sm:$0xff] }
 0x42c   :  { %v9135_v36 = vadd.s32 %v1741_v26, %v1739_v16  ;;  %2598 = vmax.xlane.f32.xlu1 %v2597_v27  ;;  %v13601_v26 = vld [vmem:[#allocation59_spill] sm:$0xff]  ;;  %v9164_v27 = vsel %vm12640_vm11, -1e+30, %v13603_v30  ;;  %v2266_v30 = vshll.u32 %v2265_v14, 16  ;;  %v2250_v14 = vcvt.f32.s32 %v8616_v63 }
 0x42d   :  { %v2218_v41 = vpop.xlane.xlu1 %2217 }
 0x42e   :  { %13599 = vst [vmem:[#allocation5_spill] sm:$0xff] %v9135_v36  ;;  %v2219_v54 = vcvt.f32.s32 %v2218_v41  ;;  %vm12639_vm9 = vcmp.eq.s32.totalorder %v6508_v31, %v9135_v36  ;;  %v2251_v63 = vshll.u32 %v2250_v14, 16 }
 0x42f   :  { %v9154_v22 = vsel %vm12639_vm9, -1e+30, %v13601_v26 }
 0x430   :  { %v9156_v16 = vadd.s32 %v2221_v29, %v2219_v54  ;;  %2508 = vmax.xlane.f32.xlu1 %v2507_v8  ;;  %v2504_v47 = vsel %vm503_vm0, %v9154_v22, -inf  ;;  %v2603_v29 = vsel %vm503_vm0, %v9164_v27, -inf  ;;  %v13604_v54 = vld [vmem:[#allocation60_spill] sm:$0xff] }
 0x431   :  { %2505 = vmax.xlane.f32.xlu0 %v2504_v47  ;;  %v1783_v41 = vpop.xlane.xlu1 %1782  ;;  %v1770_v47 = vcvt.f32.s32 %v8403_v24 }
 0x432   :  { %13602 = vst [vmem:[#allocation180_spill] sm:$0xff] %v9156_v16  ;;  %v1784_v36 = vcvt.f32.s32 %v1783_v41  ;;  %vm12642_vm9 = vcmp.eq.s32.totalorder %v6508_v31, %v9156_v16  ;;  %v13609_v16 = vld [vmem:[#allocation62_spill] sm:$0xff] }
 0x433   :  { %v9175_v8 = vsel %vm12642_vm9, -1e+30, %v13604_v54  ;;  %v1771_v24 = vshll.u32 %v1770_v47, 16  ;;  %v1815_v47 = vcvt.f32.s32 %v8417_v11 }
 0x434   :  { %13605 = vst [vmem:[#allocation104_spill] sm:$0xff] %v9175_v8  ;;  %v9177_v26 = vadd.s32 %v1786_v51, %v1784_v36  ;;  %2604 = vmax.xlane.f32.xlu1 %v2603_v29  ;;  %v2600_v53 = vsel %vm503_vm0, %v9175_v8, -inf  ;;  %v9190_v51 = vpop.xlane.xlu0 %2427 }
 0x435   :  { %2601 = vmax.xlane.f32.xlu0 %v2600_v53  ;;  %v2263_v7 = vpop.xlane.xlu1 %2262  ;;  %v1816_v14 = vshll.u32 %v1815_v47, 16 }
 0x436   :  { %13606 = vst [vmem:[#allocation6_spill] sm:$0xff] %v9177_v26  ;;  %v2264_v41 = vcvt.f32.s32 %v2263_v7  ;;  %vm12645_vm11 = vcmp.eq.s32.totalorder %v6508_v31, %v9177_v26 }
 0x437   :  { %v9188_v54 = vsel %vm12645_vm11, -1e+30, %v13607_v13 }
 0x438   :  { %v9192_v36 = vadd.s32 %v2266_v30, %v2264_v41  ;;  %v2513_v29 = vsel %vm503_vm0, %v9188_v54, -inf }
 0x439   :  { %v1768_v53 = vpop.xlane.xlu1 %1767  ;;  %2514 = vmax.xlane.f32.xlu1 %v2513_v29  ;;  %v9210_v29 = vpop.xlane.xlu0 %2523 }
 0x43a   :  { %13608 = vst [vmem:[#allocation189_spill] sm:$0xff] %v9192_v36  ;;  %v1769_v7 = vcvt.f32.s32 %v1768_v53  ;;  %vm12647_vm9 = vcmp.eq.s32.totalorder %v6508_v31, %v9192_v36  ;;  %v13614_v36 = vld [vmem:[#allocation64_spill] sm:$0xff] }
 0x43b   :  { %v9203_v13 = vsel %vm12647_vm9, -1e+30, %v13609_v16 }
 0x43c   :  { %v9205_v30 = vadd.s32 %v1771_v24, %v1769_v7  ;;  %v2609_v41 = vsel %vm503_vm0, %v9203_v13, -inf }
 0x43d   :  { %v2248_v26 = vpop.xlane.xlu1 %2247  ;;  %2610 = vmax.xlane.f32.xlu1 %v2609_v41  ;;  %v2295_v41 = vcvt.f32.s32 %v8639_v2  ;;  %v1800_v2 = vcvt.f32.s32 %v8456_v50  ;;  %v2280_v50 = vcvt.f32.s32 %v8632_v0 }
 0x43e   :  { %13610 = vst [vmem:[#allocation108_spill] sm:$0xff] %v9205_v30  ;;  %v2249_v53 = vcvt.f32.s32 %v2248_v26  ;;  %vm12650_vm11 = vcmp.eq.s32.totalorder %v6508_v31, %v9205_v30 }
 0x43f   :  { %v9218_v16 = vsel %vm12650_vm11, -1e+30, %v13611_v33  ;;  %v2281_v0 = vshll.u32 %v2280_v50, 16 }
 0x440   :  { %13612 = vst [vmem:[#allocation9_spill] sm:$0xff] %v9218_v16  ;;  %v9220_v24 = vadd.s32 %v2251_v63, %v2249_v53  ;;  %v2510_v7 = vsel %vm503_vm0, %v9218_v16, -inf  ;;  %v9233_v63 = vpop.xlane.xlu0 %2433 }
 0x441   :  { %2511 = vmax.xlane.f32.xlu0 %v2510_v7  ;;  %v1813_v11 = vpop.xlane.xlu1 %1812 }
 0x442   :  { %13613 = vst [vmem:[#allocation191_spill] sm:$0xff] %v9220_v24  ;;  %v1814_v26 = vcvt.f32.s32 %v1813_v11  ;;  %vm12653_vm9 = vcmp.eq.s32.totalorder %v6508_v31, %v9220_v24  ;;  %v2296_v11 = vshll.u32 %v2295_v41, 16  ;;  %v1801_v24 = vshll.u32 %v1800_v2, 16 }
 0x443   :  { %v9231_v33 = vsel %vm12653_vm9, -1e+30, %v13614_v36 }
 0x444   :  { %13615 = vst [vmem:[#allocation114_spill] sm:$0xff] %v9231_v33  ;;  %v9235_v53 = vadd.s32 %v1816_v14, %v1814_v26  ;;  %v2606_v7 = vsel %vm503_vm0, %v9231_v33, -inf  ;;  %v9253_v41 = vpop.xlane.xlu0 %2529 }
 0x445   :  { %2607 = vmax.xlane.f32.xlu0 %v2606_v7  ;;  %v2293_v47 = vpop.xlane.xlu1 %2292 }
 0x446   :  { %13616 = vst [vmem:[#allocation10_spill] sm:$0xff] %v9235_v53  ;;  %v2294_v30 = vcvt.f32.s32 %v2293_v47  ;;  %vm12655_vm11 = vcmp.eq.s32.totalorder %v6508_v31, %v9235_v53  ;;  %v13622_v53 = vld [vmem:[#allocation67_spill] sm:$0xff] }
 0x447   :  { %v9246_v36 = vsel %vm12655_vm11, -1e+30, %v13617_v39 }
 0x448   :  { %v9248_v14 = vadd.s32 %v2296_v11, %v2294_v30  ;;  %v2519_v26 = vsel %vm503_vm0, %v9246_v36, -inf }
 0x449   :  { %2520 = vmax.xlane.f32.xlu1 %v2519_v26  ;;  %v1798_v7 = vpop.xlane.xlu1 %1797  ;;  %v13621_v26 = vld [vmem:[#allocation79_spill] sm:$0xff] }
 0x44a   :  { %13618 = vst [vmem:[#allocation198_spill] sm:$0xff] %v9248_v14  ;;  %v1799_v47 = vcvt.f32.s32 %v1798_v7  ;;  %vm12658_vm9 = vcmp.eq.s32.totalorder %v6508_v31, %v9248_v14  ;;  %vm2618_vm11 = vcmp.eq.f32.partialorder %v13621_v26, %v9190_v51  ;;  %v13626_v26 = vld [vmem:[#allocation94_spill] sm:$0xff] }
 0x44b   :  { %v9261_v39 = vsel %vm12658_vm9, -1e+30, %v13619_v57  ;;  %vm2650_vm9 = vcmp.eq.f32.partialorder %v13626_v26, %v9210_v29 }
 0x44c   :  { %v9263_v30 = vadd.s32 %v1801_v24, %v1799_v47  ;;  %v2615_v11 = vsel %vm503_vm0, %v9261_v39, -inf  ;;  %v9277_v24 = vpop.xlane.xlu0 %2439 }
 0x44d   :  { %2616 = vmax.xlane.f32.xlu1 %v2615_v11  ;;  %v2278_v2 = vpop.xlane.xlu1 %2277  ;;  %v2682_v11 = vsel %vm2618_vm11, %v6508_v31, 8 }
 0x44e   :  { %13620 = vst [vmem:[#allocation97_spill] sm:$0xff] %v9263_v30  ;;  %v2279_v7 = vcvt.f32.s32 %v2278_v2  ;;  %vm12660_vm10 = vcmp.eq.s32.totalorder %v6508_v31, %v9263_v30  ;;  %v9305_v26 = vsel %vm503_vm0, %v2682_v11, 2147483647 }
 0x44f   :  { %v9275_v57 = vsel %vm12660_vm10, -1e+30, %v13622_v53  ;;  %13629 = vst [vmem:[#allocation212_spill] sm:$0xff] %v9305_v26 }
 0x450   :  { %13623 = vst [vmem:[#allocation13_spill] sm:$0xff] %v9275_v57  ;;  %v9279_v47 = vadd.s32 %v2281_v0, %v2279_v7  ;;  %v2516_v50 = vsel %vm503_vm0, %v9275_v57, -inf  ;;  %v13627_v0 = vld [vmem:[#allocation68_spill] sm:$0xff]  ;;  %v9311_v57 = vpop.xlane.xlu0 %2535 }
 0x451   :  { %2517 = vmax.xlane.f32.xlu0 %v2516_v50  ;;  %v9284_v2 = vpop.xlane.xlu1 %2430 }
 0x452   :  { %13624 = vst [vmem:[#allocation209_spill] sm:$0xff] %v9279_v47  ;;  %13625 = vst [vmem:[#allocation123_spill] sm:$0xff] %v9284_v2  ;;  %vm2619_vm8 = vcmp.eq.f32.partialorder %v8667_v56, %v9284_v2  ;;  %vm2360_vm10 = vcmp.eq.s32.totalorder %v6508_v31, %v9279_v47  ;;  %v2714_v56 = vsel %vm2650_vm9, %v6508_v31, 8 }
 0x453   :  { %v2683_v53 = vsel %vm2619_vm8, %v6508_v31, 8  ;;  %v9297_v7 = vsel %vm2360_vm10, -1e+30, %v13627_v0 }
 0x454   :  { %13628 = vst [vmem:[#allocation14_spill] sm:$0xff] %v9297_v7  ;;  %v2612_v50 = vsel %vm503_vm0, %v9297_v7, -inf  ;;  %v9302_v14 = vsel %vm503_vm0, %v2683_v53, 2147483647  ;;  %v2748_v53 = vshra.s32 %v9305_v26, 16  ;;  %v9339_v16 = vpop.xlane.xlu0 %2445 }
 0x455   :  { %2613 = vmax.xlane.f32.xlu0 %v2612_v50  ;;  %v9308_v2 = vpop.xlane.xlu1 %2526  ;;  %v2763_v30 = vshra.s32 %v9302_v14, 16  ;;  %v9323_v50 = vsel %vm503_vm0, %v2714_v56, 2147483647 }
 0x456   :  { %13630 = vst [vmem:[#allocation107_spill] sm:$0xff] %v9308_v2  ;;  %vm2651_vm8 = vcmp.eq.f32.partialorder %v8681_v20, %v9308_v2  ;;  %13631 = vst [vmem:[#allocation17_spill] sm:$0xff] %v9323_v50  ;;  %v13633_v20 = vld [vmem:[#allocation128_spill] sm:$0xff]  ;;  %v3228_v56 = vshra.s32 %v9323_v50, 16 }
 0x457   :  { %v2715_v0 = vsel %vm2651_vm8, %v6508_v31, 8  ;;  %v9316_v47 = vcvt.s32.f32 %v2763_v30  ;;  %vm2620_vm9 = vcmp.eq.f32.partialorder %v13633_v20, %v9233_v63  ;;  %vm2652_vm8 = vcmp.eq.f32.partialorder %v8273_v37, %v9253_v41 }
 0x458   :  { %v9320_v11 = vsel %vm503_vm0, %v2715_v0, 2147483647  ;;  %v9336_v0 = vcvt.s32.f32 %v2748_v53  ;;  %v2684_v26 = vsel %vm2620_vm9, %v6508_v31, 8  ;;  %v2716_v50 = vsel %vm2652_vm8, %v6508_v31, 8 }
 0x459   :  { %2766 = vmin.xlane.f32.xlu0 %v9316_v47  ;;  %v9326_v7 = vpop.xlane.xlu1 %2436  ;;  %v3243_v33 = vshra.s32 %v9320_v11, 16  ;;  %vm2622_vm8 = vcmp.eq.f32.partialorder %v8290_v3, %v9277_v24 }
 0x45a   :  { %13632 = vst [vmem:[#allocation208_spill] sm:$0xff] %v9326_v7  ;;  %vm2621_vm11 = vcmp.eq.f32.partialorder %v8695_v55, %v9326_v7  ;;  %13634 = vst [vmem:[#allocation117_spill] sm:$0xff] %v9336_v0  ;;  %v9361_v7 = vsel %vm503_vm0, %v2684_v26, 2147483647 }
 0x45b   :  { %v2685_v30 = vsel %vm2621_vm11, %v6508_v31, 8  ;;  %v9334_v2 = vcvt.s32.f32 %v3243_v33  ;;  %v9354_v33 = vcvt.s32.f32 %v3228_v56  ;;  %13639 = vst [vmem:[#allocation207_spill] sm:$0xff] %v9361_v7  ;;  %v2778_v26 = vshra.s32 %v9361_v7, 16 }
 0x45c   :  { %v9342_v8 = vsel %vm503_vm0, %v2685_v30, 2147483647 }
 0x45d   :  { %13635 = vst [vmem:[#allocation18_spill] sm:$0xff] %v9342_v8  ;;  %3246 = vmin.xlane.f32.xlu1 %v9334_v2  ;;  %v9346_v20 = vpop.xlane.xlu1 %2532  ;;  %2751 = vmin.xlane.f32.xlu0 %v9336_v0  ;;  %13637 = vst [vmem:[#allocation137_spill] sm:$0xff] %v9354_v33  ;;  %v2793_v53 = vshra.s32 %v9342_v8, 16 }
 0x45e   :  { %13636 = vst [vmem:[#allocation84_spill] sm:$0xff] %v9346_v20  ;;  %vm2653_vm11 = vcmp.eq.f32.partialorder %v8709_v10, %v9346_v20  ;;  %v9368_v10 = vpop.xlane.xlu0 %2541  ;;  %v9378_v20 = vsel %vm503_vm0, %v2716_v50, 2147483647 }
 0x45f   :  { %v2717_v55 = vsel %vm2653_vm11, %v6508_v31, 8  ;;  %13643 = vst [vmem:[#allocation25_spill] sm:$0xff] %v9378_v20  ;;  %v3258_v50 = vshra.s32 %v9378_v20, 16 }
 0x460   :  { %v9358_v30 = vsel %vm503_vm0, %v2717_v55, 2147483647  ;;  %v9374_v55 = vcvt.s32.f32 %v2793_v53  ;;  %v9390_v53 = vcvt.s32.f32 %v2778_v26  ;;  %v13648_v26 = vld [vmem:[#allocation8_spill] sm:$0xff] }
 0x461   :  { %13638 = vst [vmem:[#allocation21_spill] sm:$0xff] %v9358_v30  ;;  %v9364_v0 = vpop.xlane.xlu1 %2442  ;;  %3231 = vmin.xlane.f32.xlu0 %v9354_v33  ;;  %v3273_v37 = vshra.s32 %v9358_v30, 16  ;;  %v9410_v20 = vcvt.s32.f32 %v3258_v50 }
 0x462   :  { %13640 = vst [vmem:[#allocation150_spill] sm:$0xff] %v9364_v0  ;;  %vm2623_vm9 = vcmp.eq.f32.partialorder %v8723_v9, %v9364_v0  ;;  %13642 = vst [vmem:[#allocation155_spill] sm:$0xff] %v9374_v55 }
 0x463   :  { %v9372_v56 = vcvt.s32.f32 %v3273_v37  ;;  %v2687_v8 = vsel %vm2623_vm9, %v6508_v31, 8  ;;  %v9393_v37 = vpop.xlane.xlu0 %2451  ;;  %vm2654_vm9 = vcmp.eq.f32.partialorder %v13648_v26, %v9311_v57  ;;  %13650 = vst [vmem:[#allocation29_spill] sm:$0xff] %v9410_v20 }
 0x464   :  { %v9399_v7 = vsel %vm503_vm0, %v2687_v8, 2147483647 }
 0x465   :  { %13641 = vst [vmem:[#allocation22_spill] sm:$0xff] %v9372_v56  ;;  %3276 = vmin.xlane.f32.xlu1 %v9372_v56  ;;  %v9382_v33 = vpop.xlane.xlu1 %2538  ;;  %2796 = vmin.xlane.f32.xlu0 %v9374_v55  ;;  %13646 = vst [vmem:[#allocation26_spill] sm:$0xff] %v9399_v7  ;;  %v2686_v56 = vsel %vm2622_vm8, %v6508_v31, 8  ;;  %v2718_v55 = vsel %vm2654_vm9, %v6508_v31, 8 }
 0x466   :  { %13644 = vst [vmem:[#allocation159_spill] sm:$0xff] %v9382_v33  ;;  %vm2655_vm11 = vcmp.eq.f32.partialorder %v8737_v18, %v9382_v33  ;;  %v9414_v8 = vsel %vm503_vm0, %v2686_v56, 2147483647 }
 0x467   :  { %v2719_v9 = vsel %vm2655_vm11, %v6508_v31, 8  ;;  %13651 = vst [vmem:[#allocation202_spill] sm:$0xff] %v9414_v8 }
 0x468   :  { %v9396_v0 = vsel %vm503_vm0, %v2719_v9, 2147483647  ;;  %v2823_v9 = vshra.s32 %v9399_v7, 16 }
 0x469   :  { %13645 = vst [vmem:[#allocation43_spill] sm:$0xff] %v9396_v0  ;;  %v9402_v3 = vpop.xlane.xlu1 %2448  ;;  %2781 = vmin.xlane.f32.xlu0 %v9390_v53  ;;  %v3303_v18 = vshra.s32 %v9396_v0, 16  ;;  %v9421_v0 = vpop.xlane.xlu0 %2547 }
 0x46a   :  { %13647 = vst [vmem:[#allocation168_spill] sm:$0xff] %v9402_v3  ;;  %vm2625_vm8 = vcmp.eq.f32.partialorder %v8751_v61, %v9402_v3  ;;  %v9428_v56 = vcvt.s32.f32 %v2823_v9 }
 0x46b   :  { %v9408_v33 = vcvt.s32.f32 %v3303_v18  ;;  %v2808_v18 = vshra.s32 %v9414_v8, 16 }
 0x46c   :  { %13653 = vst [vmem:[#allocation30_spill] sm:$0xff] %v9428_v56 }
 0x46d   :  { %13649 = vst [vmem:[#allocation44_spill] sm:$0xff] %v9408_v33  ;;  %3306 = vmin.xlane.f32.xlu1 %v9408_v33  ;;  %v9418_v30 = vpop.xlane.xlu1 %2544  ;;  %3261 = vmin.xlane.f32.xlu0 %v9410_v20  ;;  %v9435_v33 = vsel %vm503_vm0, %v2718_v55, 2147483647  ;;  %v2689_v20 = vsel %vm2625_vm8, %v6508_v31, 8  ;;  %v9449_v3 = vpop.xlane.xlu0 %2457  ;;  %vm2656_vm8 = vcmp.eq.f32.partialorder %v8345_v25, %v9368_v10 }
 0x46e   :  { %13652 = vst [vmem:[#allocation185_spill] sm:$0xff] %v9418_v30  ;;  %vm2657_vm11 = vcmp.eq.f32.partialorder %v8765_v58, %v9418_v30  ;;  %13655 = vst [vmem:[#allocation33_spill] sm:$0xff] %v9435_v33  ;;  %v13657_v58 = vld [vmem:[#allocation12_spill] sm:$0xff]  ;;  %v9446_v30 = vcvt.s32.f32 %v2808_v18  ;;  %v9452_v55 = vsel %vm503_vm0, %v2689_v20, 2147483647 }
 0x46f   :  { %v2721_v50 = vsel %vm2657_vm11, %v6508_v31, 8  ;;  %vm2624_vm9 = vcmp.eq.f32.partialorder %v13657_v58, %v9339_v16  ;;  %13660 = vst [vmem:[#allocation48_spill] sm:$0xff] %v9452_v55  ;;  %v2853_v20 = vshra.s32 %v9452_v55, 16 }
 0x470   :  { %v9432_v26 = vsel %vm503_vm0, %v2721_v50, 2147483647  ;;  %13659 = vst [vmem:[#allocation34_spill] sm:$0xff] %v9446_v30  ;;  %v3288_v50 = vshra.s32 %v9435_v33, 16  ;;  %v2688_v8 = vsel %vm2624_vm9, %v6508_v31, 8 }
 0x471   :  { %13654 = vst [vmem:[#allocation187_spill] sm:$0xff] %v9432_v26  ;;  %v9438_v7 = vpop.xlane.xlu1 %2454  ;;  %2826 = vmin.xlane.f32.xlu0 %v9428_v56  ;;  %v3333_v61 = vshra.s32 %v9432_v26, 16  ;;  %v2720_v26 = vsel %vm2656_vm8, %v6508_v31, 8  ;;  %vm2626_vm8 = vcmp.eq.f32.partialorder %v8364_v19, %v9393_v37 }
 0x472   :  { %13656 = vst [vmem:[#allocation195_spill] sm:$0xff] %v9438_v7  ;;  %vm2627_vm9 = vcmp.eq.f32.partialorder %v8781_v12, %v9438_v7  ;;  %v2690_v19 = vsel %vm2626_vm8, %v6508_v31, 8 }
 0x473   :  { %v9444_v9 = vcvt.s32.f32 %v3333_v61  ;;  %v9464_v61 = vcvt.s32.f32 %v3288_v50  ;;  %v9482_v50 = vcvt.s32.f32 %v2853_v20  ;;  %v2691_v55 = vsel %vm2627_vm9, %v6508_v31, 8 }
 0x475   :  { %13658 = vst [vmem:[#allocation47_spill] sm:$0xff] %v9444_v9  ;;  %3336 = vmin.xlane.f32.xlu1 %v9444_v9  ;;  %v9456_v56 = vpop.xlane.xlu1 %2550  ;;  %2811 = vmin.xlane.f32.xlu0 %v9446_v30  ;;  %13662 = vst [vmem:[#allocation88_spill] sm:$0xff] %v9464_v61  ;;  %v9471_v9 = vsel %vm503_vm0, %v2688_v8, 2147483647  ;;  %v9488_v8 = vsel %vm503_vm0, %v2720_v26, 2147483647 }
 0x476   :  { %13661 = vst [vmem:[#allocation37_spill] sm:$0xff] %v9456_v56  ;;  %vm2659_vm11 = vcmp.eq.f32.partialorder %v8798_v1, %v9456_v56  ;;  %v9478_v1 = vpop.xlane.xlu0 %2553  ;;  %13665 = vst [vmem:[#allocation41_spill] sm:$0xff] %v9482_v50  ;;  %v3318_v26 = vshra.s32 %v9488_v8, 16 }
 0x477   :  { %v2723_v18 = vsel %vm2659_vm11, %v6508_v31, 8  ;;  %13667 = vst [vmem:[#allocation51_spill] sm:$0xff] %v9488_v8 }
 0x478   :  { %v9468_v58 = vsel %vm503_vm0, %v2723_v18, 2147483647  ;;  %v2838_v18 = vshra.s32 %v9471_v9, 16 }
 0x479   :  { %13663 = vst [vmem:[#allocation210_spill] sm:$0xff] %v9468_v58  ;;  %v9474_v30 = vpop.xlane.xlu1 %2460  ;;  %3291 = vmin.xlane.f32.xlu0 %v9464_v61  ;;  %v3363_v25 = vshra.s32 %v9468_v58, 16  ;;  %v9509_v58 = vsel %vm503_vm0, %v2691_v55, 2147483647  ;;  %v9520_v61 = vcvt.s32.f32 %v3318_v26  ;;  %v9524_v55 = vsel %vm503_vm0, %v2690_v19, 2147483647 }
 0x47a   :  { %13664 = vst [vmem:[#allocation38_spill] sm:$0xff] %v9474_v30  ;;  %v9500_v20 = vcvt.s32.f32 %v2838_v18  ;;  %13671 = vst [vmem:[#allocation118_spill] sm:$0xff] %v9509_v58  ;;  %v13673_v18 = vld [vmem:[#allocation15_spill] sm:$0xff]  ;;  %vm2629_vm8 = vcmp.eq.f32.partialorder %v8815_v32, %v9474_v30 }
 0x47b   :  { %v9485_v56 = vcvt.s32.f32 %v3363_v25  ;;  %v9503_v25 = vpop.xlane.xlu0 %2463  ;;  %vm2658_vm9 = vcmp.eq.f32.partialorder %v13673_v18, %v9421_v0  ;;  %13675 = vst [vmem:[#allocation55_spill] sm:$0xff] %v9520_v61  ;;  %13676 = vst [vmem:[#allocation50_spill] sm:$0xff] %v9524_v55 }
 0x47c   :  { %13669 = vst [vmem:[#allocation52_spill] sm:$0xff] %v9500_v20 }
 0x47d   :  { %13666 = vst [vmem:[#allocation206_spill] sm:$0xff] %v9485_v56  ;;  %v9491_v33 = vpop.xlane.xlu1 %2556  ;;  %2856 = vmin.xlane.f32.xlu0 %v9482_v50  ;;  %3366 = vmin.xlane.f32.xlu1 %v9485_v56  ;;  %v2722_v50 = vsel %vm2658_vm9, %v6508_v31, 8 }
 0x47e   :  { %13668 = vst [vmem:[#allocation42_spill] sm:$0xff] %v9491_v33  ;;  %vm2661_vm11 = vcmp.eq.f32.partialorder %v8841_v42, %v9491_v33 }
 0x47f   :  { %v2725_v12 = vsel %vm2661_vm11, %v6508_v31, 8 }
 0x480   :  { %v9506_v7 = vsel %vm503_vm0, %v2725_v12, 2147483647  ;;  %v2883_v12 = vshra.s32 %v9509_v58, 16 }
 0x481   :  { %13670 = vst [vmem:[#allocation45_spill] sm:$0xff] %v9506_v7  ;;  %v9512_v56 = vpop.xlane.xlu1 %2466  ;;  %2841 = vmin.xlane.f32.xlu0 %v9500_v20  ;;  %v3393_v42 = vshra.s32 %v9506_v7, 16  ;;  %v9531_v7 = vpop.xlane.xlu0 %2559 }
 0x482   :  { %13672 = vst [vmem:[#allocation46_spill] sm:$0xff] %v9512_v56  ;;  %v9538_v19 = vcvt.s32.f32 %v2883_v12 }
 0x483   :  { %v9518_v33 = vcvt.s32.f32 %v3393_v42  ;;  %v2868_v42 = vshra.s32 %v9524_v55, 16 }
 0x484   :  { %13678 = vst [vmem:[#allocation53_spill] sm:$0xff] %v9538_v19 }
 0x485   :  { %13674 = vst [vmem:[#allocation49_spill] sm:$0xff] %v9518_v33  ;;  %3396 = vmin.xlane.f32.xlu1 %v9518_v33  ;;  %v9528_v8 = vpop.xlane.xlu1 %2562  ;;  %3321 = vmin.xlane.f32.xlu0 %v9520_v61  ;;  %v9545_v33 = vsel %vm503_vm0, %v2722_v50, 2147483647  ;;  %v2693_v61 = vsel %vm2629_vm8, %v6508_v31, 8  ;;  %v9554_v12 = vpop.xlane.xlu0 %2469 }
 0x486   :  { %13677 = vst [vmem:[#allocation56_spill] sm:$0xff] %v9528_v8  ;;  %vm2663_vm11 = vcmp.eq.f32.partialorder %v8884_v34, %v9528_v8  ;;  %13680 = vst [vmem:[#allocation57_spill] sm:$0xff] %v9545_v33  ;;  %v13682_v34 = vld [vmem:[#allocation16_spill] sm:$0xff]  ;;  %v9556_v8 = vcvt.s32.f32 %v2868_v42  ;;  %v9562_v50 = vsel %vm503_vm0, %v2693_v61, 2147483647 }
 0x487   :  { %v2727_v26 = vsel %vm2663_vm11, %v6508_v31, 8  ;;  %vm2628_vm9 = vcmp.eq.f32.partialorder %v13682_v34, %v9449_v3  ;;  %13685 = vst [vmem:[#allocation61_spill] sm:$0xff] %v9562_v50  ;;  %v2913_v61 = vshra.s32 %v9562_v50, 16 }
 0x488   :  { %v9542_v18 = vsel %vm503_vm0, %v2727_v26, 2147483647  ;;  %13683 = vst [vmem:[#allocation58_spill] sm:$0xff] %v9556_v8  ;;  %v3348_v26 = vshra.s32 %v9545_v33, 16  ;;  %v2692_v20 = vsel %vm2628_vm9, %v6508_v31, 8  ;;  %vm2631_vm9 = vcmp.eq.f32.partialorder %v8867_v23, %v9512_v56  ;;  %v13696_v23 = vld [vmem:[#allocation23_spill] sm:$0xff] }
 0x489   :  { %13679 = vst [vmem:[#allocation54_spill] sm:$0xff] %v9542_v18  ;;  %v9548_v58 = vpop.xlane.xlu1 %2472  ;;  %2886 = vmin.xlane.f32.xlu0 %v9538_v19  ;;  %v3423_v32 = vshra.s32 %v9542_v18, 16  ;;  %v13687_v18 = vld [vmem:[#allocation19_spill] sm:$0xff]  ;;  %v9577_v34 = vpop.xlane.xlu0 %2565  ;;  %v9580_v19 = vsel %vm503_vm0, %v2692_v20, 2147483647  ;;  %v2695_v50 = vsel %vm2631_vm9, %v6508_v31, 8  ;;  %vm2662_vm9 = vcmp.eq.f32.partialorder %v8445_v52, %v9531_v7 }
 0x48a   :  { %13681 = vst [vmem:[#allocation59_spill] sm:$0xff] %v9548_v58  ;;  %vm2660_vm8 = vcmp.eq.f32.partialorder %v13687_v18, %v9478_v1  ;;  %13689 = vst [vmem:[#allocation64_spill] sm:$0xff] %v9580_v19  ;;  %v9619_v56 = vsel %vm503_vm0, %v2695_v50, 2147483647 }
 0x48b   :  { %v9559_v30 = vcvt.s32.f32 %v3423_v32  ;;  %v9574_v32 = vcvt.s32.f32 %v3348_v26  ;;  %v9592_v26 = vcvt.s32.f32 %v2913_v61  ;;  %13699 = vst [vmem:[#allocation12_spill] sm:$0xff] %v9619_v56 }
 0x48d   :  { %13684 = vst [vmem:[#allocation60_spill] sm:$0xff] %v9559_v30  ;;  %v9565_v55 = vpop.xlane.xlu1 %2568  ;;  %2871 = vmin.xlane.f32.xlu0 %v9556_v8  ;;  %3426 = vmin.xlane.f32.xlu1 %v9559_v30  ;;  %13688 = vst [vmem:[#allocation63_spill] sm:$0xff] %v9574_v32  ;;  %v2724_v8 = vsel %vm2660_vm8, %v6508_v31, 8  ;;  %v9595_v20 = vpop.xlane.xlu0 %2475  ;;  %vm2630_vm8 = vcmp.eq.f32.partialorder %v13696_v23, %v9503_v25 }
 0x48e   :  { %13686 = vst [vmem:[#allocation62_spill] sm:$0xff] %v9565_v55  ;;  %vm2665_vm11 = vcmp.eq.f32.partialorder %v8927_v40, %v9565_v55  ;;  %13692 = vst [vmem:[#allocation79_spill] sm:$0xff] %v9592_v26  ;;  %v2898_v55 = vshra.s32 %v9580_v19, 16  ;;  %v9598_v30 = vsel %vm503_vm0, %v2724_v8, 2147483647 }
 0x48f   :  { %v2729_v42 = vsel %vm2665_vm11, %v6508_v31, 8  ;;  %13693 = vst [vmem:[#allocation67_spill] sm:$0xff] %v9598_v30 }
 0x490   :  { %v9587_v18 = vsel %vm503_vm0, %v2729_v42, 2147483647  ;;  %v9612_v8 = vcvt.s32.f32 %v2898_v55 }
 0x491   :  { %v9583_v33 = vpop.xlane.xlu1 %2478  ;;  %3351 = vmin.xlane.f32.xlu0 %v9574_v32  ;;  %13691 = vst [vmem:[#allocation66_spill] sm:$0xff] %v9587_v18  ;;  %v3453_v40 = vshra.s32 %v9587_v18, 16  ;;  %v3378_v18 = vshra.s32 %v9598_v30, 16  ;;  %v9628_v55 = vpop.xlane.xlu0 %2571  ;;  %v2726_v30 = vsel %vm2662_vm9, %v6508_v31, 8  ;;  %vm2632_vm9 = vcmp.eq.f32.partialorder %v8467_v15, %v9554_v12  ;;  %v13712_v15 = vld [vmem:[#allocation24_spill] sm:$0xff] }
 0x492   :  { %13690 = vst [vmem:[#allocation65_spill] sm:$0xff] %v9583_v33  ;;  %13697 = vst [vmem:[#allocation128_spill] sm:$0xff] %v9612_v8 }
 0x493   :  { %v9601_v32 = vcvt.s32.f32 %v3453_v40 }
 0x495   :  { %13694 = vst [vmem:[#allocation94_spill] sm:$0xff] %v9601_v32  ;;  %v9603_v42 = vpop.xlane.xlu1 %2574  ;;  %2916 = vmin.xlane.f32.xlu0 %v9592_v26  ;;  %3456 = vmin.xlane.f32.xlu1 %v9601_v32  ;;  %v2694_v26 = vsel %vm2630_vm8, %v6508_v31, 8  ;;  %vm2633_vm8 = vcmp.eq.f32.partialorder %v8901_v60, %v9548_v58  ;;  %v2696_v58 = vsel %vm2632_vm9, %v6508_v31, 8  ;;  %vm2635_vm9 = vcmp.eq.f32.partialorder %v8953_v43, %v9583_v33 }
 0x496   :  { %13695 = vst [vmem:[#allocation68_spill] sm:$0xff] %v9603_v42  ;;  %vm2667_vm11 = vcmp.eq.f32.partialorder %v8968_v6, %v9603_v42  ;;  %v9630_v42 = vcvt.s32.f32 %v3378_v18  ;;  %v9636_v50 = vsel %vm503_vm0, %v2694_v26, 2147483647 }
 0x497   :  { %v2731_v61 = vsel %vm2667_vm11, %v6508_v31, 8  ;;  %v2928_v26 = vshra.s32 %v9636_v50, 16 }
 0x498   :  { %v9616_v40 = vsel %vm503_vm0, %v2731_v61, 2147483647  ;;  %13701 = vst [vmem:[#allocation16_spill] sm:$0xff] %v9630_v42  ;;  %v2943_v61 = vshra.s32 %v9619_v56, 16 }
 0x499   :  { %13698 = vst [vmem:[#allocation8_spill] sm:$0xff] %v9616_v40  ;;  %v9622_v23 = vpop.xlane.xlu1 %2484  ;;  %2901 = vmin.xlane.f32.xlu0 %v9612_v8  ;;  %v3483_v6 = vshra.s32 %v9616_v40, 16  ;;  %v9642_v40 = vpop.xlane.xlu0 %2481 }
 0x49a   :  { %13700 = vst [vmem:[#allocation15_spill] sm:$0xff] %v9622_v23  ;;  %v9650_v18 = vcvt.s32.f32 %v2943_v61  ;;  %v9666_v61 = vcvt.s32.f32 %v2928_v26 }
 0x49b   :  { %v9633_v32 = vcvt.s32.f32 %v3483_v6  ;;  %v9654_v6 = vsel %vm503_vm0, %v2726_v30, 2147483647 }
 0x49c   :  { %13704 = vst [vmem:[#allocation213_spill] sm:$0xff] %v9650_v18  ;;  %13705 = vst [vmem:[#allocation214_spill] sm:$0xff] %v9654_v6 }
 0x49d   :  { %13702 = vst [vmem:[#allocation19_spill] sm:$0xff] %v9633_v32  ;;  %v9639_v19 = vpop.xlane.xlu1 %2580  ;;  %3381 = vmin.xlane.f32.xlu0 %v9630_v42  ;;  %3486 = vmin.xlane.f32.xlu1 %v9633_v32  ;;  %v2697_v42 = vsel %vm2633_vm8, %v6508_v31, 8  ;;  %13708 = vst [vmem:[#allocation217_spill] sm:$0xff] %v9666_v61  ;;  %v9669_v30 = vpop.xlane.xlu0 %2577  ;;  %vm2664_vm8 = vcmp.eq.f32.partialorder %v13712_v15, %v9577_v34 }
 0x49e   :  { %13703 = vst [vmem:[#allocation23_spill] sm:$0xff] %v9639_v19  ;;  %vm2669_vm11 = vcmp.eq.f32.partialorder %v9011_v59, %v9639_v19  ;;  %v3408_v19 = vshra.s32 %v9654_v6, 16  ;;  %v9672_v32 = vsel %vm503_vm0, %v2697_v42, 2147483647  ;;  %v2728_v15 = vsel %vm2664_vm8, %v6508_v31, 8 }
 0x49f   :  { %v2733_v52 = vsel %vm2669_vm11, %v6508_v31, 8  ;;  %13709 = vst [vmem:[#allocation218_spill] sm:$0xff] %v9672_v32  ;;  %vm2634_vm8 = vcmp.eq.f32.partialorder %v8525_v4, %v9595_v20 }
 0x4a0   :  { %v9661_v60 = vsel %vm503_vm0, %v2733_v52, 2147483647  ;;  %v9686_v42 = vcvt.s32.f32 %v3408_v19  ;;  %v2698_v33 = vsel %vm2634_vm8, %v6508_v31, 8  ;;  %vm2637_vm8 = vcmp.eq.f32.partialorder %v8985_v17, %v9622_v23 }
 0x4a1   :  { %v9657_v56 = vpop.xlane.xlu1 %2490  ;;  %2946 = vmin.xlane.f32.xlu0 %v9650_v18  ;;  %13707 = vst [vmem:[#allocation216_spill] sm:$0xff] %v9661_v60  ;;  %v3513_v59 = vshra.s32 %v9661_v60, 16  ;;  %v2973_v60 = vshra.s32 %v9672_v32, 16  ;;  %v2701_v17 = vsel %vm2637_vm8, %v6508_v31, 8 }
 0x4a2   :  { %13706 = vst [vmem:[#allocation215_spill] sm:$0xff] %v9657_v56  ;;  %13713 = vst [vmem:[#allocation24_spill] sm:$0xff] %v9686_v42 }
 0x4a3   :  { %v9675_v18 = vcvt.s32.f32 %v3513_v59  ;;  %v9689_v59 = vpop.xlane.xlu0 %2487  ;;  %v9704_v19 = vcvt.s32.f32 %v2973_v60 }
 0x4a5   :  { %13710 = vst [vmem:[#allocation219_spill] sm:$0xff] %v9675_v18  ;;  %v9677_v52 = vpop.xlane.xlu1 %2586  ;;  %2931 = vmin.xlane.f32.xlu0 %v9666_v61  ;;  %3516 = vmin.xlane.f32.xlu1 %v9675_v18  ;;  %v9695_v61 = vsel %vm503_vm0, %v2696_v58, 2147483647  ;;  %13716 = vst [vmem:[#allocation223_spill] sm:$0xff] %v9704_v19  ;;  %v9710_v58 = vsel %vm503_vm0, %v2728_v15, 2147483647 }
 0x4a6   :  { %13711 = vst [vmem:[#allocation220_spill] sm:$0xff] %v9677_v52  ;;  %vm2671_vm11 = vcmp.eq.f32.partialorder %v9049_v45, %v9677_v52  ;;  %v2958_v18 = vshra.s32 %v9695_v61, 16  ;;  %13718 = vst [vmem:[#allocation225_spill] sm:$0xff] %v9710_v58  ;;  %v2699_v52 = vsel %vm2635_vm9, %v6508_v31, 8  ;;  %v3438_v15 = vshra.s32 %v9710_v58, 16 }
 0x4a7   :  { %v2735_v26 = vsel %vm2671_vm11, %v6508_v31, 8 }
 0x4a8   :  { %v9692_v8 = vsel %vm503_vm0, %v2735_v26, 2147483647  ;;  %v9724_v60 = vcvt.s32.f32 %v2958_v18 }
 0x4a9   :  { %13714 = vst [vmem:[#allocation221_spill] sm:$0xff] %v9692_v8  ;;  %v9698_v6 = vpop.xlane.xlu1 %2496  ;;  %3411 = vmin.xlane.f32.xlu0 %v9686_v42  ;;  %v3543_v45 = vshra.s32 %v9692_v8, 16  ;;  %v9718_v8 = vpop.xlane.xlu0 %2583  ;;  %v9746_v42 = vsel %vm503_vm0, %v2698_v33, 2147483647 }
 0x4aa   :  { %13715 = vst [vmem:[#allocation222_spill] sm:$0xff] %v9698_v6  ;;  %13720 = vst [vmem:[#allocation227_spill] sm:$0xff] %v9718_v8 }
 0x4ab   :  { %v9707_v26 = vcvt.s32.f32 %v3543_v45  ;;  %13721 = vst [vmem:[#allocation228_spill] sm:$0xff] %v9724_v60  ;;  %v9728_v45 = vsel %vm503_vm0, %v2699_v52, 2147483647  ;;  %13728 = vst [vmem:[#allocation233_spill] sm:$0xff] %v9746_v42 }
 0x4ac   :  { %13722 = vst [vmem:[#allocation229_spill] sm:$0xff] %v9728_v45  ;;  %v3003_v52 = vshra.s32 %v9728_v45, 16 }
 0x4ad   :  { %13717 = vst [vmem:[#allocation224_spill] sm:$0xff] %v9707_v26  ;;  %v9713_v32 = vpop.xlane.xlu1 %2592  ;;  %2976 = vmin.xlane.f32.xlu0 %v9704_v19  ;;  %3546 = vmin.xlane.f32.xlu1 %v9707_v26  ;;  %v9742_v26 = vcvt.s32.f32 %v3438_v15 }
 0x4ae   :  { %13719 = vst [vmem:[#allocation226_spill] sm:$0xff] %v9713_v32  ;;  %vm2673_vm11 = vcmp.eq.f32.partialorder %v9090_v28, %v9713_v32  ;;  %v13725_v28 = vld [vmem:[#allocation28_spill] sm:$0xff]  ;;  %v9739_v32 = vpop.xlane.xlu0 %2493  ;;  %v9760_v33 = vcvt.s32.f32 %v3003_v52  ;;  %v13736_v52 = vld [vmem:[#allocation142_spill] sm:$0xff] }
 0x4af   :  { %v2737_v43 = vsel %vm2673_vm11, %v6508_v31, 8  ;;  %vm2666_vm9 = vcmp.eq.f32.partialorder %v13725_v28, %v9628_v55  ;;  %13726 = vst [vmem:[#allocation28_spill] sm:$0xff] %v9739_v32  ;;  %13727 = vst [vmem:[#allocation232_spill] sm:$0xff] %v9742_v26  ;;  %v2988_v28 = vshra.s32 %v9746_v42, 16 }
 0x4b0   :  { %v9735_v4 = vsel %vm503_vm0, %v2737_v43, 2147483647  ;;  %v2730_v58 = vsel %vm2666_vm9, %v6508_v31, 8  ;;  %13731 = vst [vmem:[#allocation236_spill] sm:$0xff] %v9760_v33  ;;  %vm2636_vm9 = vcmp.eq.f32.partialorder %v13736_v52, %v9642_v40 }
 0x4b1   :  { %v9731_v19 = vpop.xlane.xlu1 %2502  ;;  %2961 = vmin.xlane.f32.xlu0 %v9724_v60  ;;  %13724 = vst [vmem:[#allocation231_spill] sm:$0xff] %v9735_v4  ;;  %v3573_v18 = vshra.s32 %v9735_v4, 16  ;;  %v2700_v52 = vsel %vm2636_vm9, %v6508_v31, 8  ;;  %vm2639_vm9 = vcmp.eq.f32.partialorder %v9035_v5, %v9657_v56 }
 0x4b2   :  { %13723 = vst [vmem:[#allocation230_spill] sm:$0xff] %v9731_v19  ;;  %v2703_v56 = vsel %vm2639_vm9, %v6508_v31, 8 }
 0x4b3   :  { %v9749_v60 = vcvt.s32.f32 %v3573_v18  ;;  %v9763_v18 = vpop.xlane.xlu0 %2589 }
 0x4b4   :  { %13732 = vst [vmem:[#allocation237_spill] sm:$0xff] %v9763_v18 }
 0x4b5   :  { %13729 = vst [vmem:[#allocation234_spill] sm:$0xff] %v9749_v60  ;;  %v9751_v43 = vpop.xlane.xlu1 %2598  ;;  %3441 = vmin.xlane.f32.xlu0 %v9742_v26  ;;  %3576 = vmin.xlane.f32.xlu1 %v9749_v60  ;;  %v9769_v26 = vsel %vm503_vm0, %v2730_v58, 2147483647  ;;  %v9781_v60 = vcvt.s32.f32 %v2988_v28  ;;  %v13743_v28 = vld [vmem:[#allocation141_spill] sm:$0xff] }
 0x4b6   :  { %13730 = vst [vmem:[#allocation235_spill] sm:$0xff] %v9751_v43  ;;  %vm2675_vm11 = vcmp.eq.f32.partialorder %v9126_v44, %v9751_v43  ;;  %13734 = vst [vmem:[#allocation239_spill] sm:$0xff] %v9769_v26  ;;  %v3468_v58 = vshra.s32 %v9769_v26, 16  ;;  %vm2668_vm8 = vcmp.eq.f32.partialorder %v13743_v28, %v9669_v30 }
 0x4b7   :  { %v2739_v15 = vsel %vm2675_vm11, %v6508_v31, 8  ;;  %13737 = vst [vmem:[#allocation142_spill] sm:$0xff] %v9781_v60  ;;  %v9784_v43 = vpop.xlane.xlu0 %2499 }
 0x4b8   :  { %v9766_v4 = vsel %vm503_vm0, %v2739_v15, 2147483647  ;;  %13738 = vst [vmem:[#allocation241_spill] sm:$0xff] %v9784_v43 }
 0x4b9   :  { %13733 = vst [vmem:[#allocation238_spill] sm:$0xff] %v9766_v4  ;;  %v9772_v23 = vpop.xlane.xlu1 %2508  ;;  %3006 = vmin.xlane.f32.xlu0 %v9760_v33  ;;  %v3603_v44 = vshra.s32 %v9766_v4, 16  ;;  %v9792_v4 = vsel %vm503_vm0, %v2701_v17, 2147483647  ;;  %v9805_v17 = vcvt.s32.f32 %v3468_v58 }
 0x4ba   :  { %13735 = vst [vmem:[#allocation240_spill] sm:$0xff] %v9772_v23  ;;  %vm2645_vm11 = vcmp.eq.f32.partialorder %v9141_v48, %v9772_v23  ;;  %13741 = vst [vmem:[#allocation244_spill] sm:$0xff] %v9792_v4  ;;  %v9809_v23 = vsel %vm503_vm0, %v2700_v52, 2147483647 }
 0x4bb   :  { %v2709_v15 = vsel %vm2645_vm11, %v6508_v31, 8  ;;  %v9786_v42 = vcvt.s32.f32 %v3603_v44  ;;  %13744 = vst [vmem:[#allocation141_spill] sm:$0xff] %v9805_v17  ;;  %13745 = vst [vmem:[#allocation246_spill] sm:$0xff] %v9809_v23 }
 0x4bc   :  { %v9789_v33 = vsel %vm503_vm0, %v2709_v15, 2147483647  ;;  %v3033_v15 = vshra.s32 %v9792_v4, 16  ;;  %v3242_v4 = vand.u32 65535, %v9320_v11  ;;  %v13834_v11 = vld [vmem:[#allocation71_spill] sm:$0xff] }
 0x4bd   :  { %13739 = vst [vmem:[#allocation242_spill] sm:$0xff] %v9786_v42  ;;  %13740 = vst [vmem:[#allocation243_spill] sm:$0xff] %v9789_v33  ;;  %v9795_v45 = vpop.xlane.xlu1 %2604  ;;  %2991 = vmin.xlane.f32.xlu0 %v9781_v60  ;;  %v3153_v48 = vshra.s32 %v9789_v33, 16  ;;  %3606 = vmin.xlane.f32.xlu1 %v9786_v42  ;;  %v2732_v60 = vsel %vm2668_vm8, %v6508_v31, 8 }
 0x4be   :  { %13742 = vst [vmem:[#allocation245_spill] sm:$0xff] %v9795_v45  ;;  %vm2677_vm11 = vcmp.eq.f32.partialorder %v9164_v27, %v9795_v45  ;;  %v9820_v27 = vpop.xlane.xlu0 %2595  ;;  %v9828_v52 = vcvt.s32.f32 %v3033_v15  ;;  %v9835_v5 = vsel %vm503_vm0, %v2732_v60, 2147483647 }
 0x4bf   :  { %v2741_v44 = vsel %vm2677_vm11, %v6508_v31, 8  ;;  %v9812_v33 = vcvt.s32.f32 %v3153_v48  ;;  %13748 = vst [vmem:[#allocation249_spill] sm:$0xff] %v9820_v27  ;;  %v3018_v48 = vshra.s32 %v9809_v23, 16  ;;  %13752 = vst [vmem:[#allocation253_spill] sm:$0xff] %v9835_v5  ;;  %vm2638_vm11 = vcmp.eq.f32.partialorder %v8917_v38, %v9689_v59 }
 0x4c0   :  { %v9816_v28 = vsel %vm503_vm0, %v2741_v44, 2147483647  ;;  %13750 = vst [vmem:[#allocation251_spill] sm:$0xff] %v9828_v52  ;;  %v9859_v38 = vsel %vm503_vm0, %v2703_v56, 2147483647  ;;  %v2702_v23 = vsel %vm2638_vm11, %v6508_v31, 8  ;;  %vm2641_vm11 = vcmp.eq.f32.partialorder %v9065_v35, %v9698_v6 }
 0x4c1   :  { %13746 = vst [vmem:[#allocation247_spill] sm:$0xff] %v9812_v33  ;;  %3471 = vmin.xlane.f32.xlu0 %v9805_v17  ;;  %13747 = vst [vmem:[#allocation248_spill] sm:$0xff] %v9816_v28  ;;  %v3633_v42 = vshra.s32 %v9816_v28, 16  ;;  %3156 = vmin.xlane.f32.xlu1 %v9812_v33  ;;  %v9852_v60 = vcvt.s32.f32 %v3018_v48 }
 0x4c2   :  { %v9822_v58 = vpop.xlane.xlu1 %2514  ;;  %13758 = vst [vmem:[#allocation259_spill] sm:$0xff] %v9859_v38 }
 0x4c3   :  { %13749 = vst [vmem:[#allocation250_spill] sm:$0xff] %v9822_v58  ;;  %vm2647_vm8 = vcmp.eq.f32.partialorder %v9188_v54, %v9822_v58  ;;  %v9832_v45 = vcvt.s32.f32 %v3633_v42  ;;  %v9844_v54 = vpop.xlane.xlu0 %2505  ;;  %13756 = vst [vmem:[#allocation257_spill] sm:$0xff] %v9852_v60  ;;  %v3498_v58 = vshra.s32 %v9835_v5, 16  ;;  %v13784_v5 = vld [vmem:[#allocation73_spill] sm:$0xff] }
 0x4c4   :  { %v2711_v44 = vsel %vm2647_vm8, %v6508_v31, 8  ;;  %13754 = vst [vmem:[#allocation255_spill] sm:$0xff] %v9844_v54 }
 0x4c5   :  { %13751 = vst [vmem:[#allocation252_spill] sm:$0xff] %v9832_v45  ;;  %3036 = vmin.xlane.f32.xlu0 %v9828_v52  ;;  %v9840_v33 = vsel %vm503_vm0, %v2711_v44, 2147483647  ;;  %3636 = vmin.xlane.f32.xlu1 %v9832_v45 }
 0x4c6   :  { %13753 = vst [vmem:[#allocation254_spill] sm:$0xff] %v9840_v33  ;;  %v9846_v15 = vpop.xlane.xlu1 %2610  ;;  %v3183_v42 = vshra.s32 %v9840_v33, 16 }
 0x4c7   :  { %13755 = vst [vmem:[#allocation256_spill] sm:$0xff] %v9846_v15  ;;  %vm2679_vm8 = vcmp.eq.f32.partialorder %v9203_v13, %v9846_v15  ;;  %v13760_v13 = vld [vmem:[#allocation146_spill] sm:$0xff]  ;;  %v9870_v15 = vcvt.s32.f32 %v3498_v58  ;;  %v9873_v56 = vpop.xlane.xlu0 %2601 }
 0x4c8   :  { %v2743_v44 = vsel %vm2679_vm8, %v6508_v31, 8  ;;  %v9856_v28 = vcvt.s32.f32 %v3183_v42  ;;  %vm2670_vm9 = vcmp.eq.f32.partialorder %v13760_v13, %v9718_v8  ;;  %v3063_v42 = vshra.s32 %v9859_v38, 16  ;;  %13762 = vst [vmem:[#allocation261_spill] sm:$0xff] %v9873_v56  ;;  %v13850_v8 = vld [vmem:[#allocation81_spill] sm:$0xff] }
 0x4c9   :  { %3021 = vmin.xlane.f32.xlu0 %v9852_v60  ;;  %v9864_v45 = vsel %vm503_vm0, %v2743_v44, 2147483647  ;;  %13761 = vst [vmem:[#allocation146_spill] sm:$0xff] %v9870_v15  ;;  %v9878_v60 = vsel %vm503_vm0, %v2702_v23, 2147483647  ;;  %v2734_v44 = vsel %vm2670_vm9, %v6508_v31, 8  ;;  %vm2640_vm8 = vcmp.eq.f32.partialorder %v9001_v62, %v9739_v32 }
 0x4ca   :  { %13757 = vst [vmem:[#allocation258_spill] sm:$0xff] %v9856_v28  ;;  %13759 = vst [vmem:[#allocation260_spill] sm:$0xff] %v9864_v45  ;;  %v3663_v48 = vshra.s32 %v9864_v45, 16  ;;  %3186 = vmin.xlane.f32.xlu1 %v9856_v28  ;;  %v9885_v58 = vcvt.s32.f32 %v3063_v42  ;;  %v3048_v13 = vshra.s32 %v9878_v60, 16  ;;  %v2705_v23 = vsel %vm2641_vm11, %v6508_v31, 8 }
 0x4cb   :  { %13764 = vst [vmem:[#allocation263_spill] sm:$0xff] %v9878_v60  ;;  %v9888_v45 = vpop.xlane.xlu0 %2511  ;;  %v2704_v60 = vsel %vm2640_vm8, %v6508_v31, 8 }
 0x4cc   :  { %v9875_v33 = vcvt.s32.f32 %v3663_v48  ;;  %13765 = vst [vmem:[#allocation264_spill] sm:$0xff] %v9885_v58  ;;  %13766 = vst [vmem:[#allocation265_spill] sm:$0xff] %v9888_v45  ;;  %v9891_v48 = vsel %vm503_vm0, %v2734_v44, 2147483647  ;;  %v9901_v35 = vcvt.s32.f32 %v3048_v13  ;;  %v9906_v44 = vsel %vm503_vm0, %v2705_v23, 2147483647 }
 0x4cd   :  { %3501 = vmin.xlane.f32.xlu0 %v9870_v15  ;;  %13767 = vst [vmem:[#allocation266_spill] sm:$0xff] %v9891_v48  ;;  %v3528_v42 = vshra.s32 %v9891_v48, 16  ;;  %13770 = vst [vmem:[#allocation269_spill] sm:$0xff] %v9906_v44  ;;  %v13776_v48 = vld [vmem:[#allocation149_spill] sm:$0xff] }
 0x4ce   :  { %13763 = vst [vmem:[#allocation262_spill] sm:$0xff] %v9875_v33  ;;  %3666 = vmin.xlane.f32.xlu1 %v9875_v33  ;;  %13769 = vst [vmem:[#allocation268_spill] sm:$0xff] %v9901_v35  ;;  %vm2672_vm11 = vcmp.eq.f32.partialorder %v13776_v48, %v9763_v18 }
 0x4cf   :  { %v2736_v48 = vsel %vm2672_vm11, %v6508_v31, 8 }
 0x4d1   :  { %3066 = vmin.xlane.f32.xlu0 %v9885_v58  ;;  %v12824_v58 = vmov 0.0  }
 0x4d2   :  { %v9897_v28 = vpop.xlane.xlu1 %2520  ;;  %v9917_v13 = vsel %vm2299_vm3, 1.0, %v12824_v58  ;;  %v9923_v23 = vsel %vm2331_vm15, 1.0, %v12824_v58  ;;  %v9947_v38 = vsel %vm2330_vm4, 1.0, %v12824_v58 }
 0x4d3   :  { %13768 = vst [vmem:[#allocation267_spill] sm:$0xff] %v9897_v28  ;;  %vm2649_vm9 = vcmp.eq.f32.partialorder %v9246_v36, %v9897_v28  ;;  %13773 = vst [vmem:[#allocation160_spill] sm:$0xff] %v9917_v13  ;;  %v9936_v13 = vsel %vm2298_vm2, 1.0, %v12824_v58  ;;  %v9940_v28 = vcvt.s32.f32 %v3528_v42  ;;  %v9953_v36 = vsel %vm503_vm0, %v2704_v60, 2147483647 }
 0x4d4   :  { %v2713_v33 = vsel %vm2649_vm9, %v6508_v31, 8  ;;  %13775 = vst [vmem:[#allocation31_spill] sm:$0xff] %v9923_v23  ;;  %v3093_v23 = vshra.s32 %v9906_v44, 16  ;;  %13783 = vst [vmem:[#allocation272_spill] sm:$0xff] %v9953_v36  ;;  %v9972_v60 = vsel %vm2300_vm5, 1.0, %v12824_v58  ;;  %vm2643_vm2 = vcmp.eq.f32.partialorder %v9113_v46, %v9731_v19 }
 0x4d5   :  { %3051 = vmin.xlane.f32.xlu0 %v9901_v35  ;;  %v9911_v62 = vsel %vm503_vm0, %v2713_v33, 2147483647  ;;  %v9927_v35 = vpop.xlane.xlu0 %2607  ;;  %13780 = vst [vmem:[#allocation87_spill] sm:$0xff] %v9940_v28  ;;  %v3078_v46 = vshra.s32 %v9953_v36, 16  ;;  %v10011_v19 = vsel %vm2335_vm12, 1.0, %v12824_v58  ;;  %v13802_v36 = vld [vmem:[#allocation77_spill] sm:$0xff]  ;;  %vm2674_vm9 = vcmp.eq.f32.partialorder %v9105_v21, %v9820_v27 }
 0x4d6   :  { %13771 = vst [vmem:[#allocation270_spill] sm:$0xff] %v9911_v62  ;;  %13777 = vst [vmem:[#allocation149_spill] sm:$0xff] %v9927_v35  ;;  %v9929_v33 = vpop.xlane.xlu1 %2616  ;;  %v3213_v15 = vshra.s32 %v9911_v62, 16  ;;  %v3802_v17 = vsub.f32 %v9210_v29, %v13802_v36  ;;  %v2707_v18 = vsel %vm2643_vm2, %v6508_v31, 8  ;;  %v2762_v36 = vand.u32 65535, %v9302_v14 }
 0x4d7   :  { %13778 = vst [vmem:[#allocation271_spill] sm:$0xff] %v9929_v33  ;;  %vm2681_vm3 = vcmp.eq.f32.partialorder %v9261_v39, %v9929_v33  ;;  %v3770_v39 = vsub.f32 %v9190_v51, %v13784_v5  ;;  %v9961_v33 = vsel %vm2301_vm1, 1.0, %v12824_v58  ;;  %v9978_v5 = vsel %vm2333_vm14, 1.0, %v12824_v58  ;;  %13797 = vst [vmem:[#allocation172_spill] sm:$0xff] %v10011_v19 }
 0x4d8   :  { %v2745_v62 = vsel %vm2681_vm3, %v6508_v31, 8  ;;  %v9950_v6 = vcvt.s32.f32 %v3213_v15  ;;  %13786 = vst [vmem:[#allocation73_spill] sm:$0xff] %v9961_v33  ;;  %13790 = vst [vmem:[#allocation124_spill] sm:$0xff] %v9978_v5  ;;  %v9990_v33 = vsel %vm2332_vm6, 1.0, %v12824_v58  ;;  %v9996_v5 = vsel %vm2303_vm13, 1.0, %v12824_v58  ;;  %v13806_v15 = vld [vmem:[#allocation39_spill] sm:$0xff] }
 0x4d9   :  { %3531 = vmin.xlane.f32.xlu0 %v9940_v28  ;;  %v9966_v44 = vsel %vm503_vm0, %v2745_v62, 2147483647  ;;  %13793 = vst [vmem:[#allocation35_spill] sm:$0xff] %v9996_v5  ;;  %v9998_v28 = vcvt.s32.f32 %v3093_v23  ;;  %v10016_v51 = vsel %vm503_vm0, %v2736_v48, 2147483647  ;;  %v13800_v23 = vld [vmem:[#allocation92_spill] sm:$0xff]  ;;  %vm13807_vm6 = vcmp.eq.s32.totalorder %v6508_v31, %v13806_v15 }
 0x4da   :  { %13782 = vst [vmem:[#allocation109_spill] sm:$0xff] %v9950_v6  ;;  %13787 = vst [vmem:[#allocation32_spill] sm:$0xff] %v9966_v44  ;;  %3216 = vmin.xlane.f32.xlu1 %v9950_v6  ;;  %v9983_v42 = vpop.xlane.xlu0 %2517  ;;  %v3693_v62 = vshra.s32 %v9966_v44, 16  ;;  %v10005_v44 = vsel %vm2302_vm7, 1.0, %v12824_v58  ;;  %vm13801_vm4 = vcmp.eq.s32.totalorder %v6508_v31, %v13800_v23  ;;  %v3834_v6 = vmul.f32 1.442695, %v3770_v39 }
 0x4db   :  { %13794 = vst [vmem:[#allocation99_spill] sm:$0xff] %v9998_v28  ;;  %13799 = vst [vmem:[#allocation36_spill] sm:$0xff] %v10016_v51  ;;  %v10022_v5 = vsel %vm13801_vm4, 1.0, %v12824_v58  ;;  %v10038_v23 = vsel %vm13807_vm6, 1.0, %v12824_v58  ;;  %vm2642_vm7 = vcmp.eq.f32.partialorder %v9080_v49, %v9784_v43  ;;  %v13809_v39 = vld [vmem:[#allocation112_spill] sm:$0xff]  ;;  %v13811_v15 = vld [vmem:[#allocation113_spill] sm:$0xff]  ;;  %vm2644_vm6 = vcmp.eq.f32.partialorder %v9154_v22, %v9844_v54 }
 0x4dc   :  { %v10013_v52 = vcvt.s32.f32 %v3693_v62  ;;  %v13803_v62 = vld [vmem:[#allocation175_spill] sm:$0xff]  ;;  %13808 = vst [vmem:[#allocation77_spill] sm:$0xff] %v10038_v23  ;;  %vm13810_vm12 = vcmp.eq.s32.totalorder %v6508_v31, %v13809_v39  ;;  %vm13812_vm13 = vcmp.eq.s32.totalorder %v6508_v31, %v13811_v15  ;;  %v3558_v49 = vshra.s32 %v10016_v51, 16  ;;  %v13816_v39 = vld [vmem:[#allocation40_spill] sm:$0xff] }
 0x4dd   :  { %3096 = vmin.xlane.f32.xlu0 %v9998_v28  ;;  %vm13804_vm5 = vcmp.eq.s32.totalorder %v6508_v31, %v13803_v62  ;;  %v10050_v62 = vsel %vm13810_vm12, 1.0, %v12824_v58  ;;  %v10056_v23 = vsel %vm13812_vm13, 1.0, %v12824_v58  ;;  %vm13817_vm15 = vcmp.eq.s32.totalorder %v6508_v31, %v13816_v39  ;;  %v13819_v15 = vld [vmem:[#allocation204_spill] sm:$0xff] }
 0x4de   :  { %13798 = vst [vmem:[#allocation7_spill] sm:$0xff] %v10013_v52  ;;  %v10032_v48 = vsel %vm13804_vm5, 1.0, %v12824_v58  ;;  %3696 = vmin.xlane.f32.xlu1 %v10013_v52  ;;  %v10043_v29 = vpop.xlane.xlu0 %2613  ;;  %v13814_v52 = vld [vmem:[#allocation119_spill] sm:$0xff]  ;;  %v10071_v19 = vsel %vm13817_vm15, 1.0, %v12824_v58  ;;  %vm13820_vm1 = vcmp.eq.s32.totalorder %v6508_v31, %v13819_v15  ;;  %v10080_v51 = vsel %vm503_vm0, %v2707_v18, 2147483647 }
 0x4df   :  { %13805 = vst [vmem:[#allocation92_spill] sm:$0xff] %v10032_v48  ;;  %v10058_v48 = vcvt.s32.f32 %v3078_v46  ;;  %vm13815_vm14 = vcmp.eq.s32.totalorder %v6508_v31, %v13814_v52  ;;  %13818 = vst [vmem:[#allocation39_spill] sm:$0xff] %v10071_v19  ;;  %v10077_v46 = vsel %vm13820_vm1, 1.0, %v12824_v58  ;;  %v13823_v52 = vld [vmem:[#allocation11_spill] sm:$0xff]  ;;  %5500 = vpow2.f32 %v3834_v6 }
 0x4e0   :  { %v10065_v14 = vsel %vm13815_vm14, 1.0, %v12824_v58  ;;  %13821 = vst [vmem:[#allocation112_spill] sm:$0xff] %v10077_v46  ;;  %13822 = vst [vmem:[#allocation113_spill] sm:$0xff] %v10080_v51  ;;  %vm13824_vm8 = vcmp.eq.s32.totalorder %v6508_v31, %v13823_v52  ;;  %v3898_v43 = vmul.f32 1.442695, %v3802_v17  ;;  %v2706_v39 = vsel %vm2642_vm7, %v6508_v31, 8 }
 0x4e1   :  { %13813 = vst [vmem:[#allocation175_spill] sm:$0xff] %v10058_v48  ;;  %v10086_v28 = vsel %vm13824_vm8, 1.0, %v12824_v58  ;;  %3081 = vmin.xlane.f32.xlu0 %v10058_v48  ;;  %v13825_v15 = vld [vmem:[#allocation203_spill] sm:$0xff]  ;;  %v2764_v19 = vcvt.s32.f32 %v2762_v36  ;;  %v13827_v52 = vld [vmem:[#allocation122_spill] sm:$0xff]  ;;  %v10103_v6 = vcvt.s32.f32 %v3558_v49  ;;  %v3123_v48 = vshra.s32 %v10080_v51, 16 }
 0x4e2   :  { %v3800_v46 = vsub.f32 %v9983_v42, %v13825_v15  ;;  %v10094_v18 = vpop.xlane.xlu0 %2766  ;;  %vm13828_vm11 = vcmp.eq.s32.totalorder %v6508_v31, %v13827_v52  ;;  %v13831_v15 = vld [vmem:[#allocation127_spill] sm:$0xff]  ;;  %v3832_v32 = vsub.f32 %v10043_v29, %v13834_v11  ;;  %v10117_v52 = vsel %vm503_vm0, %v2706_v39, 2147483647  ;;  %v13836_v49 = vld [vmem:[#allocation102_spill] sm:$0xff] }
 0x4e3   :  { %13826 = vst [vmem:[#allocation119_spill] sm:$0xff] %v10094_v18  ;;  %v10101_v17 = vsel %vm13828_vm11, 1.0, %v12824_v58  ;;  %13830 = vst [vmem:[#allocation204_spill] sm:$0xff] %v10103_v6  ;;  %vm2768_vm3 = vcmp.eq.f32.partialorder %v9316_v47, %v10094_v18  ;;  %vm13832_vm2 = vcmp.eq.s32.totalorder %v6508_v31, %v13831_v15  ;;  %vm13837_vm4 = vcmp.eq.s32.totalorder %v6508_v31, %v13836_v49 }
 0x4e4   :  { %13829 = vst [vmem:[#allocation40_spill] sm:$0xff] %v10101_v17  ;;  %v10112_v36 = vsel %vm13832_vm2, 1.0, %v12824_v58  ;;  %v2769_v26 = vsel %vm2768_vm3, %v2764_v19, inf  ;;  %13835 = vst [vmem:[#allocation203_spill] sm:$0xff] %v10117_v52  ;;  %v10123_v47 = vsel %vm13837_vm4, 1.0, %v12824_v58  ;;  %v13838_v17 = vld [vmem:[#allocation129_spill] sm:$0xff]  ;;  %5502 = vpow2.f32 %v3898_v43 }
 0x4e5   :  { %13833 = vst [vmem:[#allocation11_spill] sm:$0xff] %v10112_v36  ;;  %vm13839_vm5 = vcmp.eq.s32.totalorder %v6508_v31, %v13838_v17  ;;  %v2738_v19 = vsel %vm2674_vm9, %v6508_v31, 8  ;;  %3561 = vmin.xlane.f32.xlu0 %v10103_v6  ;;  %2770 = vmin.xlane.f32.xlu1 %v2769_v26  ;;  %v3894_v39 = vmul.f32 1.442695, %v3800_v46  ;;  %v3244_v17 = vcvt.s32.f32 %v3242_v4  ;;  %v13843_v43 = vld [vmem:[#allocation80_spill] sm:$0xff]  ;;  %v13846_v46 = vld [vmem:[#allocation211_spill] sm:$0xff] }
 0x4e6   :  { %v10129_v15 = vsel %vm13839_vm5, 1.0, %v12824_v58  ;;  %v10138_v11 = vpop.xlane.xlu1 %3246  ;;  %v10140_v49 = vpop.xlane.xlu0 %2751  ;;  %v13842_v58 = vld [vmem:[#allocation212_spill] sm:$0xff]  ;;  %v3772_v51 = vsub.f32 %v9233_v63, %v13843_v43  ;;  %v10145_v18 = vcvt.s32.f32 %v3123_v48  ;;  %v3108_v21 = vshra.s32 %v10117_v52, 16  ;;  %v13851_v48 = vld [vmem:[#allocation151_spill] sm:$0xff] }
 0x4e7   :  { %13840 = vst [vmem:[#allocation122_spill] sm:$0xff] %v10138_v11  ;;  %13841 = vst [vmem:[#allocation127_spill] sm:$0xff] %v10140_v49  ;;  %v2747_v36 = vand.u32 65535, %v13842_v58  ;;  %vm3248_vm7 = vcmp.eq.f32.partialorder %v9334_v2, %v10138_v11  ;;  %v13845_v26 = vmov 0.0   ;;  %vm13847_vm12 = vcmp.eq.s32.totalorder %v6508_v31, %v13846_v46 }
 0x4e8   :  { %13844 = vst [vmem:[#allocation71_spill] sm:$0xff] %v10145_v18  ;;  %v10154_v6 = vsel %vm13847_vm12, 1.0, %v13845_v26  ;;  %v3958_v27 = vmul.f32 1.442695, %v3832_v32  ;;  %v3249_v4 = vsel %vm3248_vm7, %v3244_v17, inf  ;;  %v3804_v63 = vsub.f32 %v9253_v41, %v13850_v8  ;;  %v13854_v32 = vld [vmem:[#allocation117_spill] sm:$0xff] }
 0x4e9   :  { %13848 = vst [vmem:[#allocation102_spill] sm:$0xff] %v10154_v6  ;;  %v10157_v58 = vsel %vm503_vm0, %v2738_v19, 2147483647  ;;  %vm13852_vm13 = vcmp.eq.s32.totalorder %v6508_v31, %v13851_v48  ;;  %v2708_v43 = vsel %vm2644_vm6, %v6508_v31, 8  ;;  %3126 = vmin.xlane.f32.xlu0 %v10145_v18  ;;  %3250 = vmin.xlane.f32.xlu1 %v3249_v4  ;;  %vm2753_vm14 = vcmp.eq.f32.partialorder %v13854_v32, %v10140_v49  ;;  %v13855_v19 = vld [vmem:[#allocation104_spill] sm:$0xff]  ;;  %v13856_v17 = vld [vmem:[#allocation18_spill] sm:$0xff] }
 0x4ea   :  { %13849 = vst [vmem:[#allocation129_spill] sm:$0xff] %v10157_v58  ;;  %v10165_v2 = vsel %vm13852_vm13, 1.0, %v13845_v26  ;;  %vm2676_vm15 = vcmp.eq.f32.partialorder %v13855_v19, %v9873_v56  ;;  %5504 = vpow2.f32 %v3894_v39  ;;  %v10176_v41 = vpop.xlane.xlu0 %3231  ;;  %v2749_v8 = vcvt.s32.f32 %v2747_v36  ;;  %v13857_v48 = vld [vmem:[#allocation133_spill] sm:$0xff]  ;;  %v13860_v6 = vld [vmem:[#allocation86_spill] sm:$0xff]  ;;  %v13876_v56 = vld [vmem:[#allocation155_spill] sm:$0xff] }
 0x4eb   :  { %13853 = vst [vmem:[#allocation212_spill] sm:$0xff] %v10165_v2  ;;  %v2792_v46 = vand.u32 65535, %v13856_v17  ;;  %vm13858_vm1 = vcmp.eq.s32.totalorder %v6508_v31, %v13857_v48  ;;  %v3838_v2 = vmul.f32 1.442695, %v3772_v51  ;;  %v10185_v4 = vcvt.s32.f32 %v3108_v21  ;;  %v13862_v17 = vld [vmem:[#allocation20_spill] sm:$0xff]  ;;  %v13865_v51 = vld [vmem:[#allocation201_spill] sm:$0xff] }
 0x4ec   :  { %v10183_v22 = vsel %vm13858_vm1, 1.0, %v13845_v26  ;;  %v3588_v32 = vshra.s32 %v10157_v58, 16  ;;  %v3774_v18 = vsub.f32 %v9277_v24, %v13860_v6  ;;  %5506 = vpow2.f32 %v3958_v27  ;;  %v10210_v27 = vpop.eup %5500  ;;  %v13868_v6 = vld [vmem:[#allocation75_spill] sm:$0xff] }
 0x4ed   :  { %13859 = vst [vmem:[#allocation80_spill] sm:$0xff] %v10185_v4  ;;  %v2754_v39 = vsel %vm2753_vm14, %v2749_v8, inf  ;;  %v10191_v36 = vsel %vm503_vm0, %v2708_v43, 2147483647  ;;  %vm13863_vm8 = vcmp.eq.s32.totalorder %v6508_v31, %v13862_v17  ;;  %v3902_v52 = vmul.f32 1.442695, %v3804_v63  ;;  %3111 = vmin.xlane.f32.xlu0 %v10185_v4 }
 0x4ee   :  { %13861 = vst [vmem:[#allocation211_spill] sm:$0xff] %v10191_v36  ;;  %v10197_v48 = vsel %vm13863_vm8, 1.0, %v13845_v26  ;;  %vm13866_vm9 = vcmp.eq.s32.totalorder %v6508_v31, %v13865_v51  ;;  %v2740_v24 = vsel %vm2676_vm15, %v6508_v31, 8  ;;  %2755 = vmin.xlane.f32.xlu1 %v2754_v39  ;;  %vm13869_vm11 = vcmp.eq.s32.totalorder %v6508_v31, %v13868_v6  ;;  %v13871_v43 = vld [vmem:[#allocation9_spill] sm:$0xff]  ;;  %v10220_v8 = vpop.xlane.xlu1 %3276  ;;  %v10222_v17 = vpop.xlane.xlu0 %2796 }
 0x4ef   :  { %13864 = vst [vmem:[#allocation81_spill] sm:$0xff] %v10197_v48  ;;  %v10203_v21 = vsel %vm13866_vm9, 1.0, %v13845_v26  ;;  %v10216_v63 = vsel %vm13869_vm11, 1.0, %v13845_v26  ;;  %vm2646_vm3 = vcmp.eq.f32.partialorder %v13871_v43, %v9888_v45  ;;  %13872 = vst [vmem:[#allocation104_spill] sm:$0xff] %v10220_v8  ;;  %v2794_v19 = vcvt.s32.f32 %v2792_v46  ;;  %v13874_v51 = vld [vmem:[#allocation21_spill] sm:$0xff]  ;;  %v13879_v46 = vld [vmem:[#allocation143_spill] sm:$0xff] }
 0x4f0   :  { %13867 = vst [vmem:[#allocation151_spill] sm:$0xff] %v10203_v21  ;;  %13870 = vst [vmem:[#allocation117_spill] sm:$0xff] %v10216_v63  ;;  %v3272_v21 = vand.u32 65535, %v13874_v51  ;;  %5508 = vpow2.f32 %v3838_v2  ;;  %v10225_v39 = vcvt.s32.f32 %v3588_v32  ;;  %vm2798_vm2 = vcmp.eq.f32.partialorder %v13876_v56, %v10222_v17  ;;  %v13877_v63 = vld [vmem:[#allocation91_spill] sm:$0xff]  ;;  %v13882_v56 = vld [vmem:[#allocation22_spill] sm:$0xff] }
 0x4f1   :  { %13873 = vst [vmem:[#allocation18_spill] sm:$0xff] %v10222_v17  ;;  %v3138_v6 = vshra.s32 %v10191_v36, 16  ;;  %v3842_v4 = vmul.f32 1.442695, %v3774_v18  ;;  %v3806_v58 = vsub.f32 %v9311_v57, %v13877_v63  ;;  %v2799_v43 = vsel %vm2798_vm2, %v2794_v19, inf  ;;  %v10245_v57 = vpop.eup %5502  ;;  %v13885_v51 = vld [vmem:[#allocation207_spill] sm:$0xff] }
 0x4f2   :  { %13875 = vst [vmem:[#allocation133_spill] sm:$0xff] %v10225_v39  ;;  %v10233_v45 = vsel %vm503_vm0, %v2740_v24, 2147483647  ;;  %vm13880_vm4 = vcmp.eq.s32.totalorder %v6508_v31, %v13879_v46  ;;  %5510 = vpow2.f32 %v3902_v52  ;;  %v2710_v32 = vsel %vm2646_vm3, %v6508_v31, 8  ;;  %3591 = vmin.xlane.f32.xlu0 %v10225_v39  ;;  %2800 = vmin.xlane.f32.xlu1 %v2799_v43  ;;  %v13883_v24 = vld [vmem:[#allocation114_spill] sm:$0xff]  ;;  %v10250_v63 = vpop.xlane.xlu0 %2781  ;;  %v13886_v46 = vld [vmem:[#allocation136_spill] sm:$0xff] }
 0x4f3   :  { %13878 = vst [vmem:[#allocation86_spill] sm:$0xff] %v10233_v45  ;;  %v10239_v2 = vsel %vm13880_vm4, 1.0, %v13845_v26  ;;  %vm3278_vm5 = vcmp.eq.f32.partialorder %v13882_v56, %v10220_v8  ;;  %v3962_v18 = vadd.f32 1.0, %v10210_v27  ;;  %vm2678_vm6 = vcmp.eq.f32.partialorder %v13883_v24, %v9927_v35  ;;  %13884 = vst [vmem:[#allocation201_spill] sm:$0xff] %v10250_v63  ;;  %v13889_v56 = vld [vmem:[#allocation156_spill] sm:$0xff]  ;;  %v13940_v48 = vld [vmem:[#allocation57_spill] sm:$0xff] }
 0x4f4   :  { %13881 = vst [vmem:[#allocation20_spill] sm:$0xff] %v10239_v2  ;;  %v3274_v19 = vcvt.s32.f32 %v3272_v21  ;;  %v2777_v52 = vand.u32 65535, %v13885_v51  ;;  %vm13887_vm7 = vcmp.eq.s32.totalorder %v6508_v31, %v13886_v46  ;;  %vm13890_vm12 = vcmp.eq.s32.totalorder %v6508_v31, %v13889_v56  ;;  %v13894_v36 = vld [vmem:[#allocation96_spill] sm:$0xff] }
 0x4f5   :  { %v10257_v43 = vsel %vm13887_vm7, 1.0, %v13845_v26  ;;  %v10263_v39 = vsel %vm13890_vm12, 1.0, %v13845_v26  ;;  %v10265_v8 = vcvt.s32.f32 %v3138_v6  ;;  %v3618_v24 = vshra.s32 %v10233_v45, 16  ;;  %v13938_v2 = vld [vmem:[#allocation116_spill] sm:$0xff] }
 0x4f6   :  { %13888 = vst [vmem:[#allocation75_spill] sm:$0xff] %v10257_v43  ;;  %13891 = vst [vmem:[#allocation9_spill] sm:$0xff] %v10263_v39  ;;  %5512 = vpow2.f32 %v3842_v4  ;;  %v3906_v21 = vmul.f32 1.442695, %v3806_v58  ;;  %v3279_v35 = vsel %vm3278_vm5, %v3274_v19, inf  ;;  %v3994_v46 = vadd.f32 1.0, %v10245_v57  ;;  %v10280_v4 = vpop.xlane.xlu0 %3261 }
 0x4f7   :  { %13892 = vst [vmem:[#allocation21_spill] sm:$0xff] %v10265_v8  ;;  %v10269_v51 = vsel %vm503_vm0, %v2710_v32, 2147483647  ;;  %v3776_v17 = vsub.f32 %v9339_v16, %v13894_v36  ;;  %v2742_v49 = vsel %vm2678_vm6, %v6508_v31, 8  ;;  %3141 = vmin.xlane.f32.xlu0 %v10265_v8  ;;  %3280 = vmin.xlane.f32.xlu1 %v3279_v35  ;;  %vm2783_vm13 = vcmp.eq.f32.partialorder %v9390_v53, %v10250_v63  ;;  %v13895_v58 = vld [vmem:[#allocation13_spill] sm:$0xff]  ;;  %v13896_v32 = vld [vmem:[#allocation26_spill] sm:$0xff]  ;;  %v10283_v56 = vpop.eup %5504 }
 0x4f8   :  { %13893 = vst [vmem:[#allocation155_spill] sm:$0xff] %v10269_v51  ;;  %5514 = vrcp.f32 %v3962_v18  ;;  %vm2648_vm14 = vcmp.eq.f32.partialorder %v13895_v58, %v9983_v42  ;;  %v2779_v6 = vcvt.s32.f32 %v2777_v52  ;;  %v2822_v19 = vand.u32 65535, %v13896_v32  ;;  %13897 = vst [vmem:[#allocation91_spill] sm:$0xff] %v10283_v56  ;;  %v13898_v16 = vld [vmem:[#allocation164_spill] sm:$0xff]  ;;  %v13901_v53 = vld [vmem:[#allocation103_spill] sm:$0xff] }
 0x4f9   :  { %vm13899_vm15 = vcmp.eq.s32.totalorder %v6508_v31, %v13898_v16  ;;  %vm13902_vm1 = vcmp.eq.s32.totalorder %v6508_v31, %v13901_v53  ;;  %v10297_v18 = vcvt.s32.f32 %v3618_v24  ;;  %v3168_v52 = vshra.s32 %v10269_v51, 16  ;;  %v13905_v32 = vld [vmem:[#allocation27_spill] sm:$0xff]  ;;  %v10309_v63 = vpop.eup %5506  ;;  %v13916_v42 = vld [vmem:[#allocation30_spill] sm:$0xff] }
 0x4fa   :  { %v10289_v36 = vsel %vm13899_vm15, 1.0, %v13845_v26  ;;  %v10295_v35 = vsel %vm13902_vm1, 1.0, %v13845_v26  ;;  %vm13906_vm8 = vcmp.eq.s32.totalorder %v6508_v31, %v13905_v32  ;;  %5516 = vpow2.f32 %v3906_v21  ;;  %13909 = vst [vmem:[#allocation156_spill] sm:$0xff] %v10309_v63  ;;  %v13914_v32 = vld [vmem:[#allocation43_spill] sm:$0xff] }
 0x4fb   :  { %13900 = vst [vmem:[#allocation143_spill] sm:$0xff] %v10289_v36  ;;  %13903 = vst [vmem:[#allocation22_spill] sm:$0xff] %v10295_v35  ;;  %v10304_v39 = vsel %vm13906_vm8, 1.0, %v13845_v26  ;;  %v2784_v16 = vsel %vm2783_vm13, %v2779_v6, inf  ;;  %v10307_v8 = vsel %vm503_vm0, %v2742_v49, 2147483647  ;;  %5518 = vrcp.f32 %v3994_v46  ;;  %3621 = vmin.xlane.f32.xlu0 %v10297_v18  ;;  %v10321_v6 = vpop.xlane.xlu1 %3306  ;;  %v10323_v46 = vpop.xlane.xlu0 %2826 }
 0x4fc   :  { %13904 = vst [vmem:[#allocation114_spill] sm:$0xff] %v10297_v18  ;;  %13907 = vst [vmem:[#allocation207_spill] sm:$0xff] %v10304_v39  ;;  %v3846_v53 = vmul.f32 1.442695, %v3776_v17  ;;  %v13910_v35 = vld [vmem:[#allocation101_spill] sm:$0xff]  ;;  %v2712_v51 = vsel %vm2648_vm14, %v6508_v31, 8  ;;  %2785 = vmin.xlane.f32.xlu1 %v2784_v16  ;;  %v2824_v17 = vcvt.s32.f32 %v2822_v19  ;;  %vm2828_vm11 = vcmp.eq.f32.partialorder %v13916_v42, %v10323_v46 }
 0x4fd   :  { %13908 = vst [vmem:[#allocation136_spill] sm:$0xff] %v10307_v8  ;;  %v3808_v24 = vsub.f32 %v9368_v10, %v13910_v35  ;;  %v3992_v21 = vadd.f32 1.0, %v10283_v56  ;;  %v13911_v49 = vld [vmem:[#allocation14_spill] sm:$0xff]  ;;  %13912 = vst [vmem:[#allocation96_spill] sm:$0xff] %v10321_v6  ;;  %v3302_v10 = vand.u32 65535, %v13914_v32  ;;  %v10326_v35 = vcvt.s32.f32 %v3168_v52  ;;  %v13917_v16 = vld [vmem:[#allocation17_spill] sm:$0xff]  ;;  %v10332_v56 = vpop.eup %5508 }
 0x4fe   :  { %vm2680_vm9 = vcmp.eq.f32.partialorder %v13911_v49, %v10043_v29  ;;  %13913 = vst [vmem:[#allocation13_spill] sm:$0xff] %v10323_v46  ;;  %v3648_v58 = vshra.s32 %v10307_v8, 16  ;;  %v3227_v18 = vand.u32 65535, %v13917_v16  ;;  %v4024_v45 = vadd.f32 1.0, %v10309_v63  ;;  %v13919_v19 = vld [vmem:[#allocation25_spill] sm:$0xff]  ;;  %v13920_v42 = vld [vmem:[#allocation44_spill] sm:$0xff] }
 0x4ff   :  { %13915 = vst [vmem:[#allocation26_spill] sm:$0xff] %v10326_v35  ;;  %v2829_v11 = vsel %vm2828_vm11, %v2824_v17, inf  ;;  %v10336_v54 = vsel %vm503_vm0, %v2712_v51, 2147483647  ;;  %v3257_v39 = vand.u32 65535, %v13919_v19  ;;  %5520 = vpow2.f32 %v3846_v53  ;;  %3171 = vmin.xlane.f32.xlu0 %v10326_v35  ;;  %v10346_v16 = vpop.eup %5510  ;;  %v10348_v51 = vpop.xlane.xlu0 %2811  ;;  %v13922_v19 = vld [vmem:[#allocation202_spill] sm:$0xff] }
 0x500   :  { %13918 = vst [vmem:[#allocation164_spill] sm:$0xff] %v10336_v54  ;;  %v3910_v52 = vmul.f32 1.442695, %v3808_v24  ;;  %v2744_v32 = vsel %vm2680_vm9, %v6508_v31, 8  ;;  %2830 = vmin.xlane.f32.xlu1 %v2829_v11  ;;  %vm3308_vm3 = vcmp.eq.f32.partialorder %v13920_v42, %v10321_v6  ;;  %5522 = vrcp.f32 %v3992_v21  ;;  %13921 = vst [vmem:[#allocation103_spill] sm:$0xff] %v10348_v51  ;;  %v13923_v24 = vld [vmem:[#allocation33_spill] sm:$0xff] }
 0x501   :  { %v3304_v17 = vcvt.s32.f32 %v3302_v10  ;;  %v2807_v53 = vand.u32 65535, %v13922_v19  ;;  %v3287_v63 = vand.u32 65535, %v13923_v24  ;;  %v3964_v8 = vadd.f32 1.0, %v10332_v56  ;;  %v13925_v35 = vld [vmem:[#allocation106_spill] sm:$0xff] }
 0x502   :  { %v10353_v29 = vcvt.s32.f32 %v3648_v58  ;;  %v3198_v49 = vshra.s32 %v10336_v54, 16  ;;  %v2837_v11 = vand.u32 65535, %v9471_v9  ;;  %v3778_v42 = vsub.f32 %v9393_v37, %v13925_v35  ;;  %v13927_v58 = vld [vmem:[#allocation34_spill] sm:$0xff]  ;;  %v13928_v9 = vld [vmem:[#allocation51_spill] sm:$0xff]  ;;  %v13929_v37 = vld [vmem:[#allocation165_spill] sm:$0xff] }
 0x503   :  { %5524 = vrcp.f32 %v4024_v45  ;;  %v3309_v21 = vsel %vm3308_vm3, %v3304_v17, inf  ;;  %v10360_v6 = vsel %vm503_vm0, %v2744_v32, 2147483647  ;;  %v10362_v10 = vpop.eup %5512  ;;  %v3996_v19 = vadd.f32 1.0, %v10346_v16  ;;  %v10375_v35 = vpop.xlane.xlu0 %3291  ;;  %v13933_v17 = vld [vmem:[#allocation48_spill] sm:$0xff] }
 0x504   :  { %13924 = vst [vmem:[#allocation27_spill] sm:$0xff] %v10353_v29  ;;  %13926 = vst [vmem:[#allocation101_spill] sm:$0xff] %v10360_v6  ;;  %5526 = vpow2.f32 %v3910_v52  ;;  %3651 = vmin.xlane.f32.xlu0 %v10353_v29  ;;  %3310 = vmin.xlane.f32.xlu1 %v3309_v21  ;;  %vm2813_vm2 = vcmp.eq.f32.partialorder %v13927_v58, %v10348_v51  ;;  %v3317_v24 = vand.u32 65535, %v13928_v9  ;;  %v2809_v32 = vcvt.s32.f32 %v2807_v53  ;;  %v13934_v29 = vld [vmem:[#allocation111_spill] sm:$0xff] }
 0x505   :  { %vm13930_vm4 = vcmp.eq.s32.totalorder %v6508_v31, %v13929_v37  ;;  %13932 = vst [vmem:[#allocation43_spill] sm:$0xff] %v10375_v35  ;;  %v2852_v54 = vand.u32 65535, %v13933_v17  ;;  %v3229_v52 = vcvt.s32.f32 %v3227_v18  ;;  %v5515_v46 = vpop.eup %5514  ;;  %v3810_v21 = vsub.f32 %v9421_v0, %v13934_v29 }
 0x506   :  { %v10373_v45 = vsel %vm13930_vm4, 1.0, %v13845_v26  ;;  %v10380_v36 = vcvt.s32.f32 %v3198_v49  ;;  %v3678_v58 = vshra.s32 %v10360_v6, 16  ;;  %v10383_v9 = vcvt.s32.f32 %v3257_v39  ;;  %v10393_v49 = vpop.xlane.xlu1 %3336 }
 0x507   :  { %13931 = vst [vmem:[#allocation14_spill] sm:$0xff] %v10373_v45  ;;  %5528 = vrcp.f32 %v3964_v8  ;;  %v3850_v37 = vmul.f32 1.442695, %v3778_v42  ;;  %v2814_v51 = vsel %vm2813_vm2, %v2809_v32, inf  ;;  %v10385_v45 = vcvt.s32.f32 %v3287_v63  ;;  %v10387_v43 = vpop.eup %5516  ;;  %v10395_v39 = vpop.xlane.xlu0 %2856  ;;  %v13936_v42 = vld [vmem:[#allocation187_spill] sm:$0xff]  ;;  %v13937_v32 = vld [vmem:[#allocation50_spill] sm:$0xff] }
 0x508   :  { %13935 = vst [vmem:[#allocation30_spill] sm:$0xff] %v10380_v36  ;;  %5530 = vrcp.f32 %v3996_v19  ;;  %v3966_v18 = vadd.f32 1.0, %v10362_v10  ;;  %3201 = vmin.xlane.f32.xlu0 %v10380_v36  ;;  %2815 = vmin.xlane.f32.xlu1 %v2814_v51  ;;  %v2839_v0 = vcvt.s32.f32 %v2837_v11  ;;  %v10391_v53 = vcvt.s32.f32 %v3317_v24  ;;  %v5519_v29 = vpop.eup %5518  ;;  %v13939_v24 = vld [vmem:[#allocation41_spill] sm:$0xff] }
 0x509   :  { %v2854_v8 = vcvt.s32.f32 %v2852_v54  ;;  %v3332_v63 = vand.u32 65535, %v13936_v42  ;;  %v2867_v17 = vand.u32 65535, %v13937_v32  ;;  %v10400_v19 = vmul.f32 %v5515_v46, %v10210_v27  ;;  %v13941_v27 = vld [vmem:[#allocation137_spill] sm:$0xff] }
 0x50a   :  { %v3914_v6 = vmul.f32 1.442695, %v3810_v21  ;;  %v3780_v51 = vsub.f32 %v9449_v3, %v13938_v2  ;;  %v10404_v11 = vcvt.s32.f32 %v3678_v58  ;;  %vm2858_vm5 = vcmp.eq.f32.partialorder %v13939_v24, %v10395_v39  ;;  %v13942_v3 = vld [vmem:[#allocation47_spill] sm:$0xff]  ;;  %v13943_v58 = vld [vmem:[#allocation121_spill] sm:$0xff] }
 0x50b   :  { %v3998_v36 = vadd.f32 1.0, %v10387_v43  ;;  %5532 = vpow2.f32 %v3850_v37  ;;  %v2859_v54 = vsel %vm2858_vm5, %v2854_v8, inf  ;;  %v3347_v42 = vand.u32 65535, %v13940_v48  ;;  %v10422_v8 = vpop.xlane.xlu0 %2841 }
 0x50c   :  { %5534 = vrcp.f32 %v3966_v18  ;;  %3681 = vmin.xlane.f32.xlu0 %v10404_v11  ;;  %2860 = vmin.xlane.f32.xlu1 %v2859_v54  ;;  %vm3233_vm6 = vcmp.eq.f32.partialorder %v13941_v27, %v10176_v41  ;;  %vm3338_vm7 = vcmp.eq.f32.partialorder %v13942_v3, %v10393_v49  ;;  %v10416_v2 = vmul.f32 %v5515_v46, %v9936_v13  ;;  %v10418_v21 = vpop.eup %5520  ;;  %v13946_v27 = vld [vmem:[#allocation126_spill] sm:$0xff] }
 0x50d   :  { %v3812_v37 = vsub.f32 %v9478_v1, %v13943_v58  ;;  %v3334_v48 = vcvt.s32.f32 %v3332_v63  ;;  %v10424_v18 = vcvt.s32.f32 %v2867_v17  ;;  %v10427_v32 = vmul.f32 %v5519_v29, %v10245_v57  ;;  %v10429_v24 = vpop.eup %5522  ;;  %v13949_v17 = vld [vmem:[#allocation97_spill] sm:$0xff] }
 0x50e   :  { %13945 = vst [vmem:[#allocation25_spill] sm:$0xff] %v10429_v24  ;;  %5536 = vpow2.f32 %v3914_v6  ;;  %v3854_v54 = vmul.f32 1.442695, %v3780_v51  ;;  %v3782_v13 = vsub.f32 %v9503_v25, %v13946_v27  ;;  %v10434_v46 = vmul.f32 %v5519_v29, %v9947_v38  ;;  %v13951_v25 = vld [vmem:[#allocation29_spill] sm:$0xff]  ;;  %v13952_v38 = vld [vmem:[#allocation52_spill] sm:$0xff]  ;;  %v13953_v29 = vld [vmem:[#allocation131_spill] sm:$0xff] }
 0x50f   :  { %13944 = vst [vmem:[#allocation17_spill] sm:$0xff] %v10427_v32  ;;  %5538 = vrcp.f32 %v3998_v36  ;;  %v3234_v1 = vsel %vm3233_vm6, %v3229_v52, inf  ;;  %v3339_v3 = vsel %vm3338_vm7, %v3334_v48, inf  ;;  %v10436_v58 = vcvt.s32.f32 %v3347_v42  ;;  %v10453_v42 = vpop.xlane.xlu0 %3321  ;;  %v13955_v48 = vld [vmem:[#allocation118_spill] sm:$0xff] }
 0x510   :  { %13947 = vst [vmem:[#allocation44_spill] sm:$0xff] %v10434_v46  ;;  %v10438_v63 = vpop.eup %5524  ;;  %v3968_v57 = vadd.f32 1.0, %v10418_v21  ;;  %vm13950_vm12 = vcmp.eq.s32.totalorder %v6508_v31, %v13949_v17  ;;  %3235 = vmin.xlane.f32.xlu0 %v3234_v1  ;;  %3340 = vmin.xlane.f32.xlu1 %v3339_v3  ;;  %vm3263_vm13 = vcmp.eq.f32.partialorder %v13951_v25, %v10280_v4  ;;  %v3918_v52 = vmul.f32 1.442695, %v3812_v37  ;;  %v13957_v3 = vld [vmem:[#allocation135_spill] sm:$0xff]  ;;  %v13959_v46 = vld [vmem:[#allocation140_spill] sm:$0xff] }
 0x511   :  { %13948 = vst [vmem:[#allocation202_spill] sm:$0xff] %v10438_v63  ;;  %v4902_v6 = vsel %vm13950_vm12, 1.0, %v13845_v26  ;;  %vm2843_vm14 = vcmp.eq.f32.partialorder %v13952_v38, %v10422_v8  ;;  %v10449_v36 = vpop.eup %5526  ;;  %v3814_v51 = vsub.f32 %v9531_v7, %v13953_v29  ;;  %13954 = vst [vmem:[#allocation33_spill] sm:$0xff] %v10453_v42  ;;  %v2882_v27 = vand.u32 65535, %v13955_v48 }
 0x512   :  { %v10457_v17 = vmul.f32 %v10429_v24, %v4902_v6  ;;  %5540 = vpow2.f32 %v3854_v54  ;;  %v3858_v1 = vmul.f32 1.442695, %v3782_v13  ;;  %v3784_v25 = vsub.f32 %v9554_v12, %v13957_v3  ;;  %v13961_v13 = vld [vmem:[#allocation145_spill] sm:$0xff]  ;;  %v13962_v3 = vld [vmem:[#allocation88_spill] sm:$0xff] }
 0x513   :  { %v4934_v37 = vsel %vm2360_vm10, 1.0, %v13845_v26  ;;  %v3816_v7 = vsub.f32 %v9577_v34, %v13959_v46  ;;  %v3264_v29 = vsel %vm3263_vm13, %v10383_v9, inf  ;;  %v2844_v32 = vsel %vm2843_vm14, %v2839_v0, inf  ;;  %v10476_v9 = vpop.xlane.xlu1 %3366  ;;  %v10478_v0 = vpop.xlane.xlu0 %2886 }
 0x514   :  { %13956 = vst [vmem:[#allocation106_spill] sm:$0xff] %v10457_v17  ;;  %v10469_v48 = vmul.f32 %v10438_v63, %v4934_v37  ;;  %v5529_v6 = vpop.eup %5528  ;;  %5542 = vrcp.f32 %v3968_v57  ;;  %v4000_v54 = vadd.f32 1.0, %v10449_v36  ;;  %v3786_v12 = vsub.f32 %v9595_v20, %v13961_v13  ;;  %3265 = vmin.xlane.f32.xlu0 %v3264_v29  ;;  %2845 = vmin.xlane.f32.xlu1 %v2844_v32  ;;  %v13965_v37 = vld [vmem:[#allocation210_spill] sm:$0xff]  ;;  %v13966_v17 = vld [vmem:[#allocation53_spill] sm:$0xff]  ;;  %v13967_v20 = vld [vmem:[#allocation64_spill] sm:$0xff] }
 0x515   :  { %vm3293_vm10 = vcmp.eq.f32.partialorder %v13962_v3, %v10375_v35  ;;  %v5531_v38 = vpop.eup %5530  ;;  %5544 = vpow2.f32 %v3918_v52  ;;  %v3922_v34 = vmul.f32 1.442695, %v3814_v51  ;;  %13963 = vst [vmem:[#allocation51_spill] sm:$0xff] %v10476_v9  ;;  %13964 = vst [vmem:[#allocation165_spill] sm:$0xff] %v10478_v0  ;;  %v2884_v46 = vcvt.s32.f32 %v2882_v27  ;;  %v13968_v13 = vld [vmem:[#allocation148_spill] sm:$0xff] }
 0x516   :  { %13960 = vst [vmem:[#allocation34_spill] sm:$0xff] %v10469_v48  ;;  %v3362_v57 = vand.u32 65535, %v13965_v37  ;;  %5546 = vpow2.f32 %v3858_v1  ;;  %v3862_v48 = vmul.f32 1.442695, %v3784_v25  ;;  %vm2888_vm15 = vcmp.eq.f32.partialorder %v13966_v17, %v10478_v0  ;;  %v13969_v1 = vld [vmem:[#allocation55_spill] sm:$0xff]  ;;  %v13970_v17 = vld [vmem:[#allocation206_spill] sm:$0xff] }
 0x517   :  { %v2897_v32 = vand.u32 65535, %v13967_v20  ;;  %v3926_v29 = vmul.f32 1.442695, %v3816_v7  ;;  %v3818_v3 = vsub.f32 %v9628_v55, %v13968_v13  ;;  %v3294_v52 = vsel %vm3293_vm10, %v10385_v45, inf  ;;  %v13971_v7 = vld [vmem:[#allocation70_spill] sm:$0xff]  ;;  %v13972_v37 = vld [vmem:[#allocation123_spill] sm:$0xff]  ;;  %v10495_v20 = vpop.xlane.xlu0 %2871 }
 0x518   :  { %v2889_v51 = vsel %vm2888_vm15, %v2884_v46, inf  ;;  %v10487_v63 = vpop.eup %5532  ;;  %5548 = vrcp.f32 %v4000_v54  ;;  %v3866_v27 = vmul.f32 1.442695, %v3786_v12  ;;  %3295 = vmin.xlane.f32.xlu0 %v3294_v52  ;;  %vm3323_vm1 = vcmp.eq.f32.partialorder %v13969_v1, %v10453_v42  ;;  %13973 = vst [vmem:[#allocation48_spill] sm:$0xff] %v10495_v20  ;;  %v13974_v54 = vld [vmem:[#allocation69_spill] sm:$0xff]  ;;  %v13975_v12 = vld [vmem:[#allocation107_spill] sm:$0xff] }
 0x519   :  { %2890 = vmin.xlane.f32.xlu1 %v2889_v51  ;;  %vm3368_vm8 = vcmp.eq.f32.partialorder %v13970_v17, %v10476_v9  ;;  %v5535_v25 = vpop.eup %5534  ;;  %5550 = vpow2.f32 %v3922_v34  ;;  %v3771_v55 = vsub.f32 %v13972_v37, %v13971_v7  ;;  %v3364_v45 = vcvt.s32.f32 %v3362_v57  ;;  %v13985_v42 = vld [vmem:[#allocation63_spill] sm:$0xff] }
 0x51a   :  { %v10498_v46 = vmul.f32 %v5529_v6, %v10332_v56  ;;  %5552 = vpow2.f32 %v3862_v48  ;;  %v3803_v13 = vsub.f32 %v13975_v12, %v13974_v54  ;;  %v10502_v52 = vcvt.s32.f32 %v2897_v32  ;;  %v13976_v48 = vld [vmem:[#allocation58_spill] sm:$0xff]  ;;  %v13977_v32 = vld [vmem:[#allocation67_spill] sm:$0xff]  ;;  %v13979_v54 = vld [vmem:[#allocation208_spill] sm:$0xff] }
 0x51b   :  { %v10505_v51 = vmul.f32 %v5529_v6, %v9972_v60  ;;  %v10507_v1 = vpop.eup %5536  ;;  %5554 = vpow2.f32 %v3926_v29  ;;  %v3930_v34 = vmul.f32 1.442695, %v3818_v3  ;;  %v3324_v17 = vsel %vm3323_vm1, %v10391_v53, inf  ;;  %v13978_v6 = vld [vmem:[#allocation72_spill] sm:$0xff]  ;;  %v10516_v29 = vpop.xlane.xlu0 %3351  ;;  %v13981_v3 = vld [vmem:[#allocation61_spill] sm:$0xff] }
 0x51c   :  { %v3369_v7 = vsel %vm3368_vm8, %v3364_v45, inf  ;;  %v5539_v57 = vpop.eup %5538  ;;  %v3970_v56 = vadd.f32 1.0, %v10487_v63  ;;  %5556 = vpow2.f32 %v3866_v27  ;;  %3325 = vmin.xlane.f32.xlu0 %v3324_v17  ;;  %vm2873_vm9 = vcmp.eq.f32.partialorder %v13976_v48, %v10495_v20  ;;  %13980 = vst [vmem:[#allocation111_spill] sm:$0xff] %v10516_v29  ;;  %v13983_v27 = vld [vmem:[#allocation76_spill] sm:$0xff]  ;;  %v14024_v20 = vld [vmem:[#allocation225_spill] sm:$0xff] }
 0x51d   :  { %3370 = vmin.xlane.f32.xlu1 %v3369_v7  ;;  %v3377_v37 = vand.u32 65535, %v13977_v32  ;;  %v3836_v60 = vmul.f32 1.442695, %v3771_v55  ;;  %v3773_v12 = vsub.f32 %v13979_v54, %v13978_v6  ;;  %v2912_v53 = vand.u32 65535, %v13981_v3  ;;  %v13984_v17 = vld [vmem:[#allocation84_spill] sm:$0xff]  ;;  %v13987_v3 = vld [vmem:[#allocation214_spill] sm:$0xff] }
 0x51e   :  { %v10520_v45 = vmul.f32 %v5531_v38, %v10346_v16  ;;  %v3900_v24 = vmul.f32 1.442695, %v3803_v13  ;;  %v3805_v7 = vsub.f32 %v13984_v17, %v13983_v27  ;;  %vm3353_vm11 = vcmp.eq.f32.partialorder %v13985_v42, %v10516_v29  ;;  %v13990_v17 = vld [vmem:[#allocation45_spill] sm:$0xff] }
 0x51f   :  { %v10527_v48 = vmul.f32 %v5531_v38, %v9990_v33  ;;  %v10529_v55 = vpop.eup %5540  ;;  %5558 = vpow2.f32 %v3930_v34  ;;  %v2874_v32 = vsel %vm2873_vm9, %v10424_v18, inf  ;;  %v3354_v6 = vsel %vm3353_vm11, %v10436_v58, inf  ;;  %v10536_v38 = vpop.xlane.xlu1 %3396 }
 0x520   :  { %13982 = vst [vmem:[#allocation187_spill] sm:$0xff] %v10520_v45  ;;  %v2927_v16 = vand.u32 65535, %v9636_v50  ;;  %5560 = vrcp.f32 %v3970_v56  ;;  %v4002_v13 = vadd.f32 1.0, %v10507_v1  ;;  %3355 = vmin.xlane.f32.xlu0 %v3354_v6  ;;  %v3379_v54 = vcvt.s32.f32 %v3377_v37  ;;  %13988 = vst [vmem:[#allocation116_spill] sm:$0xff] %v10536_v38  ;;  %v10538_v34 = vpop.xlane.xlu0 %2916  ;;  %v13991_v56 = vld [vmem:[#allocation85_spill] sm:$0xff]  ;;  %v13993_v37 = vld [vmem:[#allocation79_spill] sm:$0xff] }
 0x521   :  { %13986 = vst [vmem:[#allocation50_spill] sm:$0xff] %v10527_v48  ;;  %2875 = vmin.xlane.f32.xlu1 %v2874_v32  ;;  %v3407_v42 = vand.u32 65535, %v13987_v3  ;;  %v5543_v27 = vpop.eup %5542  ;;  %5562 = vpow2.f32 %v3836_v60  ;;  %v3840_v33 = vmul.f32 1.442695, %v3773_v12  ;;  %13989 = vst [vmem:[#allocation41_spill] sm:$0xff] %v10538_v34  ;;  %v2914_v18 = vcvt.s32.f32 %v2912_v53  ;;  %v13992_v32 = vld [vmem:[#allocation150_spill] sm:$0xff] }
 0x522   :  { %v3392_v58 = vand.u32 65535, %v13990_v17  ;;  %v10541_v48 = vpop.eup %5544  ;;  %5564 = vpow2.f32 %v3900_v24  ;;  %v3904_v50 = vmul.f32 1.442695, %v3805_v7  ;;  %v3775_v6 = vsub.f32 %v13992_v32, %v13991_v56  ;;  %v13994_v7 = vld [vmem:[#allocation90_spill] sm:$0xff]  ;;  %v13995_v17 = vld [vmem:[#allocation159_spill] sm:$0xff]  ;;  %v13996_v32 = vld [vmem:[#allocation49_spill] sm:$0xff] }
 0x523   :  { %vm2918_vm3 = vcmp.eq.f32.partialorder %v13993_v37, %v10538_v34  ;;  %v10547_v3 = vpop.eup %5546  ;;  %v10549_v12 = vcvt.s32.f32 %v2927_v16  ;;  %v10552_v45 = vmul.f32 %v5535_v25, %v10362_v10  ;;  %v10555_v53 = vmul.f32 %v5535_v25, %v10005_v44 }
 0x524   :  { %v2919_v60 = vsel %vm2918_vm3, %v2914_v18, inf  ;;  %5566 = vrcp.f32 %v4002_v13  ;;  %v3972_v24 = vadd.f32 1.0, %v10529_v55  ;;  %v3807_v56 = vsub.f32 %v13995_v17, %v13994_v7  ;;  %v10563_v18 = vpop.xlane.xlu0 %2901 }
 0x525   :  { %2920 = vmin.xlane.f32.xlu1 %v2919_v60  ;;  %vm3398_vm2 = vcmp.eq.f32.partialorder %v13996_v32, %v10536_v38  ;;  %v5549_v37 = vpop.eup %5548  ;;  %v4004_v16 = vadd.f32 1.0, %v10541_v48  ;;  %5568 = vpow2.f32 %v3840_v33  ;;  %13997 = vst [vmem:[#allocation57_spill] sm:$0xff] %v10563_v18  ;;  %v3394_v10 = vcvt.s32.f32 %v3392_v58  ;;  %v14007_v38 = vld [vmem:[#allocation12_spill] sm:$0xff] }
 0x526   :  { %v10566_v44 = vmul.f32 %v5539_v57, %v10387_v43  ;;  %v10568_v25 = vpop.eup %5550  ;;  %5570 = vpow2.f32 %v3904_v50  ;;  %v3844_v13 = vmul.f32 1.442695, %v3775_v6  ;;  %v10570_v34 = vcvt.s32.f32 %v3407_v42  ;;  %v14002_v42 = vld [vmem:[#allocation128_spill] sm:$0xff]  ;;  %v14004_v6 = vld [vmem:[#allocation95_spill] sm:$0xff] }
 0x527   :  { %v10573_v60 = vmul.f32 %v5539_v57, %v10022_v5  ;;  %v10575_v7 = vpop.eup %5552  ;;  %v3974_v17 = vadd.f32 1.0, %v10547_v3  ;;  %v3399_v33 = vsel %vm3398_vm2, %v3394_v10, inf  ;;  %v10579_v32 = vmul.f32 %v5543_v27, %v10418_v21  ;;  %v14005_v10 = vld [vmem:[#allocation168_spill] sm:$0xff] }
 0x528   :  { %13998 = vst [vmem:[#allocation137_spill] sm:$0xff] %v10566_v44  ;;  %v10582_v43 = vmul.f32 %v5543_v27, %v10050_v62  ;;  %v10584_v58 = vpop.eup %5554  ;;  %5572 = vrcp.f32 %v3972_v24  ;;  %v3908_v50 = vmul.f32 1.442695, %v3807_v56  ;;  %vm2903_vm4 = vcmp.eq.f32.partialorder %v14002_v42, %v10563_v18  ;;  %v10596_v27 = vpop.xlane.xlu0 %3381  ;;  %v14008_v42 = vld [vmem:[#allocation100_spill] sm:$0xff]  ;;  %v14012_v44 = vld [vmem:[#allocation195_spill] sm:$0xff] }
 0x529   :  { %13999 = vst [vmem:[#allocation47_spill] sm:$0xff] %v10573_v60  ;;  %14000 = vst [vmem:[#allocation121_spill] sm:$0xff] %v10579_v32  ;;  %3400 = vmin.xlane.f32.xlu1 %v3399_v33  ;;  %v10589_v5 = vmul.f32 %v5549_v37, %v10449_v36  ;;  %v10591_v57 = vpop.eup %5556  ;;  %5574 = vrcp.f32 %v4004_v16  ;;  %v4006_v21 = vadd.f32 1.0, %v10568_v25  ;;  %v3777_v62 = vsub.f32 %v14005_v10, %v14004_v6  ;;  %v14009_v33 = vld [vmem:[#allocation185_spill] sm:$0xff]  ;;  %v14010_v36 = vld [vmem:[#allocation16_spill] sm:$0xff] }
 0x52a   :  { %14001 = vst [vmem:[#allocation126_spill] sm:$0xff] %v10582_v43  ;;  %14006 = vst [vmem:[#allocation29_spill] sm:$0xff] %v10596_v27  ;;  %v2942_v24 = vand.u32 65535, %v14007_v38  ;;  %v3976_v56 = vadd.f32 1.0, %v10575_v7  ;;  %5576 = vpow2.f32 %v3844_v13  ;;  %v3809_v18 = vsub.f32 %v14009_v33, %v14008_v42  ;;  %v14011_v38 = vld [vmem:[#allocation105_spill] sm:$0xff] }
 0x52b   :  { %14003 = vst [vmem:[#allocation97_spill] sm:$0xff] %v10589_v5  ;;  %vm3383_vm5 = vcmp.eq.f32.partialorder %v14010_v36, %v10596_v27  ;;  %5578 = vrcp.f32 %v3974_v17  ;;  %v4008_v16 = vadd.f32 1.0, %v10584_v58  ;;  %v2904_v5 = vsel %vm2903_vm4, %v10502_v52, inf  ;;  %v10614_v36 = vpop.xlane.xlu1 %3426  ;;  %v14016_v27 = vld [vmem:[#allocation54_spill] sm:$0xff] }
 0x52c   :  { %v3384_v60 = vsel %vm3383_vm5, %v3379_v54, inf  ;;  %v10606_v6 = vpop.eup %5558  ;;  %v3978_v10 = vadd.f32 1.0, %v10591_v57  ;;  %5580 = vpow2.f32 %v3908_v50  ;;  %v3779_v13 = vsub.f32 %v14012_v44, %v14011_v38  ;;  %14014 = vst [vmem:[#allocation131_spill] sm:$0xff] %v10614_v36  ;;  %v10616_v52 = vpop.xlane.xlu0 %2946  ;;  %v14017_v44 = vld [vmem:[#allocation213_spill] sm:$0xff]  ;;  %v14020_v38 = vld [vmem:[#allocation115_spill] sm:$0xff] }
 0x52d   :  { %2905 = vmin.xlane.f32.xlu1 %v2904_v5  ;;  %3385 = vmin.xlane.f32.xlu0 %v3384_v60  ;;  %v10612_v42 = vmul.f32 %v5549_v37, %v10056_v23  ;;  %v5561_v33 = vpop.eup %5560  ;;  %5582 = vrcp.f32 %v4006_v21  ;;  %v3848_v17 = vmul.f32 1.442695, %v3777_v62  ;;  %14015 = vst [vmem:[#allocation118_spill] sm:$0xff] %v10616_v52  ;;  %v2944_v54 = vcvt.s32.f32 %v2942_v24  ;;  %v14018_v5 = vld [vmem:[#allocation110_spill] sm:$0xff]  ;;  %v14019_v21 = vld [vmem:[#allocation37_spill] sm:$0xff] }
 0x52e   :  { %v3422_v43 = vand.u32 65535, %v14016_v27  ;;  %v10619_v29 = vpop.eup %5562  ;;  %5584 = vrcp.f32 %v3976_v56  ;;  %v3912_v50 = vmul.f32 1.442695, %v3809_v18  ;;  %vm2948_vm6 = vcmp.eq.f32.partialorder %v14017_v44, %v10616_v52  ;;  %v14022_v18 = vld [vmem:[#allocation60_spill] sm:$0xff] }
 0x52f   :  { %14013 = vst [vmem:[#allocation52_spill] sm:$0xff] %v10612_v42  ;;  %v2957_v23 = vand.u32 65535, %v9695_v61  ;;  %v10624_v37 = vpop.eup %5564  ;;  %5586 = vrcp.f32 %v4008_v16  ;;  %v4010_v60 = vadd.f32 1.0, %v10606_v6  ;;  %v3811_v62 = vsub.f32 %v14019_v21, %v14018_v5  ;;  %v14021_v42 = vld [vmem:[#allocation38_spill] sm:$0xff] }
 0x530   :  { %v2949_v24 = vsel %vm2948_vm6, %v2944_v54, inf  ;;  %5588 = vrcp.f32 %v3978_v10  ;;  %v3852_v27 = vmul.f32 1.442695, %v3779_v13  ;;  %v3781_v56 = vsub.f32 %v14021_v42, %v14020_v38  ;;  %v10634_v16 = vpop.xlane.xlu0 %2931 }
 0x531   :  { %2950 = vmin.xlane.f32.xlu1 %v2949_v24  ;;  %vm3428_vm7 = vcmp.eq.f32.partialorder %v14022_v18, %v10614_v36  ;;  %v5567_v44 = vpop.eup %5566  ;;  %v3963_v61 = vadd.f32 1.0, %v10619_v29  ;;  %5590 = vpow2.f32 %v3848_v17  ;;  %14023 = vst [vmem:[#allocation135_spill] sm:$0xff] %v10634_v16  ;;  %v3424_v52 = vcvt.s32.f32 %v3422_v43  ;;  %v14027_v43 = vld [vmem:[#allocation153_spill] sm:$0xff]  ;;  %v14030_v18 = vld [vmem:[#allocation42_spill] sm:$0xff] }
 0x532   :  { %v3437_v32 = vand.u32 65535, %v14024_v20  ;;  %v10637_v5 = vpop.eup %5568  ;;  %v3995_v10 = vadd.f32 1.0, %v10624_v37  ;;  %5592 = vpow2.f32 %v3912_v50  ;;  %v10640_v13 = vcvt.s32.f32 %v2957_v23  ;;  %v14028_v50 = vld [vmem:[#allocation217_spill] sm:$0xff] }
 0x533   :  { %v10643_v42 = vmul.f32 %v5561_v33, %v10487_v63  ;;  %v10645_v54 = vpop.eup %5570  ;;  %5594 = vrcp.f32 %v4010_v60  ;;  %v3916_v21 = vmul.f32 1.442695, %v3811_v62  ;;  %v3429_v17 = vsel %vm3428_vm7, %v3424_v52, inf  ;;  %v14029_v63 = vld [vmem:[#allocation120_spill] sm:$0xff]  ;;  %v14032_v52 = vld [vmem:[#allocation218_spill] sm:$0xff] }
 0x534   :  { %v10648_v24 = vmul.f32 %v5561_v33, %v10065_v14  ;;  %5596 = vpow2.f32 %v3852_v27  ;;  %v3856_v20 = vmul.f32 1.442695, %v3781_v56  ;;  %v3788_v38 = vsub.f32 %v9642_v40, %v14027_v43  ;;  %v10656_v60 = vpop.xlane.xlu0 %3411  ;;  %v14033_v56 = vld [vmem:[#allocation24_spill] sm:$0xff] }
 0x535   :  { %14025 = vst [vmem:[#allocation209_spill] sm:$0xff] %v10643_v42  ;;  %vm2933_vm12 = vcmp.eq.f32.partialorder %v14028_v50, %v10634_v16  ;;  %3430 = vmin.xlane.f32.xlu1 %v3429_v17  ;;  %v5573_v23 = vpop.eup %5572  ;;  %5598 = vrcp.f32 %v3963_v61  ;;  %v3813_v36 = vsub.f32 %v14030_v18, %v14029_v63  ;;  %14031 = vst [vmem:[#allocation145_spill] sm:$0xff] %v10656_v60  ;;  %v2972_v62 = vand.u32 65535, %v14032_v52  ;;  %v14034_v61 = vld [vmem:[#allocation158_spill] sm:$0xff]  ;;  %v10669_v63 = vpop.xlane.xlu1 %3456 }
 0x536   :  { %14026 = vst [vmem:[#allocation140_spill] sm:$0xff] %v10648_v24  ;;  %v10659_v14 = vcvt.s32.f32 %v3437_v32  ;;  %v5575_v33 = vpop.eup %5574  ;;  %5600 = vrcp.f32 %v3995_v10  ;;  %v3965_v27 = vadd.f32 1.0, %v10637_v5  ;;  %v3997_v40 = vadd.f32 1.0, %v10645_v54  ;;  %14035 = vst [vmem:[#allocation88_spill] sm:$0xff] %v10669_v63  ;;  %v14039_v24 = vld [vmem:[#allocation46_spill] sm:$0xff] }
 0x537   :  { %vm3413_vm13 = vcmp.eq.f32.partialorder %v14033_v56, %v10656_v60  ;;  %v10665_v17 = vpop.eup %5576  ;;  %5602 = vpow2.f32 %v3916_v21  ;;  %v3820_v43 = vsub.f32 %v9669_v30, %v14034_v61  ;;  %v2934_v32 = vsel %vm2933_vm12, %v10549_v12, inf  ;;  %v14038_v60 = vld [vmem:[#allocation125_spill] sm:$0xff]  ;;  %v14041_v16 = vld [vmem:[#allocation66_spill] sm:$0xff] }
 0x538   :  { %v3414_v10 = vsel %vm3413_vm13, %v10570_v34, inf  ;;  %v5579_v18 = vpop.eup %5578  ;;  %5604 = vpow2.f32 %v3856_v20  ;;  %v3870_v52 = vmul.f32 1.442695, %v3788_v38  ;;  %v10677_v56 = vmul.f32 %v5567_v44, %v10507_v1  ;;  %v10686_v12 = vpop.xlane.xlu0 %2976 }
 0x539   :  { %2935 = vmin.xlane.f32.xlu1 %v2934_v32  ;;  %3415 = vmin.xlane.f32.xlu0 %v3414_v10  ;;  %v10680_v21 = vmul.f32 %v5567_v44, %v10086_v28  ;;  %v10682_v30 = vpop.eup %5580  ;;  %v3920_v61 = vmul.f32 1.442695, %v3813_v36  ;;  %v3783_v50 = vsub.f32 %v14039_v24, %v14038_v60  ;;  %14040 = vst [vmem:[#allocation64_spill] sm:$0xff] %v10686_v12  ;;  %v2974_v34 = vcvt.s32.f32 %v2972_v62  ;;  %v14042_v32 = vld [vmem:[#allocation130_spill] sm:$0xff]  ;;  %v14043_v10 = vld [vmem:[#allocation56_spill] sm:$0xff]  ;;  %v14044_v44 = vld [vmem:[#allocation223_spill] sm:$0xff]  ;;  %v10698_v60 = vpop.xlane.xlu1 %3486 }
 0x53a   :  { %14036 = vst [vmem:[#allocation210_spill] sm:$0xff] %v10677_v56  ;;  %v3452_v20 = vand.u32 65535, %v14041_v16  ;;  %v10689_v38 = vpop.eup %5582  ;;  %5606 = vrcp.f32 %v3965_v27  ;;  %v3967_v1 = vadd.f32 1.0, %v10665_v17  ;;  %v3815_v28 = vsub.f32 %v14043_v10, %v14042_v32  ;;  %14045 = vst [vmem:[#allocation148_spill] sm:$0xff] %v10698_v60  ;;  %v14047_v56 = vld [vmem:[#allocation134_spill] sm:$0xff]  ;;  %v14048_v32 = vld [vmem:[#allocation59_spill] sm:$0xff] }
 0x53b   :  { %14037 = vst [vmem:[#allocation53_spill] sm:$0xff] %v10680_v21  ;;  %vm2978_vm14 = vcmp.eq.f32.partialorder %v14044_v44, %v10686_v12  ;;  %v10696_v36 = vpop.eup %5584  ;;  %5608 = vrcp.f32 %v3997_v40  ;;  %v3934_v24 = vmul.f32 1.442695, %v3820_v43  ;;  %v10701_v16 = vmul.f32 %v5573_v23, %v10529_v55  ;;  %v14049_v44 = vld [vmem:[#allocation94_spill] sm:$0xff] }
 0x53c   :  { %v2979_v62 = vsel %vm2978_vm14, %v2974_v34, inf  ;;  %v10703_v21 = vpop.eup %5586  ;;  %v3999_v27 = vadd.f32 1.0, %v10682_v30  ;;  %5610 = vpow2.f32 %v3870_v52  ;;  %v3785_v10 = vsub.f32 %v14048_v32, %v14047_v56  ;;  %v10712_v34 = vpop.xlane.xlu0 %2961 }
 0x53d   :  { %14046 = vst [vmem:[#allocation55_spill] sm:$0xff] %v10701_v16  ;;  %2980 = vmin.xlane.f32.xlu1 %v2979_v62  ;;  %vm3458_vm10 = vcmp.eq.f32.partialorder %v14049_v44, %v10669_v63  ;;  %v10710_v40 = vpop.eup %5588  ;;  %5612 = vpow2.f32 %v3920_v61  ;;  %v3860_v43 = vmul.f32 1.442695, %v3783_v50  ;;  %14050 = vst [vmem:[#allocation206_spill] sm:$0xff] %v10712_v34  ;;  %v3454_v55 = vcvt.s32.f32 %v3452_v20  ;;  %v14054_v61 = vld [vmem:[#allocation162_spill] sm:$0xff]  ;;  %v10729_v20 = vpop.xlane.xlu1 %3516 }
 0x53e   :  { %v10715_v12 = vmul.f32 %v5573_v23, %v10123_v47  ;;  %v10717_v16 = vpop.eup %5590  ;;  %5614 = vrcp.f32 %v3967_v1  ;;  %v3924_v52 = vmul.f32 1.442695, %v3815_v28  ;;  %v10720_v56 = vmul.f32 %v5575_v33, %v10541_v48  ;;  %14055 = vst [vmem:[#allocation107_spill] sm:$0xff] %v10729_v20  ;;  %v14061_v44 = vld [vmem:[#allocation62_spill] sm:$0xff] }
 0x53f   :  { %v10723_v62 = vmul.f32 %v5575_v33, %v10129_v15  ;;  %v10725_v32 = vpop.eup %5592  ;;  %5616 = vpow2.f32 %v3934_v24  ;;  %v3790_v50 = vsub.f32 %v9689_v59, %v14054_v61  ;;  %v3459_v47 = vsel %vm3458_vm10, %v3454_v55, inf  ;;  %v14057_v33 = vld [vmem:[#allocation228_spill] sm:$0xff]  ;;  %v14060_v24 = vld [vmem:[#allocation139_spill] sm:$0xff]  ;;  %v14063_v61 = vld [vmem:[#allocation229_spill] sm:$0xff] }
 0x540   :  { %14051 = vst [vmem:[#allocation70_spill] sm:$0xff] %v10715_v12  ;;  %14052 = vst [vmem:[#allocation123_spill] sm:$0xff] %v10720_v56  ;;  %v10735_v23 = vmul.f32 %v5579_v18, %v10547_v3  ;;  %v10737_v48 = vpop.eup %5594  ;;  %5618 = vrcp.f32 %v3999_v27  ;;  %v3864_v15 = vmul.f32 1.442695, %v3785_v10  ;;  %vm2963_vm15 = vcmp.eq.f32.partialorder %v14057_v33, %v10712_v34  ;;  %v10749_v55 = vpop.xlane.xlu0 %3441 }
 0x541   :  { %14053 = vst [vmem:[#allocation69_spill] sm:$0xff] %v10723_v62  ;;  %3460 = vmin.xlane.f32.xlu1 %v3459_v47  ;;  %v10742_v1 = vmul.f32 %v5579_v18, %v10183_v22  ;;  %v10744_v59 = vpop.eup %5596  ;;  %v3969_v28 = vadd.f32 1.0, %v10717_v16  ;;  %5620 = vpow2.f32 %v3860_v43  ;;  %v3817_v3 = vsub.f32 %v14061_v44, %v14060_v24  ;;  %14062 = vst [vmem:[#allocation208_spill] sm:$0xff] %v10749_v55  ;;  %v14064_v47 = vld [vmem:[#allocation167_spill] sm:$0xff]  ;;  %v14067_v62 = vld [vmem:[#allocation144_spill] sm:$0xff]  ;;  %v10763_v12 = vpop.xlane.xlu1 %3546 }
 0x542   :  { %14056 = vst [vmem:[#allocation58_spill] sm:$0xff] %v10735_v23  ;;  %14059 = vst [vmem:[#allocation72_spill] sm:$0xff] %v10744_v59  ;;  %v3002_v27 = vand.u32 65535, %v14063_v61  ;;  %v10752_v10 = vpop.eup %5598  ;;  %v4001_v23 = vadd.f32 1.0, %v10725_v32  ;;  %5622 = vpow2.f32 %v3924_v52  ;;  %v14065_v22 = vld [vmem:[#allocation227_spill] sm:$0xff]  ;;  %v14068_v24 = vld [vmem:[#allocation65_spill] sm:$0xff] }
 0x543   :  { %14058 = vst [vmem:[#allocation67_spill] sm:$0xff] %v10742_v1  ;;  %v3822_v18 = vsub.f32 %v14065_v22, %v14064_v47  ;;  %v14066_v1 = vld [vmem:[#allocation232_spill] sm:$0xff]  ;;  %v10759_v63 = vpop.eup %5600  ;;  %v3874_v43 = vmul.f32 1.442695, %v3790_v50  ;;  %v3787_v44 = vsub.f32 %v14068_v24, %v14067_v62  ;;  %14069 = vst [vmem:[#allocation61_spill] sm:$0xff] %v10763_v12  ;;  %v2964_v61 = vsel %vm2963_vm15, %v10640_v13, inf }
 0x544   :  { %vm3443_vm1 = vcmp.eq.f32.partialorder %v14066_v1, %v10749_v55  ;;  %v10770_v56 = vpop.eup %5602  ;;  %v3971_v47 = vadd.f32 1.0, %v10744_v59  ;;  %5624 = vpow2.f32 %v3864_v15  ;;  %v14071_v50 = vld [vmem:[#allocation233_spill] sm:$0xff]  ;;  %v10776_v62 = vmul.f32 %v10689_v38, %v10568_v25  ;;  %v10780_v13 = vpop.xlane.xlu0 %3006  ;;  %v14075_v24 = vld [vmem:[#allocation8_spill] sm:$0xff]  ;;  %v14076_v15 = vld [vmem:[#allocation147_spill] sm:$0xff] }
 0x545   :  { %v3444_v52 = vsel %vm3443_vm1, %v10659_v14, inf  ;;  %14070 = vst [vmem:[#allocation76_spill] sm:$0xff] %v10770_v56  ;;  %2965 = vmin.xlane.f32.xlu1 %v2964_v61  ;;  %v2987_v1 = vand.u32 65535, %v14071_v50  ;;  %v10778_v22 = vpop.eup %5604  ;;  %5626 = vrcp.f32 %v3969_v28  ;;  %v3928_v33 = vmul.f32 1.442695, %v3817_v3  ;;  %14074 = vst [vmem:[#allocation214_spill] sm:$0xff] %v10780_v13  ;;  %v10791_v9 = vpop.xlane.xlu1 %3576 }
 0x546   :  { %3445 = vmin.xlane.f32.xlu0 %v3444_v52  ;;  %14072 = vst [vmem:[#allocation84_spill] sm:$0xff] %v10776_v62  ;;  %14073 = vst [vmem:[#allocation63_spill] sm:$0xff] %v10778_v22  ;;  %v3004_v14 = vcvt.s32.f32 %v3002_v27  ;;  %v3482_v55 = vand.u32 65535, %v14075_v24  ;;  %5628 = vrcp.f32 %v4001_v23  ;;  %v3938_v34 = vmul.f32 1.442695, %v3822_v18  ;;  %v14077_v61 = vld [vmem:[#allocation68_spill] sm:$0xff] }
 0x547   :  { %v3819_v52 = vsub.f32 %v14077_v61, %v14076_v15  ;;  %v14078_v50 = vld [vmem:[#allocation236_spill] sm:$0xff]  ;;  %v10787_v42 = vpop.eup %5606  ;;  %5630 = vpow2.f32 %v3874_v43  ;;  %v3868_v25 = vmul.f32 1.442695, %v3787_v44  ;;  %v14080_v28 = vld [vmem:[#allocation15_spill] sm:$0xff]  ;;  %14081 = vst [vmem:[#allocation45_spill] sm:$0xff] %v10791_v9  ;;  %v4003_v23 = vadd.f32 1.0, %v10770_v56 }
 0x548   :  { %vm3008_vm8 = vcmp.eq.f32.partialorder %v14078_v50, %v10780_v13  ;;  %v14079_v62 = vld [vmem:[#allocation152_spill] sm:$0xff]  ;;  %v10793_v0 = vpop.eup %5608  ;;  %5632 = vrcp.f32 %v3971_v47  ;;  %v14082_v18 = vld [vmem:[#allocation19_spill] sm:$0xff]  ;;  %v14083_v24 = vld [vmem:[#allocation81_spill] sm:$0xff]  ;;  %v3973_v44 = vadd.f32 1.0, %v10778_v22  ;;  %v2989_v35 = vcvt.s32.f32 %v2987_v1 }
 0x549   :  { %v3789_v3 = vsub.f32 %v14080_v28, %v14079_v62  ;;  %v3009_v27 = vsel %vm3008_vm8, %v3004_v14, inf  ;;  %vm3488_vm9 = vcmp.eq.f32.partialorder %v14082_v18, %v10698_v60  ;;  %v10800_v15 = vmul.f32 %v10689_v38, %v14083_v24  ;;  %v10802_v43 = vpop.eup %5610  ;;  %v10805_v62 = vpop.xlane.xlu0 %2991  ;;  %v14087_v61 = vld [vmem:[#allocation239_spill] sm:$0xff]  ;;  %v14090_v13 = vld [vmem:[#allocation28_spill] sm:$0xff]  ;;  %v14091_v24 = vld [vmem:[#allocation205_spill] sm:$0xff] }
 0x54a   :  { %3010 = vmin.xlane.f32.xlu1 %v3009_v27  ;;  %14085 = vst [vmem:[#allocation150_spill] sm:$0xff] %v10802_v43  ;;  %5634 = vpow2.f32 %v3928_v33  ;;  %14086 = vst [vmem:[#allocation79_spill] sm:$0xff] %v10805_v62  ;;  %v3484_v14 = vcvt.s32.f32 %v3482_v55  ;;  %v3467_v47 = vand.u32 65535, %v14087_v61  ;;  %v10808_v50 = vpop.eup %5612  ;;  %v3932_v28 = vmul.f32 1.442695, %v3819_v52  ;;  %v14089_v27 = vld [vmem:[#allocation171_spill] sm:$0xff] }
 0x54b   :  { %14084 = vst [vmem:[#allocation85_spill] sm:$0xff] %v10800_v15  ;;  %14088 = vst [vmem:[#allocation90_spill] sm:$0xff] %v10808_v50  ;;  %5636 = vpow2.f32 %v3938_v34  ;;  %v3792_v56 = vsub.f32 %v14090_v13, %v14089_v27  ;;  %v10812_v38 = vpop.eup %5614  ;;  %vm14092_vm11 = vcmp.eq.s32.totalorder %v6508_v31, %v14091_v24  ;;  %v3872_v55 = vmul.f32 1.442695, %v3789_v3  ;;  %v10820_v15 = vpop.xlane.xlu1 %3606  ;;  %v14096_v13 = vld [vmem:[#allocation157_spill] sm:$0xff]  ;;  %v14097_v61 = vld [vmem:[#allocation23_spill] sm:$0xff] }
 0x54c   :  { %v10818_v33 = vsel %vm14092_vm11, 1.0, %v13845_v26  ;;  %5638 = vpow2.f32 %v3868_v25  ;;  %14094 = vst [vmem:[#allocation49_spill] sm:$0xff] %v10820_v15  ;;  %v3489_v34 = vsel %vm3488_vm9, %v3484_v14, inf  ;;  %v10825_v52 = vpop.eup %5616  ;;  %v3980_v1 = vadd.f32 1.0, %v10802_v43  ;;  %v14098_v24 = vld [vmem:[#allocation142_spill] sm:$0xff]  ;;  %v14100_v14 = vld [vmem:[#allocation244_spill] sm:$0xff] }
 0x54d   :  { %14093 = vst [vmem:[#allocation159_spill] sm:$0xff] %v10818_v33  ;;  %14095 = vst [vmem:[#allocation128_spill] sm:$0xff] %v10825_v52  ;;  %5640 = vrcp.f32 %v4003_v23  ;;  %v3821_v27 = vsub.f32 %v14097_v61, %v14096_v13  ;;  %vm2993_vm3 = vcmp.eq.f32.partialorder %v14098_v24, %v10805_v62  ;;  %v10832_v25 = vpop.eup %5618  ;;  %v4005_v3 = vadd.f32 1.0, %v10808_v50  ;;  %v10835_v33 = vpop.xlane.xlu0 %3471  ;;  %v14102_v22 = vld [vmem:[#allocation174_spill] sm:$0xff]  ;;  %v14103_v13 = vld [vmem:[#allocation237_spill] sm:$0xff] }
 0x54e   :  { %3490 = vmin.xlane.f32.xlu1 %v3489_v34  ;;  %5642 = vrcp.f32 %v3973_v44  ;;  %14099 = vst [vmem:[#allocation95_spill] sm:$0xff] %v10835_v33  ;;  %v3469_v18 = vcvt.s32.f32 %v3467_v47  ;;  %v3032_v60 = vand.u32 65535, %v14100_v14  ;;  %v10838_v23 = vpop.eup %5620  ;;  %v3878_v43 = vmul.f32 1.442695, %v3792_v56  ;;  %v14104_v59 = vld [vmem:[#allocation141_spill] sm:$0xff] }
 0x54f   :  { %14101 = vst [vmem:[#allocation168_spill] sm:$0xff] %v10838_v23  ;;  %5644 = vpow2.f32 %v3932_v28  ;;  %v3824_v61 = vsub.f32 %v14103_v13, %v14102_v22  ;;  %vm3473_vm2 = vcmp.eq.f32.partialorder %v14104_v59, %v10835_v33  ;;  %v10844_v34 = vpop.eup %5622  ;;  %v4012_v44 = vadd.f32 1.0, %v10825_v52  ;;  %v14107_v22 = vld [vmem:[#allocation20_spill] sm:$0xff]  ;;  %v10861_v24 = vpop.xlane.xlu1 %3156  ;;  %v14124_v62 = vld [vmem:[#allocation253_spill] sm:$0xff] }
 0x550   :  { %14105 = vst [vmem:[#allocation12_spill] sm:$0xff] %v10844_v34  ;;  %5646 = vpow2.f32 %v3872_v55  ;;  %v2994_v47 = vsel %vm2993_vm3, %v2989_v35, inf  ;;  %v3474_v14 = vsel %vm3473_vm2, %v3469_v18, inf  ;;  %v3936_v50 = vmul.f32 1.442695, %v3821_v27  ;;  %v14111_v27 = vld [vmem:[#allocation216_spill] sm:$0xff] }
 0x551   :  { %5648 = vrcp.f32 %v3980_v1  ;;  %3475 = vmin.xlane.f32.xlu0 %v3474_v14  ;;  %v10852_v56 = vmul.f32 %v10696_v36, %v10575_v7  ;;  %v10856_v59 = vmul.f32 %v10696_v36, %v14107_v22  ;;  %v10858_v28 = vpop.eup %5624  ;;  %v3975_v55 = vadd.f32 1.0, %v10838_v23  ;;  %v10863_v35 = vpop.xlane.xlu0 %3036  ;;  %v14113_v14 = vld [vmem:[#allocation215_spill] sm:$0xff]  ;;  %v14115_v52 = vld [vmem:[#allocation200_spill] sm:$0xff] }
 0x552   :  { %2995 = vmin.xlane.f32.xlu1 %v2994_v47  ;;  %14109 = vst [vmem:[#allocation16_spill] sm:$0xff] %v10858_v28  ;;  %5650 = vrcp.f32 %v4005_v3  ;;  %14110 = vst [vmem:[#allocation105_spill] sm:$0xff] %v10863_v35  ;;  %v3034_v1 = vcvt.s32.f32 %v3032_v60  ;;  %v3512_v18 = vand.u32 65535, %v14111_v27  ;;  %v10866_v13 = vpop.eup %5626  ;;  %v3942_v7 = vmul.f32 1.442695, %v3824_v61  ;;  %v14112_v47 = vld [vmem:[#allocation161_spill] sm:$0xff] }
 0x553   :  { %14106 = vst [vmem:[#allocation100_spill] sm:$0xff] %v10852_v56  ;;  %14108 = vst [vmem:[#allocation185_spill] sm:$0xff] %v10856_v59  ;;  %5652 = vpow2.f32 %v3878_v43  ;;  %v3791_v36 = vsub.f32 %v14113_v14, %v14112_v47  ;;  %v14114_v22 = vld [vmem:[#allocation251_spill] sm:$0xff]  ;;  %v10872_v3 = vpop.eup %5628  ;;  %vm14116_vm5 = vcmp.eq.s32.totalorder %v6508_v31, %v14115_v52  ;;  %v4007_v60 = vadd.f32 1.0, %v10844_v34  ;;  %v14119_v47 = vld [vmem:[#allocation166_spill] sm:$0xff] }
 0x554   :  { %vm3038_vm4 = vcmp.eq.f32.partialorder %v14114_v22, %v10863_v35  ;;  %v10878_v59 = vsel %vm14116_vm5, 1.0, %v13845_v26  ;;  %5654 = vrcp.f32 %v4012_v44  ;;  %v10881_v43 = vpop.eup %5630  ;;  %v3977_v61 = vadd.f32 1.0, %v10858_v28  ;;  %v14120_v14 = vld [vmem:[#allocation220_spill] sm:$0xff]  ;;  %v14121_v35 = vld [vmem:[#allocation219_spill] sm:$0xff] }
 0x555   :  { %14117 = vst [vmem:[#allocation195_spill] sm:$0xff] %v10878_v59  ;;  %v3039_v27 = vsel %vm3038_vm4, %v3034_v1, inf  ;;  %14118 = vst [vmem:[#allocation54_spill] sm:$0xff] %v10881_v43  ;;  %5656 = vpow2.f32 %v3936_v50  ;;  %v3823_v22 = vsub.f32 %v14120_v14, %v14119_v47  ;;  %vm3518_vm6 = vcmp.eq.f32.partialorder %v14121_v35, %v10729_v20  ;;  %v10888_v33 = vpop.eup %5632  ;;  %v10890_v52 = vpop.xlane.xlu0 %3021  ;;  %v14123_v59 = vld [vmem:[#allocation246_spill] sm:$0xff]  ;;  %v14127_v47 = vld [vmem:[#allocation75_spill] sm:$0xff] }
 0x556   :  { %3040 = vmin.xlane.f32.xlu1 %v3039_v27  ;;  %5658 = vrcp.f32 %v3975_v55  ;;  %14122 = vst [vmem:[#allocation213_spill] sm:$0xff] %v10890_v52  ;;  %v3514_v44 = vcvt.s32.f32 %v3512_v18  ;;  %v3017_v1 = vand.u32 65535, %v14123_v59  ;;  %v3497_v56 = vand.u32 65535, %v14124_v62  ;;  %v14130_v18 = vld [vmem:[#allocation132_spill] sm:$0xff] }
 0x557   :  { %v10894_v34 = vpop.eup %5634  ;;  %5660 = vpow2.f32 %v3942_v7  ;;  %v3876_v50 = vmul.f32 1.442695, %v3791_v36  ;;  %v10898_v27 = vmul.f32 %v10703_v21, %v10584_v58  ;;  %v10902_v14 = vmul.f32 %v10703_v21, %v14127_v47  ;;  %v10913_v7 = vpop.xlane.xlu1 %3636  ;;  %v14135_v47 = vld [vmem:[#allocation170_spill] sm:$0xff] }
 0x558   :  { %14125 = vst [vmem:[#allocation110_spill] sm:$0xff] %v10894_v34  ;;  %v10904_v55 = vpop.eup %5636  ;;  %vm14131_vm7 = vcmp.eq.s32.totalorder %v6508_v31, %v14130_v18  ;;  %5662 = vrcp.f32 %v4007_v60  ;;  %v3982_v62 = vadd.f32 1.0, %v10881_v43  ;;  %14133 = vst [vmem:[#allocation225_spill] sm:$0xff] %v10913_v7  ;;  %v3519_v58 = vsel %vm3518_vm6, %v3514_v44, inf  ;;  %v14137_v18 = vld [vmem:[#allocation257_spill] sm:$0xff]  ;;  %v14140_v44 = vld [vmem:[#allocation259_spill] sm:$0xff] }
 0x559   :  { %14126 = vst [vmem:[#allocation37_spill] sm:$0xff] %v10898_v27  ;;  %14128 = vst [vmem:[#allocation115_spill] sm:$0xff] %v10902_v14  ;;  %v10910_v59 = vsel %vm14131_vm7, 1.0, %v13845_v26  ;;  %v10918_v36 = vpop.eup %5638  ;;  %5664 = vrcp.f32 %v3977_v61  ;;  %v3940_v21 = vmul.f32 1.442695, %v3823_v22  ;;  %v14136_v14 = vld [vmem:[#allocation222_spill] sm:$0xff]  ;;  %vm3023_vm12 = vcmp.eq.f32.partialorder %v14137_v18, %v10890_v52 }
 0x55a   :  { %14129 = vst [vmem:[#allocation38_spill] sm:$0xff] %v10904_v55  ;;  %14132 = vst [vmem:[#allocation60_spill] sm:$0xff] %v10910_v59  ;;  %v3793_v27 = vsub.f32 %v14136_v14, %v14135_v47  ;;  %3520 = vmin.xlane.f32.xlu1 %v3519_v58  ;;  %v10924_v60 = vpop.eup %5640  ;;  %v4009_v43 = vadd.f32 1.0, %v10894_v34  ;;  %v10927_v59 = vpop.xlane.xlu0 %3501  ;;  %v3019_v28 = vcvt.s32.f32 %v3017_v1  ;;  %v3499_v35 = vcvt.s32.f32 %v3497_v56  ;;  %v14142_v61 = vld [vmem:[#allocation154_spill] sm:$0xff] }
 0x55b   :  { %14134 = vst [vmem:[#allocation153_spill] sm:$0xff] %v10918_v36  ;;  %14138 = vst [vmem:[#allocation217_spill] sm:$0xff] %v10924_v60  ;;  %v3062_v20 = vand.u32 65535, %v14140_v44  ;;  %v10930_v23 = vpop.eup %5642  ;;  %vm14143_vm13 = vcmp.eq.s32.totalorder %v6508_v31, %v14142_v61  ;;  %v4014_v14 = vadd.f32 1.0, %v10904_v55  ;;  %5666 = vpow2.f32 %v3876_v50  ;;  %v14145_v58 = vld [vmem:[#allocation146_spill] sm:$0xff]  ;;  %v14251_v60 = vld [vmem:[#allocation203_spill] sm:$0xff] }
 0x55c   :  { %14139 = vst [vmem:[#allocation120_spill] sm:$0xff] %v10927_v59  ;;  %14141 = vst [vmem:[#allocation42_spill] sm:$0xff] %v10930_v23  ;;  %v10936_v22 = vsel %vm14143_vm13, 1.0, %v13845_v26  ;;  %vm3503_vm14 = vcmp.eq.f32.partialorder %v14145_v58, %v10927_v59  ;;  %v10941_v47 = vpop.eup %5644  ;;  %5668 = vrcp.f32 %v3982_v62  ;;  %v3979_v56 = vadd.f32 1.0, %v10918_v36  ;;  %v14148_v61 = vld [vmem:[#allocation74_spill] sm:$0xff] }
 0x55d   :  { %14144 = vst [vmem:[#allocation218_spill] sm:$0xff] %v10936_v22  ;;  %14146 = vst [vmem:[#allocation24_spill] sm:$0xff] %v10941_v47  ;;  %v3024_v1 = vsel %vm3023_vm12, %v3019_v28, inf  ;;  %v3504_v44 = vsel %vm3503_vm14, %v3499_v35, inf  ;;  %v10947_v34 = vpop.eup %5646  ;;  %vm14149_vm10 = vcmp.eq.s32.totalorder %v6508_v31, %v14148_v61  ;;  %5670 = vpow2.f32 %v3940_v21  ;;  %v14151_v55 = vld [vmem:[#allocation178_spill] sm:$0xff]  ;;  %v14152_v22 = vld [vmem:[#allocation241_spill] sm:$0xff]  ;;  %v10965_v35 = vpop.xlane.xlu1 %3186 }
 0x55e   :  { %14147 = vst [vmem:[#allocation158_spill] sm:$0xff] %v10947_v34  ;;  %v10953_v50 = vsel %vm14149_vm10, 1.0, %v13845_v26  ;;  %v3880_v58 = vmul.f32 1.442695, %v3793_v27  ;;  %v3794_v62 = vsub.f32 %v14152_v22, %v14151_v55  ;;  %3025 = vmin.xlane.f32.xlu1 %v3024_v1  ;;  %3505 = vmin.xlane.f32.xlu0 %v3504_v44  ;;  %v10957_v59 = vpop.eup %5648  ;;  %v14154_v28 = vld [vmem:[#allocation138_spill] sm:$0xff]  ;;  %5672 = vrcp.f32 %v4009_v43  ;;  %14157 = vst [vmem:[#allocation130_spill] sm:$0xff] %v10965_v35  ;;  %v10967_v61 = vpop.xlane.xlu0 %3066 }
 0x55f   :  { %14150 = vst [vmem:[#allocation125_spill] sm:$0xff] %v10953_v50  ;;  %14153 = vst [vmem:[#allocation46_spill] sm:$0xff] %v10957_v59  ;;  %vm14155_vm15 = vcmp.eq.s32.totalorder %v6508_v31, %v14154_v28  ;;  %v3064_v21 = vcvt.s32.f32 %v3062_v20  ;;  %v14159_v27 = vld [vmem:[#allocation221_spill] sm:$0xff]  ;;  %v10970_v52 = vpop.eup %5650  ;;  %v14161_v55 = vld [vmem:[#allocation82_spill] sm:$0xff]  ;;  %5674 = vrcp.f32 %v4014_v14  ;;  %v4011_v1 = vadd.f32 1.0, %v10941_v47 }
 0x560   :  { %v10963_v18 = vsel %vm14155_vm15, 1.0, %v13845_v26  ;;  %14158 = vst [vmem:[#allocation56_spill] sm:$0xff] %v10967_v61  ;;  %v3542_v50 = vand.u32 65535, %v14159_v27  ;;  %14160 = vst [vmem:[#allocation223_spill] sm:$0xff] %v10970_v52  ;;  %vm14162_vm1 = vcmp.eq.s32.totalorder %v6508_v31, %v14161_v55  ;;  %v14164_v43 = vld [vmem:[#allocation264_spill] sm:$0xff]  ;;  %v10981_v44 = vpop.eup %5652  ;;  %5676 = vrcp.f32 %v3979_v56  ;;  %v14172_v59 = vld [vmem:[#allocation173_spill] sm:$0xff] }
 0x561   :  { %14156 = vst [vmem:[#allocation66_spill] sm:$0xff] %v10963_v18  ;;  %v10976_v22 = vsel %vm14162_vm1, 1.0, %v13845_v26  ;;  %vm3068_vm8 = vcmp.eq.f32.partialorder %v14164_v43, %v10967_v61  ;;  %14165 = vst [vmem:[#allocation59_spill] sm:$0xff] %v10981_v44  ;;  %v3981_v20 = vadd.f32 1.0, %v10947_v34  ;;  %v10986_v27 = vmul.f32 %v10710_v40, %v10591_v57  ;;  %v10988_v18 = vpop.eup %5654  ;;  %v14168_v14 = vld [vmem:[#allocation224_spill] sm:$0xff] }
 0x562   :  { %14163 = vst [vmem:[#allocation134_spill] sm:$0xff] %v10976_v22  ;;  %v3069_v28 = vsel %vm3068_vm8, %v3064_v21, inf  ;;  %14167 = vst [vmem:[#allocation162_spill] sm:$0xff] %v10988_v18  ;;  %5678 = vpow2.f32 %v3880_v58  ;;  %v3882_v55 = vmul.f32 1.442695, %v3794_v62  ;;  %vm3548_vm9 = vcmp.eq.f32.partialorder %v14168_v14, %v10763_v12  ;;  %v14169_v22 = vld [vmem:[#allocation143_spill] sm:$0xff]  ;;  %v10996_v56 = vpop.eup %5656  ;;  %v11000_v34 = vpop.xlane.xlu0 %3051 }
 0x563   :  { %14166 = vst [vmem:[#allocation94_spill] sm:$0xff] %v10986_v27  ;;  %3070 = vmin.xlane.f32.xlu1 %v3069_v28  ;;  %v10994_v43 = vmul.f32 %v10710_v40, %v14169_v22  ;;  %14171 = vst [vmem:[#allocation139_spill] sm:$0xff] %v10996_v56  ;;  %v14173_v21 = vld [vmem:[#allocation226_spill] sm:$0xff]  ;;  %v3544_v57 = vcvt.s32.f32 %v3542_v50  ;;  %v14175_v27 = vld [vmem:[#allocation263_spill] sm:$0xff]  ;;  %v11004_v28 = vpop.eup %5658  ;;  %5680 = vrcp.f32 %v4011_v1  ;;  %v3984_v22 = vadd.f32 1.0, %v10981_v44 }
 0x564   :  { %v3825_v61 = vsub.f32 %v14173_v21, %v14172_v59  ;;  %14174 = vst [vmem:[#allocation62_spill] sm:$0xff] %v11000_v34  ;;  %v3047_v18 = vand.u32 65535, %v14175_v27  ;;  %v14176_v58 = vld [vmem:[#allocation266_spill] sm:$0xff]  ;;  %14177 = vst [vmem:[#allocation229_spill] sm:$0xff] %v11004_v28  ;;  %v14178_v47 = vld [vmem:[#allocation184_spill] sm:$0xff]  ;;  %v11015_v59 = vmul.f32 %v10737_v48, %v10606_v6  ;;  %v11017_v50 = vpop.eup %5660  ;;  %5682 = vrcp.f32 %v3981_v20 }
 0x565   :  { %14170 = vst [vmem:[#allocation228_spill] sm:$0xff] %v10994_v43  ;;  %v3527_v62 = vand.u32 65535, %v14176_v58  ;;  %vm14179_vm11 = vcmp.eq.s32.totalorder %v6508_v31, %v14178_v47  ;;  %14182 = vst [vmem:[#allocation232_spill] sm:$0xff] %v11017_v50  ;;  %v14183_v27 = vld [vmem:[#allocation182_spill] sm:$0xff]  ;;  %v14184_v21 = vld [vmem:[#allocation249_spill] sm:$0xff]  ;;  %v11021_v43 = vpop.xlane.xlu1 %3666  ;;  %v3549_v47 = vsel %vm3548_vm9, %v3544_v57, inf  ;;  %v11030_v44 = vpop.eup %5662  ;;  %5684 = vpow2.f32 %v3882_v55 }
 0x566   :  { %v11010_v40 = vsel %vm14179_vm11, 1.0, %v13845_v26  ;;  %14181 = vst [vmem:[#allocation227_spill] sm:$0xff] %v11015_v59  ;;  %v3826_v58 = vsub.f32 %v14184_v21, %v14183_v27  ;;  %14185 = vst [vmem:[#allocation144_spill] sm:$0xff] %v11021_v43  ;;  %v4013_v6 = vadd.f32 1.0, %v10996_v56  ;;  %v14189_v59 = vld [vmem:[#allocation176_spill] sm:$0xff]  ;;  %v14190_v20 = vld [vmem:[#allocation230_spill] sm:$0xff]  ;;  %v11037_v21 = vpop.eup %5664  ;;  %v11039_v57 = vpop.xlane.xlu0 %3531  ;;  %v3049_v12 = vcvt.s32.f32 %v3047_v18 }
 0x567   :  { %14180 = vst [vmem:[#allocation167_spill] sm:$0xff] %v11010_v40  ;;  %v14186_v40 = vld [vmem:[#allocation207_spill] sm:$0xff]  ;;  %14188 = vst [vmem:[#allocation233_spill] sm:$0xff] %v11030_v44  ;;  %v3795_v36 = vsub.f32 %v14190_v20, %v14189_v59  ;;  %v14191_v27 = vld [vmem:[#allocation268_spill] sm:$0xff]  ;;  %3550 = vmin.xlane.f32.xlu1 %v3549_v47  ;;  %v3944_v14 = vmul.f32 1.442695, %v3825_v61  ;;  %5686 = vrcp.f32 %v3984_v22 }
 0x568   :  { %v11028_v1 = vmul.f32 %v10737_v48, %v14186_v40  ;;  %vm3053_vm3 = vcmp.eq.f32.partialorder %v14191_v27, %v11000_v34  ;;  %14192 = vst [vmem:[#allocation8_spill] sm:$0xff] %v11037_v21  ;;  %14193 = vst [vmem:[#allocation147_spill] sm:$0xff] %v11039_v57  ;;  %v3529_v48 = vcvt.s32.f32 %v3527_v62  ;;  %v14194_v40 = vld [vmem:[#allocation269_spill] sm:$0xff]  ;;  %v14195_v56 = vld [vmem:[#allocation78_spill] sm:$0xff]  ;;  %v4016_v59 = vadd.f32 1.0, %v11017_v50  ;;  %v11051_v20 = vpop.eup %5666 }
 0x569   :  { %vm14196_vm2 = vcmp.eq.s32.totalorder %v6508_v31, %v14195_v56  ;;  %v14198_v47 = vld [vmem:[#allocation87_spill] sm:$0xff]  ;;  %14199 = vst [vmem:[#allocation236_spill] sm:$0xff] %v11051_v20  ;;  %v3946_v61 = vmul.f32 1.442695, %v3826_v58  ;;  %v11055_v44 = vpop.xlane.xlu1 %3216  ;;  %v3054_v56 = vsel %vm3053_vm3, %v3049_v12, inf  ;;  %v14207_v58 = vld [vmem:[#allocation169_spill] sm:$0xff]  ;;  %5688 = vrcp.f32 %v4013_v6 }
 0x56a   :  { %14187 = vst [vmem:[#allocation65_spill] sm:$0xff] %v11028_v1  ;;  %v3092_v1 = vand.u32 65535, %v14194_v40  ;;  %v11046_v55 = vsel %vm14196_vm2, 1.0, %v13845_v26  ;;  %vm3533_vm4 = vcmp.eq.f32.partialorder %v14198_v47, %v11039_v57  ;;  %v14200_v21 = vld [vmem:[#allocation179_spill] sm:$0xff]  ;;  %14202 = vst [vmem:[#allocation152_spill] sm:$0xff] %v11055_v44  ;;  %vm14208_vm6 = vcmp.eq.s32.totalorder %v6508_v31, %v14207_v58  ;;  %v14244_v52 = vld [vmem:[#allocation204_spill] sm:$0xff] }
 0x56b   :  { %14197 = vst [vmem:[#allocation68_spill] sm:$0xff] %v11046_v55  ;;  %v14201_v18 = vld [vmem:[#allocation235_spill] sm:$0xff]  ;;  %v3534_v40 = vsel %vm3533_vm4, %v3529_v48, inf  ;;  %v11060_v55 = vpop.eup %5668  ;;  %3055 = vmin.xlane.f32.xlu1 %v3054_v56  ;;  %5690 = vpow2.f32 %v3944_v14  ;;  %v3983_v56 = vadd.f32 1.0, %v11051_v20 }
 0x56c   :  { %v3827_v62 = vsub.f32 %v14201_v18, %v14200_v21  ;;  %14203 = vst [vmem:[#allocation15_spill] sm:$0xff] %v11060_v55  ;;  %v14204_v22 = vld [vmem:[#allocation83_spill] sm:$0xff]  ;;  %v11072_v21 = vsel %vm14208_vm6, 1.0, %v13845_v26  ;;  %v3884_v18 = vmul.f32 1.442695, %v3795_v36  ;;  %3535 = vmin.xlane.f32.xlu0 %v3534_v40  ;;  %v11074_v12 = vpop.eup %5670  ;;  %v3094_v50 = vcvt.s32.f32 %v3092_v1  ;;  %v14217_v36 = vld [vmem:[#allocation89_spill] sm:$0xff] }
 0x56d   :  { %vm14205_vm5 = vcmp.eq.s32.totalorder %v6508_v31, %v14204_v22  ;;  %14209 = vst [vmem:[#allocation81_spill] sm:$0xff] %v11072_v21  ;;  %14210 = vst [vmem:[#allocation239_spill] sm:$0xff] %v11074_v12  ;;  %v14211_v27 = vld [vmem:[#allocation163_spill] sm:$0xff]  ;;  %v11082_v22 = vpop.xlane.xlu0 %3096  ;;  %v11085_v55 = vpop.eup %5672  ;;  %vm14218_vm12 = vcmp.eq.s32.totalorder %v6508_v31, %v14217_v36  ;;  %5692 = vrcp.f32 %v4016_v59  ;;  %v4015_v36 = vadd.f32 1.0, %v11074_v12  ;;  %v14225_v59 = vld [vmem:[#allocation234_spill] sm:$0xff] }
 0x56e   :  { %v11066_v47 = vsel %vm14205_vm5, 1.0, %v13845_v26  ;;  %vm14212_vm7 = vcmp.eq.s32.totalorder %v6508_v31, %v14211_v27  ;;  %14214 = vst [vmem:[#allocation28_spill] sm:$0xff] %v11082_v22  ;;  %14216 = vst [vmem:[#allocation205_spill] sm:$0xff] %v11085_v55  ;;  %v11091_v6 = vsel %vm14218_vm12, 1.0, %v13845_v26  ;;  %v14220_v40 = vld [vmem:[#allocation99_spill] sm:$0xff]  ;;  %v11096_v14 = vpop.eup %5674  ;;  %5694 = vpow2.f32 %v3946_v61  ;;  %v14222_v27 = vld [vmem:[#allocation181_spill] sm:$0xff] }
 0x56f   :  { %14206 = vst [vmem:[#allocation19_spill] sm:$0xff] %v11066_v47  ;;  %v11080_v48 = vsel %vm14212_vm7, 1.0, %v13845_v26  ;;  %v14215_v47 = vld [vmem:[#allocation231_spill] sm:$0xff]  ;;  %14219 = vst [vmem:[#allocation157_spill] sm:$0xff] %v11091_v6  ;;  %vm3098_vm13 = vcmp.eq.f32.partialorder %v14220_v40, %v11082_v22  ;;  %v3948_v1 = vmul.f32 1.442695, %v3827_v62  ;;  %v11100_v57 = vpop.eup %5676  ;;  %5696 = vpow2.f32 %v3884_v18 }
 0x570   :  { %14213 = vst [vmem:[#allocation171_spill] sm:$0xff] %v11080_v48  ;;  %v3572_v58 = vand.u32 65535, %v14215_v47  ;;  %14221 = vst [vmem:[#allocation23_spill] sm:$0xff] %v11096_v14  ;;  %v14223_v47 = vld [vmem:[#allocation240_spill] sm:$0xff]  ;;  %v3099_v21 = vsel %vm3098_vm13, %v3094_v50, inf  ;;  %vm3578_vm14 = vcmp.eq.f32.partialorder %v14225_v59, %v10791_v9  ;;  %v11107_v40 = vmul.f32 %v10752_v10, %v10619_v29  ;;  %v11109_v6 = vpop.eup %5678  ;;  %v14228_v62 = vld [vmem:[#allocation255_spill] sm:$0xff] }
 0x571   :  { %v3797_v48 = vsub.f32 %v14223_v47, %v14222_v27  ;;  %14224 = vst [vmem:[#allocation142_spill] sm:$0xff] %v11100_v57  ;;  %3100 = vmin.xlane.f32.xlu1 %v3099_v21  ;;  %14226 = vst [vmem:[#allocation244_spill] sm:$0xff] %v11109_v6  ;;  %v14227_v61 = vld [vmem:[#allocation188_spill] sm:$0xff]  ;;  %v11113_v27 = vpop.xlane.xlu1 %3696  ;;  %v11115_v50 = vpop.xlane.xlu0 %3081  ;;  %5698 = vrcp.f32 %v3983_v56  ;;  %v14233_v20 = vld [vmem:[#allocation119_spill] sm:$0xff]  ;;  %v11126_v55 = vmul.f32 %v10759_v63, %v10624_v37 }
 0x572   :  { %v3796_v14 = vsub.f32 %v14228_v62, %v14227_v61  ;;  %14229 = vst [vmem:[#allocation174_spill] sm:$0xff] %v11113_v27  ;;  %14230 = vst [vmem:[#allocation237_spill] sm:$0xff] %v11115_v50  ;;  %v3574_v47 = vcvt.s32.f32 %v3572_v58  ;;  %v14231_v22 = vld [vmem:[#allocation272_spill] sm:$0xff]  ;;  %v2773_v34 = vcvt.f32.s32 %v14233_v20  ;;  %v11128_v61 = vpop.eup %5680  ;;  %5700 = vpow2.f32 %v3948_v1  ;;  %v14236_v58 = vld [vmem:[#allocation31_spill] sm:$0xff] }
 0x573   :  { %v3077_v18 = vand.u32 65535, %v14231_v22  ;;  %v14232_v21 = vld [vmem:[#allocation36_spill] sm:$0xff]  ;;  %14235 = vst [vmem:[#allocation141_spill] sm:$0xff] %v11128_v61  ;;  %v3888_v62 = vmul.f32 1.442695, %v3797_v48  ;;  %v11135_v56 = vmul.f32 %v10759_v63, %v14236_v58  ;;  %v11137_v20 = vpop.eup %5682  ;;  %5702 = vrcp.f32 %v4015_v36  ;;  %v14238_v37 = vld [vmem:[#allocation175_spill] sm:$0xff] }
 0x574   :  { %v3557_v12 = vand.u32 65535, %v14232_v21  ;;  %v14234_v57 = vld [vmem:[#allocation160_spill] sm:$0xff]  ;;  %v3579_v22 = vsel %vm3578_vm14, %v3574_v47, inf  ;;  %14237 = vst [vmem:[#allocation20_spill] sm:$0xff] %v11137_v20  ;;  %vm3083_vm10 = vcmp.eq.f32.partialorder %v14238_v37, %v11115_v50  ;;  %v11143_v48 = vpop.eup %5684  ;;  %v11145_v21 = vmul.f32 1.442695, %v3796_v14 }
 0x575   :  { %v11122_v29 = vmul.f32 %v10752_v10, %v14234_v57  ;;  %v3985_v10 = vadd.f32 1.0, %v11109_v6  ;;  %3580 = vmin.xlane.f32.xlu1 %v3579_v22  ;;  %v14239_v57 = vld [vmem:[#allocation113_spill] sm:$0xff]  ;;  %14240 = vst [vmem:[#allocation216_spill] sm:$0xff] %v11143_v48  ;;  %v2771_v59 = vpop.xlane.xlu1 %2770  ;;  %v11147_v47 = vpop.xlane.xlu0 %3561  ;;  %v3079_v63 = vcvt.s32.f32 %v3077_v18  ;;  %v14242_v9 = vld [vmem:[#allocation238_spill] sm:$0xff]  ;;  %v2774_v36 = vshll.u32 %v2773_v34, 16 }
 0x576   :  { %v3122_v1 = vand.u32 65535, %v14239_v57  ;;  %14241 = vst [vmem:[#allocation161_spill] sm:$0xff] %v11147_v47  ;;  %v3559_v58 = vcvt.s32.f32 %v3557_v12  ;;  %v3602_v20 = vand.u32 65535, %v14242_v9  ;;  %v14243_v61 = vld [vmem:[#allocation122_spill] sm:$0xff]  ;;  %v2772_v28 = vcvt.f32.s32 %v2771_v59  ;;  %v11153_v22 = vpop.eup %5686  ;;  %v14247_v14 = vld [vmem:[#allocation245_spill] sm:$0xff]  ;;  %v14249_v59 = vld [vmem:[#allocation127_spill] sm:$0xff] }
 0x577   :  { %v3253_v6 = vcvt.f32.s32 %v14243_v61  ;;  %vm3563_vm15 = vcmp.eq.f32.partialorder %v14244_v52, %v11147_v47  ;;  %14245 = vst [vmem:[#allocation215_spill] sm:$0xff] %v11153_v22  ;;  %5704 = vpow2.f32 %v3888_v62  ;;  %v14246_v57 = vld [vmem:[#allocation186_spill] sm:$0xff]  ;;  %v3084_v18 = vsel %vm3083_vm10, %v3079_v63, inf  ;;  %v11163_v52 = vpop.eup %5688  ;;  %v14252_v63 = vld [vmem:[#allocation129_spill] sm:$0xff] }
 0x578   :  { %v3564_v12 = vsel %vm3563_vm15, %v3559_v58, inf  ;;  %5706 = vrcp.f32 %v3985_v10  ;;  %v11161_v9 = vadd.f32 1.0, %v11143_v48  ;;  %v2775_v34 = vadd.s32 %v2774_v36, %v2772_v28  ;;  %14248 = vst [vmem:[#allocation251_spill] sm:$0xff] %v11163_v52  ;;  %v11170_v10 = vpop.eup %5690 }
 0x579   :  { %3085 = vmin.xlane.f32.xlu1 %v3084_v18  ;;  %3565 = vmin.xlane.f32.xlu0 %v3564_v12  ;;  %v3124_v61 = vcvt.s32.f32 %v3122_v1  ;;  %v2758_v62 = vcvt.f32.s32 %v14249_v59  ;;  %v3251_v47 = vpop.xlane.xlu1 %3250  ;;  %v11166_v22 = vpop.xlane.xlu0 %3126  ;;  %v3604_v23 = vcvt.s32.f32 %v3602_v20  ;;  %v3107_v37 = vand.u32 65535, %v14251_v60  ;;  %v14253_v1 = vld [vmem:[#allocation71_spill] sm:$0xff]  ;;  %v14255_v60 = vld [vmem:[#allocation73_spill] sm:$0xff] }
 0x57a   :  { %14250 = vst [vmem:[#allocation200_spill] sm:$0xff] %v11166_v22  ;;  %v3587_v58 = vand.u32 65535, %v14252_v63  ;;  %v3254_v48 = vshll.u32 %v3253_v6, 16  ;;  %vm3707_vm1 = vcmp.eq.s32.totalorder %v6508_v31, %v2775_v34  ;;  %v3252_v28 = vcvt.f32.s32 %v3251_v47  ;;  %v11175_v36 = vpop.eup %5692  ;;  %v14257_v63 = vld [vmem:[#allocation242_spill] sm:$0xff] }
 0x57b   :  { %vm3128_vm8 = vcmp.eq.f32.partialorder %v14253_v1, %v11166_v22  ;;  %14254 = vst [vmem:[#allocation166_spill] sm:$0xff] %v11175_v36  ;;  %v4937_v18 = vsel %vm3707_vm1, 1.0, %v13845_v26  ;;  %v11180_v20 = vmul.f32 %v10787_v42, %v10637_v5  ;;  %v11184_v59 = vmul.f32 %v10787_v42, %v14255_v60  ;;  %v11186_v6 = vpop.eup %5694  ;;  %v14258_v1 = vld [vmem:[#allocation243_spill] sm:$0xff]  ;;  %v14260_v36 = vld [vmem:[#allocation18_spill] sm:$0xff] }
 0x57c   :  { %v3129_v12 = vsel %vm3128_vm8, %v3124_v61, inf  ;;  %14256 = vst [vmem:[#allocation220_spill] sm:$0xff] %v11186_v6  ;;  %v4539_v47 = vmul.f32 %v4937_v18, %v11107_v40  ;;  %v3255_v34 = vadd.s32 %v3254_v48, %v3252_v28  ;;  %vm3608_vm9 = vcmp.eq.f32.partialorder %v14257_v63, %v10820_v15  ;;  %v11192_v61 = vpop.eup %5696  ;;  %v14262_v63 = vld [vmem:[#allocation124_spill] sm:$0xff] }
 0x57d   :  { %3130 = vmin.xlane.f32.xlu1 %v3129_v12  ;;  %v3152_v22 = vand.u32 65535, %v14258_v1  ;;  %14259 = vst [vmem:[#allocation219_spill] sm:$0xff] %v11192_v61  ;;  %v2803_v5 = vcvt.f32.s32 %v14260_v36  ;;  %v2756_v50 = vpop.xlane.xlu1 %2755  ;;  %v11195_v52 = vpop.xlane.xlu0 %3111  ;;  %v3109_v42 = vcvt.s32.f32 %v3107_v37  ;;  %v3589_v60 = vcvt.s32.f32 %v3587_v58  ;;  %v14263_v37 = vld [vmem:[#allocation211_spill] sm:$0xff]  ;;  %v14269_v61 = vld [vmem:[#allocation86_spill] sm:$0xff] }
 0x57e   :  { %v11199_v6 = vmul.f32 %v10793_v0, %v10645_v54  ;;  %v2759_v40 = vshll.u32 %v2758_v62, 16  ;;  %v4603_v48 = vadd.f32 %v4539_v47, %v11122_v29  ;;  %vm3739_vm11 = vcmp.eq.s32.totalorder %v6508_v31, %v3255_v34  ;;  %v11203_v18 = vpop.eup %5698  ;;  %v14265_v29 = vld [vmem:[#allocation80_spill] sm:$0xff] }
 0x57f   :  { %v2757_v28 = vcvt.f32.s32 %v2756_v50  ;;  %14261 = vst [vmem:[#allocation246_spill] sm:$0xff] %v11203_v18  ;;  %v4969_v12 = vsel %vm3739_vm11, 1.0, %v13845_v26  ;;  %v3609_v36 = vsel %vm3608_vm9, %v3604_v23, inf  ;;  %v11208_v1 = vmul.f32 %v10793_v0, %v14262_v63  ;;  %v11211_v15 = vpop.eup %5700  ;;  %v14266_v0 = vld [vmem:[#allocation104_spill] sm:$0xff] }
 0x580   :  { %v3137_v58 = vand.u32 65535, %v14263_v37  ;;  %14264 = vst [vmem:[#allocation253_spill] sm:$0xff] %v11211_v15  ;;  %4795 = vst.msk [vmem:[%s12167_s5 + $0x8] sm:$0xff] %vm503_vm0, %v4603_v48  ;;  %v4571_v54 = vmul.f32 %v4969_v12, %v11126_v55  ;;  %vm3113_vm3 = vcmp.eq.f32.partialorder %v14265_v29, %v11195_v52  ;;  %v3154_v23 = vcvt.s32.f32 %v3152_v22  ;;  %v11220_v62 = vpop.eup %5702  ;;  %v14268_v18 = vld [vmem:[#allocation248_spill] sm:$0xff] }
 0x581   :  { %v2760_v50 = vadd.s32 %v2759_v40, %v2757_v28  ;;  %3610 = vmin.xlane.f32.xlu1 %v3609_v36  ;;  %v3283_v47 = vcvt.f32.s32 %v14266_v0  ;;  %v2804_v34 = vshll.u32 %v2803_v5, 16  ;;  %v2801_v63 = vpop.xlane.xlu1 %2800  ;;  %v11223_v37 = vpop.xlane.xlu0 %3591  ;;  %v3632_v15 = vand.u32 65535, %v14268_v18  ;;  %v14270_v28 = vld [vmem:[#allocation133_spill] sm:$0xff]  ;;  %v14271_v18 = vld [vmem:[#allocation247_spill] sm:$0xff] }
 0x582   :  { %14267 = vst [vmem:[#allocation75_spill] sm:$0xff] %v11223_v37  ;;  %v3617_v48 = vand.u32 65535, %v14269_v61  ;;  %v4635_v55 = vadd.f32 %v4571_v54, %v11135_v56  ;;  %v2802_v40 = vcvt.f32.s32 %v2801_v63  ;;  %vm3593_vm4 = vcmp.eq.f32.partialorder %v14270_v28, %v11223_v37  ;;  %v14272_v54 = vld [vmem:[#allocation201_spill] sm:$0xff] }
 0x583   :  { %vm3706_vm2 = vcmp.eq.s32.totalorder %v6508_v31, %v2760_v50  ;;  %v3114_v12 = vsel %vm3113_vm3, %v3109_v42, inf  ;;  %v3594_v36 = vsel %vm3593_vm4, %v3589_v60, inf  ;;  %v11234_v5 = vmul.f32 %v10812_v38, %v10665_v17 }
 0x584   :  { %v4936_v22 = vsel %vm3706_vm2, 1.0, %v13845_v26  ;;  %v11236_v29 = vpop.eup %5704  ;;  %4827 = vst.msk [vmem:[%s12167_s5 + $0x108] sm:$0xff] %vm503_vm0, %v4635_v55  ;;  %v2805_v61 = vadd.s32 %v2804_v34, %v2802_v40  ;;  %3595 = vmin.xlane.f32.xlu0 %v3594_v36  ;;  %vm3158_vm5 = vcmp.eq.f32.partialorder %v14271_v18, %v10861_v24  ;;  %v3139_v42 = vcvt.s32.f32 %v3137_v58  ;;  %v14273_v34 = vld [vmem:[#allocation21_spill] sm:$0xff]  ;;  %v14276_v36 = vld [vmem:[#allocation155_spill] sm:$0xff] }
 0x585   :  { %v4538_v56 = vmul.f32 %v4936_v22, %v10400_v19  ;;  %3115 = vmin.xlane.f32.xlu1 %v3114_v12  ;;  %v11245_v60 = vpop.eup %5706  ;;  %v3284_v17 = vshll.u32 %v3283_v47, 16  ;;  %v2788_v50 = vcvt.f32.s32 %v14272_v54  ;;  %v3281_v0 = vpop.xlane.xlu1 %3280  ;;  %v3634_v28 = vcvt.s32.f32 %v3632_v15  ;;  %v14274_v47 = vld [vmem:[#allocation254_spill] sm:$0xff] }
 0x586   :  { %v11248_v63 = vpop.xlane.xlu0 %3141  ;;  %v3619_v37 = vcvt.s32.f32 %v3617_v48  ;;  %vm3709_vm6 = vcmp.eq.s32.totalorder %v6508_v31, %v2805_v61  ;;  %v3282_v19 = vcvt.f32.s32 %v3281_v0  ;;  %v3159_v40 = vsel %vm3158_vm5, %v3154_v23, inf  ;;  %v14275_v48 = vld [vmem:[#allocation252_spill] sm:$0xff]  ;;  %v14277_v23 = vld [vmem:[#allocation13_spill] sm:$0xff]  ;;  %v14279_v0 = vld [vmem:[#allocation35_spill] sm:$0xff] }
 0x587   :  { %v4602_v55 = vadd.f32 %v4538_v56, %v10416_v2  ;;  %vm3143_vm7 = vcmp.eq.f32.partialorder %v14273_v34, %v11248_v63  ;;  %v4939_v58 = vsel %vm3709_vm6, 1.0, %v13845_v26  ;;  %v3182_v12 = vand.u32 65535, %v14274_v47 }
 0x588   :  { %v3144_v22 = vsel %vm3143_vm7, %v3139_v42, inf  ;;  %v4541_v15 = vmul.f32 %v4939_v58, %v11180_v20  ;;  %v3285_v2 = vadd.s32 %v3284_v17, %v3282_v19  ;;  %vm3638_vm12 = vcmp.eq.f32.partialorder %v14275_v48, %v10913_v7 }
 0x589   :  { %4794 = vst.msk [vmem:[%s12167_s5] sm:$0xff] %vm503_vm0, %v4602_v55  ;;  %3160 = vmin.xlane.f32.xlu1 %v3159_v40  ;;  %3145 = vmin.xlane.f32.xlu0 %v3144_v22  ;;  %v3167_v56 = vand.u32 65535, %v14276_v36  ;;  %v2789_v61 = vshll.u32 %v2788_v50, 16  ;;  %v2833_v18 = vcvt.f32.s32 %v14277_v23  ;;  %v2786_v42 = vpop.xlane.xlu1 %2785  ;;  %v11269_v34 = vmul.f32 %v10812_v38, %v14279_v0  ;;  %v14280_v50 = vld [vmem:[#allocation114_spill] sm:$0xff]  ;;  %v14285_v23 = vld [vmem:[#allocation136_spill] sm:$0xff] }
 0x58a   :  { %v11265_v54 = vpop.xlane.xlu0 %3621  ;;  %v11273_v20 = vmul.f32 %v10832_v25, %v10682_v30  ;;  %v4605_v17 = vadd.f32 %v4541_v15, %v11184_v59  ;;  %vm3741_vm13 = vcmp.eq.s32.totalorder %v6508_v31, %v3285_v2  ;;  %v2787_v55 = vcvt.f32.s32 %v2786_v42  ;;  %v14281_v38 = vld [vmem:[#allocation258_spill] sm:$0xff]  ;;  %v14282_v15 = vld [vmem:[#allocation96_spill] sm:$0xff] }
 0x58b   :  { %14278 = vst [vmem:[#allocation132_spill] sm:$0xff] %v11265_v54  ;;  %vm3623_vm14 = vcmp.eq.f32.partialorder %v14280_v50, %v11265_v54  ;;  %v4971_v19 = vsel %vm3741_vm13, 1.0, %v13845_v26  ;;  %v3639_v58 = vsel %vm3638_vm12, %v3634_v28, inf  ;;  %v3184_v22 = vcvt.s32.f32 %v3182_v12  ;;  %v14284_v12 = vld [vmem:[#allocation260_spill] sm:$0xff] }
 0x58c   :  { %v3624_v40 = vsel %vm3623_vm14, %v3619_v37, inf  ;;  %vm3188_vm10 = vcmp.eq.f32.partialorder %v14281_v38, %v10965_v35  ;;  %4797 = vst.msk [vmem:[%s12167_s5 + $0x18] sm:$0xff] %vm503_vm0, %v4605_v17  ;;  %v4573_v30 = vmul.f32 %v4971_v19, %v11199_v6  ;;  %v2790_v59 = vadd.s32 %v2789_v61, %v2787_v55  ;;  %v14286_v6 = vld [vmem:[#allocation26_spill] sm:$0xff] }
 0x58d   :  { %3640 = vmin.xlane.f32.xlu1 %v3639_v58  ;;  %3625 = vmin.xlane.f32.xlu0 %v3624_v40  ;;  %v3169_v47 = vcvt.s32.f32 %v3167_v56  ;;  %v3313_v2 = vcvt.f32.s32 %v14282_v15  ;;  %v2834_v48 = vshll.u32 %v2833_v18, 16  ;;  %v2831_v28 = vpop.xlane.xlu1 %2830  ;;  %v3662_v36 = vand.u32 65535, %v14284_v12  ;;  %v14287_v55 = vld [vmem:[#allocation270_spill] sm:$0xff]  ;;  %v14289_v40 = vld [vmem:[#allocation164_spill] sm:$0xff] }
 0x58e   :  { %v11288_v37 = vpop.xlane.xlu0 %3171  ;;  %v3647_v42 = vand.u32 65535, %v14285_v23  ;;  %v4637_v0 = vadd.f32 %v4573_v30, %v11208_v1  ;;  %vm3708_vm15 = vcmp.eq.s32.totalorder %v6508_v31, %v2790_v59  ;;  %v2832_v17 = vcvt.f32.s32 %v2831_v28  ;;  %v14288_v19 = vld [vmem:[#allocation262_spill] sm:$0xff] }
 0x58f   :  { %14283 = vst [vmem:[#allocation170_spill] sm:$0xff] %v11288_v37  ;;  %vm3173_vm1 = vcmp.eq.f32.partialorder %v14286_v6, %v11288_v37  ;;  %v4938_v56 = vsel %vm3708_vm15, 1.0, %v13845_v26  ;;  %v3189_v61 = vsel %vm3188_vm10, %v3184_v22, inf  ;;  %v3212_v50 = vand.u32 65535, %v14287_v55  ;;  %v14290_v22 = vld [vmem:[#allocation103_spill] sm:$0xff] }
 0x590   :  { %v3174_v18 = vsel %vm3173_vm1, %v3169_v47, inf  ;;  %vm3668_vm8 = vcmp.eq.f32.partialorder %v14288_v19, %v11021_v43  ;;  %4829 = vst.msk [vmem:[%s12167_s5 + $0x118] sm:$0xff] %vm503_vm0, %v4637_v0  ;;  %v4540_v1 = vmul.f32 %v4938_v56, %v10498_v46  ;;  %v2835_v58 = vadd.s32 %v2834_v48, %v2832_v17  ;;  %v14292_v46 = vld [vmem:[#allocation27_spill] sm:$0xff]  ;;  %v14293_v56 = vld [vmem:[#allocation109_spill] sm:$0xff] }
 0x591   :  { %3190 = vmin.xlane.f32.xlu1 %v3189_v61  ;;  %3175 = vmin.xlane.f32.xlu0 %v3174_v18  ;;  %v3197_v30 = vand.u32 65535, %v14289_v40  ;;  %v3314_v38 = vshll.u32 %v3313_v2, 16  ;;  %v2818_v59 = vcvt.f32.s32 %v14290_v22  ;;  %v3311_v47 = vpop.xlane.xlu1 %3310  ;;  %v3664_v28 = vcvt.s32.f32 %v3662_v36 }
 0x592   :  { %v11310_v15 = vpop.xlane.xlu0 %3651  ;;  %v3649_v12 = vcvt.s32.f32 %v3647_v42  ;;  %v4604_v23 = vadd.f32 %v4540_v1, %v10505_v51  ;;  %vm3711_vm9 = vcmp.eq.s32.totalorder %v6508_v31, %v2835_v58  ;;  %v3312_v0 = vcvt.f32.s32 %v3311_v47  ;;  %v14296_v58 = vld [vmem:[#allocation101_spill] sm:$0xff] }
 0x593   :  { %14291 = vst [vmem:[#allocation222_spill] sm:$0xff] %v11310_v15  ;;  %vm3653_vm11 = vcmp.eq.f32.partialorder %v14292_v46, %v11310_v15  ;;  %v4941_v48 = vsel %vm3711_vm9, 1.0, %v13845_v26  ;;  %v3669_v2 = vsel %vm3668_vm8, %v3664_v28, inf  ;;  %v3214_v6 = vcvt.s32.f32 %v3212_v50  ;;  %v14295_v50 = vld [vmem:[#allocation32_spill] sm:$0xff]  ;;  %v14421_v15 = vld [vmem:[#allocation65_spill] sm:$0xff] }
 0x594   :  { %v3654_v17 = vsel %vm3653_vm11, %v3649_v12, inf  ;;  %vm3218_vm3 = vcmp.eq.f32.partialorder %v14293_v56, %v11055_v44  ;;  %4796 = vst.msk [vmem:[%s12167_s5 + $0x10] sm:$0xff] %vm503_vm0, %v4604_v23  ;;  %v4543_v51 = vmul.f32 %v4941_v48, %v11234_v5  ;;  %v3315_v36 = vadd.s32 %v3314_v38, %v3312_v0  ;;  %v14297_v5 = vld [vmem:[#allocation30_spill] sm:$0xff]  ;;  %v14298_v38 = vld [vmem:[#allocation172_spill] sm:$0xff] }
 0x595   :  { %3670 = vmin.xlane.f32.xlu1 %v3669_v2  ;;  %3655 = vmin.xlane.f32.xlu0 %v3654_v17  ;;  %v3199_v42 = vcvt.s32.f32 %v3197_v30  ;;  %v2819_v61 = vshll.u32 %v2818_v59, 16  ;;  %v2863_v18 = vcvt.f32.s32 %v10395_v39  ;;  %v2816_v55 = vpop.xlane.xlu1 %2815  ;;  %v3692_v1 = vand.u32 65535, %v14295_v50 }
 0x596   :  { %v11328_v19 = vpop.xlane.xlu0 %3201  ;;  %v3677_v40 = vand.u32 65535, %v14296_v58  ;;  %v4607_v22 = vadd.f32 %v4543_v51, %v11269_v34  ;;  %vm3743_vm2 = vcmp.eq.s32.totalorder %v6508_v31, %v3315_v36  ;;  %v2817_v47 = vcvt.f32.s32 %v2816_v55  ;;  %v14299_v34 = vld [vmem:[#allocation7_spill] sm:$0xff] }
 0x597   :  { %14294 = vst [vmem:[#allocation257_spill] sm:$0xff] %v11328_v19  ;;  %vm3203_vm4 = vcmp.eq.f32.partialorder %v14297_v5, %v11328_v19  ;;  %v4383_v30 = vmul.f32 %v10832_v25, %v14298_v38  ;;  %v4973_v39 = vsel %vm3743_vm2, 1.0, %v13845_v26  ;;  %v3219_v59 = vsel %vm3218_vm3, %v3214_v6, inf  ;;  %v14420_v19 = vld [vmem:[#allocation228_spill] sm:$0xff] }
 0x598   :  { %v3204_v28 = vsel %vm3203_vm4, %v3199_v42, inf  ;;  %v3238_v12 = vcvt.f32.s32 %v10176_v41  ;;  %vm3698_vm5 = vcmp.eq.f32.partialorder %v14299_v34, %v11113_v27  ;;  %4799 = vst.msk [vmem:[%s12167_s5 + $0x28] sm:$0xff] %vm503_vm0, %v4607_v22  ;;  %v4575_v23 = vmul.f32 %v4973_v39, %v11273_v20  ;;  %v14302_v22 = vld [vmem:[#allocation92_spill] sm:$0xff] }
 0x599   :  { %v2820_v25 = vadd.s32 %v2819_v61, %v2817_v47  ;;  %3220 = vmin.xlane.f32.xlu1 %v3219_v59  ;;  %3205 = vmin.xlane.f32.xlu0 %v3204_v28  ;;  %v3343_v0 = vcvt.f32.s32 %v10393_v49  ;;  %v2864_v46 = vshll.u32 %v2863_v18, 16  ;;  %v2861_v48 = vpop.xlane.xlu1 %2860  ;;  %v3694_v41 = vcvt.s32.f32 %v3692_v1  ;;  %v14304_v39 = vld [vmem:[#allocation72_spill] sm:$0xff]  ;;  %v14305_v28 = vld [vmem:[#allocation43_spill] sm:$0xff] }
 0x59a   :  { %v11351_v2 = vpop.xlane.xlu0 %3681  ;;  %v3679_v17 = vcvt.s32.f32 %v3677_v40  ;;  %v4639_v6 = vadd.f32 %v4575_v23, %v4383_v30  ;;  %v2862_v56 = vcvt.f32.s32 %v2861_v48  ;;  %5708 = vpow2.f32 %v11145_v21  ;;  %v14306_v23 = vld [vmem:[#allocation165_spill] sm:$0xff]  ;;  %v14307_v48 = vld [vmem:[#allocation51_spill] sm:$0xff] }
 0x59b   :  { %14300 = vst [vmem:[#allocation259_spill] sm:$0xff] %v11351_v2  ;;  %vm3710_vm6 = vcmp.eq.s32.totalorder %v6508_v31, %v2820_v25  ;;  %vm3683_vm7 = vcmp.eq.f32.partialorder %v10404_v11, %v11351_v2  ;;  %v3699_v49 = vsel %vm3698_vm5, %v3694_v41, inf  ;;  %v14301_v36 = vsub.f32 %v14247_v14, %v14246_v57 }
 0x59c   :  { %v4940_v20 = vsel %vm3710_vm6, 1.0, %v13845_v26  ;;  %v3684_v51 = vsel %vm3683_vm7, %v3679_v17, inf  ;;  %4831 = vst.msk [vmem:[%s12167_s5 + $0x128] sm:$0xff] %vm503_vm0, %v4639_v6  ;;  %v4161_v21 = vmul.f32 %v10866_v13, %v10717_v16  ;;  %v2865_v61 = vadd.s32 %v2864_v46, %v2862_v56 }
 0x59d   :  { %v11364_v42 = vmul.f32 1.442695, %v14301_v36  ;;  %v4542_v11 = vmul.f32 %v4940_v20, %v10552_v45  ;;  %3700 = vmin.xlane.f32.xlu1 %v3699_v49  ;;  %3685 = vmin.xlane.f32.xlu0 %v3684_v51  ;;  %v3239_v18 = vshll.u32 %v3238_v12, 16  ;;  %v3268_v55 = vcvt.f32.s32 %v10280_v4  ;;  %v3341_v14 = vpop.xlane.xlu1 %3340  ;;  %v14303_v4 = vld [vmem:[#allocation77_spill] sm:$0xff] }
 0x59e   :  { %v3344_v50 = vshll.u32 %v3343_v0, 16  ;;  %v2848_v57 = vcvt.f32.s32 %v10422_v8  ;;  %v3236_v1 = vpop.xlane.xlu0 %3235  ;;  %vm3713_vm12 = vcmp.eq.s32.totalorder %v6508_v31, %v2865_v61  ;;  %v3342_v40 = vcvt.f32.s32 %v3341_v14  ;;  %v14308_v20 = vld [vmem:[#allocation33_spill] sm:$0xff] }
 0x59f   :  { %v4606_v58 = vadd.f32 %v4542_v11, %v10555_v53  ;;  %v3237_v45 = vcvt.f32.s32 %v3236_v1  ;;  %v4353_v16 = vmul.f32 %v10866_v13, %v14302_v22  ;;  %v4943_v47 = vsel %vm3713_vm12, 1.0, %v13845_v26  ;;  %v14309_v36 = vld [vmem:[#allocation17_spill] sm:$0xff] }
 0x5a0   :  { %v4193_v5 = vmul.f32 %v10872_v3, %v10725_v32  ;;  %v4385_v38 = vmul.f32 %v10872_v3, %v14303_v4  ;;  %v4545_v8 = vmul.f32 %v4943_v47, %v4161_v21  ;;  %v3345_v53 = vadd.s32 %v3344_v50, %v3342_v40  ;;  %v14310_v50 = vld [vmem:[#allocation39_spill] sm:$0xff]  ;;  %v14311_v40 = vld [vmem:[#allocation44_spill] sm:$0xff] }
 0x5a1   :  { %4798 = vst.msk [vmem:[%s12167_s5 + $0x20] sm:$0xff] %vm503_vm0, %v4606_v58  ;;  %v3240_v30 = vadd.s32 %v3239_v18, %v3237_v45  ;;  %v4163_v59 = vmul.f32 %v10888_v33, %v14304_v39  ;;  %v3269_v13 = vshll.u32 %v3268_v55, 16  ;;  %v3298_v12 = vcvt.f32.s32 %v14305_v28  ;;  %v2846_v25 = vpop.xlane.xlu1 %2845  ;;  %v14313_v39 = vld [vmem:[#allocation48_spill] sm:$0xff]  ;;  %v14314_v28 = vld [vmem:[#allocation111_spill] sm:$0xff] }
 0x5a2   :  { %v2849_v34 = vshll.u32 %v2848_v57, 16  ;;  %v2893_v32 = vcvt.f32.s32 %v14306_v23  ;;  %v3266_v0 = vpop.xlane.xlu0 %3265  ;;  %v4609_v3 = vadd.f32 %v4545_v8, %v4353_v16  ;;  %vm3745_vm13 = vcmp.eq.s32.totalorder %v6508_v31, %v3345_v53 }
 0x5a3   :  { %vm3738_vm14 = vcmp.eq.s32.totalorder %v6508_v31, %v3240_v30  ;;  %v2847_v46 = vcvt.f32.s32 %v2846_v25  ;;  %v3373_v41 = vcvt.f32.s32 %v14307_v48  ;;  %v4975_v17 = vsel %vm3745_vm13, 1.0, %v13845_v26 }
 0x5a4   :  { %v4968_v6 = vsel %vm3738_vm14, 1.0, %v13845_v26  ;;  %v3267_v56 = vcvt.f32.s32 %v3266_v0  ;;  %v3328_v49 = vcvt.f32.s32 %v14308_v20  ;;  %4801 = vst.msk [vmem:[%s12167_s5 + $0x38] sm:$0xff] %vm503_vm0, %v4609_v3  ;;  %v4577_v51 = vmul.f32 %v4975_v17, %v4193_v5  ;;  %v14316_v3 = vld [vmem:[#allocation126_spill] sm:$0xff]  ;;  %v14318_v20 = vld [vmem:[#allocation76_spill] sm:$0xff] }
 0x5a5   :  { %v4570_v11 = vmul.f32 %v4968_v6, %v14309_v36  ;;  %v2850_v21 = vadd.s32 %v2849_v34, %v2847_v46  ;;  %v3299_v61 = vshll.u32 %v3298_v12, 16  ;;  %v2894_v18 = vshll.u32 %v2893_v32, 16  ;;  %v2891_v14 = vpop.xlane.xlu1 %2890  ;;  %v14315_v34 = vld [vmem:[#allocation187_spill] sm:$0xff]  ;;  %v14317_v17 = vld [vmem:[#allocation50_spill] sm:$0xff] }
 0x5a6   :  { %v3270_v55 = vadd.s32 %v3269_v13, %v3267_v56  ;;  %v4355_v57 = vmul.f32 %v10888_v33, %v14310_v50  ;;  %v3296_v1 = vpop.xlane.xlu0 %3295  ;;  %v4641_v58 = vadd.f32 %v4577_v51, %v4385_v38  ;;  %v2892_v22 = vcvt.f32.s32 %v2891_v14  ;;  %v14312_v33 = vld [vmem:[#allocation121_spill] sm:$0xff] }
 0x5a7   :  { %v4634_v45 = vadd.f32 %v4570_v11, %v14311_v40  ;;  %vm3712_vm10 = vcmp.eq.s32.totalorder %v6508_v31, %v2850_v21  ;;  %v3374_v16 = vshll.u32 %v3373_v41, 16  ;;  %v3297_v5 = vcvt.f32.s32 %v3296_v1  ;;  %v11409_v4 = vpop.eup %5708  ;;  %v14320_v50 = vld [vmem:[#allocation41_spill] sm:$0xff] }
 0x5a8   :  { %v4942_v47 = vsel %vm3712_vm10, 1.0, %v13845_v26  ;;  %vm3740_vm15 = vcmp.eq.s32.totalorder %v6508_v31, %v3270_v55  ;;  %v3329_v8 = vshll.u32 %v3328_v49, 16  ;;  %4833 = vst.msk [vmem:[%s12167_s5 + $0x138] sm:$0xff] %vm503_vm0, %v4641_v58  ;;  %v2895_v30 = vadd.s32 %v2894_v18, %v2892_v22  ;;  %v14319_v49 = vld [vmem:[#allocation217_spill] sm:$0xff] }
 0x5a9   :  { %4826 = vst.msk [vmem:[%s12167_s5 + $0x100] sm:$0xff] %vm503_vm0, %v4634_v45  ;;  %v4544_v38 = vmul.f32 %v4942_v47, %v14312_v33  ;;  %v4970_v53 = vsel %vm3740_vm15, 1.0, %v13845_v26  ;;  %v2878_v13 = vcvt.f32.s32 %v14313_v39  ;;  %v3358_v12 = vcvt.f32.s32 %v14314_v28  ;;  %v3371_v25 = vpop.xlane.xlu1 %3370  ;;  %v14321_v1 = vld [vmem:[#allocation137_spill] sm:$0xff] }
 0x5aa   :  { %v4572_v23 = vmul.f32 %v4970_v53, %v14315_v34  ;;  %v3300_v32 = vadd.s32 %v3299_v61, %v3297_v5  ;;  %v3326_v0 = vpop.xlane.xlu0 %3325  ;;  %vm3715_vm1 = vcmp.eq.s32.totalorder %v6508_v31, %v2895_v30  ;;  %v3372_v48 = vcvt.f32.s32 %v3371_v25  ;;  %v14324_v30 = vld [vmem:[#allocation97_spill] sm:$0xff] }
 0x5ab   :  { %v4608_v46 = vadd.f32 %v4544_v38, %v14316_v3  ;;  %v3327_v41 = vcvt.f32.s32 %v3326_v0  ;;  %v4945_v56 = vsel %vm3715_vm1, 1.0, %v13845_v26  ;;  %v4195_v51 = vmul.f32 %v14319_v49, %v14318_v20  ;;  %v14323_v38 = vld [vmem:[#allocation112_spill] sm:$0xff]  ;;  %v14325_v28 = vld [vmem:[#allocation193_spill] sm:$0xff] }
 0x5ac   :  { %v4636_v6 = vadd.f32 %v4572_v23, %v14317_v17  ;;  %vm3742_vm8 = vcmp.eq.s32.totalorder %v6508_v31, %v3300_v32  ;;  %v4547_v36 = vmul.f32 %v4945_v56, %v4163_v59  ;;  %v3375_v21 = vadd.s32 %v3374_v16, %v3372_v48  ;;  %v14322_v16 = vld [vmem:[#allocation47_spill] sm:$0xff]  ;;  %v14327_v23 = vld [vmem:[#allocation116_spill] sm:$0xff]  ;;  %v14329_v20 = vld [vmem:[#allocation209_spill] sm:$0xff] }
 0x5ad   :  { %4800 = vst.msk [vmem:[%s12167_s5 + $0x30] sm:$0xff] %vm503_vm0, %v4608_v46  ;;  %v4972_v11 = vsel %vm3742_vm8, 1.0, %v13845_v26  ;;  %v3330_v61 = vadd.s32 %v3329_v8, %v3327_v41  ;;  %v2879_v18 = vshll.u32 %v2878_v13, 16  ;;  %v3359_v55 = vshll.u32 %v3358_v12, 16  ;;  %v2876_v40 = vpop.xlane.xlu1 %2875  ;;  %v14326_v12 = vld [vmem:[#allocation261_spill] sm:$0xff]  ;;  %v14328_v48 = vld [vmem:[#allocation52_spill] sm:$0xff] }
 0x5ae   :  { %v2923_v14 = vcvt.f32.s32 %v14320_v50  ;;  %4828 = vst.msk [vmem:[%s12167_s5 + $0x110] sm:$0xff] %vm503_vm0, %v4636_v6  ;;  %v4574_v58 = vmul.f32 %v4972_v11, %v14321_v1  ;;  %v3356_v45 = vpop.xlane.xlu0 %3355  ;;  %v4611_v22 = vadd.f32 %v4547_v36, %v4355_v57  ;;  %vm3747_vm9 = vcmp.eq.s32.totalorder %v6508_v31, %v3375_v21  ;;  %v14330_v36 = vld [vmem:[#allocation57_spill] sm:$0xff]  ;;  %v14334_v50 = vld [vmem:[#allocation42_spill] sm:$0xff] }
 0x5af   :  { %vm3744_vm11 = vcmp.eq.s32.totalorder %v6508_v31, %v3330_v61  ;;  %v2877_v59 = vcvt.f32.s32 %v2876_v40  ;;  %v4977_v5 = vsel %vm3747_vm9, 1.0, %v13845_v26  ;;  %v3357_v33 = vcvt.f32.s32 %v3356_v45  ;;  %v14331_v21 = vld [vmem:[#allocation29_spill] sm:$0xff]  ;;  %v14335_v40 = vld [vmem:[#allocation140_spill] sm:$0xff] }
 0x5b0   :  { %v4638_v47 = vadd.f32 %v4574_v58, %v14322_v16  ;;  %v4974_v8 = vsel %vm3744_vm11, 1.0, %v13845_v26  ;;  %4803 = vst.msk [vmem:[%s12167_s5 + $0x48] sm:$0xff] %vm503_vm0, %v4611_v22  ;;  %v4387_v57 = vmul.f32 %v14319_v49, %v14323_v38  ;;  %v4579_v53 = vmul.f32 %v4977_v5, %v4195_v51  ;;  %v14336_v16 = vld [vmem:[#allocation53_spill] sm:$0xff]  ;;  %v14338_v38 = vld [vmem:[#allocation40_spill] sm:$0xff] }
 0x5b1   :  { %v4576_v39 = vmul.f32 %v4974_v8, %v14324_v30  ;;  %v2880_v13 = vadd.s32 %v2879_v18, %v2877_v59  ;;  %v3828_v34 = vsub.f32 %v14326_v12, %v14325_v28  ;;  %v3403_v32 = vcvt.f32.s32 %v14327_v23  ;;  %v2921_v3 = vpop.xlane.xlu1 %2920  ;;  %v14337_v8 = vld [vmem:[#allocation220_spill] sm:$0xff]  ;;  %v14339_v28 = vld [vmem:[#allocation118_spill] sm:$0xff]  ;;  %v14341_v23 = vld [vmem:[#allocation223_spill] sm:$0xff] }
 0x5b2   :  { %v2924_v25 = vshll.u32 %v2923_v14, 16  ;;  %4830 = vst.msk [vmem:[%s12167_s5 + $0x120] sm:$0xff] %vm503_vm0, %v4638_v47  ;;  %v3360_v0 = vadd.s32 %v3359_v55, %v3357_v33  ;;  %v4643_v46 = vadd.f32 %v4579_v53, %v4387_v57  ;;  %v2922_v17 = vcvt.f32.s32 %v2921_v3  ;;  %v14333_v55 = vld [vmem:[#allocation63_spill] sm:$0xff] }
 0x5b3   :  { %v4640_v41 = vadd.f32 %v4576_v39, %v14328_v48  ;;  %vm3714_vm3 = vcmp.eq.s32.totalorder %v6508_v31, %v2880_v13  ;;  %5710 = vrcp.f32 %v11161_v9  ;;  %v4017_v6 = vadd.f32 1.0, %v11170_v10 }
 0x5b4   :  { %v4944_v56 = vsel %vm3714_vm3, 1.0, %v13845_v26  ;;  %vm3746_vm2 = vcmp.eq.s32.totalorder %v6508_v31, %v3360_v0  ;;  %5712 = vpow2.f32 %v11364_v42  ;;  %4835 = vst.msk [vmem:[%s12167_s5 + $0x148] sm:$0xff] %vm503_vm0, %v4643_v46  ;;  %v2925_v51 = vadd.s32 %v2924_v25, %v2922_v17  ;;  %v14332_v42 = vld [vmem:[#allocation210_spill] sm:$0xff] }
 0x5b5   :  { %4832 = vst.msk [vmem:[%s12167_s5 + $0x130] sm:$0xff] %vm503_vm0, %v4640_v41  ;;  %v4546_v9 = vmul.f32 %v4944_v56, %v14329_v20  ;;  %v4976_v49 = vsel %vm3746_vm2, 1.0, %v13845_v26  ;;  %v2908_v11 = vcvt.f32.s32 %v14330_v36  ;;  %v3388_v61 = vcvt.f32.s32 %v14331_v21  ;;  %v3401_v1 = vpop.xlane.xlu1 %3400  ;;  %v14342_v41 = vld [vmem:[#allocation219_spill] sm:$0xff]  ;;  %v14344_v56 = vld [vmem:[#allocation250_spill] sm:$0xff] }
 0x5b6   :  { %v4578_v18 = vmul.f32 %v4976_v49, %v14332_v42  ;;  %v4165_v14 = vmul.f32 %v14334_v50, %v14333_v55  ;;  %v3404_v58 = vshll.u32 %v3403_v32, 16  ;;  %vm3717_vm4 = vcmp.eq.s32.totalorder %v6508_v31, %v2925_v51  ;;  %v3386_v0 = vpop.xlane.xlu0 %3385  ;;  %v14345_v49 = vld [vmem:[#allocation11_spill] sm:$0xff] }
 0x5b7   :  { %v4610_v45 = vadd.f32 %v4546_v9, %v14335_v40  ;;  %v3402_v22 = vcvt.f32.s32 %v3401_v1  ;;  %5714 = vrcp.f32 %v4017_v6  ;;  %v3950_v59 = vmul.f32 1.442695, %v3828_v34  ;;  %v14340_v34 = vld [vmem:[#allocation90_spill] sm:$0xff] }
 0x5b8   :  { %v4642_v47 = vadd.f32 %v4578_v18, %v14336_v16  ;;  %v4947_v5 = vsel %vm3717_vm4, 1.0, %v13845_v26  ;;  %v4018_v33 = vadd.f32 1.0, %v14337_v8  ;;  %v4357_v57 = vmul.f32 %v14334_v50, %v14338_v38  ;;  %v14343_v6 = vld [vmem:[#allocation190_spill] sm:$0xff]  ;;  %v14348_v18 = vld [vmem:[#allocation131_spill] sm:$0xff]  ;;  %v14349_v16 = vld [vmem:[#allocation192_spill] sm:$0xff] }
 0x5b9   :  { %4802 = vst.msk [vmem:[%s12167_s5 + $0x40] sm:$0xff] %vm503_vm0, %v4610_v45  ;;  %v4549_v53 = vmul.f32 %v4947_v5, %v4165_v14  ;;  %v3405_v30 = vadd.s32 %v3404_v58, %v3402_v22  ;;  %v2909_v39 = vshll.u32 %v2908_v11, 16  ;;  %v3389_v13 = vshll.u32 %v3388_v61, 16  ;;  %v2906_v25 = vpop.xlane.xlu1 %2905  ;;  %v14346_v61 = vld [vmem:[#allocation183_spill] sm:$0xff] }
 0x5ba   :  { %v2953_v12 = vcvt.f32.s32 %v14339_v28  ;;  %4834 = vst.msk [vmem:[%s12167_s5 + $0x140] sm:$0xff] %vm503_vm0, %v4642_v47  ;;  %v4197_v32 = vmul.f32 %v14341_v23, %v14340_v34  ;;  %v2907_v46 = vcvt.f32.s32 %v2906_v25  ;;  %v3387_v48 = vcvt.f32.s32 %v3386_v0  ;;  %v14350_v47 = vld [vmem:[#allocation256_spill] sm:$0xff]  ;;  %v14353_v28 = vld [vmem:[#allocation135_spill] sm:$0xff]  ;;  %v14354_v34 = vld [vmem:[#allocation145_spill] sm:$0xff] }
 0x5bb   :  { %v4613_v3 = vadd.f32 %v4549_v53, %v4357_v57  ;;  %vm3749_vm5 = vcmp.eq.s32.totalorder %v6508_v31, %v3405_v30  ;;  %v3987_v17 = vadd.f32 1.0, %v14342_v41  ;;  %5716 = vpow2.f32 %v3950_v59  ;;  %v14352_v57 = vld [vmem:[#allocation123_spill] sm:$0xff]  ;;  %v14356_v25 = vld [vmem:[#allocation229_spill] sm:$0xff] }
 0x5bc   :  { %v3799_v20 = vsub.f32 %v14344_v56, %v14343_v6  ;;  %v4979_v9 = vsel %vm3749_vm5, 1.0, %v13845_v26  ;;  %v4389_v51 = vmul.f32 %v14341_v23, %v14345_v49  ;;  %v2910_v11 = vadd.s32 %v2909_v39, %v2907_v46  ;;  %v14357_v46 = vld [vmem:[#allocation70_spill] sm:$0xff]  ;;  %v14361_v49 = vld [vmem:[#allocation253_spill] sm:$0xff] }
 0x5bd   :  { %4805 = vst.msk [vmem:[%s12167_s5 + $0x58] sm:$0xff] %vm503_vm0, %v4613_v3  ;;  %v4581_v36 = vmul.f32 %v4979_v9, %v4197_v32  ;;  %v3390_v21 = vadd.s32 %v3389_v13, %v3387_v48  ;;  %vm14347_vm6 = vcmp.eq.s32.totalorder %v6508_v31, %v14346_v61  ;;  %5718 = vrcp.f32 %v4018_v33  ;;  %v2951_v14 = vpop.xlane.xlu1 %2950  ;;  %v14351_v33 = vld [vmem:[#allocation55_spill] sm:$0xff]  ;;  %v14355_v32 = vld [vmem:[#allocation168_spill] sm:$0xff]  ;;  %v14362_v61 = vld [vmem:[#allocation102_spill] sm:$0xff] }
 0x5be   :  { %v11516_v42 = vsel %vm14347_vm6, 1.0, %v13845_v26  ;;  %v3433_v55 = vcvt.f32.s32 %v14348_v18  ;;  %v2954_v50 = vshll.u32 %v2953_v12, 16  ;;  %vm3716_vm7 = vcmp.eq.s32.totalorder %v6508_v31, %v2910_v11 }
 0x5bf   :  { %v4645_v1 = vadd.f32 %v4581_v36, %v4389_v51  ;;  %vm3748_vm12 = vcmp.eq.s32.totalorder %v6508_v31, %v3390_v21  ;;  %v2952_v58 = vcvt.f32.s32 %v2951_v14  ;;  %5720 = vrcp.f32 %v3987_v17  ;;  %v14358_v17 = vld [vmem:[#allocation69_spill] sm:$0xff] }
 0x5c0   :  { %v3892_v40 = vmul.f32 1.442695, %v3799_v20  ;;  %v4946_v45 = vsel %vm3716_vm7, 1.0, %v13845_v26  ;;  %v4978_v22 = vsel %vm3748_vm12, 1.0, %v13845_v26  ;;  %v11523_v59 = vpop.eup %5710  ;;  %v3831_v5 = vsub.f32 %v14350_v47, %v14349_v16  ;;  %v14359_v20 = vld [vmem:[#allocation98_spill] sm:$0xff] }
 0x5c1   :  { %4837 = vst.msk [vmem:[%s12167_s5 + $0x158] sm:$0xff] %vm503_vm0, %v4645_v1  ;;  %v4548_v38 = vmul.f32 %v4946_v45, %v14351_v33  ;;  %v4580_v53 = vmul.f32 %v4978_v22, %v14352_v57  ;;  %v2955_v30 = vadd.s32 %v2954_v50, %v2952_v58  ;;  %v11533_v39 = vpop.eup %5712  ;;  %v3434_v13 = vshll.u32 %v3433_v55, 16  ;;  %v3431_v3 = vpop.xlane.xlu1 %3430  ;;  %v14363_v58 = vld [vmem:[#allocation64_spill] sm:$0xff]  ;;  %v14365_v22 = vld [vmem:[#allocation233_spill] sm:$0xff] }
 0x5c2   :  { %v2938_v12 = vcvt.f32.s32 %v14353_v28  ;;  %v3418_v23 = vcvt.f32.s32 %v14354_v34  ;;  %v4167_v0 = vmul.f32 %v14356_v25, %v14355_v32  ;;  %v3432_v56 = vcvt.f32.s32 %v3431_v3  ;;  %v14364_v45 = vld [vmem:[#allocation12_spill] sm:$0xff]  ;;  %v14367_v28 = vld [vmem:[#allocation265_spill] sm:$0xff] }
 0x5c3   :  { %v4612_v48 = vadd.f32 %v4548_v38, %v14357_v46  ;;  %v4644_v6 = vadd.f32 %v4580_v53, %v14358_v17  ;;  %vm3719_vm13 = vcmp.eq.s32.totalorder %v6508_v31, %v2955_v30  ;;  %vm14360_vm14 = vcmp.eq.s32.totalorder %v6508_v31, %v14359_v20  ;;  %v14366_v30 = vld [vmem:[#allocation196_spill] sm:$0xff]  ;;  %v14369_v46 = vld [vmem:[#allocation177_spill] sm:$0xff] }
 0x5c4   :  { %v11546_v9 = vsel %vm14360_vm14, 1.0, %v13845_v26  ;;  %v4019_v51 = vadd.f32 1.0, %v14361_v49  ;;  %5722 = vpow2.f32 %v3892_v40  ;;  %v4949_v36 = vsel %vm3719_vm13, 1.0, %v13845_v26  ;;  %v11550_v11 = vpop.eup %5714  ;;  %v14371_v17 = vld [vmem:[#allocation88_spill] sm:$0xff] }
 0x5c5   :  { %v3956_v21 = vmul.f32 1.442695, %v3831_v5  ;;  %4804 = vst.msk [vmem:[%s12167_s5 + $0x50] sm:$0xff] %vm503_vm0, %v4612_v48  ;;  %4836 = vst.msk [vmem:[%s12167_s5 + $0x150] sm:$0xff] %vm503_vm0, %v4644_v6  ;;  %v4359_v18 = vmul.f32 %v14356_v25, %v14362_v61  ;;  %v4551_v55 = vmul.f32 %v4949_v36, %v4167_v0  ;;  %v3435_v50 = vadd.s32 %v3434_v13, %v3432_v56  ;;  %v2936_v47 = vpop.xlane.xlu1 %2935  ;;  %v3416_v5 = vpop.xlane.xlu0 %3415 }
 0x5c6   :  { %v2939_v14 = vshll.u32 %v2938_v12, 16  ;;  %v3419_v1 = vshll.u32 %v3418_v23, 16  ;;  %v2983_v40 = vcvt.f32.s32 %v14363_v58  ;;  %v4199_v16 = vmul.f32 %v14365_v22, %v14364_v45  ;;  %v14368_v23 = vld [vmem:[#allocation212_spill] sm:$0xff] }
 0x5c7   :  { %v4615_v33 = vadd.f32 %v4551_v55, %v4359_v18  ;;  %vm3751_vm10 = vcmp.eq.s32.totalorder %v6508_v31, %v3435_v50  ;;  %v2937_v38 = vcvt.f32.s32 %v2936_v47  ;;  %v3417_v57 = vcvt.f32.s32 %v3416_v5  ;;  %v14372_v55 = vld [vmem:[#allocation199_spill] sm:$0xff]  ;;  %v14373_v50 = vld [vmem:[#allocation149_spill] sm:$0xff] }
 0x5c8   :  { %5724 = vrcp.f32 %v4019_v51  ;;  %v3989_v53 = vadd.f32 1.0, %v11236_v29  ;;  %v3798_v13 = vsub.f32 %v14367_v28, %v14366_v30  ;;  %v4981_v12 = vsel %vm3751_vm10, 1.0, %v13845_v26  ;;  %v11570_v34 = vpop.eup %5716  ;;  %v14378_v28 = vld [vmem:[#allocation16_spill] sm:$0xff] }
 0x5c9   :  { %4807 = vst.msk [vmem:[%s12167_s5 + $0x68] sm:$0xff] %vm503_vm0, %v4615_v33  ;;  %v4391_v32 = vmul.f32 %v14365_v22, %v14368_v23  ;;  %v4583_v25 = vmul.f32 %v4981_v12, %v4199_v16  ;;  %v2940_v0 = vadd.s32 %v2939_v14, %v2937_v38  ;;  %v3420_v3 = vadd.s32 %v3419_v1, %v3417_v57  ;;  %v2981_v20 = vpop.xlane.xlu1 %2980  ;;  %v14375_v22 = vld [vmem:[#allocation84_spill] sm:$0xff]  ;;  %v14376_v33 = vld [vmem:[#allocation206_spill] sm:$0xff] }
 0x5ca   :  { %vm14370_vm15 = vcmp.eq.s32.totalorder %v6508_v31, %v14369_v46  ;;  %5726 = vpow2.f32 %v3956_v21  ;;  %v3463_v6 = vcvt.f32.s32 %v14371_v17  ;;  %v2984_v56 = vshll.u32 %v2983_v40, 16  ;;  %v11585_v51 = vpop.eup %5718  ;;  %v14374_v40 = vld [vmem:[#allocation58_spill] sm:$0xff]  ;;  %v14377_v57 = vld [vmem:[#allocation208_spill] sm:$0xff] }
 0x5cb   :  { %v11582_v48 = vsel %vm14370_vm15, 1.0, %v13845_v26  ;;  %v4647_v36 = vadd.f32 %v4583_v25, %v4391_v32  ;;  %vm3718_vm1 = vcmp.eq.s32.totalorder %v6508_v31, %v2940_v0  ;;  %vm3750_vm8 = vcmp.eq.s32.totalorder %v6508_v31, %v3420_v3  ;;  %v14381_v25 = vld [vmem:[#allocation85_spill] sm:$0xff] }
 0x5cc   :  { %v2982_v61 = vcvt.f32.s32 %v2981_v20  ;;  %v3890_v18 = vmul.f32 1.442695, %v3798_v13  ;;  %v3830_v14 = vsub.f32 %v14373_v50, %v14372_v55  ;;  %v4948_v1 = vsel %vm3718_vm1, 1.0, %v13845_v26  ;;  %v11593_v58 = vpop.eup %5720  ;;  %v14379_v13 = vld [vmem:[#allocation8_spill] sm:$0xff]  ;;  %v14384_v55 = vld [vmem:[#allocation151_spill] sm:$0xff] }
 0x5cd   :  { %v4980_v21 = vsel %vm3750_vm8, 1.0, %v13845_v26  ;;  %5728 = vrcp.f32 %v3989_v53  ;;  %4839 = vst.msk [vmem:[%s12167_s5 + $0x168] sm:$0xff] %vm503_vm0, %v4647_v36  ;;  %v4550_v45 = vmul.f32 %v4948_v1, %v14374_v40  ;;  %v3464_v5 = vshll.u32 %v3463_v6, 16  ;;  %v3461_v23 = vpop.xlane.xlu1 %3460  ;;  %v14380_v53 = vld [vmem:[#allocation67_spill] sm:$0xff] }
 0x5ce   :  { %v4582_v16 = vmul.f32 %v4980_v21, %v14375_v22  ;;  %v2985_v47 = vadd.s32 %v2984_v56, %v2982_v61  ;;  %v2968_v38 = vcvt.f32.s32 %v14376_v33  ;;  %v3448_v30 = vcvt.f32.s32 %v14377_v57  ;;  %v14382_v56 = vld [vmem:[#allocation194_spill] sm:$0xff]  ;;  %v14383_v6 = vld [vmem:[#allocation267_spill] sm:$0xff] }
 0x5cf   :  { %v4169_v12 = vmul.f32 %v14379_v13, %v14378_v28  ;;  %v4614_v32 = vadd.f32 %v4550_v45, %v14380_v53  ;;  %v3462_v3 = vcvt.f32.s32 %v3461_v23  ;;  %v3988_v46 = vadd.f32 1.0, %v11409_v4  ;;  %v14385_v45 = vld [vmem:[#allocation214_spill] sm:$0xff]  ;;  %v3446_v57 = vpop.xlane.xlu0 %3445 }
 0x5d0   :  { %v4646_v0 = vadd.f32 %v4582_v16, %v14381_v25  ;;  %vm3721_vm9 = vcmp.eq.s32.totalorder %v6508_v31, %v2985_v47  ;;  %v3954_v17 = vmul.f32 1.442695, %v3830_v14  ;;  %v3801_v20 = vsub.f32 %v14383_v6, %v14382_v56  ;;  %v14387_v16 = vld [vmem:[#allocation205_spill] sm:$0xff] }
 0x5d1   :  { %v4951_v36 = vsel %vm3721_vm9, 1.0, %v13845_v26  ;;  %v11612_v61 = vpop.eup %5722  ;;  %5730 = vpow2.f32 %v3890_v18  ;;  %4806 = vst.msk [vmem:[%s12167_s5 + $0x60] sm:$0xff] %vm503_vm0, %v4614_v32  ;;  %v4361_v50 = vmul.f32 %v14379_v13, %v14384_v55  ;;  %v3465_v1 = vadd.s32 %v3464_v5, %v3462_v3  ;;  %v14386_v18 = vld [vmem:[#allocation110_spill] sm:$0xff]  ;;  %v2966_v33 = vpop.xlane.xlu1 %2965 }
 0x5d2   :  { %4838 = vst.msk [vmem:[%s12167_s5 + $0x160] sm:$0xff] %vm503_vm0, %v4646_v0  ;;  %v4553_v14 = vmul.f32 %v4951_v36, %v4169_v12  ;;  %v2969_v21 = vshll.u32 %v2968_v38, 16  ;;  %v3449_v40 = vshll.u32 %v3448_v30, 16  ;;  %v3013_v22 = vcvt.f32.s32 %v14385_v45  ;;  %v14388_v30 = vld [vmem:[#allocation117_spill] sm:$0xff]  ;;  %v14391_v45 = vld [vmem:[#allocation271_spill] sm:$0xff] }
 0x5d3   :  { %v4201_v47 = vmul.f32 %v14387_v16, %v14386_v18  ;;  %vm3753_vm11 = vcmp.eq.s32.totalorder %v6508_v31, %v3465_v1  ;;  %v2967_v23 = vcvt.f32.s32 %v2966_v33  ;;  %v3447_v53 = vcvt.f32.s32 %v3446_v57  ;;  %v14390_v1 = vld [vmem:[#allocation197_spill] sm:$0xff] }
 0x5d4   :  { %v4617_v28 = vadd.f32 %v4553_v14, %v4361_v50  ;;  %v4021_v32 = vadd.f32 1.0, %v11533_v39  ;;  %5732 = vpow2.f32 %v3954_v17  ;;  %v3896_v13 = vmul.f32 1.442695, %v3801_v20  ;;  %v14389_v17 = vld [vmem:[#allocation148_spill] sm:$0xff] }
 0x5d5   :  { %v4983_v5 = vsel %vm3753_vm11, 1.0, %v13845_v26  ;;  %v11630_v38 = vpop.eup %5724  ;;  %v4393_v12 = vmul.f32 %v14387_v16, %v14388_v30  ;;  %v2970_v0 = vadd.s32 %v2969_v21, %v2967_v23  ;;  %v3450_v3 = vadd.s32 %v3449_v40, %v3447_v53  ;;  %v3011_v36 = vpop.xlane.xlu1 %3010  ;;  %v14393_v16 = vld [vmem:[#allocation37_spill] sm:$0xff]  ;;  %v14394_v23 = vld [vmem:[#allocation79_spill] sm:$0xff] }
 0x5d6   :  { %4809 = vst.msk [vmem:[%s12167_s5 + $0x78] sm:$0xff] %vm503_vm0, %v4617_v28  ;;  %v4585_v25 = vmul.f32 %v4983_v5, %v4201_v47  ;;  %5734 = vrcp.f32 %v3988_v46  ;;  %v4020_v56 = vadd.f32 1.0, %v11570_v34  ;;  %v3493_v6 = vcvt.f32.s32 %v14389_v17  ;;  %v14396_v30 = vld [vmem:[#allocation153_spill] sm:$0xff]  ;;  %v14399_v17 = vld [vmem:[#allocation115_spill] sm:$0xff] }
 0x5d7   :  { %v3014_v20 = vshll.u32 %v3013_v22, 16  ;;  %v11640_v55 = vpop.eup %5726  ;;  %vm3720_vm3 = vcmp.eq.s32.totalorder %v6508_v31, %v2970_v0  ;;  %vm3752_vm2 = vcmp.eq.s32.totalorder %v6508_v31, %v3450_v3  ;;  %v3012_v14 = vcvt.f32.s32 %v3011_v36  ;;  %v14392_v22 = vld [vmem:[#allocation100_spill] sm:$0xff]  ;;  %v14398_v0 = vld [vmem:[#allocation185_spill] sm:$0xff] }
 0x5d8   :  { %v4649_v50 = vadd.f32 %v4585_v25, %v4393_v12  ;;  %5736 = vpow2.f32 %v3896_v13  ;;  %v3833_v21 = vsub.f32 %v14391_v45, %v14390_v1  ;;  %v4950_v46 = vsel %vm3720_vm3, 1.0, %v13845_v26  ;;  %v14395_v13 = vld [vmem:[#allocation95_spill] sm:$0xff]  ;;  %v14397_v12 = vld [vmem:[#allocation142_spill] sm:$0xff] }
 0x5d9   :  { %v4982_v40 = vsel %vm3752_vm2, 1.0, %v13845_v26  ;;  %5738 = vrcp.f32 %v4021_v32  ;;  %v4552_v18 = vmul.f32 %v4950_v46, %v14392_v22  ;;  %v3015_v33 = vadd.s32 %v3014_v20, %v3012_v14  ;;  %v3491_v25 = vpop.xlane.xlu1 %3490  ;;  %v14400_v20 = vld [vmem:[#allocation93_spill] sm:$0xff] }
 0x5da   :  { %4841 = vst.msk [vmem:[%s12167_s5 + $0x178] sm:$0xff] %vm503_vm0, %v4649_v50  ;;  %v4584_v47 = vmul.f32 %v4982_v40, %v14393_v16  ;;  %v11654_v57 = vpop.eup %5728  ;;  %v3494_v28 = vshll.u32 %v3493_v6, 16  ;;  %v2998_v53 = vcvt.f32.s32 %v14394_v23  ;;  %v3478_v5 = vcvt.f32.s32 %v14395_v13  ;;  %v14402_v46 = vld [vmem:[#allocation9_spill] sm:$0xff]  ;;  %v14404_v23 = vld [vmem:[#allocation24_spill] sm:$0xff] }
 0x5db   :  { %v4171_v32 = vmul.f32 %v14397_v12, %v14396_v30  ;;  %v4616_v3 = vadd.f32 %v4552_v18, %v14398_v0  ;;  %vm3723_vm4 = vcmp.eq.s32.totalorder %v6508_v31, %v3015_v33  ;;  %v3492_v50 = vcvt.f32.s32 %v3491_v25  ;;  %v14405_v13 = vld [vmem:[#allocation141_spill] sm:$0xff]  ;;  %v3476_v0 = vpop.xlane.xlu0 %3475 }
 0x5dc   :  { %v4648_v36 = vadd.f32 %v4584_v47, %v14399_v17  ;;  %vm14401_vm5 = vcmp.eq.s32.totalorder %v6508_v31, %v14400_v20  ;;  %5740 = vrcp.f32 %v4020_v56  ;;  %v3960_v14 = vmul.f32 1.442695, %v3833_v21  ;;  %v14403_v47 = vld [vmem:[#allocation105_spill] sm:$0xff] }
 0x5dd   :  { %v11667_v6 = vsel %vm14401_vm5, 1.0, %v13845_v26  ;;  %v4953_v1 = vsel %vm3723_vm4, 1.0, %v13845_v26  ;;  %v3991_v45 = vadd.f32 1.0, %v11612_v61  ;;  %4808 = vst.msk [vmem:[%s12167_s5 + $0x70] sm:$0xff] %vm503_vm0, %v4616_v3  ;;  %v4363_v40 = vmul.f32 %v14397_v12, %v14402_v46  ;;  %v2996_v25 = vpop.xlane.xlu1 %2995  ;;  %v14406_v12 = vld [vmem:[#allocation5_spill] sm:$0xff] }
 0x5de   :  { %4840 = vst.msk [vmem:[%s12167_s5 + $0x170] sm:$0xff] %vm503_vm0, %v4648_v36  ;;  %v4555_v22 = vmul.f32 %v4953_v1, %v4171_v32  ;;  %v3495_v56 = vadd.s32 %v3494_v28, %v3492_v50  ;;  %v11681_v21 = vpop.eup %5730  ;;  %v2999_v18 = vshll.u32 %v2998_v53, 16  ;;  %v3479_v16 = vshll.u32 %v3478_v5, 16  ;;  %v14409_v50 = vld [vmem:[#allocation22_spill] sm:$0xff] }
 0x5df   :  { %v3043_v33 = vcvt.f32.s32 %v14403_v47  ;;  %v4203_v30 = vmul.f32 %v14405_v13, %v14404_v23  ;;  %v2997_v17 = vcvt.f32.s32 %v2996_v25  ;;  %v3477_v36 = vcvt.f32.s32 %v3476_v0 }
 0x5e0   :  { %v4619_v3 = vadd.f32 %v4555_v22, %v4363_v40  ;;  %vm3755_vm6 = vcmp.eq.s32.totalorder %v6508_v31, %v3495_v56  ;;  %vm14407_vm7 = vcmp.eq.s32.totalorder %v6508_v31, %v14406_v12  ;;  %v4023_v53 = vadd.f32 1.0, %v11640_v55  ;;  %v14410_v22 = vld [vmem:[#allocation180_spill] sm:$0xff]  ;;  %v14412_v56 = vld [vmem:[#allocation107_spill] sm:$0xff] }
 0x5e1   :  { %v11691_v28 = vsel %vm14407_vm7, 1.0, %v13845_v26  ;;  %5742 = vpow2.f32 %v3960_v14  ;;  %v4985_v5 = vsel %vm3755_vm6, 1.0, %v13845_v26  ;;  %v11695_v32 = vpop.eup %5732  ;;  %v4395_v20 = vmul.f32 %v14405_v13, %v14409_v50  ;;  %v3041_v25 = vpop.xlane.xlu1 %3040  ;;  %v14415_v12 = vld [vmem:[#allocation227_spill] sm:$0xff] }
 0x5e2   :  { %14408 = vst [vmem:[#allocation154_spill] sm:$0xff] %v11695_v32  ;;  %4811 = vst.msk [vmem:[%s12167_s5 + $0x88] sm:$0xff] %vm503_vm0, %v4619_v3  ;;  %v4587_v1 = vmul.f32 %v4985_v5, %v4203_v30  ;;  %v3000_v46 = vadd.s32 %v2999_v18, %v2997_v17  ;;  %v3480_v40 = vadd.s32 %v3479_v16, %v3477_v36  ;;  %5744 = vrcp.f32 %v3991_v45  ;;  %v14414_v17 = vld [vmem:[#allocation94_spill] sm:$0xff] }
 0x5e3   :  { %vm14411_vm12 = vcmp.eq.s32.totalorder %v6508_v31, %v14410_v22  ;;  %v3523_v47 = vcvt.f32.s32 %v14412_v56  ;;  %v3044_v23 = vshll.u32 %v3043_v33, 16  ;;  %v11710_v0 = vpop.eup %5734  ;;  %v3042_v18 = vcvt.f32.s32 %v3041_v25  ;;  %v14418_v56 = vld [vmem:[#allocation158_spill] sm:$0xff]  ;;  %v14419_v25 = vld [vmem:[#allocation20_spill] sm:$0xff] }
 0x5e4   :  { %v11707_v14 = vsel %vm14411_vm12, 1.0, %v13845_v26  ;;  %v4651_v3 = vadd.f32 %v4587_v1, %v4395_v20  ;;  %vm3722_vm13 = vcmp.eq.s32.totalorder %v6508_v31, %v3000_v46  ;;  %vm3754_vm14 = vcmp.eq.s32.totalorder %v6508_v31, %v3480_v40  ;;  %v14416_v1 = vld [vmem:[#allocation213_spill] sm:$0xff]  ;;  %v14417_v40 = vld [vmem:[#allocation120_spill] sm:$0xff] }
 0x5e5   :  { %5746 = vrcp.f32 %v4023_v53  ;;  %v3990_v16 = vadd.f32 1.0, %v11681_v21  ;;  %v4952_v13 = vsel %vm3722_vm13, 1.0, %v13845_v26  ;;  %v4984_v30 = vsel %vm3754_vm14, 1.0, %v13845_v26  ;;  %v11717_v45 = vpop.eup %5736  ;;  %v3521_v27 = vpop.xlane.xlu1 %3520 }
 0x5e6   :  { %14413 = vst [vmem:[#allocation146_spill] sm:$0xff] %v11717_v45  ;;  %v4022_v33 = vadd.f32 1.0, %v11695_v32  ;;  %4843 = vst.msk [vmem:[%s12167_s5 + $0x188] sm:$0xff] %vm503_vm0, %v4651_v3  ;;  %v4554_v36 = vmul.f32 %v4952_v13, %v14414_v17  ;;  %v4586_v5 = vmul.f32 %v4984_v30, %v14415_v12  ;;  %v3045_v53 = vadd.s32 %v3044_v23, %v3042_v18  ;;  %v11726_v50 = vpop.eup %5738  ;;  %v14422_v23 = vld [vmem:[#allocation6_spill] sm:$0xff] }
 0x5e7   :  { %v3524_v20 = vshll.u32 %v3523_v47, 16  ;;  %v3028_v46 = vcvt.f32.s32 %v14416_v1  ;;  %v3508_v22 = vcvt.f32.s32 %v14417_v40  ;;  %v4173_v2 = vmul.f32 %v14419_v25, %v14418_v56  ;;  %v14427_v1 = vld [vmem:[#allocation251_spill] sm:$0xff] }
 0x5e8   :  { %v4618_v44 = vadd.f32 %v4554_v36, %v14420_v19  ;;  %v4650_v3 = vadd.f32 %v4586_v5, %v14421_v15  ;;  %vm3725_vm10 = vcmp.eq.s32.totalorder %v6508_v31, %v3045_v53  ;;  %v3522_v13 = vcvt.f32.s32 %v3521_v27  ;;  %v14424_v27 = vld [vmem:[#allocation14_spill] sm:$0xff]  ;;  %v14425_v5 = vld [vmem:[#allocation56_spill] sm:$0xff] }
 0x5e9   :  { %vm14423_vm15 = vcmp.eq.s32.totalorder %v6508_v31, %v14422_v23  ;;  %5748 = vrcp.f32 %v3990_v16  ;;  %v3993_v18 = vadd.f32 1.0, %v11717_v45  ;;  %v4955_v30 = vsel %vm3725_vm10, 1.0, %v13845_v26  ;;  %v11743_v17 = vpop.eup %5740  ;;  %v3026_v56 = vpop.xlane.xlu1 %3025 }
 0x5ea   :  { %v11739_v47 = vsel %vm14423_vm15, 1.0, %v13845_v26  ;;  %5750 = vrcp.f32 %v4022_v33  ;;  %4810 = vst.msk [vmem:[%s12167_s5 + $0x80] sm:$0xff] %vm503_vm0, %v4618_v44  ;;  %4842 = vst.msk [vmem:[%s12167_s5 + $0x180] sm:$0xff] %vm503_vm0, %v4650_v3  ;;  %v4365_v15 = vmul.f32 %v14419_v25, %v14424_v27  ;;  %v4557_v19 = vmul.f32 %v4955_v30, %v4173_v2  ;;  %v14426_v33 = vld [vmem:[#allocation139_spill] sm:$0xff]  ;;  %v3506_v23 = vpop.xlane.xlu0 %3505  ;;  %v14428_v3 = vld [vmem:[#allocation189_spill] sm:$0xff] }
 0x5eb   :  { %v3525_v16 = vadd.s32 %v3524_v20, %v3522_v13  ;;  %v3029_v36 = vshll.u32 %v3028_v46, 16  ;;  %v3509_v12 = vshll.u32 %v3508_v22, 16  ;;  %v3073_v53 = vcvt.f32.s32 %v14425_v5  ;;  %v14431_v20 = vld [vmem:[#allocation108_spill] sm:$0xff]  ;;  %v14434_v13 = vld [vmem:[#allocation159_spill] sm:$0xff] }
 0x5ec   :  { %v4205_v40 = vmul.f32 %v14427_v1, %v14426_v33  ;;  %v4621_v44 = vadd.f32 %v4557_v19, %v4365_v15  ;;  %v3027_v45 = vcvt.f32.s32 %v3026_v56  ;;  %v3507_v37 = vcvt.f32.s32 %v3506_v23  ;;  %v14436_v56 = vld [vmem:[#allocation150_spill] sm:$0xff] }
 0x5ed   :  { %vm3757_vm1 = vcmp.eq.s32.totalorder %v6508_v31, %v3525_v16  ;;  %vm14429_vm8 = vcmp.eq.s32.totalorder %v6508_v31, %v14428_v3  ;;  %vm14432_vm9 = vcmp.eq.s32.totalorder %v6508_v31, %v14431_v20  ;;  %5752 = vrcp.f32 %v3993_v18  ;;  %v14435_v16 = vld [vmem:[#allocation61_spill] sm:$0xff]  ;;  %v14437_v18 = vld [vmem:[#allocation46_spill] sm:$0xff]  ;;  %v14438_v3 = vld [vmem:[#allocation128_spill] sm:$0xff]  ;;  %v3071_v35 = vpop.xlane.xlu1 %3070 }
 0x5ee   :  { %v11763_v2 = vsel %vm14429_vm8, 1.0, %v13845_v26  ;;  %v11769_v46 = vsel %vm14432_vm9, 1.0, %v13845_v26  ;;  %v4987_v22 = vsel %vm3757_vm1, 1.0, %v13845_v26  ;;  %v11772_v25 = vpop.eup %5742  ;;  %4813 = vst.msk [vmem:[%s12167_s5 + $0x98] sm:$0xff] %vm503_vm0, %v4621_v44  ;;  %v4397_v30 = vmul.f32 %v14427_v1, %v14434_v13  ;;  %v14439_v20 = vld [vmem:[#allocation162_spill] sm:$0xff] }
 0x5ef   :  { %14430 = vst [vmem:[#allocation74_spill] sm:$0xff] %v11763_v2  ;;  %14433 = vst [vmem:[#allocation178_spill] sm:$0xff] %v11772_v25  ;;  %v4589_v27 = vmul.f32 %v4987_v22, %v4205_v40  ;;  %v3030_v15 = vadd.s32 %v3029_v36, %v3027_v45  ;;  %v3510_v19 = vadd.s32 %v3509_v12, %v3507_v37  ;;  %v3553_v5 = vcvt.f32.s32 %v14435_v16  ;;  %v11785_v54 = vpop.eup %5744  ;;  %v14440_v45 = vld [vmem:[#allocation195_spill] sm:$0xff]  ;;  %v14441_v22 = vld [vmem:[#allocation60_spill] sm:$0xff] }
 0x5f0   :  { %v3074_v33 = vshll.u32 %v3073_v53, 16  ;;  %v4172_v23 = vmul.f32 %v14437_v18, %v14436_v56  ;;  %v4204_v43 = vmul.f32 %v14439_v20, %v14438_v3  ;;  %v3072_v1 = vcvt.f32.s32 %v3071_v35  ;;  %v14443_v16 = vld [vmem:[#allocation147_spill] sm:$0xff]  ;;  %v14445_v3 = vld [vmem:[#allocation246_spill] sm:$0xff] }
 0x5f1   :  { %v4653_v7 = vadd.f32 %v4589_v27, %v4397_v30  ;;  %vm3724_vm11 = vcmp.eq.s32.totalorder %v6508_v31, %v3030_v15  ;;  %vm3756_vm3 = vcmp.eq.s32.totalorder %v6508_v31, %v3510_v19  ;;  %v4025_v37 = vadd.f32 1.0, %v11772_v25  ;;  %v14442_v15 = vld [vmem:[#allocation62_spill] sm:$0xff]  ;;  %v3551_v25 = vpop.xlane.xlu1 %3550 }
 0x5f2   :  { %v4364_v36 = vmul.f32 %v14437_v18, %v14440_v45  ;;  %v4954_v12 = vsel %vm3724_vm11, 1.0, %v13845_v26  ;;  %v4986_v53 = vsel %vm3756_vm3, 1.0, %v13845_v26  ;;  %v11794_v40 = vpop.eup %5746  ;;  %v4396_v35 = vmul.f32 %v14439_v20, %v14441_v22  ;;  %v14444_v18 = vld [vmem:[#allocation236_spill] sm:$0xff] }
 0x5f3   :  { %4845 = vst.msk [vmem:[%s12167_s5 + $0x198] sm:$0xff] %vm503_vm0, %v4653_v7  ;;  %v4556_v44 = vmul.f32 %v4954_v12, %v4172_v23  ;;  %v4588_v13 = vmul.f32 %v4986_v53, %v4204_v43  ;;  %v3075_v30 = vadd.s32 %v3074_v33, %v3072_v1  ;;  %v3554_v27 = vshll.u32 %v3553_v5, 16  ;;  %v14446_v23 = vld [vmem:[#allocation191_spill] sm:$0xff]  ;;  %v14449_v5 = vld [vmem:[#allocation10_spill] sm:$0xff] }
 0x5f4   :  { %v3058_v19 = vcvt.f32.s32 %v14442_v15  ;;  %v3538_v56 = vcvt.f32.s32 %v14443_v16  ;;  %v4175_v45 = vmul.f32 %v14445_v3, %v14444_v18  ;;  %v3552_v7 = vcvt.f32.s32 %v3551_v25  ;;  %v14452_v25 = vld [vmem:[#allocation218_spill] sm:$0xff]  ;;  %v14453_v53 = vld [vmem:[#allocation239_spill] sm:$0xff] }
 0x5f5   :  { %v4620_v32 = vadd.f32 %v4556_v44, %v4364_v36  ;;  %v4652_v2 = vadd.f32 %v4588_v13, %v4396_v35  ;;  %vm3727_vm2 = vcmp.eq.s32.totalorder %v6508_v31, %v3075_v30  ;;  %vm14447_vm4 = vcmp.eq.s32.totalorder %v6508_v31, %v14446_v23  ;;  %v14455_v30 = vld [vmem:[#allocation28_spill] sm:$0xff]  ;;  %v3056_v18 = vpop.xlane.xlu1 %3055  ;;  %v3536_v23 = vpop.xlane.xlu0 %3535 }
 0x5f6   :  { %v11811_v43 = vsel %vm14447_vm4, 1.0, %v13845_v26  ;;  %vm14450_vm5 = vcmp.eq.s32.totalorder %v6508_v31, %v14449_v5  ;;  %5754 = vrcp.f32 %v4025_v37  ;;  %v4957_v20 = vsel %vm3727_vm2, 1.0, %v13845_v26  ;;  %v11820_v1 = vpop.eup %5748 }
 0x5f7   :  { %14448 = vst [vmem:[#allocation241_spill] sm:$0xff] %v11811_v43  ;;  %v11817_v33 = vsel %vm14450_vm5, 1.0, %v13845_v26  ;;  %4812 = vst.msk [vmem:[%s12167_s5 + $0x90] sm:$0xff] %vm503_vm0, %v4620_v32  ;;  %v4367_v36 = vmul.f32 %v14445_v3, %v14452_v25  ;;  %v4559_v12 = vmul.f32 %v4957_v20, %v4175_v45  ;;  %v4207_v37 = vmul.f32 %v11220_v62, %v14453_v53  ;;  %v11834_v22 = vpop.eup %5750  ;;  %v14456_v32 = vld [vmem:[#allocation125_spill] sm:$0xff]  ;;  %v14457_v20 = vld [vmem:[#allocation54_spill] sm:$0xff] }
 0x5f8   :  { %14451 = vst [vmem:[#allocation138_spill] sm:$0xff] %v11817_v33  ;;  %4844 = vst.msk [vmem:[%s12167_s5 + $0x190] sm:$0xff] %vm503_vm0, %v4652_v2  ;;  %v3555_v44 = vadd.s32 %v3554_v27, %v3552_v7  ;;  %v3059_v35 = vshll.u32 %v3058_v19, 16  ;;  %v3539_v13 = vshll.u32 %v3538_v56, 16  ;;  %v3103_v15 = vcvt.f32.s32 %v14455_v30  ;;  %v14458_v27 = vld [vmem:[#allocation15_spill] sm:$0xff]  ;;  %v14459_v25 = vld [vmem:[#allocation66_spill] sm:$0xff] }
 0x5f9   :  { %14454 = vst [vmem:[#allocation221_spill] sm:$0xff] %v11834_v22  ;;  %v4399_v16 = vmul.f32 %v11220_v62, %v14456_v32  ;;  %v4623_v2 = vadd.f32 %v4559_v12, %v4367_v36  ;;  %v3057_v3 = vcvt.f32.s32 %v3056_v18  ;;  %v3537_v45 = vcvt.f32.s32 %v3536_v23  ;;  %v14460_v56 = vld [vmem:[#allocation38_spill] sm:$0xff]  ;;  %v14461_v53 = vld [vmem:[#allocation23_spill] sm:$0xff]  ;;  %v14464_v18 = vld [vmem:[#allocation45_spill] sm:$0xff] }
 0x5fa   :  { %vm3759_vm6 = vcmp.eq.s32.totalorder %v6508_v31, %v3555_v44  ;;  %v4174_v7 = vmul.f32 %v14458_v27, %v14457_v20  ;;  %v4366_v19 = vmul.f32 %v14458_v27, %v14459_v25  ;;  %v4206_v30 = vmul.f32 %v14461_v53, %v14460_v56  ;;  %v11847_v33 = vpop.eup %5752  ;;  %v14463_v12 = vld [vmem:[#allocation134_spill] sm:$0xff]  ;;  %v14465_v27 = vld [vmem:[#allocation244_spill] sm:$0xff]  ;;  %v14466_v56 = vld [vmem:[#allocation167_spill] sm:$0xff]  ;;  %v3101_v43 = vpop.xlane.xlu1 %3100 }
 0x5fb   :  { %v4989_v5 = vsel %vm3759_vm6, 1.0, %v13845_v26  ;;  %14462 = vst [vmem:[#allocation82_spill] sm:$0xff] %v11847_v33  ;;  %4815 = vst.msk [vmem:[%s12167_s5 + $0xa8] sm:$0xff] %vm503_vm0, %v4623_v2  ;;  %v3060_v36 = vadd.s32 %v3059_v35, %v3057_v3  ;;  %v4398_v44 = vmul.f32 %v14461_v53, %v14463_v12  ;;  %v3540_v32 = vadd.s32 %v3539_v13, %v3537_v45  ;;  %v14467_v2 = vld [vmem:[#allocation68_spill] sm:$0xff] }
 0x5fc   :  { %v4591_v62 = vmul.f32 %v4989_v5, %v4207_v37  ;;  %v3583_v23 = vcvt.f32.s32 %v14464_v18  ;;  %v3104_v20 = vshll.u32 %v3103_v15, 16  ;;  %v4177_v25 = vmul.f32 %v11245_v60, %v14465_v27  ;;  %v14468_v5 = vld [vmem:[#allocation59_spill] sm:$0xff] }
 0x5fd   :  { %v4369_v33 = vmul.f32 %v11245_v60, %v14466_v56  ;;  %vm3726_vm7 = vcmp.eq.s32.totalorder %v6508_v31, %v3060_v36  ;;  %vm3758_vm12 = vcmp.eq.s32.totalorder %v6508_v31, %v3540_v32  ;;  %v3102_v37 = vcvt.f32.s32 %v3101_v43  ;;  %v14469_v43 = vld [vmem:[#allocation215_spill] sm:$0xff]  ;;  %v14470_v36 = vld [vmem:[#allocation237_spill] sm:$0xff] }
 0x5fe   :  { %v4655_v22 = vadd.f32 %v4591_v62, %v4399_v16  ;;  %v4956_v35 = vsel %vm3726_vm7, 1.0, %v13845_v26  ;;  %v4988_v13 = vsel %vm3758_vm12, 1.0, %v13845_v26  ;;  %v4209_v15 = vmul.f32 %v11550_v11, %v11170_v10  ;;  %v14471_v32 = vld [vmem:[#allocation161_spill] sm:$0xff]  ;;  %v3581_v10 = vpop.xlane.xlu1 %3580  ;;  %v14472_v27 = vld [vmem:[#allocation19_spill] sm:$0xff] }
 0x5ff   :  { %v4401_v3 = vmul.f32 %v11550_v11, %v14467_v2  ;;  %v4558_v60 = vmul.f32 %v4956_v35, %v4174_v7  ;;  %v4590_v16 = vmul.f32 %v4988_v13, %v4206_v30  ;;  %v3105_v45 = vadd.s32 %v3104_v20, %v3102_v37  ;;  %v14473_v30 = vld [vmem:[#allocation232_spill] sm:$0xff]  ;;  %v14474_v20 = vld [vmem:[#allocation166_spill] sm:$0xff]  ;;  %v14475_v35 = vld [vmem:[#allocation81_spill] sm:$0xff] }
 0x600   :  { %4847 = vst.msk [vmem:[%s12167_s5 + $0x1a8] sm:$0xff] %vm503_vm0, %v4655_v22  ;;  %v4176_v53 = vmul.f32 %v14469_v43, %v14468_v5  ;;  %v3584_v62 = vshll.u32 %v3583_v23, 16  ;;  %v3088_v12 = vcvt.f32.s32 %v14470_v36  ;;  %v3568_v18 = vcvt.f32.s32 %v14471_v32  ;;  %v14477_v36 = vld [vmem:[#allocation200_spill] sm:$0xff] }
 0x601   :  { %v4368_v11 = vmul.f32 %v14469_v43, %v14472_v27  ;;  %v4622_v56 = vadd.f32 %v4558_v60, %v4366_v19  ;;  %v4654_v2 = vadd.f32 %v4590_v16, %v4398_v44  ;;  %vm3729_vm13 = vcmp.eq.s32.totalorder %v6508_v31, %v3105_v45  ;;  %v14476_v60 = vld [vmem:[#allocation171_spill] sm:$0xff] }
 0x602   :  { %v3582_v22 = vcvt.f32.s32 %v3581_v10  ;;  %v4959_v7 = vsel %vm3729_vm13, 1.0, %v13845_v26  ;;  %v4208_v37 = vmul.f32 %v14474_v20, %v14473_v30  ;;  %v4400_v23 = vmul.f32 %v14474_v20, %v14475_v35  ;;  %v3086_v10 = vpop.xlane.xlu1 %3085  ;;  %v3566_v27 = vpop.xlane.xlu0 %3565  ;;  %v14480_v35 = vld [vmem:[#allocation49_spill] sm:$0xff] }
 0x603   :  { %v4179_v13 = vmul.f32 %v11593_v58, %v14342_v41  ;;  %v11886_v5 = vpop.eup %5754  ;;  %4814 = vst.msk [vmem:[%s12167_s5 + $0xa0] sm:$0xff] %vm503_vm0, %v4622_v56  ;;  %4846 = vst.msk [vmem:[%s12167_s5 + $0x1a0] sm:$0xff] %vm503_vm0, %v4654_v2  ;;  %v4561_v19 = vmul.f32 %v4959_v7, %v4177_v25  ;;  %v11898_v16 = vmul.f32 %v11593_v58, %v14476_v60  ;;  %v3089_v45 = vshll.u32 %v3088_v12, 16  ;;  %v14478_v56 = vld [vmem:[#allocation157_spill] sm:$0xff] }
 0x604   :  { %v3585_v44 = vadd.s32 %v3584_v62, %v3582_v22  ;;  %v11902_v41 = vmul.f32 %v11630_v38, %v14361_v49  ;;  %v3569_v43 = vshll.u32 %v3568_v18, 16  ;;  %v3133_v32 = vcvt.f32.s32 %v14477_v36  ;;  %v14479_v22 = vld [vmem:[#allocation216_spill] sm:$0xff] }
 0x605   :  { %v11907_v30 = vmul.f32 %v11630_v38, %v14478_v56  ;;  %v4625_v25 = vadd.f32 %v4561_v19, %v4369_v33  ;;  %v3087_v62 = vcvt.f32.s32 %v3086_v10  ;;  %v3567_v58 = vcvt.f32.s32 %v3566_v27 }
 0x606   :  { %vm3761_vm14 = vcmp.eq.s32.totalorder %v6508_v31, %v3585_v44  ;;  %v11913_v49 = vmul.f32 %v11523_v59, %v14479_v22  ;;  %v11917_v12 = vmul.f32 %v11523_v59, %v11516_v42  ;;  %v11921_v18 = vmul.f32 %v11585_v51, %v14337_v8  ;;  %v3131_v59 = vpop.xlane.xlu1 %3130 }
 0x607   :  { %v4991_v2 = vsel %vm3761_vm14, 1.0, %v13845_v26  ;;  %4817 = vst.msk [vmem:[%s12167_s5 + $0xb8] sm:$0xff] %vm503_vm0, %v4625_v25  ;;  %v3090_v33 = vadd.s32 %v3089_v45, %v3087_v62  ;;  %v3570_v7 = vadd.s32 %v3569_v43, %v3567_v58  ;;  %v11929_v20 = vmul.f32 %v11585_v51, %v11546_v9 }
 0x608   :  { %v4593_v38 = vmul.f32 %v4991_v2, %v4209_v15  ;;  %v3613_v19 = vcvt.f32.s32 %v14480_v35  ;;  %v3134_v42 = vshll.u32 %v3133_v32, 16  ;;  %v11934_v8 = vmul.f32 %v11654_v57, %v11236_v29  ;;  %v14481_v32 = vld [vmem:[#allocation75_spill] sm:$0xff] }
 0x609   :  { %v11938_v44 = vmul.f32 %v11654_v57, %v11582_v48  ;;  %vm3728_vm10 = vcmp.eq.s32.totalorder %v6508_v31, %v3090_v33  ;;  %vm3760_vm15 = vcmp.eq.s32.totalorder %v6508_v31, %v3570_v7  ;;  %v3132_v15 = vcvt.f32.s32 %v3131_v59  ;;  %v14483_v7 = vld [vmem:[#allocation154_spill] sm:$0xff] }
 0x60a   :  { %v4657_v60 = vadd.f32 %v4593_v38, %v4401_v3  ;;  %v4958_v9 = vsel %vm3728_vm10, 1.0, %v13845_v26  ;;  %v4990_v51 = vsel %vm3760_vm15, 1.0, %v13845_v26  ;;  %v11946_v45 = vmul.f32 %v11710_v0, %v11409_v4  ;;  %v3611_v27 = vpop.xlane.xlu1 %3610 }
 0x60b   :  { %v11950_v29 = vmul.f32 %v11710_v0, %v11691_v28  ;;  %v4560_v48 = vmul.f32 %v4958_v9, %v4176_v53  ;;  %v4592_v57 = vmul.f32 %v4990_v51, %v4208_v37  ;;  %v3135_v3 = vadd.s32 %v3134_v42, %v3132_v15  ;;  %v14487_v51 = vld [vmem:[#allocation132_spill] sm:$0xff] }
 0x60c   :  { %4849 = vst.msk [vmem:[%s12167_s5 + $0x1b8] sm:$0xff] %vm503_vm0, %v4657_v60  ;;  %v11958_v43 = vmul.f32 %v11726_v50, %v11533_v39  ;;  %v3614_v36 = vshll.u32 %v3613_v19, 16  ;;  %v3118_v4 = vcvt.f32.s32 %v11195_v52  ;;  %v3598_v10 = vcvt.f32.s32 %v14481_v32  ;;  %v14486_v60 = vld [vmem:[#allocation241_spill] sm:$0xff] }
 0x60d   :  { %v11964_v28 = vmul.f32 %v11726_v50, %v11667_v6  ;;  %v4624_v0 = vadd.f32 %v4560_v48, %v4368_v11  ;;  %v4656_v56 = vadd.f32 %v4592_v57, %v4400_v23  ;;  %vm3731_vm1 = vcmp.eq.s32.totalorder %v6508_v31, %v3135_v3  ;;  %v3596_v58 = vpop.xlane.xlu0 %3595 }
 0x60e   :  { %v3612_v53 = vcvt.f32.s32 %v3611_v27  ;;  %v4961_v37 = vsel %vm3731_vm1, 1.0, %v13845_v26  ;;  %v11970_v39 = vmul.f32 %v11743_v17, %v11570_v34  ;;  %v11974_v52 = vmul.f32 %v11743_v17, %v11707_v14  ;;  %v3116_v62 = vpop.xlane.xlu1 %3115 }
 0x60f   :  { %v11978_v25 = vmul.f32 %v11785_v54, %v11612_v61  ;;  %4816 = vst.msk [vmem:[%s12167_s5 + $0xb0] sm:$0xff] %vm503_vm0, %v4624_v0  ;;  %4848 = vst.msk [vmem:[%s12167_s5 + $0x1b0] sm:$0xff] %vm503_vm0, %v4656_v56  ;;  %v4563_v34 = vmul.f32 %v4961_v37, %v4179_v13  ;;  %v11990_v14 = vmul.f32 %v11785_v54, %v11739_v47  ;;  %v3163_v50 = vcvt.f32.s32 %v10861_v24  ;;  %v14482_v47 = vld [vmem:[#allocation74_spill] sm:$0xff]  ;;  %v14489_v56 = vld [vmem:[#allocation144_spill] sm:$0xff] }
 0x610   :  { %v3615_v6 = vadd.s32 %v3614_v36, %v3612_v53  ;;  %v11994_v61 = vmul.f32 %v11820_v1, %v11681_v21  ;;  %v3119_v17 = vshll.u32 %v3118_v4, 16  ;;  %v3599_v11 = vshll.u32 %v3598_v10, 16  ;;  %v14488_v4 = vld [vmem:[#allocation130_spill] sm:$0xff] }
 0x611   :  { %v3148_v23 = vcvt.f32.s32 %v11248_v63  ;;  %v4627_v2 = vadd.f32 %v4563_v34, %v11898_v16  ;;  %v3117_v13 = vcvt.f32.s32 %v3116_v62  ;;  %v3597_v22 = vcvt.f32.s32 %v3596_v58  ;;  %v14490_v37 = vld [vmem:[#allocation170_spill] sm:$0xff] }
 0x612   :  { %vm3763_vm8 = vcmp.eq.s32.totalorder %v6508_v31, %v3615_v6  ;;  %v12003_v21 = vmul.f32 %v11820_v1, %v11769_v46  ;;  %v12007_v24 = vmul.f32 %v11794_v40, %v11640_v55  ;;  %v12011_v63 = vmul.f32 %v11794_v40, %v14482_v47  ;;  %v14484_v46 = vld [vmem:[#allocation221_spill] sm:$0xff]  ;;  %v3161_v59 = vpop.xlane.xlu1 %3160  ;;  %v3146_v40 = vpop.xlane.xlu0 %3145 }
 0x613   :  { %v4993_v54 = vsel %vm3763_vm8, 1.0, %v13845_v26  ;;  %4819 = vst.msk [vmem:[%s12167_s5 + $0xc8] sm:$0xff] %vm503_vm0, %v4627_v2  ;;  %v3120_v38 = vadd.s32 %v3119_v17, %v3117_v13  ;;  %v3600_v33 = vadd.s32 %v3599_v11, %v3597_v22  ;;  %v12020_v1 = vmul.f32 %v14484_v46, %v14483_v7  ;;  %v14485_v55 = vld [vmem:[#allocation225_spill] sm:$0xff] }
 0x614   :  { %v4595_v16 = vmul.f32 %v4993_v54, %v11902_v41  ;;  %v3164_v35 = vshll.u32 %v3163_v50, 16  ;;  %v3643_v19 = vcvt.f32.s32 %v14485_v55  ;;  %v3149_v42 = vshll.u32 %v3148_v23, 16  ;;  %v14491_v54 = vld [vmem:[#allocation222_spill] sm:$0xff] }
 0x615   :  { %v12025_v15 = vmul.f32 %v14484_v46, %v14486_v60  ;;  %vm3730_vm9 = vcmp.eq.s32.totalorder %v6508_v31, %v3120_v38  ;;  %vm3762_vm11 = vcmp.eq.s32.totalorder %v6508_v31, %v3600_v33  ;;  %v3162_v41 = vcvt.f32.s32 %v3161_v59  ;;  %v14492_v60 = vld [vmem:[#allocation152_spill] sm:$0xff] }
 0x616   :  { %v4659_v9 = vadd.f32 %v4595_v16, %v11907_v30  ;;  %v3628_v48 = vcvt.f32.s32 %v14487_v51  ;;  %v4960_v57 = vsel %vm3730_vm9, 1.0, %v13845_v26  ;;  %v4992_v3 = vsel %vm3762_vm11, 1.0, %v13845_v26  ;;  %v3641_v50 = vpop.xlane.xlu1 %3640  ;;  %v3626_v17 = vpop.xlane.xlu0 %3625  ;;  %v14493_v51 = vld [vmem:[#allocation257_spill] sm:$0xff] }
 0x617   :  { %v3147_v36 = vcvt.f32.s32 %v3146_v40  ;;  %v3193_v32 = vcvt.f32.s32 %v14488_v4  ;;  %v4562_v30 = vmul.f32 %v4960_v57, %v11913_v49  ;;  %v4594_v10 = vmul.f32 %v4992_v3, %v11921_v18 }
 0x618   :  { %4851 = vst.msk [vmem:[%s12167_s5 + $0x1c8] sm:$0xff] %vm503_vm0, %v4659_v9  ;;  %v3165_v27 = vadd.s32 %v3164_v35, %v3162_v41  ;;  %v3644_v0 = vshll.u32 %v3643_v19, 16  ;;  %v3673_v53 = vcvt.f32.s32 %v14489_v56  ;;  %v3178_v34 = vcvt.f32.s32 %v14490_v37  ;;  %v14495_v56 = vld [vmem:[#allocation82_spill] sm:$0xff] }
 0x619   :  { %v3150_v6 = vadd.s32 %v3149_v42, %v3147_v36  ;;  %v4626_v11 = vadd.f32 %v4562_v30, %v11917_v12  ;;  %v4658_v23 = vadd.f32 %v4594_v10, %v11929_v20  ;;  %v3642_v62 = vcvt.f32.s32 %v3641_v50 }
 0x61a   :  { %vm3733_vm3 = vcmp.eq.s32.totalorder %v6508_v31, %v3165_v27  ;;  %v3629_v58 = vshll.u32 %v3628_v48, 16  ;;  %v3627_v18 = vcvt.f32.s32 %v3626_v17  ;;  %v3194_v2 = vshll.u32 %v3193_v32, 16  ;;  %v3191_v33 = vpop.xlane.xlu1 %3190  ;;  %v3176_v7 = vpop.xlane.xlu0 %3175 }
 0x61b   :  { %v4963_v49 = vsel %vm3733_vm3, 1.0, %v13845_v26  ;;  %vm3732_vm2 = vcmp.eq.s32.totalorder %v6508_v31, %v3150_v6  ;;  %4818 = vst.msk [vmem:[%s12167_s5 + $0xc0] sm:$0xff] %vm503_vm0, %v4626_v11  ;;  %4850 = vst.msk [vmem:[%s12167_s5 + $0x1c0] sm:$0xff] %vm503_vm0, %v4658_v23  ;;  %v3645_v13 = vadd.s32 %v3644_v0, %v3642_v62  ;;  %v3179_v22 = vshll.u32 %v3178_v34, 16  ;;  %v14494_v0 = vld [vmem:[#allocation146_spill] sm:$0xff]  ;;  %v14497_v6 = vld [vmem:[#allocation259_spill] sm:$0xff] }
 0x61c   :  { %v4565_v12 = vmul.f32 %v4963_v49, %v11934_v8  ;;  %v4962_v20 = vsel %vm3732_vm2, 1.0, %v13845_v26  ;;  %v3658_v47 = vcvt.f32.s32 %v14491_v54  ;;  %v3630_v38 = vadd.s32 %v3629_v58, %v3627_v18 }
 0x61d   :  { %v4564_v16 = vmul.f32 %v4962_v20, %v11946_v45  ;;  %vm3765_vm4 = vcmp.eq.s32.totalorder %v6508_v31, %v3645_v13  ;;  %v3192_v35 = vcvt.f32.s32 %v3191_v33  ;;  %v3177_v55 = vcvt.f32.s32 %v3176_v7 }
 0x61e   :  { %v4629_v46 = vadd.f32 %v4565_v12, %v11938_v44  ;;  %v3674_v19 = vshll.u32 %v3673_v53, 16  ;;  %v4995_v42 = vsel %vm3765_vm4, 1.0, %v13845_v26  ;;  %vm3764_vm5 = vcmp.eq.s32.totalorder %v6508_v31, %v3630_v38  ;;  %v3671_v57 = vpop.xlane.xlu1 %3670  ;;  %v3656_v3 = vpop.xlane.xlu0 %3655 }
 0x61f   :  { %v4628_v8 = vadd.f32 %v4564_v16, %v11950_v29  ;;  %v4597_v45 = vmul.f32 %v4995_v42, %v11958_v43  ;;  %v4994_v44 = vsel %vm3764_vm5, 1.0, %v13845_v26  ;;  %v3195_v59 = vadd.s32 %v3194_v2, %v3192_v35  ;;  %v14498_v2 = vld [vmem:[#allocation138_spill] sm:$0xff] }
 0x620   :  { %4821 = vst.msk [vmem:[%s12167_s5 + $0xd8] sm:$0xff] %vm503_vm0, %v4629_v46  ;;  %v3180_v40 = vadd.s32 %v3179_v22, %v3177_v55  ;;  %v3223_v9 = vcvt.f32.s32 %v14492_v60  ;;  %v3659_v41 = vshll.u32 %v3658_v47, 16  ;;  %v3208_v29 = vcvt.f32.s32 %v14493_v51  ;;  %v14499_v55 = vld [vmem:[#allocation91_spill] sm:$0xff]  ;;  %v14502_v60 = vld [vmem:[#allocation156_spill] sm:$0xff]  ;;  %v14504_v51 = vld [vmem:[#allocation198_spill] sm:$0xff] }
 0x621   :  { %4820 = vst.msk [vmem:[%s12167_s5 + $0xd0] sm:$0xff] %vm503_vm0, %v4628_v8  ;;  %v4596_v48 = vmul.f32 %v4994_v44, %v11970_v39  ;;  %v4661_v43 = vadd.f32 %v4597_v45, %v11964_v28  ;;  %vm3735_vm6 = vcmp.eq.s32.totalorder %v6508_v31, %v3195_v59  ;;  %v3672_v36 = vcvt.f32.s32 %v3671_v57  ;;  %v14501_v44 = vld [vmem:[#allocation178_spill] sm:$0xff] }
 0x622   :  { %vm3734_vm7 = vcmp.eq.s32.totalorder %v6508_v31, %v3180_v40  ;;  %v4965_v32 = vsel %vm3735_vm6, 1.0, %v13845_v26  ;;  %v3657_v10 = vcvt.f32.s32 %v3656_v3  ;;  %v4185_v53 = vmul.f32 %v14495_v56, %v14494_v0  ;;  %v3221_v11 = vpop.xlane.xlu1 %3220  ;;  %v3206_v23 = vpop.xlane.xlu0 %3205 }
 0x623   :  { %v4660_v4 = vadd.f32 %v4596_v48, %v11974_v52  ;;  %v4964_v30 = vsel %vm3734_vm7, 1.0, %v13845_v26  ;;  %4853 = vst.msk [vmem:[%s12167_s5 + $0x1d8] sm:$0xff] %vm503_vm0, %v4661_v43  ;;  %v4567_v39 = vmul.f32 %v4965_v32, %v11978_v25  ;;  %v3675_v27 = vadd.s32 %v3674_v19, %v3672_v36  ;;  %v14496_v52 = vld [vmem:[#allocation174_spill] sm:$0xff]  ;;  %v14500_v19 = vld [vmem:[#allocation25_spill] sm:$0xff] }
 0x624   :  { %v4566_v28 = vmul.f32 %v4964_v30, %v11994_v61  ;;  %v3224_v37 = vshll.u32 %v3223_v9, 16  ;;  %v3703_v34 = vcvt.f32.s32 %v14496_v52  ;;  %v3688_v50 = vcvt.f32.s32 %v14497_v6  ;;  %v14503_v9 = vld [vmem:[#allocation202_spill] sm:$0xff] }
 0x625   :  { %4852 = vst.msk [vmem:[%s12167_s5 + $0x1d0] sm:$0xff] %vm503_vm0, %v4660_v4  ;;  %v3660_v17 = vadd.s32 %v3659_v41, %v3657_v10  ;;  %v4631_v25 = vadd.f32 %v4567_v39, %v11990_v14  ;;  %vm3767_vm12 = vcmp.eq.s32.totalorder %v6508_v31, %v3675_v27  ;;  %v3222_v62 = vcvt.f32.s32 %v3221_v11  ;;  %v14506_v48 = vld [vmem:[#allocation106_spill] sm:$0xff] }
 0x626   :  { %v4630_v61 = vadd.f32 %v4566_v28, %v12003_v21  ;;  %v3209_v58 = vshll.u32 %v3208_v29, 16  ;;  %v4997_v49 = vsel %vm3767_vm12, 1.0, %v13845_v26  ;;  %v3207_v18 = vcvt.f32.s32 %v3206_v23  ;;  %v3701_v16 = vpop.xlane.xlu1 %3700  ;;  %v3686_v38 = vpop.xlane.xlu0 %3685  ;;  %v14507_v30 = vld [vmem:[#allocation34_spill] sm:$0xff] }
 0x627   :  { %vm3766_vm13 = vcmp.eq.s32.totalorder %v6508_v31, %v3660_v17  ;;  %4823 = vst.msk [vmem:[%s12167_s5 + $0xe8] sm:$0xff] %vm503_vm0, %v4631_v25  ;;  %v4599_v14 = vmul.f32 %v4997_v49, %v12007_v24  ;;  %v4377_v12 = vmul.f32 %v14495_v56, %v14498_v2  ;;  %v3225_v20 = vadd.s32 %v3224_v37, %v3222_v62 }
 0x628   :  { %4822 = vst.msk [vmem:[%s12167_s5 + $0xe0] sm:$0xff] %vm503_vm0, %v4630_v61  ;;  %v4996_v21 = vsel %vm3766_vm13, 1.0, %v13845_v26  ;;  %v3704_v13 = vshll.u32 %v3703_v34, 16  ;;  %v3689_v22 = vshll.u32 %v3688_v50, 16  ;;  %v3210_v47 = vadd.s32 %v3209_v58, %v3207_v18 }
 0x629   :  { %v4598_v54 = vmul.f32 %v4996_v21, %v12020_v1  ;;  %v4663_v33 = vadd.f32 %v4599_v14, %v12011_v63  ;;  %vm3737_vm14 = vcmp.eq.s32.totalorder %v6508_v31, %v3225_v20  ;;  %v3702_v7 = vcvt.f32.s32 %v3701_v16 }
 0x62a   :  { %v3687_v46 = vcvt.f32.s32 %v3686_v38  ;;  %v4967_v35 = vsel %vm3737_vm14, 1.0, %v13845_v26  ;;  %v4184_v8 = vmul.f32 %v14500_v19, %v14499_v55  ;;  %vm3736_vm10 = vcmp.eq.s32.totalorder %v6508_v31, %v3210_v47 }
 0x62b   :  { %v4662_v24 = vadd.f32 %v4598_v54, %v12025_v15  ;;  %4855 = vst.msk [vmem:[%s12167_s5 + $0x1e8] sm:$0xff] %vm503_vm0, %v4663_v33  ;;  %v4569_v1 = vmul.f32 %v4967_v35, %v4185_v53  ;;  %v4966_v63 = vsel %vm3736_vm10, 1.0, %v13845_v26  ;;  %v3705_v42 = vadd.s32 %v3704_v13, %v3702_v7 }
 0x62c   :  { %v3690_v45 = vadd.s32 %v3689_v22, %v3687_v46  ;;  %v4568_v15 = vmul.f32 %v4966_v63, %v4184_v8  ;;  %v4217_v59 = vmul.f32 %v11886_v5, %v14501_v44  ;;  %v4216_v41 = vmul.f32 %v14503_v9, %v14502_v60 }
 0x62d   :  { %4854 = vst.msk [vmem:[%s12167_s5 + $0x1e0] sm:$0xff] %vm503_vm0, %v4662_v24  ;;  %v4633_v40 = vadd.f32 %v4569_v1, %v4377_v12  ;;  %vm3769_vm15 = vcmp.eq.s32.totalorder %v6508_v31, %v3705_v42  ;;  %vm14505_vm8 = vcmp.eq.s32.totalorder %v6508_v31, %v14504_v51 }
 0x62e   :  { %vm3768_vm1 = vcmp.eq.s32.totalorder %v6508_v31, %v3690_v45  ;;  %v4935_v29 = vsel %vm14505_vm8, 1.0, %v13845_v26  ;;  %v4632_v57 = vadd.f32 %v4568_v15, %v14506_v48  ;;  %v4999_v3 = vsel %vm3769_vm15, 1.0, %v13845_v26 }
 0x62f   :  { %v4998_v43 = vsel %vm3768_vm1, 1.0, %v13845_v26  ;;  %4825 = vst.msk [vmem:[%s12167_s5 + $0xf8] sm:$0xff] %vm503_vm0, %v4633_v40  ;;  %v4409_v36 = vmul.f32 %v11886_v5, %v4935_v29  ;;  %v4601_v4 = vmul.f32 %v4999_v3, %v4217_v59 }
 0x630   :  { %v4600_v32 = vmul.f32 %v4998_v43, %v4216_v41  ;;  %4824 = vst.msk [vmem:[%s12167_s5 + $0xf0] sm:$0xff] %vm503_vm0, %v4632_v57 }
 0x631   :  { %v4665_v31 = vadd.f32 %v4601_v4, %v4409_v36 }
 0x632   :  { %v4664_v10 = vadd.f32 %v4600_v32, %v14507_v30 }
 0x633   :  { %4857 = vst.msk [vmem:[%s12167_s5 + $0x1f8] sm:$0xff] %vm503_vm0, %v4665_v31 }
 0x634   :  { %4856 = vst.msk [vmem:[%s12167_s5 + $0x1f0] sm:$0xff] %vm503_vm0, %v4664_v10 }
 0x635   :  { %4870 = vsyncpa [#allocation3], 1 }

</bundles_post_ra>
